<compile_context>
chip_gen: v6e
topology: v6e:2x2x1
jax: 0.10.0
libtpu: 0.0.40
codegen_flags: <defaults>
</compile_context>

<pallas_src>
import jax
import jax.numpy as jnp
from jax import lax
from jax.experimental import pallas as pl
from jax.experimental.pallas import tpu as pltpu

IN_FEATS = 128 * 128 * 3   # 49152
H1, H2, OUT = 96, 46, 6
TK = 24576                 # K-tile for layer-1 reduction (49152 / 24576 = 2 steps)
N_K = IN_FEATS // TK


def fcn_kernel(x_ref, w1t_ref, b1_ref, w2_ref, b2_ref, w3_ref, b3_ref,
               o_ref, acc_ref):
    k = pl.program_id(0)

    @pl.when(k == 0)
    def _():
        acc_ref[...] = jnp.zeros_like(acc_ref)

    # Layer-1 partial matmul over this K tile.
    #   x tile    : (B, TK)  f32 from HBM, cast to bf16 on the VPU (tiny, hidden
    #               under the W1 DMA)
    #   W1^T tile : (H1, TK) bf16, lane-dense (TK on the 128-lane axis)
    # Contract the TK axis of both -> (B, H1); accumulate in f32.
    x_bf16 = x_ref[...].astype(jnp.bfloat16)
    acc_ref[...] += lax.dot_general(
        x_bf16, w1t_ref[...],
        dimension_numbers=(((1,), (1,)), ((), ())),
        preferred_element_type=jnp.float32)

    @pl.when(k == pl.num_programs(0) - 1)
    def _():
        # Tiny fused epilogue, entirely in f32.
        h1 = jnp.maximum(acc_ref[...] + b1_ref[...], 0.0)                    # ReLU(layer1)
        h2 = jnp.dot(h1, w2_ref[...], preferred_element_type=jnp.float32)
        h2 = jnp.maximum(h2 + b2_ref[...], 0.0)                              # ReLU(layer2)
        h3 = jnp.dot(h2, w3_ref[...], preferred_element_type=jnp.float32)
        o_ref[...] = (h3 + b3_ref[...]).astype(o_ref.dtype)                  # layer3 (no act)


def prepare_params(w1, b1, w2, b2, w3, b3):
    """One-time weight prep (do NOT call per forward).

    W1 is stored transposed as (H1=96, 49152) bf16: 96 % 8 == 0 and
    49152 % 128 == 0, so the streamed tiles are lane-dense (no 96->128 pad).
    """
    w1t_bf16 = jnp.asarray(w1, jnp.float32).T.astype(jnp.bfloat16)   # (H1, IN_FEATS)
    return (w1t_bf16,
            jnp.asarray(b1, jnp.float32).reshape(1, H1),
            jnp.asarray(w2, jnp.float32),
            jnp.asarray(b2, jnp.float32).reshape(1, H2),
            jnp.asarray(w3, jnp.float32),
            jnp.asarray(b3, jnp.float32).reshape(1, OUT))


@jax.jit
def fcn_forward(x_nchw, w1t_bf16, b1, w2, b2, w3, b3):
    B = x_nchw.shape[0]
    x = x_nchw.reshape(B, IN_FEATS)      # matches torch .view(-1, 49152) on NCHW

    grid_spec = pltpu.PrefetchScalarGridSpec(
        num_scalar_prefetch=0,
        grid=(N_K,),
        in_specs=[
            pl.BlockSpec((B, TK), lambda k: (0, k)),       # x tile along K (f32)
            pl.BlockSpec((H1, TK), lambda k: (0, k)),      # W1^T tile along K (bf16)
            pl.BlockSpec((1, H1), lambda k: (0, 0)),       # b1
            pl.BlockSpec((H1, H2), lambda k: (0, 0)),      # W2 (full, f32)
            pl.BlockSpec((1, H2), lambda k: (0, 0)),       # b2
            pl.BlockSpec((H2, OUT), lambda k: (0, 0)),     # W3 (full, f32)
            pl.BlockSpec((1, OUT), lambda k: (0, 0)),      # b3
        ],
        out_specs=pl.BlockSpec((B, OUT), lambda k: (0, 0)),
        scratch_shapes=[pltpu.VMEM((B, H1), jnp.float32)],
    )

    flops = 2 * B * IN_FEATS * H1 + 2 * B * H1 * H2 + 2 * B * H2 * OUT
    bytes_accessed = (
        B * IN_FEATS * 4                                   # x stream (f32)
        + IN_FEATS * H1 * 2                                # W1^T stream (bf16)
        + (H1 + H1 * H2 + H2 + H2 * OUT + OUT) * 4         # small f32 params
        + B * OUT * 4                                      # output
    )

    return pl.pallas_call(
        fcn_kernel,
        out_shape=jax.ShapeDtypeStruct((B, OUT), jnp.float32),
        grid_spec=grid_spec,
        compiler_params=pltpu.CompilerParams(
            dimension_semantics=("arbitrary",),            # K is a reduction axis
            vmem_limit_bytes=32 << 20,                     # ~10 MiB used; explicit headroom
        ),
        cost_estimate=pl.CostEstimate(
            flops=flops, transcendentals=0, bytes_accessed=bytes_accessed),
    )(x, w1t_bf16, b1, w2, b2, w3, b3)


def fcn_reference(x_nchw, w1, b1, w2, b2, w3, b3):
    x = x_nchw.reshape(x_nchw.shape[0], IN_FEATS)
    h = jnp.maximum(x @ w1 + b1, 0.0)
    h = jnp.maximum(h @ w2 + b2, 0.0)
    return h @ w3 + b3


if __name__ == "__main__":
    key = jax.random.PRNGKey(0)
    kx, k1, k2, k3, k4, k5, k6 = jax.random.split(key, 7)

    # Batch=2, NCHW image input consistent with Linear(128*128*3, ...).
    B = 2
    x = jax.random.normal(kx, (B, 3, 128, 128), jnp.float32)

    # Deterministic synthetic params (shapes from the torch module's __init__).
    w1 = jax.random.normal(k1, (IN_FEATS, H1), jnp.float32) * 0.01
    b1 = jax.random.normal(k2, (H1,), jnp.float32) * 0.01
    w2 = jax.random.normal(k3, (H1, H2), jnp.float32) * 0.1
    b2 = jax.random.normal(k4, (H2,), jnp.float32) * 0.1
    w3 = jax.random.normal(k5, (H2, OUT), jnp.float32) * 0.1
    b3 = jax.random.normal(k6, (OUT,), jnp.float32) * 0.1

    params = prepare_params(w1, b1, w2, b2, w3, b3)   # one-time bf16 / transpose

    out = jax.block_until_ready(fcn_forward(x, *params))

    ref = fcn_reference(x, w1, b1, w2, b2, w3, b3)    # f32 reference
    assert out.shape == (B, OUT)
    # Error comes only from the bf16 cast of x / W1 in layer 1 (f32 accumulation);
    # tightened vs. the previous 1e-1 so layout/indexing bugs are actually caught.
    assert jnp.allclose(out, ref, atol=3e-2, rtol=3e-2), "mismatch vs f32 reference"
    print("KERNEL_OK")
</pallas_src>

<mosaic_0001>
module attributes {stable_mosaic.version = 11 : i64} {
  func.func @fcn_kernel(%arg0: i32, %arg1: memref<2x24576xf32, #tpu.memory_space<vmem>>, %arg2: memref<96x24576xbf16, #tpu.memory_space<vmem>>, %arg3: memref<1x96xf32, #tpu.memory_space<vmem>>, %arg4: memref<96x46xf32, #tpu.memory_space<vmem>>, %arg5: memref<1x46xf32, #tpu.memory_space<vmem>>, %arg6: memref<46x6xf32, #tpu.memory_space<vmem>>, %arg7: memref<1x6xf32, #tpu.memory_space<vmem>>, %arg8: memref<2x6xf32, #tpu.memory_space<vmem>>, %arg9: memref<2x96xf32, #tpu.memory_space<vmem>>) attributes {dimension_semantics = [#tpu.dimension_semantics<arbitrary>], iteration_bounds = array<i64: 2>, scalar_prefetch = 0 : i64, scratch_operands = 1 : i64, tpu.core_type = #tpu.core_type<tc>, window_params = [{transform_indices = @transform_0, window_bounds = array<i64: 2, 24576>}, {transform_indices = @transform_1, window_bounds = array<i64: 96, 24576>}, {pipeline_mode = #tpu.pipeline_mode<synchronous>, transform_indices = @transform_2, window_bounds = array<i64: 1, 96>}, {pipeline_mode = #tpu.pipeline_mode<synchronous>, transform_indices = @transform_3, window_bounds = array<i64: 96, 46>}, {pipeline_mode = #tpu.pipeline_mode<synchronous>, transform_indices = @transform_4, window_bounds = array<i64: 1, 46>}, {pipeline_mode = #tpu.pipeline_mode<synchronous>, transform_indices = @transform_5, window_bounds = array<i64: 46, 6>}, {pipeline_mode = #tpu.pipeline_mode<synchronous>, transform_indices = @transform_6, window_bounds = array<i64: 1, 6>}, {pipeline_mode = #tpu.pipeline_mode<synchronous>, transform_indices = @transform_7, window_bounds = array<i64: 2, 6>}]} {
    %c0_i32 = arith.constant 0 : i32
    %0 = arith.cmpi eq, %arg0, %c0_i32 : i32
    %1 = arith.extui %0 : i1 to i32
    %c0_i32_0 = arith.constant 0 : i32
    %2 = arith.cmpi ne, %1, %c0_i32_0 : i32
    scf.if %2 {
      %cst_9 = arith.constant 0.000000e+00 : f32
      %13 = vector.broadcast %cst_9 : f32 to vector<2x96xf32>
      %c0_10 = arith.constant 0 : index
      %c0_11 = arith.constant 0 : index
      %14 = vector.load %arg9[%c0_10, %c0_11] : memref<2x96xf32, #tpu.memory_space<vmem>>, vector<2x96xf32>
      tpu.vector_store %arg9[%c0_10, %c0_11], %13 {strides = array<i32>} : memref<2x96xf32, #tpu.memory_space<vmem>>, vector<2x96xf32>,
    } else {
    }
    %c0 = arith.constant 0 : index
    %c0_1 = arith.constant 0 : index
    %3 = vector.load %arg1[%c0, %c0_1] : memref<2x24576xf32, #tpu.memory_space<vmem>>, vector<2x24576xf32>
    %4 = arith.truncf %3 : vector<2x24576xf32> to vector<2x24576xbf16>
    %c0_2 = arith.constant 0 : index
    %c0_3 = arith.constant 0 : index
    %5 = vector.load %arg9[%c0_2, %c0_3] : memref<2x96xf32, #tpu.memory_space<vmem>>, vector<2x96xf32>
    %c0_4 = arith.constant 0 : index
    %c0_5 = arith.constant 0 : index
    %6 = vector.load %arg2[%c0_4, %c0_5] : memref<96x24576xbf16, #tpu.memory_space<vmem>>, vector<96x24576xbf16>
    %cst = arith.constant dense<0.000000e+00> : vector<2x96xf32>
    %7 = tpu.matmul %4, %6, %cst {dimension_numbers = #tpu.dot_dimension_numbers<[1], [1], [0], [0], [0, 0, 1, 0], [], []>} : vector<2x24576xbf16>, vector<96x24576xbf16>, vector<2x96xf32> -> vector<2x96xf32>
    %8 = arith.addf %5, %7 : vector<2x96xf32>
    %c0_6 = arith.constant 0 : index
    %c0_7 = arith.constant 0 : index
    %9 = vector.load %arg9[%c0_6, %c0_7] : memref<2x96xf32, #tpu.memory_space<vmem>>, vector<2x96xf32>
    tpu.vector_store %arg9[%c0_6, %c0_7], %8 {strides = array<i32>} : memref<2x96xf32, #tpu.memory_space<vmem>>, vector<2x96xf32>,
    %c1_i32 = arith.constant 1 : i32
    %10 = arith.cmpi eq, %arg0, %c1_i32 : i32
    %11 = arith.extui %10 : i1 to i32
    %c0_i32_8 = arith.constant 0 : i32
    %12 = arith.cmpi ne, %11, %c0_i32_8 : i32
    scf.if %12 {
      %c0_9 = arith.constant 0 : index
      %c0_10 = arith.constant 0 : index
      %13 = vector.load %arg9[%c0_9, %c0_10] : memref<2x96xf32, #tpu.memory_space<vmem>>, vector<2x96xf32>
      %c0_11 = arith.constant 0 : index
      %c0_12 = arith.constant 0 : index
      %14 = vector.load %arg3[%c0_11, %c0_12] : memref<1x96xf32, #tpu.memory_space<vmem>>, vector<1x96xf32>
      %15 = vector.broadcast %14 : vector<1x96xf32> to vector<2x96xf32>
      %16 = arith.addf %13, %15 : vector<2x96xf32>
      %cst_13 = arith.constant 0.000000e+00 : f32
      %17 = vector.broadcast %cst_13 : f32 to vector<2x96xf32>
      %18 = arith.maximumf %16, %17 : vector<2x96xf32>
      %c0_14 = arith.constant 0 : index
      %c0_15 = arith.constant 0 : index
      %19 = vector.load %arg4[%c0_14, %c0_15] : memref<96x46xf32, #tpu.memory_space<vmem>>, vector<96x46xf32>
      %cst_16 = arith.constant dense<0.000000e+00> : vector<2x46xf32>
      %20 = tpu.matmul %18, %19, %cst_16 {dimension_numbers = #tpu.dot_dimension_numbers<[1], [0], [0], [1], [0, 0, 1, 1], [], []>} : vector<2x96xf32>, vector<96x46xf32>, vector<2x46xf32> -> vector<2x46xf32>
      %c0_17 = arith.constant 0 : index
      %c0_18 = arith.constant 0 : index
      %21 = vector.load %arg5[%c0_17, %c0_18] : memref<1x46xf32, #tpu.memory_space<vmem>>, vector<1x46xf32>
      %22 = vector.broadcast %21 : vector<1x46xf32> to vector<2x46xf32>
      %23 = arith.addf %20, %22 : vector<2x46xf32>
      %cst_19 = arith.constant 0.000000e+00 : f32
      %24 = vector.broadcast %cst_19 : f32 to vector<2x46xf32>
      %25 = arith.maximumf %23, %24 : vector<2x46xf32>
      %c0_20 = arith.constant 0 : index
      %c0_21 = arith.constant 0 : index
      %26 = vector.load %arg6[%c0_20, %c0_21] : memref<46x6xf32, #tpu.memory_space<vmem>>, vector<46x6xf32>
      %cst_22 = arith.constant dense<0.000000e+00> : vector<2x6xf32>
      %27 = tpu.matmul %25, %26, %cst_22 {dimension_numbers = #tpu.dot_dimension_numbers<[1], [0], [0], [1], [0, 0, 1, 1], [], []>} : vector<2x46xf32>, vector<46x6xf32>, vector<2x6xf32> -> vector<2x6xf32>
      %c0_23 = arith.constant 0 : index
      %c0_24 = arith.constant 0 : index
      %28 = vector.load %arg7[%c0_23, %c0_24] : memref<1x6xf32, #tpu.memory_space<vmem>>, vector<1x6xf32>
      %29 = vector.broadcast %28 : vector<1x6xf32> to vector<2x6xf32>
      %30 = arith.addf %27, %29 : vector<2x6xf32>
      %c0_25 = arith.constant 0 : index
      %c0_26 = arith.constant 0 : index
      %31 = vector.load %arg8[%c0_25, %c0_26] : memref<2x6xf32, #tpu.memory_space<vmem>>, vector<2x6xf32>
      tpu.vector_store %arg8[%c0_25, %c0_26], %30 {strides = array<i32>} : memref<2x6xf32, #tpu.memory_space<vmem>>, vector<2x6xf32>,
    } else {
    }
    return
  }
  func.func @transform_0(%arg0: i32) -> (i32, i32) {
    %c0_i32 = arith.constant 0 : i32
    %c0_i32_0 = arith.constant 0 : i32
    return %c0_i32, %arg0 : i32, i32
  }
  func.func @transform_1(%arg0: i32) -> (i32, i32) {
    %c0_i32 = arith.constant 0 : i32
    %c0_i32_0 = arith.constant 0 : i32
    return %c0_i32, %arg0 : i32, i32
  }
  func.func @transform_2(%arg0: i32) -> (i32, i32) {
    %c0_i32 = arith.constant 0 : i32
    %c0_i32_0 = arith.constant 0 : i32
    %c0_i32_1 = arith.constant 0 : i32
    return %c0_i32, %c0_i32_0 : i32, i32
  }
  func.func @transform_3(%arg0: i32) -> (i32, i32) {
    %c0_i32 = arith.constant 0 : i32
    %c0_i32_0 = arith.constant 0 : i32
    %c0_i32_1 = arith.constant 0 : i32
    return %c0_i32, %c0_i32_0 : i32, i32
  }
  func.func @transform_4(%arg0: i32) -> (i32, i32) {
    %c0_i32 = arith.constant 0 : i32
    %c0_i32_0 = arith.constant 0 : i32
    %c0_i32_1 = arith.constant 0 : i32
    return %c0_i32, %c0_i32_0 : i32, i32
  }
  func.func @transform_5(%arg0: i32) -> (i32, i32) {
    %c0_i32 = arith.constant 0 : i32
    %c0_i32_0 = arith.constant 0 : i32
    %c0_i32_1 = arith.constant 0 : i32
    return %c0_i32, %c0_i32_0 : i32, i32
  }
  func.func @transform_6(%arg0: i32) -> (i32, i32) {
    %c0_i32 = arith.constant 0 : i32
    %c0_i32_0 = arith.constant 0 : i32
    %c0_i32_1 = arith.constant 0 : i32
    return %c0_i32, %c0_i32_0 : i32, i32
  }
  func.func @transform_7(%arg0: i32) -> (i32, i32) {
    %c0_i32 = arith.constant 0 : i32
    %c0_i32_0 = arith.constant 0 : i32
    %c0_i32_1 = arith.constant 0 : i32
    return %c0_i32, %c0_i32_0 : i32, i32
  }
}

</mosaic_0001>

<bundles_post_ra>
// kernel: fcn_forward.1
= control target key start
LH: loop header
LB: loop body
LE: loop exit
PB: predicated region body
PF: predicated region fallthrough
CT: control target
= control target key end

     0   :  { %12 = vsyncpa [#allocation4], 0  ;;  %s16538_s0 = inlined_call_operand.vmem [shape: f32[2,49152], index: 0, kind: input, shape index: {}]   ;;  %s16539_s1 = inlined_call_operand.hbm [shape: bf16[96,49152], index: 1, kind: input, shape index: {}]   ;;  %s16540_s2 = inlined_call_operand.hbm [shape: f32[1,96], index: 2, kind: input, shape index: {}]   ;;  %s16541_s3 = inlined_call_operand.vmem [shape: f32[96,46], index: 3, kind: input, shape index: {}]   ;;  %s16542_s4 = inlined_call_operand.hbm [shape: f32[1,46], index: 4, kind: input, shape index: {}]   ;;  %s16543_s5 = inlined_call_operand.vmem [shape: f32[46,6], index: 5, kind: input, shape index: {}]   ;;  %s16544_s6 = inlined_call_operand.hbm [shape: f32[1,6], index: 6, kind: input, shape index: {}]   ;;  %s16545_s7 = inlined_call_operand.hbm [shape: f32[2,6], index: 7, kind: output, shape index: {}]  }
   0x1   :  { %14 = vsyncpa [#allocation4 + $0x1], 0 }
   0x2   :  { %15 = vsyncpa [#allocation7], 0 }
   0x3   :  { %16 = vsyncpa [#allocation10], 0 }
   0x4   :  { %17 = vsyncpa [#allocation5], 0  ;;  %s14307_s24 = smov 0   ;;  %s14309_s25 = smov 0  }
   0x5   :  { %s14311_s26 = smov 0   ;;  %s14313_s27 = smov 0  }
   0x6 LB: > { %s14326_s28 = sadd.s32 4294967295, %s14253_s27   ;;  %s14329_s29 = sadd.s32 1, %s14253_s27   ;;  %s14253_s27 = sphi %s14313_s27, %s16564_s27   ;;  %s14249_s26 = sphi %s14311_s26, %s16563_s26   ;;  %s14245_s25 = sphi %s14309_s25, %s16562_s25   ;;  %s14241_s24 = sphi %s14307_s24, %s16561_s24  }
   0x7   : > { %s53_s30 = ssub.s32 %s14253_s27, %s14329_s29  ;;  %s56_s8 = sadd.s32 1, %s14249_s26 }
   0x8   : > { %p54_p0 = scmp.eq.s32.totalorder %s53_s30, 0  ;;  %p63_p1 = scmp.ne.s32.totalorder %s14249_s26, %s14245_s25 }
   0x9   : > { %p64_p2 = scmp.eq.s32.totalorder %s14253_s27, 0  ;;  %p69_p3 = scmp.ne.s32.totalorder %s14245_s25, %s14241_s24 }
   0xa   : > { %s14339_s9 = scalar_select %p54_p0, %s14249_s26, %s56_s8  }
   0xb   : > { %p14341_p4 = por %p64_p2, %p63_p1  ;;  %p16546_p5 = scmp.eq.s32.totalorder %s14326_s28, 0 }
   0xc   : > { %p12705_p6 = scmp.ge.s32.totalorder %s14253_s27, 1  ;;  %p206_p7 = scmp.lt.s32.totalorder %s14253_s27, 3 }
   0xd   : > { %p14350_p8 = por %p16546_p5, %p69_p3  ;;  %s14255_s13 = smov [#allocation6]  }
   0xe   : > { %p14355_p10 = pnand %p12705_p6, %p206_p7  ;;  %s219_s14 = sshll.u32 %s14255_s13, 4  ;;  %s220_s14 = int_to_ptr.vmem [resolvable:$true] %s219_s14 }
   0xf   : > { %s16550_s11 = scalar_select %p14350_p8, 1, 0 }
  0x10   : > { %s16551_s12 = scalar_select %p14355_p10, 1, 0 }
  0x11   : > { %p13963_p11 = pneg %p14355_p10  ;;  %p13980_p12 = scmp.lt.s32.totalorder %s14253_s27, 2 }
  0x12   : > { %s14256_s16 = smov [#allocation8]   ;;  %s14088_s19 = scalar_lea.vmem %s220_s14, 16 }
  0x13   : > { %p14364_p13 = pnand %p13963_p11, %p16546_p5  ;;  %s233_s17 = sshll.u32 %s14256_s16, 4  ;;  %s234_s17 = int_to_ptr.vmem [resolvable:$true] %s233_s17 }
  0x14   : > { %p14370_p0 = pnand %p13980_p12, %p14341_p4  ;;  %p14089_p2 = scmp.ne.s32.totalorder %s220_s14, %s14088_s19 }
  0x15   : > { %p14079_p1 = pneg %p14364_p13  ;;  %s14095_s20 = scalar_lea.vmem %s220_s14, 32 }
  0x16   : > { %p14096_p7 = scmp.lt.s32.totalorder %s220_s14, %s220_s14  ;;  %p14097_p11 = scmp.lt.s32.totalorder %s14095_s20, %s14088_s19 }
  0x17   : > { %p14091_p3 = pnand %p14089_p2, %p14079_p1 }
  0x18   : > { %p14098_p9 = por %p14097_p11, %p14096_p7 }
  0x19   : > { %p14092_p6 = pneg %p14091_p3 }
  0x1b   : > { %p14099_p5 = pnand %p14098_p9, %p14092_p6 }
  0x1d   : > { %14102 = shalt.err (!%p14099_p5)
}
  0x1e   : > { %13966 = dma.hbm_to_vmem [thread:$0]  (!%p14364_p13), %s16540_s2, 16, %s220_s14, [#allocation7]  }
  0x1f   : > { %s14257_s23 = smov [#allocation9]   ;;  %s14114_s30 = scalar_lea.vmem %s234_s17, 16 }
  0x20   : > { %s247_s24 = sshll.u32 %s14257_s23, 4  ;;  %p14115_p4 = scmp.ne.s32.totalorder %s234_s17, %s14114_s30  ;;  %s248_s24 = int_to_ptr.vmem [resolvable:$true] %s247_s24 }
  0x21   : > { %s14121_s8 = scalar_lea.vmem %s234_s17, 32  ;;  %p14122_p3 = scmp.lt.s32.totalorder %s234_s17, %s234_s17 }
  0x22   : > { %p14117_p12 = pnand %p14115_p4, %p14079_p1  ;;  %p14123_p7 = scmp.lt.s32.totalorder %s14121_s8, %s14114_s30 }
  0x24   : > { %p14118_p2 = pneg %p14117_p12  ;;  %p14124_p9 = por %p14123_p7, %p14122_p3 }
  0x26   : > { %p14125_p5 = pnand %p14124_p9, %p14118_p2 }
  0x28   : > { %14128 = shalt.err (!%p14125_p5)
}
  0x29   : > { %13969 = dma.hbm_to_vmem [thread:$0]  (!%p14364_p13), %s16542_s4, 16, %s234_s17, [#allocation7]  }
  0x2a   : > { %s267_s14 = sand.u32 1, %s14249_s26   ;;  %s14140_s16 = scalar_lea.vmem %s248_s24, 16 }
  0x2b   : > { %p14141_p6 = scmp.ne.s32.totalorder %s248_s24, %s14140_s16  ;;  %s14147_s19 = scalar_lea.vmem %s248_s24, 32 }
  0x2c   : > { %p14148_p12 = scmp.lt.s32.totalorder %s248_s24, %s248_s24  ;;  %p14149_p2 = scmp.lt.s32.totalorder %s14147_s19, %s14140_s16 }
  0x2d   : > { %p14143_p11 = pnand %p14141_p6, %p14079_p1 }
  0x2e   : > { %p14150_p3 = por %p14149_p2, %p14148_p12 }
  0x2f   : > { %p14144_p4 = pneg %p14143_p11 }
  0x31   : > { %p14151_p7 = pnand %p14150_p3, %p14144_p4 }
  0x33   : > { %14154 = shalt.err (!%p14151_p7)
}
  0x34   : > { %13972 = dma.hbm_to_vmem [thread:$0]  (!%p14364_p13), %s16544_s6, 16, %s248_s24, [#allocation10]  }
  0x35   : > { %s13943_s17 = smul.u32 9216, %s267_s14  ;;  %s14409_s15 = scalar_lea.sflag [#allocation4], %s267_s14 }
  0x36   : > { %s13880_s22 = smul.u32 12288, %s14253_s27  ;;  %p14157_p13 = pneg %p14370_p0 }
  0x37   : > { %s271_s10 = scalar_lea.vmem [#allocation3], %s13943_s17  ;;  %s14160_s19 = scalar_lea.hbm %s16539_s1, 294912 }
  0x38   : > { %s14405_s8 = scalar_lea.hbm %s16539_s1, %s13880_s22  ;;  %s278_s13 = sshll.u32 %s271_s10, 4  ;;  %s14407_s13 = int_to_ptr.vmem [resolvable:$true] %s278_s13 }
  0x39   : > { %s14155_s16 = scalar_lea.hbm %s14405_s8, 147456  ;;  %p14161_p6 = scmp.lt.s32.totalorder %s14405_s8, %s16539_s1 }
  0x3a   : > { %p14156_p1 = scmp.ne.s32.totalorder %s14405_s8, %s14155_s16  ;;  %p14162_p11 = scmp.lt.s32.totalorder %s14160_s19, %s14155_s16 }
  0x3c   : > { %p14158_p9 = pnand %p14157_p13, %p14156_p1  ;;  %p14163_p4 = por %p14162_p11, %p14161_p6 }
  0x3e   : > { %p14159_p5 = pneg %p14158_p9 }
  0x40   : > { %p14164_p12 = pnand %p14163_p4, %p14159_p5 }
  0x42   : > { %14167 = shalt.err (!%p14164_p12)
}
  0x43   : > { %s14168_s14 = scalar_lea.vmem %s14407_s13, 147456  ;;  %s14258_s17 = smov [#allocation3]  }
  0x44   : > { %p14169_p2 = scmp.ne.s32.totalorder %s14407_s13, %s14168_s14  ;;  %s14173_s22 = sshll.u32 %s14258_s17, 4  ;;  %s14174_s22 = int_to_ptr.vmem [resolvable:$false] %s14173_s22 }
  0x45   : > { %s14175_s23 = scalar_lea.vmem %s14174_s22, 294912  ;;  %p14176_p1 = scmp.lt.s32.totalorder %s14407_s13, %s14174_s22 }
  0x46   : > { %p14171_p3 = pnand %p14169_p2, %p14157_p13  ;;  %p14177_p9 = scmp.lt.s32.totalorder %s14175_s23, %s14168_s14 }
  0x48   : > { %p14172_p7 = pneg %p14171_p3  ;;  %p14178_p8 = por %p14177_p9, %p14176_p1 }
  0x4a   : > { %p14179_p10 = pnand %p14178_p8, %p14172_p7 }
  0x4c   : > { %14182 = shalt.err (!%p14179_p10)
}
  0x4d   : > { %s14259_s30 = smov 24576   ;;  %s14260_s10 = smov 12288  }
  0x4e   : > { %s14261_s16 = smov 768   ;;  %p16554_p13 = scmp.ne.s32.totalorder %s16551_s12, 0 }
  0x4f   : > { %13976 = dma.hbm_to_vmem [thread:$0]  (!%p14370_p0), %s14405_s8, 147456, %s14407_s13, %s14409_s15, %s14259_s30, %s14260_s10, %s14261_s16  }
  0x50   : > { %290 = sbr.rel (%p16554_p13) target bundleno = 3043 (0xbe3), region = 48  ;;  %s292_s27 = sand.u32 (!%p16554_p13), 1, %s14245_s25  }
  0x51   : > { %s13944_s24 = smul.u32 (!%p16554_p13), 9216, %s292_s27  ;;  %s293_s19 = scalar_lea.sflag (!%p16554_p13), [#allocation4], %s292_s27 }
  0x52   : > { %p16555_p8 = scmp.ne.s32.totalorder (!%p16554_p13), %s16550_s11, 0 }
  0x53   : > { %s14433_s20 = scalar_lea.vmem (!%p16554_p13), [#allocation3], %s13944_s24 }
  0x55   : > { %14224 = dma.done.wait (%p16555_p8), %s293_s19, 147456  }
  0x56   : > { %14226 = vsyncadd (%p16555_p8), %s293_s19, 4294819840  ;;  %p16556_p10 = scmp.eq.s32.totalorder %s14326_s28, 0 }
  0x58   : > { %14228 = dma.done.wait (%p16556_p10), [#allocation7], 32   ;;  %p16557_p0 = pmov %p16556_p10 }
  0x5a   : > { %14230 = vsyncadd (%p16557_p0), [#allocation7], 4294967264  ;;  %p16558_p5 = pmov %p16557_p0 }
  0x5b   : > { %p16559_p6 = pmov %p16557_p0 }
  0x5c   : > { %14232 = dma.done.wait (%p16558_p5), [#allocation10], 16  }
  0x5d   : > { %14234 = vsyncadd (%p16559_p6), [#allocation10], 4294967280  ;;  %s339_s12 = smul.u32 192, %s14326_s28  ;;  %p16560_p4 = scmp.ne.s32.totalorder %s14326_s28, 0 }
  0x5f   : > { %p340_p11 = scmp.lt.s32.totalorder %s339_s12, 383  ;;  %350 = sbr.rel (%p16560_p4) target bundleno = 102 (0x66), region = 68 }
  0x61   : > { %s16566_s12 = smov (!%p340_p11, %s339_s12), 383 }
  0x62   : > { %s12715_s18 = sshll.u32 %s16566_s12, 1 }
  0x63   : > { %s14451_s13 = scalar_lea.vmem %s16538_s0, %s12715_s18 }
  0x64   : > { %vm351_vm0 = vcmask 779264   ;;  %v14262_v0 = vmov 0.0  }
  0x65   : > { %352 = vst.msk [vmem:[#allocation2] sm:$0x3] %vm351_vm0, %v14262_v0 }
  0x66 PF: > { %v2610_v1 = vld [vmem:[%s14433_s20 + $0x1e00] sm:$0xff]  ;;  %v2611_v3 = vld [vmem:[%s14433_s20 + $0x1e08] sm:$0xff]  ;;  %v453_v4 = vlaneseq  ;;  %v14263_v10 = vmov 1983009808   ;;  %v2612_v62 = vld [vmem:[%s14433_s20 + $0x1e10] sm:$0xff]  ;;  %vm12403_vm1 = vcmask 779264  }
  0x67   : > { %v2706_v2 = vld [vmem:[%s14433_s20 + $0x2100] sm:$0xff]  ;;  %v2707_v6 = vld [vmem:[%s14433_s20 + $0x2108] sm:$0xff]  ;;  %v451_v11 = vunpack.c.l.s4 %v14263_v10  ;;  %v2708_v63 = vld [vmem:[%s14433_s20 + $0x2110] sm:$0xff]  ;;  %p13869_p12 = scmp.ne.s32.totalorder %s14326_s28, 1 }
  0x68   : > { %v13678_v5 = vcombine.high %v2610_v1, %v2706_v2  ;;  %v13677_v7 = vcombine.low %v2610_v1, %v2706_v2  ;;  %v2418_v8 = vld [vmem:[%s14433_s20 + $0x1800] sm:$0xff]  ;;  %v13680_v12 = vcombine.high %v2611_v3, %v2707_v6  ;;  %v13679_v13 = vcombine.low %v2611_v3, %v2707_v6  ;;  %v2419_v15 = vld [vmem:[%s14433_s20 + $0x1808] sm:$0xff]  ;;  %v2613_v0 = vld [vmem:[%s14433_s20 + $0x1e18] sm:$0xff] }
  0x69   : > { %v2514_v9 = vld [vmem:[%s14433_s20 + $0x1b00] sm:$0xff]  ;;  %v2515_v16 = vld [vmem:[%s14433_s20 + $0x1b08] sm:$0xff]  ;;  %v452_v18 = vunpack.c.0.s8 %v451_v11  ;;  %v454_v19 = vshrl.u32 %v453_v4, 7  ;;  %v2709_v1 = vld [vmem:[%s14433_s20 + $0x2118] sm:$0xff] }
  0x6a   : > { %v13486_v14 = vcombine.high %v2418_v8, %v2514_v9  ;;  %8566 = vmatprep.subr.bf16.mxu0 %v13678_v5  ;;  %v13488_v17 = vcombine.high %v2419_v15, %v2515_v16  ;;  %8606 = vmatprep.subr.bf16.mxu1 %v13680_v12  ;;  %v2226_v20 = vld [vmem:[%s14433_s20 + $0x1200] sm:$0xff]  ;;  %v2227_v22 = vld [vmem:[%s14433_s20 + $0x1208] sm:$0xff]  ;;  %v13485_v25 = vcombine.low %v2418_v8, %v2514_v9  ;;  %v2420_v9 = vld [vmem:[%s14433_s20 + $0x1810] sm:$0xff] }
  0x6b   : > { %8567 = vmatpush1.bf16.xpose.msra.mxu0 %v13677_v7  ;;  %8607 = vmatpush1.bf16.xpose.msra.mxu1 %v13679_v13  ;;  %v2322_v21 = vld [vmem:[%s14433_s20 + $0x1500] sm:$0xff]  ;;  %v2323_v23 = vld [vmem:[%s14433_s20 + $0x1508] sm:$0xff]  ;;  %v14467_v24 = vsub.s32 %v452_v18, %v454_v19  ;;  %v13487_v27 = vcombine.low %v2419_v15, %v2515_v16  ;;  %v13682_v5 = vcombine.high %v2612_v62, %v2708_v63  ;;  %v2516_v10 = vld [vmem:[%s14433_s20 + $0x1b10] sm:$0xff] }
  0x6c   : > { %8568 = vmatprep.subr.bf16.mxu0 %v13486_v14  ;;  %8608 = vmatprep.subr.bf16.mxu1 %v13488_v17  ;;  %v353_v26 = vld [vmem:[%s14451_s13] sm:$0xff]  ;;  %v13294_v28 = vcombine.high %v2226_v20, %v2322_v21  ;;  %v13296_v31 = vcombine.high %v2227_v22, %v2323_v23  ;;  %v2035_v38 = vld [vmem:[%s14433_s20 + $0xc08] sm:$0xff]  ;;  %v13293_v41 = vcombine.low %v2226_v20, %v2322_v21 }
  0x6d   : > { %v14471_v29 = vrot.slane %v353_v26, %v14467_v24  ;;  %v449_v30 = vcombine.high %v353_v26, %v353_v26  ;;  %v2034_v36 = vld [vmem:[%s14433_s20 + $0xc00] sm:$0xff]  ;;  %v2131_v39 = vld [vmem:[%s14433_s20 + $0xf08] sm:$0xff]  ;;  %v13295_v42 = vcombine.low %v2227_v22, %v2323_v23  ;;  %v13684_v6 = vcombine.high %v2613_v0, %v2709_v1  ;;  %v2421_v13 = vld [vmem:[%s14433_s20 + $0x1818] sm:$0xff] }
  0x6e   : > { %v2130_v37 = vld [vmem:[%s14433_s20 + $0xf00] sm:$0xff]  ;;  %v13104_v44 = vcombine.high %v2035_v38, %v2131_v39  ;;  %v1843_v47 = vld [vmem:[%s14433_s20 + $0x608] sm:$0xff]  ;;  %v13103_v50 = vcombine.low %v2035_v38, %v2131_v39  ;;  %v2517_v14 = vld [vmem:[%s14433_s20 + $0x1b18] sm:$0xff]  ;;  %v13681_v17 = vcombine.low %v2612_v62, %v2708_v63  ;;  %v13683_v18 = vcombine.low %v2613_v0, %v2709_v1 }
  0x6f   : > { %v464_v32 = vcombine.high %v14471_v29, %v14471_v29  ;;  %v14476_v33 = vrot.slane %v449_v30, %v14467_v24  ;;  %v13102_v43 = vcombine.high %v2034_v36, %v2130_v37  ;;  %v1842_v45 = vld [vmem:[%s14433_s20 + $0x600] sm:$0xff]  ;;  %v1939_v48 = vld [vmem:[%s14433_s20 + $0x908] sm:$0xff]  ;;  %v13101_v49 = vcombine.low %v2034_v36, %v2130_v37  ;;  %v2228_v23 = vld [vmem:[%s14433_s20 + $0x1210] sm:$0xff] }
  0x70   : > { %v1938_v46 = vld [vmem:[%s14433_s20 + $0x900] sm:$0xff]  ;;  %v12912_v52 = vcombine.high %v1843_v47, %v1939_v48  ;;  %v1651_v55 = vld [vmem:[%s14433_s20 + $0x8] sm:$0xff]  ;;  %v12911_v58 = vcombine.low %v1843_v47, %v1939_v48  ;;  %v1457_v12 = vpack.c.bf16 %v14471_v29, %v14471_v29  ;;  %v13490_v19 = vcombine.high %v2420_v9, %v2516_v10  ;;  %v2229_v26 = vld [vmem:[%s14433_s20 + $0x1218] sm:$0xff] }
  0x71   : > { %v1458_v34 = vpack.c.bf16 %v464_v32, %v464_v32  ;;  %v465_v35 = vcombine.high %v14476_v33, %v14476_v33  ;;  %v12910_v51 = vcombine.high %v1842_v45, %v1938_v46  ;;  %v1650_v53 = vld [vmem:[%s14433_s20] sm:$0xff]  ;;  %v1747_v56 = vld [vmem:[%s14433_s20 + $0x308] sm:$0xff]  ;;  %v12909_v57 = vcombine.low %v1842_v45, %v1938_v46  ;;  %v2036_v32 = vld [vmem:[%s14433_s20 + $0xc10] sm:$0xff] }
  0x72   : > { %v1746_v54 = vld [vmem:[%s14433_s20 + $0x300] sm:$0xff]  ;;  %v12720_v60 = vcombine.high %v1651_v55, %v1747_v56  ;;  %v12719_v4 = vcombine.low %v1651_v55, %v1747_v56  ;;  %v1459_v16 = vpack.c.bf16 %v14476_v33, %v14476_v33  ;;  %v13492_v20 = vcombine.high %v2421_v13, %v2517_v14  ;;  %v2132_v33 = vld [vmem:[%s14433_s20 + $0xf10] sm:$0xff] }
  0x73   : > { %8569 = vmatpush1.bf16.xpose.msra.mxu0 %v13485_v25  ;;  %8609 = vmatpush1.bf16.xpose.msra.mxu1 %v13487_v27  ;;  %v1460_v40 = vpack.c.bf16 %v465_v35, %v465_v35  ;;  %v12718_v59 = vcombine.high %v1650_v53, %v1746_v54  ;;  %v354_v61 = vld [vmem:[%s14451_s13 + $0x8] sm:$0xff]  ;;  %v12717_v3 = vcombine.low %v1650_v53, %v1746_v54  ;;  %v2324_v25 = vld [vmem:[%s14433_s20 + $0x1510] sm:$0xff]  ;;  %v2325_v27 = vld [vmem:[%s14433_s20 + $0x1518] sm:$0xff] }
  0x74   : > { %8570 = vmatprep.subr.bf16.mxu0 %v13294_v28  ;;  %8610 = vmatprep.subr.bf16.mxu1 %v13296_v31  ;;  %v466_v2 = vcombine.high %v354_v61, %v354_v61  ;;  %v14498_v7 = vrot.slane %v354_v61, %v14467_v24  ;;  %v13489_v28 = vcombine.low %v2420_v9, %v2516_v10  ;;  %v2133_v35 = vld [vmem:[%s14433_s20 + $0xf18] sm:$0xff]  ;;  %v1652_v48 = vld [vmem:[%s14433_s20 + $0x10] sm:$0xff]  ;;  %v2423_v10 = vld [vmem:[%s14433_s20 + $0x1828] sm:$0xff] }
  0x75   : > { %8594 = vmatprep.mubr.bf16.mxu0 %v1458_v34  ;;  %8634 = vmatprep.mubr.bf16.mxu1 %v1460_v40  ;;  %v13491_v29 = vcombine.low %v2421_v13, %v2517_v14  ;;  %v13298_v30 = vcombine.high %v2228_v23, %v2324_v25  ;;  %v13300_v31 = vcombine.high %v2229_v26, %v2325_v27  ;;  %v2037_v34 = vld [vmem:[%s14433_s20 + $0xc18] sm:$0xff]  ;;  %v1844_v40 = vld [vmem:[%s14433_s20 + $0x610] sm:$0xff] }
  0x76   : > { %v14501_v8 = vrot.slane %v466_v2, %v14467_v24  ;;  %v481_v11 = vcombine.high %v14498_v7, %v14498_v7  ;;  %v13297_v36 = vcombine.low %v2228_v23, %v2324_v25  ;;  %v13299_v37 = vcombine.low %v2229_v26, %v2325_v27  ;;  %v355_v56 = vld [vmem:[%s14451_s13 + $0x10] sm:$0xff]  ;;  %v2038_v27 = vld [vmem:[%s14433_s20 + $0xc20] sm:$0xff] }
  0x77   : > { %v13106_v38 = vcombine.high %v2036_v32, %v2132_v33  ;;  %v13108_v39 = vcombine.high %v2037_v34, %v2133_v35  ;;  %v13107_v45 = vcombine.low %v2037_v34, %v2133_v35  ;;  %v483_v61 = vcombine.high %v355_v56, %v355_v56  ;;  %v1846_v35 = vld [vmem:[%s14433_s20 + $0x620] sm:$0xff] }
  0x78   : > { %v482_v15 = vcombine.high %v14501_v8, %v14501_v8  ;;  %v1462_v21 = vpack.c.bf16 %v481_v11, %v481_v11  ;;  %v14537_v2 = vrot.slane %v355_v56, %v14467_v24  ;;  %v1461_v9 = vpack.c.bf16 %v14498_v7, %v14498_v7  ;;  %v2519_v11 = vld [vmem:[%s14433_s20 + $0x1b28] sm:$0xff]  ;;  %v2230_v7 = vld [vmem:[%s14433_s20 + $0x1220] sm:$0xff] }
  0x79   : > { %v1463_v13 = vpack.c.bf16 %v14501_v8, %v14501_v8  ;;  %v2231_v8 = vld [vmem:[%s14433_s20 + $0x1228] sm:$0xff]  ;;  %v13495_v23 = vcombine.low %v2423_v10, %v2519_v11 }
  0x7a   : > { %v1464_v22 = vpack.c.bf16 %v482_v15, %v482_v15 }
  0x7b   : > { %8571 = vmatpush1.bf16.xpose.msra.mxu0 %v13293_v41  ;;  %8611 = vmatpush1.bf16.xpose.msra.mxu1 %v13295_v42  ;;  %v1940_v41 = vld [vmem:[%s14433_s20 + $0x910] sm:$0xff]  ;;  %v1845_v42 = vld [vmem:[%s14433_s20 + $0x618] sm:$0xff] }
  0x7c   : > { %8572 = vmatprep.subr.bf16.mxu0 %v13102_v43  ;;  %8612 = vmatprep.subr.bf16.mxu1 %v13104_v44  ;;  %v1941_v43 = vld [vmem:[%s14433_s20 + $0x918] sm:$0xff]  ;;  %v13105_v44 = vcombine.low %v2036_v32, %v2132_v33  ;;  %v12914_v46 = vcombine.high %v1844_v40, %v1940_v41 }
  0x7d   : > { %v12916_v47 = vcombine.high %v1845_v42, %v1941_v43  ;;  %v12915_v53 = vcombine.low %v1845_v42, %v1941_v43  ;;  %v1654_v43 = vld [vmem:[%s14433_s20 + $0x20] sm:$0xff] }
  0x83   : > { %8573 = vmatpush1.bf16.xpose.msra.mxu0 %v13101_v49  ;;  %8613 = vmatpush1.bf16.xpose.msra.mxu1 %v13103_v50  ;;  %v1748_v49 = vld [vmem:[%s14433_s20 + $0x310] sm:$0xff]  ;;  %v1653_v50 = vld [vmem:[%s14433_s20 + $0x18] sm:$0xff] }
  0x84   : > { %8574 = vmatprep.subr.bf16.mxu0 %v12910_v51  ;;  %8614 = vmatprep.subr.bf16.mxu1 %v12912_v52  ;;  %v1749_v51 = vld [vmem:[%s14433_s20 + $0x318] sm:$0xff]  ;;  %v12913_v52 = vcombine.low %v1844_v40, %v1940_v41  ;;  %v12722_v54 = vcombine.high %v1652_v48, %v1748_v49  ;;  %v12721_v62 = vcombine.low %v1652_v48, %v1748_v49 }
  0x85   : > { %v12724_v55 = vcombine.high %v1653_v50, %v1749_v51  ;;  %v12723_v63 = vcombine.low %v1653_v50, %v1749_v51  ;;  %v356_v51 = vld [vmem:[%s14451_s13 + $0x18] sm:$0xff] }
  0x86   : > { %v500_v56 = vcombine.high %v356_v51, %v356_v51 }
  0x8b   : > { %8575 = vmatpush1.bf16.xpose.msra.mxu0 %v12909_v57  ;;  %8615 = vmatpush1.bf16.xpose.msra.mxu1 %v12911_v58  ;;  %v2614_v57 = vld [vmem:[%s14433_s20 + $0x1e20] sm:$0xff] }
  0x8c   : > { %8576 = vmatprep.subr.bf16.mxu0 %v12718_v59  ;;  %8616 = vmatprep.subr.bf16.mxu1 %v12720_v60  ;;  %v2710_v58 = vld [vmem:[%s14433_s20 + $0x2120] sm:$0xff]  ;;  %v2615_v59 = vld [vmem:[%s14433_s20 + $0x1e28] sm:$0xff] }
  0x8d   : > { %v2711_v60 = vld [vmem:[%s14433_s20 + $0x2128] sm:$0xff]  ;;  %v13686_v0 = vcombine.high %v2614_v57, %v2710_v58  ;;  %v13685_v14 = vcombine.low %v2614_v57, %v2710_v58 }
  0x8e   : > { %v13688_v1 = vcombine.high %v2615_v59, %v2711_v60  ;;  %v13687_v15 = vcombine.low %v2615_v59, %v2711_v60 }
  0x93   : > { %8577 = vmatpush1.bf16.xpose.msra.mxu0 %v12717_v3  ;;  %8617 = vmatpush1.bf16.xpose.msra.mxu1 %v12719_v4  ;;  %v14540_v3 = vrot.slane %v483_v61, %v14467_v24  ;;  %v2422_v4 = vld [vmem:[%s14433_s20 + $0x1820] sm:$0xff]  ;;  %v14576_v61 = vrot.slane %v356_v51, %v14467_v24 }
  0x94   : > { %8646 = vmatprep.subr.bf16.mxu0 %v13682_v5  ;;  %8686 = vmatprep.subr.bf16.mxu1 %v13684_v6  ;;  %v2518_v5 = vld [vmem:[%s14433_s20 + $0x1b20] sm:$0xff]  ;;  %v498_v6 = vcombine.high %v14537_v2, %v14537_v2 }
  0x9a   : > { %8595 = vmatmul.mubr.bf16.vlgmr.msra.gmra.mxu0 %v1457_v12  ;;  %8635 = vmatmul.mubr.bf16.vlgmr.msra.gmra.mxu1 %v1459_v16  ;;  %v499_v12 = vcombine.high %v14540_v3, %v14540_v3  ;;  %v13494_v16 = vcombine.high %v2422_v4, %v2518_v5 }
  0x9b   : > { %8647 = vmatpush1.bf16.xpose.msra.mxu0 %v13681_v17  ;;  %8687 = vmatpush1.bf16.xpose.msra.mxu1 %v13683_v18  ;;  %v13496_v17 = vcombine.high %v2423_v10, %v2519_v11  ;;  %v1466_v18 = vpack.c.bf16 %v498_v6, %v498_v6  ;;  %v2521_v6 = vld [vmem:[%s14433_s20 + $0x1b38] sm:$0xff]  ;;  %v1467_v10 = vpack.c.bf16 %v14540_v3, %v14540_v3 }
  0x9c   : > { %8648 = vmatprep.subr.bf16.mxu0 %v13490_v19  ;;  %8688 = vmatprep.subr.bf16.mxu1 %v13492_v20  ;;  %v1468_v19 = vpack.c.bf16 %v499_v12, %v499_v12  ;;  %v2326_v20 = vld [vmem:[%s14433_s20 + $0x1520] sm:$0xff]  ;;  %v2233_v3 = vld [vmem:[%s14433_s20 + $0x1238] sm:$0xff] }
  0x9d   : > { %8674 = vmatprep.mubr.bf16.mxu0 %v1462_v21  ;;  %8714 = vmatprep.mubr.bf16.mxu1 %v1464_v22  ;;  %v2327_v21 = vld [vmem:[%s14433_s20 + $0x1528] sm:$0xff]  ;;  %v13493_v22 = vcombine.low %v2422_v4, %v2518_v5  ;;  %v13302_v25 = vcombine.high %v2230_v7, %v2326_v20  ;;  %v1465_v4 = vpack.c.bf16 %v14537_v2, %v14537_v2  ;;  %v2425_v5 = vld [vmem:[%s14433_s20 + $0x1838] sm:$0xff]  ;;  %v2232_v2 = vld [vmem:[%s14433_s20 + $0x1230] sm:$0xff] }
  0x9e   : > { %v13304_v26 = vcombine.high %v2231_v8, %v2327_v21  ;;  %v13303_v32 = vcombine.low %v2231_v8, %v2327_v21  ;;  %v2040_v21 = vld [vmem:[%s14433_s20 + $0xc30] sm:$0xff] }
  0xa3   : > { %8649 = vmatpush1.bf16.xpose.msra.mxu0 %v13489_v28  ;;  %8689 = vmatpush1.bf16.xpose.msra.mxu1 %v13491_v29  ;;  %v2134_v28 = vld [vmem:[%s14433_s20 + $0xf20] sm:$0xff]  ;;  %v2039_v29 = vld [vmem:[%s14433_s20 + $0xc28] sm:$0xff] }
  0xa4   : > { %8650 = vmatprep.subr.bf16.mxu0 %v13298_v30  ;;  %8690 = vmatprep.subr.bf16.mxu1 %v13300_v31  ;;  %v2135_v30 = vld [vmem:[%s14433_s20 + $0xf28] sm:$0xff]  ;;  %v13301_v31 = vcombine.low %v2230_v7, %v2326_v20  ;;  %v13110_v33 = vcombine.high %v2038_v27, %v2134_v28  ;;  %v13499_v7 = vcombine.low %v2425_v5, %v2521_v6 }
  0xa5   : > { %v13112_v34 = vcombine.high %v2039_v29, %v2135_v30  ;;  %v13111_v40 = vcombine.low %v2039_v29, %v2135_v30  ;;  %v1848_v30 = vld [vmem:[%s14433_s20 + $0x630] sm:$0xff] }
  0xab   : > { %8651 = vmatpush1.bf16.xpose.msra.mxu0 %v13297_v36  ;;  %8691 = vmatpush1.bf16.xpose.msra.mxu1 %v13299_v37  ;;  %v1942_v36 = vld [vmem:[%s14433_s20 + $0x920] sm:$0xff]  ;;  %v1847_v37 = vld [vmem:[%s14433_s20 + $0x628] sm:$0xff] }
  0xac   : > { %8652 = vmatprep.subr.bf16.mxu0 %v13106_v38  ;;  %8692 = vmatprep.subr.bf16.mxu1 %v13108_v39  ;;  %v1943_v38 = vld [vmem:[%s14433_s20 + $0x928] sm:$0xff]  ;;  %v13109_v39 = vcombine.low %v2038_v27, %v2134_v28  ;;  %v12918_v41 = vcombine.high %v1846_v35, %v1942_v36 }
  0xad   : > { %v12920_v42 = vcombine.high %v1847_v37, %v1943_v38  ;;  %v12919_v48 = vcombine.low %v1847_v37, %v1943_v38  ;;  %v1656_v38 = vld [vmem:[%s14433_s20 + $0x30] sm:$0xff] }
  0xb3   : > { %8653 = vmatpush1.bf16.xpose.msra.mxu0 %v13105_v44  ;;  %8693 = vmatpush1.bf16.xpose.msra.mxu1 %v13107_v45  ;;  %v1750_v44 = vld [vmem:[%s14433_s20 + $0x320] sm:$0xff]  ;;  %v1655_v45 = vld [vmem:[%s14433_s20 + $0x28] sm:$0xff] }
  0xb4   : > { %8654 = vmatprep.subr.bf16.mxu0 %v12914_v46  ;;  %8694 = vmatprep.subr.bf16.mxu1 %v12916_v47  ;;  %v1751_v46 = vld [vmem:[%s14433_s20 + $0x328] sm:$0xff]  ;;  %v12917_v47 = vcombine.low %v1846_v35, %v1942_v36  ;;  %v12726_v49 = vcombine.high %v1654_v43, %v1750_v44  ;;  %v12725_v57 = vcombine.low %v1654_v43, %v1750_v44 }
  0xb5   : > { %v12728_v50 = vcombine.high %v1655_v45, %v1751_v46  ;;  %v12727_v58 = vcombine.low %v1655_v45, %v1751_v46  ;;  %v357_v46 = vld [vmem:[%s14451_s13 + $0x20] sm:$0xff] }
  0xb6   : > { %v517_v51 = vcombine.high %v357_v46, %v357_v46 }
  0xbb   : > { %8655 = vmatpush1.bf16.xpose.msra.mxu0 %v12913_v52  ;;  %8695 = vmatpush1.bf16.xpose.msra.mxu1 %v12915_v53  ;;  %v2616_v52 = vld [vmem:[%s14433_s20 + $0x1e30] sm:$0xff] }
  0xbc   : > { %8656 = vmatprep.subr.bf16.mxu0 %v12722_v54  ;;  %8696 = vmatprep.subr.bf16.mxu1 %v12724_v55  ;;  %v2712_v53 = vld [vmem:[%s14433_s20 + $0x2130] sm:$0xff]  ;;  %v2617_v54 = vld [vmem:[%s14433_s20 + $0x1e38] sm:$0xff] }
  0xbd   : > { %v2713_v55 = vld [vmem:[%s14433_s20 + $0x2138] sm:$0xff]  ;;  %v13690_v59 = vcombine.high %v2616_v52, %v2712_v53  ;;  %v13689_v11 = vcombine.low %v2616_v52, %v2712_v53 }
  0xbe   : > { %v13692_v60 = vcombine.high %v2617_v54, %v2713_v55  ;;  %v13691_v12 = vcombine.low %v2617_v54, %v2713_v55 }
  0xc3   : > { %8657 = vmatpush1.bf16.xpose.msra.mxu0 %v12721_v62  ;;  %8697 = vmatpush1.bf16.xpose.msra.mxu1 %v12723_v63  ;;  %v14579_v62 = vrot.slane %v500_v56, %v14467_v24  ;;  %v2424_v63 = vld [vmem:[%s14433_s20 + $0x1830] sm:$0xff]  ;;  %v14615_v56 = vrot.slane %v357_v46, %v14467_v24 }
  0xc4   : > { %8726 = vmatprep.subr.bf16.mxu0 %v13686_v0  ;;  %8766 = vmatprep.subr.bf16.mxu1 %v13688_v1  ;;  %v2520_v0 = vld [vmem:[%s14433_s20 + $0x1b30] sm:$0xff]  ;;  %v515_v1 = vcombine.high %v14576_v61, %v14576_v61 }
  0xca   : > { %8675 = vmatmul.mubr.bf16.vlgmr.msra.gmra.mxu0 %v1461_v9  ;;  %8715 = vmatmul.mubr.bf16.vlgmr.msra.gmra.mxu1 %v1463_v13  ;;  %v516_v9 = vcombine.high %v14579_v62, %v14579_v62  ;;  %v13498_v13 = vcombine.high %v2424_v63, %v2520_v0 }
  0xcb   : > { %8727 = vmatpush1.bf16.xpose.msra.mxu0 %v13685_v14  ;;  %8767 = vmatpush1.bf16.xpose.msra.mxu1 %v13687_v15  ;;  %v13500_v14 = vcombine.high %v2425_v5, %v2521_v6  ;;  %v1470_v15 = vpack.c.bf16 %v515_v1, %v515_v1  ;;  %v2523_v1 = vld [vmem:[%s14433_s20 + $0x1b48] sm:$0xff]  ;;  %v1471_v5 = vpack.c.bf16 %v14579_v62, %v14579_v62 }
  0xcc   : > { %8728 = vmatprep.subr.bf16.mxu0 %v13494_v16  ;;  %8768 = vmatprep.subr.bf16.mxu1 %v13496_v17  ;;  %v1472_v16 = vpack.c.bf16 %v516_v9, %v516_v9  ;;  %v2328_v17 = vld [vmem:[%s14433_s20 + $0x1530] sm:$0xff]  ;;  %v2235_v62 = vld [vmem:[%s14433_s20 + $0x1248] sm:$0xff] }
  0xcd   : > { %8754 = vmatprep.mubr.bf16.mxu0 %v1466_v18  ;;  %8794 = vmatprep.mubr.bf16.mxu1 %v1468_v19  ;;  %v2329_v18 = vld [vmem:[%s14433_s20 + $0x1538] sm:$0xff]  ;;  %v13497_v19 = vcombine.low %v2424_v63, %v2520_v0  ;;  %v13306_v20 = vcombine.high %v2232_v2, %v2328_v17  ;;  %v1469_v63 = vpack.c.bf16 %v14576_v61, %v14576_v61  ;;  %v2427_v0 = vld [vmem:[%s14433_s20 + $0x1848] sm:$0xff]  ;;  %v2234_v61 = vld [vmem:[%s14433_s20 + $0x1240] sm:$0xff] }
  0xce   : > { %v13308_v8 = vcombine.high %v2233_v3, %v2329_v18  ;;  %v13307_v27 = vcombine.low %v2233_v3, %v2329_v18  ;;  %v2042_v18 = vld [vmem:[%s14433_s20 + $0xc40] sm:$0xff] }
  0xd3   : > { %8729 = vmatpush1.bf16.xpose.msra.mxu0 %v13493_v22  ;;  %8769 = vmatpush1.bf16.xpose.msra.mxu1 %v13495_v23  ;;  %v2136_v22 = vld [vmem:[%s14433_s20 + $0xf30] sm:$0xff]  ;;  %v2041_v23 = vld [vmem:[%s14433_s20 + $0xc38] sm:$0xff] }
  0xd4   : > { %8730 = vmatprep.subr.bf16.mxu0 %v13302_v25  ;;  %8770 = vmatprep.subr.bf16.mxu1 %v13304_v26  ;;  %v2137_v25 = vld [vmem:[%s14433_s20 + $0xf38] sm:$0xff]  ;;  %v13305_v26 = vcombine.low %v2232_v2, %v2328_v17  ;;  %v13114_v28 = vcombine.high %v2040_v21, %v2136_v22  ;;  %v13503_v2 = vcombine.low %v2427_v0, %v2523_v1 }
  0xd5   : > { %v13116_v29 = vcombine.high %v2041_v23, %v2137_v25  ;;  %v13115_v35 = vcombine.low %v2041_v23, %v2137_v25  ;;  %v1850_v25 = vld [vmem:[%s14433_s20 + $0x640] sm:$0xff] }
  0xdb   : > { %8731 = vmatpush1.bf16.xpose.msra.mxu0 %v13301_v31  ;;  %8771 = vmatpush1.bf16.xpose.msra.mxu1 %v13303_v32  ;;  %v1944_v31 = vld [vmem:[%s14433_s20 + $0x930] sm:$0xff]  ;;  %v1849_v32 = vld [vmem:[%s14433_s20 + $0x638] sm:$0xff] }
  0xdc   : > { %8732 = vmatprep.subr.bf16.mxu0 %v13110_v33  ;;  %8772 = vmatprep.subr.bf16.mxu1 %v13112_v34  ;;  %v1945_v33 = vld [vmem:[%s14433_s20 + $0x938] sm:$0xff]  ;;  %v13113_v34 = vcombine.low %v2040_v21, %v2136_v22  ;;  %v12922_v36 = vcombine.high %v1848_v30, %v1944_v31 }
  0xdd   : > { %v12924_v37 = vcombine.high %v1849_v32, %v1945_v33  ;;  %v12923_v43 = vcombine.low %v1849_v32, %v1945_v33  ;;  %v1658_v33 = vld [vmem:[%s14433_s20 + $0x40] sm:$0xff] }
  0xe3   : > { %8733 = vmatpush1.bf16.xpose.msra.mxu0 %v13109_v39  ;;  %8773 = vmatpush1.bf16.xpose.msra.mxu1 %v13111_v40  ;;  %v1752_v39 = vld [vmem:[%s14433_s20 + $0x330] sm:$0xff]  ;;  %v1657_v40 = vld [vmem:[%s14433_s20 + $0x38] sm:$0xff] }
  0xe4   : > { %8734 = vmatprep.subr.bf16.mxu0 %v12918_v41  ;;  %8774 = vmatprep.subr.bf16.mxu1 %v12920_v42  ;;  %v1753_v41 = vld [vmem:[%s14433_s20 + $0x338] sm:$0xff]  ;;  %v12921_v42 = vcombine.low %v1848_v30, %v1944_v31  ;;  %v12730_v44 = vcombine.high %v1656_v38, %v1752_v39  ;;  %v12729_v52 = vcombine.low %v1656_v38, %v1752_v39 }
  0xe5   : > { %v12732_v45 = vcombine.high %v1657_v40, %v1753_v41  ;;  %v12731_v53 = vcombine.low %v1657_v40, %v1753_v41  ;;  %v358_v41 = vld [vmem:[%s14451_s13 + $0x28] sm:$0xff] }
  0xe6   : > { %v534_v46 = vcombine.high %v358_v41, %v358_v41 }
  0xeb   : > { %8735 = vmatpush1.bf16.xpose.msra.mxu0 %v12917_v47  ;;  %8775 = vmatpush1.bf16.xpose.msra.mxu1 %v12919_v48  ;;  %v2618_v47 = vld [vmem:[%s14433_s20 + $0x1e40] sm:$0xff] }
  0xec   : > { %8736 = vmatprep.subr.bf16.mxu0 %v12726_v49  ;;  %8776 = vmatprep.subr.bf16.mxu1 %v12728_v50  ;;  %v2714_v48 = vld [vmem:[%s14433_s20 + $0x2140] sm:$0xff]  ;;  %v2619_v49 = vld [vmem:[%s14433_s20 + $0x1e48] sm:$0xff] }
  0xed   : > { %v2715_v50 = vld [vmem:[%s14433_s20 + $0x2148] sm:$0xff]  ;;  %v13694_v54 = vcombine.high %v2618_v47, %v2714_v48  ;;  %v13693_v6 = vcombine.low %v2618_v47, %v2714_v48 }
  0xee   : > { %v13696_v55 = vcombine.high %v2619_v49, %v2715_v50  ;;  %v13695_v9 = vcombine.low %v2619_v49, %v2715_v50 }
  0xf3   : > { %8737 = vmatpush1.bf16.xpose.msra.mxu0 %v12725_v57  ;;  %8777 = vmatpush1.bf16.xpose.msra.mxu1 %v12727_v58  ;;  %v14618_v57 = vrot.slane %v517_v51, %v14467_v24  ;;  %v2426_v58 = vld [vmem:[%s14433_s20 + $0x1840] sm:$0xff]  ;;  %v14654_v51 = vrot.slane %v358_v41, %v14467_v24 }
  0xf4   : > { %8806 = vmatprep.subr.bf16.mxu0 %v13690_v59  ;;  %8846 = vmatprep.subr.bf16.mxu1 %v13692_v60  ;;  %v2522_v59 = vld [vmem:[%s14433_s20 + $0x1b40] sm:$0xff]  ;;  %v532_v60 = vcombine.high %v14615_v56, %v14615_v56 }
  0xfa   : > { %8755 = vmatmul.mubr.bf16.vlgmr.msra.gmra.mxu0 %v1465_v4  ;;  %8795 = vmatmul.mubr.bf16.vlgmr.msra.gmra.mxu1 %v1467_v10  ;;  %v533_v4 = vcombine.high %v14618_v57, %v14618_v57  ;;  %v13502_v10 = vcombine.high %v2426_v58, %v2522_v59 }
  0xfb   : > { %8807 = vmatpush1.bf16.xpose.msra.mxu0 %v13689_v11  ;;  %8847 = vmatpush1.bf16.xpose.msra.mxu1 %v13691_v12  ;;  %v13504_v11 = vcombine.high %v2427_v0, %v2523_v1  ;;  %v1474_v12 = vpack.c.bf16 %v532_v60, %v532_v60  ;;  %v2525_v60 = vld [vmem:[%s14433_s20 + $0x1b58] sm:$0xff]  ;;  %v1475_v0 = vpack.c.bf16 %v14618_v57, %v14618_v57 }
  0xfc   : > { %8808 = vmatprep.subr.bf16.mxu0 %v13498_v13  ;;  %8848 = vmatprep.subr.bf16.mxu1 %v13500_v14  ;;  %v1476_v13 = vpack.c.bf16 %v533_v4, %v533_v4  ;;  %v2330_v14 = vld [vmem:[%s14433_s20 + $0x1540] sm:$0xff] }
  0xfd   : > { %8834 = vmatprep.mubr.bf16.mxu0 %v1470_v15  ;;  %8874 = vmatprep.mubr.bf16.mxu1 %v1472_v16  ;;  %v2331_v15 = vld [vmem:[%s14433_s20 + $0x1548] sm:$0xff]  ;;  %v13501_v16 = vcombine.low %v2426_v58, %v2522_v59  ;;  %v13310_v17 = vcombine.high %v2234_v61, %v2330_v14  ;;  %v1473_v58 = vpack.c.bf16 %v14615_v56, %v14615_v56  ;;  %v2429_v59 = vld [vmem:[%s14433_s20 + $0x1858] sm:$0xff] }
  0xfe   : > { %v13312_v3 = vcombine.high %v2235_v62, %v2331_v15  ;;  %v13311_v21 = vcombine.low %v2235_v62, %v2331_v15  ;;  %v2237_v15 = vld [vmem:[%s14433_s20 + $0x1258] sm:$0xff] }
 0x103   : > { %8809 = vmatpush1.bf16.xpose.msra.mxu0 %v13497_v19  ;;  %8849 = vmatpush1.bf16.xpose.msra.mxu1 %v13499_v7  ;;  %v2138_v19 = vld [vmem:[%s14433_s20 + $0xf40] sm:$0xff]  ;;  %v2043_v7 = vld [vmem:[%s14433_s20 + $0xc48] sm:$0xff] }
 0x104   : > { %8810 = vmatprep.subr.bf16.mxu0 %v13306_v20  ;;  %8850 = vmatprep.subr.bf16.mxu1 %v13308_v8  ;;  %v2139_v20 = vld [vmem:[%s14433_s20 + $0xf48] sm:$0xff]  ;;  %v13309_v8 = vcombine.low %v2234_v61, %v2330_v14  ;;  %v13118_v22 = vcombine.high %v2042_v18, %v2138_v19  ;;  %v2236_v61 = vld [vmem:[%s14433_s20 + $0x1250] sm:$0xff] }
 0x105   : > { %v13120_v23 = vcombine.high %v2043_v7, %v2139_v20  ;;  %v13119_v30 = vcombine.low %v2043_v7, %v2139_v20  ;;  %v2332_v14 = vld [vmem:[%s14433_s20 + $0x1550] sm:$0xff] }
 0x10b   : > { %8811 = vmatpush1.bf16.xpose.msra.mxu0 %v13305_v26  ;;  %8851 = vmatpush1.bf16.xpose.msra.mxu1 %v13307_v27  ;;  %v1946_v26 = vld [vmem:[%s14433_s20 + $0x940] sm:$0xff]  ;;  %v1851_v27 = vld [vmem:[%s14433_s20 + $0x648] sm:$0xff] }
 0x10c   : > { %8812 = vmatprep.subr.bf16.mxu0 %v13114_v28  ;;  %8852 = vmatprep.subr.bf16.mxu1 %v13116_v29  ;;  %v1947_v28 = vld [vmem:[%s14433_s20 + $0x948] sm:$0xff]  ;;  %v13117_v29 = vcombine.low %v2042_v18, %v2138_v19  ;;  %v12926_v31 = vcombine.high %v1850_v25, %v1946_v26  ;;  %v13507_v18 = vcombine.low %v2429_v59, %v2525_v60 }
 0x10d   : > { %v12928_v32 = vcombine.high %v1851_v27, %v1947_v28  ;;  %v12927_v38 = vcombine.low %v1851_v27, %v1947_v28  ;;  %v13314_v19 = vcombine.high %v2236_v61, %v2332_v14 }
 0x113   : > { %8813 = vmatpush1.bf16.xpose.msra.mxu0 %v13113_v34  ;;  %8853 = vmatpush1.bf16.xpose.msra.mxu1 %v13115_v35  ;;  %v1754_v34 = vld [vmem:[%s14433_s20 + $0x340] sm:$0xff]  ;;  %v1659_v35 = vld [vmem:[%s14433_s20 + $0x48] sm:$0xff] }
 0x114   : > { %8814 = vmatprep.subr.bf16.mxu0 %v12922_v36  ;;  %8854 = vmatprep.subr.bf16.mxu1 %v12924_v37  ;;  %v1755_v36 = vld [vmem:[%s14433_s20 + $0x348] sm:$0xff]  ;;  %v12925_v37 = vcombine.low %v1850_v25, %v1946_v26  ;;  %v12734_v39 = vcombine.high %v1658_v33, %v1754_v34  ;;  %v12733_v47 = vcombine.low %v1658_v33, %v1754_v34 }
 0x115   : > { %v12736_v40 = vcombine.high %v1659_v35, %v1755_v36  ;;  %v12735_v48 = vcombine.low %v1659_v35, %v1755_v36  ;;  %v13313_v25 = vcombine.low %v2236_v61, %v2332_v14 }
 0x11b   : > { %8815 = vmatpush1.bf16.xpose.msra.mxu0 %v12921_v42  ;;  %8855 = vmatpush1.bf16.xpose.msra.mxu1 %v12923_v43  ;;  %v2620_v42 = vld [vmem:[%s14433_s20 + $0x1e50] sm:$0xff] }
 0x11c   : > { %8816 = vmatprep.subr.bf16.mxu0 %v12730_v44  ;;  %8856 = vmatprep.subr.bf16.mxu1 %v12732_v45  ;;  %v2716_v43 = vld [vmem:[%s14433_s20 + $0x2150] sm:$0xff]  ;;  %v2621_v44 = vld [vmem:[%s14433_s20 + $0x1e58] sm:$0xff] }
 0x11d   : > { %v2717_v45 = vld [vmem:[%s14433_s20 + $0x2158] sm:$0xff]  ;;  %v13698_v49 = vcombine.high %v2620_v42, %v2716_v43  ;;  %v13697_v1 = vcombine.low %v2620_v42, %v2716_v43 }
 0x11e   : > { %v13700_v50 = vcombine.high %v2621_v44, %v2717_v45  ;;  %v13699_v4 = vcombine.low %v2621_v44, %v2717_v45  ;;  %v359_v45 = vld [vmem:[%s14451_s13 + $0x30] sm:$0xff] }
 0x123   : > { %8817 = vmatpush1.bf16.xpose.msra.mxu0 %v12729_v52  ;;  %8857 = vmatpush1.bf16.xpose.msra.mxu1 %v12731_v53  ;;  %v14657_v52 = vrot.slane %v534_v46, %v14467_v24  ;;  %v2428_v53 = vld [vmem:[%s14433_s20 + $0x1850] sm:$0xff]  ;;  %v2622_v46 = vld [vmem:[%s14433_s20 + $0x1e60] sm:$0xff] }
 0x124   : > { %8886 = vmatprep.subr.bf16.mxu0 %v13694_v54  ;;  %8926 = vmatprep.subr.bf16.mxu1 %v13696_v55  ;;  %v2524_v54 = vld [vmem:[%s14433_s20 + $0x1b50] sm:$0xff]  ;;  %v549_v55 = vcombine.high %v14654_v51, %v14654_v51 }
 0x12a   : > { %8835 = vmatmul.mubr.bf16.vlgmr.msra.gmra.mxu0 %v1469_v63  ;;  %8875 = vmatmul.mubr.bf16.vlgmr.msra.gmra.mxu1 %v1471_v5  ;;  %v550_v63 = vcombine.high %v14657_v52, %v14657_v52  ;;  %v13506_v5 = vcombine.high %v2428_v53, %v2524_v54 }
 0x12b   : > { %8887 = vmatpush1.bf16.xpose.msra.mxu0 %v13693_v6  ;;  %8927 = vmatpush1.bf16.xpose.msra.mxu1 %v13695_v9  ;;  %v13508_v6 = vcombine.high %v2429_v59, %v2525_v60  ;;  %v1478_v9 = vpack.c.bf16 %v549_v55, %v549_v55  ;;  %v14695_v59 = vrot.slane %v359_v45, %v14467_v24 }
 0x12c   : > { %8888 = vmatprep.subr.bf16.mxu0 %v13502_v10  ;;  %8928 = vmatprep.subr.bf16.mxu1 %v13504_v11  ;;  %v1480_v56 = vpack.c.bf16 %v550_v63, %v550_v63  ;;  %v2430_v63 = vld [vmem:[%s14433_s20 + $0x1860] sm:$0xff] }
 0x12d   : > { %8914 = vmatprep.mubr.bf16.mxu0 %v1474_v12  ;;  %8954 = vmatprep.mubr.bf16.mxu1 %v1476_v13 }
 0x133   : > { %8889 = vmatpush1.bf16.xpose.msra.mxu0 %v13501_v16  ;;  %8929 = vmatpush1.bf16.xpose.msra.mxu1 %v13503_v2  ;;  %v2333_v16 = vld [vmem:[%s14433_s20 + $0x1558] sm:$0xff] }
 0x134   : > { %8890 = vmatprep.subr.bf16.mxu0 %v13310_v17  ;;  %8930 = vmatprep.subr.bf16.mxu1 %v13312_v3  ;;  %v13505_v17 = vcombine.low %v2428_v53, %v2524_v54  ;;  %v13316_v20 = vcombine.high %v2237_v15, %v2333_v16  ;;  %v13315_v26 = vcombine.low %v2237_v15, %v2333_v16 }
 0x13b   : > { %8891 = vmatpush1.bf16.xpose.msra.mxu0 %v13309_v8  ;;  %8931 = vmatpush1.bf16.xpose.msra.mxu1 %v13311_v21  ;;  %v2044_v8 = vld [vmem:[%s14433_s20 + $0xc50] sm:$0xff] }
 0x13c   : > { %8892 = vmatprep.subr.bf16.mxu0 %v13118_v22  ;;  %8932 = vmatprep.subr.bf16.mxu1 %v13120_v23  ;;  %v2140_v21 = vld [vmem:[%s14433_s20 + $0xf50] sm:$0xff]  ;;  %v2045_v22 = vld [vmem:[%s14433_s20 + $0xc58] sm:$0xff] }
 0x13d   : > { %v2141_v23 = vld [vmem:[%s14433_s20 + $0xf58] sm:$0xff]  ;;  %v13122_v27 = vcombine.high %v2044_v8, %v2140_v21  ;;  %v13121_v33 = vcombine.low %v2044_v8, %v2140_v21 }
 0x13e   : > { %v13124_v28 = vcombine.high %v2045_v22, %v2141_v23  ;;  %v13123_v34 = vcombine.low %v2045_v22, %v2141_v23 }
 0x143   : > { %8893 = vmatpush1.bf16.xpose.msra.mxu0 %v13117_v29  ;;  %8933 = vmatpush1.bf16.xpose.msra.mxu1 %v13119_v30  ;;  %v1852_v29 = vld [vmem:[%s14433_s20 + $0x650] sm:$0xff] }
 0x144   : > { %8894 = vmatprep.subr.bf16.mxu0 %v12926_v31  ;;  %8934 = vmatprep.subr.bf16.mxu1 %v12928_v32  ;;  %v1948_v30 = vld [vmem:[%s14433_s20 + $0x950] sm:$0xff]  ;;  %v1853_v31 = vld [vmem:[%s14433_s20 + $0x658] sm:$0xff] }
 0x145   : > { %v1949_v32 = vld [vmem:[%s14433_s20 + $0x958] sm:$0xff]  ;;  %v12930_v35 = vcombine.high %v1852_v29, %v1948_v30  ;;  %v12929_v41 = vcombine.low %v1852_v29, %v1948_v30  ;;  %v2143_v29 = vld [vmem:[%s14433_s20 + $0xf68] sm:$0xff] }
 0x146   : > { %v12932_v36 = vcombine.high %v1853_v31, %v1949_v32  ;;  %v12931_v42 = vcombine.low %v1853_v31, %v1949_v32 }
 0x14b   : > { %8895 = vmatpush1.bf16.xpose.msra.mxu0 %v12925_v37  ;;  %8935 = vmatpush1.bf16.xpose.msra.mxu1 %v12927_v38  ;;  %v1660_v37 = vld [vmem:[%s14433_s20 + $0x50] sm:$0xff] }
 0x14c   : > { %8896 = vmatprep.subr.bf16.mxu0 %v12734_v39  ;;  %8936 = vmatprep.subr.bf16.mxu1 %v12736_v40  ;;  %v1756_v38 = vld [vmem:[%s14433_s20 + $0x350] sm:$0xff]  ;;  %v1661_v39 = vld [vmem:[%s14433_s20 + $0x58] sm:$0xff] }
 0x14d   : > { %v1757_v40 = vld [vmem:[%s14433_s20 + $0x358] sm:$0xff]  ;;  %v12738_v43 = vcombine.high %v1660_v37, %v1756_v38  ;;  %v12737_v53 = vcombine.low %v1660_v37, %v1756_v38  ;;  %v1951_v37 = vld [vmem:[%s14433_s20 + $0x968] sm:$0xff] }
 0x14e   : > { %v12740_v44 = vcombine.high %v1661_v39, %v1757_v40  ;;  %v12739_v54 = vcombine.low %v1661_v39, %v1757_v40 }
 0x153   : > { %8897 = vmatpush1.bf16.xpose.msra.mxu0 %v12733_v47  ;;  %8937 = vmatpush1.bf16.xpose.msra.mxu1 %v12735_v48  ;;  %v2718_v47 = vld [vmem:[%s14433_s20 + $0x2160] sm:$0xff]  ;;  %v2623_v48 = vld [vmem:[%s14433_s20 + $0x1e68] sm:$0xff] }
 0x154   : > { %8966 = vmatprep.subr.bf16.mxu0 %v13698_v49  ;;  %9006 = vmatprep.subr.bf16.mxu1 %v13700_v50  ;;  %v2719_v49 = vld [vmem:[%s14433_s20 + $0x2168] sm:$0xff]  ;;  %v551_v50 = vcombine.high %v359_v45, %v359_v45  ;;  %v13702_v55 = vcombine.high %v2622_v46, %v2718_v47 }
 0x155   : > { %v1759_v45 = vld [vmem:[%s14433_s20 + $0x368] sm:$0xff] }
 0x156   : > { %v14698_v60 = vrot.slane %v551_v50, %v14467_v24  ;;  %v360_v50 = vld [vmem:[%s14451_s13 + $0x38] sm:$0xff] }
 0x15a   : > { %v8596_v10 = vpop.f32.mrf.mxu0  ;;  %8915 = vmatmul.mubr.bf16.vlgmr.msra.gmra.mxu0 %v1473_v58  ;;  %v8636_v11 = vpop.f32.mrf.mxu1  ;;  %8955 = vmatmul.mubr.bf16.vlgmr.msra.gmra.mxu1 %v1475_v0  ;;  %v13704_v58 = vcombine.high %v2623_v48, %v2719_v49  ;;  %v2526_v0 = vld [vmem:[%s14433_s20 + $0x1b60] sm:$0xff] }
 0x15b   : > { %8967 = vmatpush1.bf16.xpose.msra.mxu0 %v13697_v1  ;;  %v14671_v12 = vadd.f32 %v8636_v11, %v8596_v10  ;;  %9007 = vmatpush1.bf16.xpose.msra.mxu1 %v13699_v4  ;;  %v566_v1 = vcombine.high %v14695_v59, %v14695_v59  ;;  %v1477_v4 = vpack.c.bf16 %v14654_v51, %v14654_v51 }
 0x15c   : > { %v8598_v13 = vpop.f32.mrf.mxu0  ;;  %8968 = vmatprep.subr.bf16.mxu0 %v13506_v5  ;;  %v8638_v57 = vpop.f32.mrf.mxu1  ;;  %9008 = vmatprep.subr.bf16.mxu1 %v13508_v6  ;;  %v2431_v5 = vld [vmem:[%s14433_s20 + $0x1868] sm:$0xff]  ;;  %v1479_v10 = vpack.c.bf16 %v14657_v52, %v14657_v52  ;;  %v13703_v11 = vcombine.low %v2623_v48, %v2719_v49 }
 0x15d   : > { %8994 = vmatprep.mubr.bf16.mxu0 %v1478_v9  ;;  %9034 = vmatprep.mubr.bf16.mxu1 %v1480_v56  ;;  %v2527_v6 = vld [vmem:[%s14433_s20 + $0x1b68] sm:$0xff]  ;;  %v567_v9 = vcombine.high %v14698_v60, %v14698_v60  ;;  %v13701_v56 = vcombine.low %v2622_v46, %v2718_v47  ;;  %v13510_v13 = vcombine.high %v2430_v63, %v2526_v0 }
 0x15e   : > { %v8599_v62 = vpop.f32.mrf.mxu0  ;;  %v8639_v2 = vpop.f32.mrf.mxu1  ;;  %v13512_v57 = vcombine.high %v2431_v5, %v2527_v6  ;;  %v1482_v61 = vpack.c.bf16 %v566_v1, %v566_v1  ;;  %v13511_v21 = vcombine.low %v2431_v5, %v2527_v6  ;;  %v14737_v6 = vrot.slane %v360_v50, %v14467_v24 }
 0x15f   : > { %v1484_v62 = vpack.c.bf16 %v567_v9, %v567_v9 }
 0x160   : > { %v8600_v3 = vpop.f32.mrf.mxu0  ;;  %v8640_v7 = vpop.f32.mrf.mxu1 }
 0x161   : > { %v2334_v3 = vld [vmem:[%s14433_s20 + $0x1560] sm:$0xff]  ;;  %v2335_v7 = vld [vmem:[%s14433_s20 + $0x1568] sm:$0xff] }
 0x163   : > { %8969 = vmatpush1.bf16.xpose.msra.mxu0 %v13505_v17  ;;  %9009 = vmatpush1.bf16.xpose.msra.mxu1 %v13507_v18  ;;  %v2238_v17 = vld [vmem:[%s14433_s20 + $0x1260] sm:$0xff] }
 0x164   : > { %8970 = vmatprep.subr.bf16.mxu0 %v13314_v19  ;;  %9010 = vmatprep.subr.bf16.mxu1 %v13316_v20  ;;  %v2239_v19 = vld [vmem:[%s14433_s20 + $0x1268] sm:$0xff]  ;;  %v13509_v20 = vcombine.low %v2430_v63, %v2526_v0  ;;  %v13318_v22 = vcombine.high %v2238_v17, %v2334_v3  ;;  %v13317_v30 = vcombine.low %v2238_v17, %v2334_v3 }
 0x165   : > { %v13319_v31 = vcombine.low %v2239_v19, %v2335_v7  ;;  %v568_v63 = vcombine.high %v360_v50, %v360_v50  ;;  %v1761_v50 = vld [vmem:[%s14433_s20 + $0x378] sm:$0xff] }
 0x167   : > { %v14740_v9 = vrot.slane %v568_v63, %v14467_v24  ;;  %v361_v63 = vld [vmem:[%s14451_s13 + $0x40] sm:$0xff] }
 0x16b   : > { %8971 = vmatpush1.bf16.xpose.msra.mxu0 %v13313_v25  ;;  %9011 = vmatpush1.bf16.xpose.msra.mxu1 %v13315_v26  ;;  %v13320_v25 = vcombine.high %v2239_v19, %v2335_v7  ;;  %v2046_v26 = vld [vmem:[%s14433_s20 + $0xc60] sm:$0xff] }
 0x16c   : > { %8972 = vmatprep.subr.bf16.mxu0 %v13122_v27  ;;  %9012 = vmatprep.subr.bf16.mxu1 %v13124_v28  ;;  %v2142_v27 = vld [vmem:[%s14433_s20 + $0xf60] sm:$0xff]  ;;  %v2047_v28 = vld [vmem:[%s14433_s20 + $0xc68] sm:$0xff] }
 0x16d   : > { %v13126_v32 = vcombine.high %v2046_v26, %v2142_v27  ;;  %v13125_v38 = vcombine.low %v2046_v26, %v2142_v27  ;;  %v13127_v39 = vcombine.low %v2047_v28, %v2143_v29 }
 0x173   : > { %8973 = vmatpush1.bf16.xpose.msra.mxu0 %v13121_v33  ;;  %9013 = vmatpush1.bf16.xpose.msra.mxu1 %v13123_v34  ;;  %v13128_v33 = vcombine.high %v2047_v28, %v2143_v29  ;;  %v1854_v34 = vld [vmem:[%s14433_s20 + $0x660] sm:$0xff] }
 0x174   : > { %8974 = vmatprep.subr.bf16.mxu0 %v12930_v35  ;;  %9014 = vmatprep.subr.bf16.mxu1 %v12932_v36  ;;  %v1950_v35 = vld [vmem:[%s14433_s20 + $0x960] sm:$0xff]  ;;  %v1855_v36 = vld [vmem:[%s14433_s20 + $0x668] sm:$0xff] }
 0x175   : > { %v12934_v40 = vcombine.high %v1854_v34, %v1950_v35  ;;  %v12933_v46 = vcombine.low %v1854_v34, %v1950_v35  ;;  %v12935_v47 = vcombine.low %v1855_v36, %v1951_v37  ;;  %v2145_v34 = vld [vmem:[%s14433_s20 + $0xf78] sm:$0xff] }
 0x17b   : > { %8975 = vmatpush1.bf16.xpose.msra.mxu0 %v12929_v41  ;;  %9015 = vmatpush1.bf16.xpose.msra.mxu1 %v12931_v42  ;;  %v12936_v41 = vcombine.high %v1855_v36, %v1951_v37  ;;  %v1662_v42 = vld [vmem:[%s14433_s20 + $0x60] sm:$0xff] }
 0x17c   : > { %8976 = vmatprep.subr.bf16.mxu0 %v12738_v43  ;;  %9016 = vmatprep.subr.bf16.mxu1 %v12740_v44  ;;  %v1758_v43 = vld [vmem:[%s14433_s20 + $0x360] sm:$0xff]  ;;  %v1663_v44 = vld [vmem:[%s14433_s20 + $0x68] sm:$0xff] }
 0x17d   : > { %v12742_v48 = vcombine.high %v1662_v42, %v1758_v43  ;;  %v12744_v49 = vcombine.high %v1663_v44, %v1759_v45  ;;  %v12741_v0 = vcombine.low %v1662_v42, %v1758_v43  ;;  %v12743_v1 = vcombine.low %v1663_v44, %v1759_v45  ;;  %v1953_v42 = vld [vmem:[%s14433_s20 + $0x978] sm:$0xff] }
 0x183   : > { %8977 = vmatpush1.bf16.xpose.msra.mxu0 %v12737_v53  ;;  %9017 = vmatpush1.bf16.xpose.msra.mxu1 %v12739_v54  ;;  %v2624_v53 = vld [vmem:[%s14433_s20 + $0x1e70] sm:$0xff] }
 0x184   : > { %9046 = vmatprep.subr.bf16.mxu0 %v13702_v55  ;;  %9086 = vmatprep.subr.bf16.mxu1 %v13704_v58  ;;  %v2720_v54 = vld [vmem:[%s14433_s20 + $0x2170] sm:$0xff]  ;;  %v2625_v55 = vld [vmem:[%s14433_s20 + $0x1e78] sm:$0xff] }
 0x185   : > { %v2721_v58 = vld [vmem:[%s14433_s20 + $0x2178] sm:$0xff] }
 0x186   : > { %v13708_v5 = vcombine.high %v2625_v55, %v2721_v58 }
 0x18a   : > { %v8676_v14 = vpop.f32.mrf.mxu0  ;;  %8995 = vmatmul.mubr.bf16.vlgmr.msra.gmra.mxu0 %v1477_v4  ;;  %v8716_v15 = vpop.f32.mrf.mxu1  ;;  %9035 = vmatmul.mubr.bf16.vlgmr.msra.gmra.mxu1 %v1479_v10  ;;  %v13706_v4 = vcombine.high %v2624_v53, %v2720_v54  ;;  %v2432_v10 = vld [vmem:[%s14433_s20 + $0x1870] sm:$0xff] }
 0x18b   : > { %v8677_v51 = vadd.f32 %v8676_v14, %v14671_v12  ;;  %9047 = vmatpush1.bf16.xpose.msra.mxu0 %v13701_v56  ;;  %9087 = vmatpush1.bf16.xpose.msra.mxu1 %v13703_v11  ;;  %v2528_v56 = vld [vmem:[%s14433_s20 + $0x1b70] sm:$0xff]  ;;  %v583_v11 = vcombine.high %v14737_v6, %v14737_v6  ;;  %v584_v14 = vcombine.high %v14740_v9, %v14740_v9 }
 0x18c   : > { %v8678_v16 = vpop.f32.mrf.mxu0  ;;  %9048 = vmatprep.subr.bf16.mxu0 %v13510_v13  ;;  %v8718_v2 = vpop.f32.mrf.mxu1  ;;  %9088 = vmatprep.subr.bf16.mxu1 %v13512_v57  ;;  %v1481_v13 = vpack.c.bf16 %v14695_v59, %v14695_v59  ;;  %v2433_v57 = vld [vmem:[%s14433_s20 + $0x1878] sm:$0xff] }
 0x18d   : > { %v14713_v52 = vadd.f32 %v8716_v15, %v8677_v51  ;;  %9074 = vmatprep.mubr.bf16.mxu0 %v1482_v61  ;;  %9114 = vmatprep.mubr.bf16.mxu1 %v1484_v62  ;;  %v2529_v61 = vld [vmem:[%s14433_s20 + $0x1b78] sm:$0xff]  ;;  %v1483_v62 = vpack.c.bf16 %v14698_v60, %v14698_v60  ;;  %v13705_v51 = vcombine.low %v2624_v53, %v2720_v54 }
 0x18e   : > { %v8679_v18 = vpop.f32.mrf.mxu0  ;;  %v8719_v12 = vpop.f32.mrf.mxu1  ;;  %v13707_v15 = vcombine.low %v2625_v55, %v2721_v58  ;;  %v13514_v16 = vcombine.high %v2432_v10, %v2528_v56  ;;  %v13516_v2 = vcombine.high %v2433_v57, %v2529_v61  ;;  %v1486_v17 = vpack.c.bf16 %v583_v11, %v583_v11 }
 0x18f   : > { %v1488_v18 = vpack.c.bf16 %v584_v14, %v584_v14  ;;  %v13515_v27 = vcombine.low %v2433_v57, %v2529_v61  ;;  %v14779_v61 = vrot.slane %v361_v63, %v14467_v24 }
 0x190   : > { %v8680_v8 = vpop.f32.mrf.mxu0  ;;  %v8720_v23 = vpop.f32.mrf.mxu1 }
 0x191   : > { %v2336_v8 = vld [vmem:[%s14433_s20 + $0x1570] sm:$0xff]  ;;  %v2337_v23 = vld [vmem:[%s14433_s20 + $0x1578] sm:$0xff] }
 0x193   : > { %9049 = vmatpush1.bf16.xpose.msra.mxu0 %v13509_v20  ;;  %9089 = vmatpush1.bf16.xpose.msra.mxu1 %v13511_v21  ;;  %v2240_v20 = vld [vmem:[%s14433_s20 + $0x1270] sm:$0xff] }
 0x194   : > { %9050 = vmatprep.subr.bf16.mxu0 %v13318_v22  ;;  %9090 = vmatprep.subr.bf16.mxu1 %v13320_v25  ;;  %v2241_v22 = vld [vmem:[%s14433_s20 + $0x1278] sm:$0xff]  ;;  %v13513_v25 = vcombine.low %v2432_v10, %v2528_v56  ;;  %v13322_v28 = vcombine.high %v2240_v20, %v2336_v8  ;;  %v13321_v35 = vcombine.low %v2240_v20, %v2336_v8 }
 0x195   : > { %v13323_v36 = vcombine.low %v2241_v22, %v2337_v23  ;;  %v585_v10 = vcombine.high %v361_v63, %v361_v63  ;;  %v1763_v63 = vld [vmem:[%s14433_s20 + $0x388] sm:$0xff] }
 0x197   : > { %v14782_v14 = vrot.slane %v585_v10, %v14467_v24  ;;  %v362_v10 = vld [vmem:[%s14451_s13 + $0x48] sm:$0xff] }
 0x19b   : > { %9051 = vmatpush1.bf16.xpose.msra.mxu0 %v13317_v30  ;;  %9091 = vmatpush1.bf16.xpose.msra.mxu1 %v13319_v31  ;;  %v13324_v30 = vcombine.high %v2241_v22, %v2337_v23  ;;  %v2048_v31 = vld [vmem:[%s14433_s20 + $0xc70] sm:$0xff] }
 0x19c   : > { %9052 = vmatprep.subr.bf16.mxu0 %v13126_v32  ;;  %9092 = vmatprep.subr.bf16.mxu1 %v13128_v33  ;;  %v2144_v32 = vld [vmem:[%s14433_s20 + $0xf70] sm:$0xff]  ;;  %v2049_v33 = vld [vmem:[%s14433_s20 + $0xc78] sm:$0xff] }
 0x19d   : > { %v13130_v37 = vcombine.high %v2048_v31, %v2144_v32  ;;  %v13129_v43 = vcombine.low %v2048_v31, %v2144_v32  ;;  %v13131_v44 = vcombine.low %v2049_v33, %v2145_v34 }
 0x1a3   : > { %9053 = vmatpush1.bf16.xpose.msra.mxu0 %v13125_v38  ;;  %9093 = vmatpush1.bf16.xpose.msra.mxu1 %v13127_v39  ;;  %v13132_v38 = vcombine.high %v2049_v33, %v2145_v34  ;;  %v1856_v39 = vld [vmem:[%s14433_s20 + $0x670] sm:$0xff] }
 0x1a4   : > { %9054 = vmatprep.subr.bf16.mxu0 %v12934_v40  ;;  %9094 = vmatprep.subr.bf16.mxu1 %v12936_v41  ;;  %v1952_v40 = vld [vmem:[%s14433_s20 + $0x970] sm:$0xff]  ;;  %v1857_v41 = vld [vmem:[%s14433_s20 + $0x678] sm:$0xff] }
 0x1a5   : > { %v12938_v45 = vcombine.high %v1856_v39, %v1952_v40  ;;  %v12937_v53 = vcombine.low %v1856_v39, %v1952_v40  ;;  %v12939_v54 = vcombine.low %v1857_v41, %v1953_v42  ;;  %v2147_v39 = vld [vmem:[%s14433_s20 + $0xf88] sm:$0xff] }
 0x1ab   : > { %9055 = vmatpush1.bf16.xpose.msra.mxu0 %v12933_v46  ;;  %9095 = vmatpush1.bf16.xpose.msra.mxu1 %v12935_v47  ;;  %v12940_v46 = vcombine.high %v1857_v41, %v1953_v42  ;;  %v1664_v47 = vld [vmem:[%s14433_s20 + $0x70] sm:$0xff] }
 0x1ac   : > { %9056 = vmatprep.subr.bf16.mxu0 %v12742_v48  ;;  %9096 = vmatprep.subr.bf16.mxu1 %v12744_v49  ;;  %v1760_v48 = vld [vmem:[%s14433_s20 + $0x370] sm:$0xff]  ;;  %v1665_v49 = vld [vmem:[%s14433_s20 + $0x78] sm:$0xff] }
 0x1ad   : > { %v12746_v55 = vcombine.high %v1664_v47, %v1760_v48  ;;  %v12748_v58 = vcombine.high %v1665_v49, %v1761_v50  ;;  %v12745_v56 = vcombine.low %v1664_v47, %v1760_v48  ;;  %v12747_v11 = vcombine.low %v1665_v49, %v1761_v50  ;;  %v1955_v47 = vld [vmem:[%s14433_s20 + $0x988] sm:$0xff] }
 0x1b3   : > { %9057 = vmatpush1.bf16.xpose.msra.mxu0 %v12741_v0  ;;  %9097 = vmatpush1.bf16.xpose.msra.mxu1 %v12743_v1  ;;  %v2626_v0 = vld [vmem:[%s14433_s20 + $0x1e80] sm:$0xff] }
 0x1b4   : > { %9126 = vmatprep.subr.bf16.mxu0 %v13706_v4  ;;  %9166 = vmatprep.subr.bf16.mxu1 %v13708_v5  ;;  %v2722_v1 = vld [vmem:[%s14433_s20 + $0x2180] sm:$0xff]  ;;  %v2627_v4 = vld [vmem:[%s14433_s20 + $0x1e88] sm:$0xff] }
 0x1b5   : > { %v2723_v5 = vld [vmem:[%s14433_s20 + $0x2188] sm:$0xff] }
 0x1b6   : > { %v13712_v57 = vcombine.high %v2627_v4, %v2723_v5 }
 0x1ba   : > { %v8756_v3 = vpop.f32.mrf.mxu0  ;;  %9075 = vmatmul.mubr.bf16.vlgmr.msra.gmra.mxu0 %v1481_v13  ;;  %v8796_v19 = vpop.f32.mrf.mxu1  ;;  %9115 = vmatmul.mubr.bf16.vlgmr.msra.gmra.mxu1 %v1483_v62  ;;  %v13710_v13 = vcombine.high %v2626_v0, %v2722_v1  ;;  %v2434_v62 = vld [vmem:[%s14433_s20 + $0x1880] sm:$0xff] }
 0x1bb   : > { %v8757_v59 = vadd.f32 %v8756_v3, %v14713_v52  ;;  %9127 = vmatpush1.bf16.xpose.msra.mxu0 %v13705_v51  ;;  %9167 = vmatpush1.bf16.xpose.msra.mxu1 %v13707_v15  ;;  %v2530_v51 = vld [vmem:[%s14433_s20 + $0x1b80] sm:$0xff]  ;;  %v600_v15 = vcombine.high %v14779_v61, %v14779_v61  ;;  %v601_v3 = vcombine.high %v14782_v14, %v14782_v14 }
 0x1bc   : > { %v8758_v7 = vpop.f32.mrf.mxu0  ;;  %9128 = vmatprep.subr.bf16.mxu0 %v13514_v16  ;;  %v8798_v12 = vpop.f32.mrf.mxu1  ;;  %9168 = vmatprep.subr.bf16.mxu1 %v13516_v2  ;;  %v1485_v16 = vpack.c.bf16 %v14737_v6, %v14737_v6  ;;  %v2435_v2 = vld [vmem:[%s14433_s20 + $0x1888] sm:$0xff] }
 0x1bd   : > { %v14755_v60 = vadd.f32 %v8796_v19, %v8757_v59  ;;  %9154 = vmatprep.mubr.bf16.mxu0 %v1486_v17  ;;  %9194 = vmatprep.mubr.bf16.mxu1 %v1488_v18  ;;  %v2531_v17 = vld [vmem:[%s14433_s20 + $0x1b88] sm:$0xff]  ;;  %v1487_v18 = vpack.c.bf16 %v14740_v9, %v14740_v9  ;;  %v13709_v59 = vcombine.low %v2626_v0, %v2722_v1 }
 0x1be   : > { %v8759_v21 = vpop.f32.mrf.mxu0  ;;  %v8799_v52 = vpop.f32.mrf.mxu1  ;;  %v13711_v19 = vcombine.low %v2627_v4, %v2723_v5  ;;  %v13518_v7 = vcombine.high %v2434_v62, %v2530_v51  ;;  %v13520_v12 = vcombine.high %v2435_v2, %v2531_v17  ;;  %v1490_v20 = vpack.c.bf16 %v600_v15, %v600_v15 }
 0x1bf   : > { %v1492_v21 = vpack.c.bf16 %v601_v3, %v601_v3  ;;  %v13519_v32 = vcombine.low %v2435_v2, %v2531_v17  ;;  %v14821_v17 = vrot.slane %v362_v10, %v14467_v24 }
 0x1c0   : > { %v8760_v26 = vpop.f32.mrf.mxu0  ;;  %v8800_v29 = vpop.f32.mrf.mxu1 }
 0x1c1   : > { %v2338_v26 = vld [vmem:[%s14433_s20 + $0x1580] sm:$0xff]  ;;  %v2339_v29 = vld [vmem:[%s14433_s20 + $0x1588] sm:$0xff] }
 0x1c3   : > { %9129 = vmatpush1.bf16.xpose.msra.mxu0 %v13513_v25  ;;  %9169 = vmatpush1.bf16.xpose.msra.mxu1 %v13515_v27  ;;  %v2242_v25 = vld [vmem:[%s14433_s20 + $0x1280] sm:$0xff] }
 0x1c4   : > { %9130 = vmatprep.subr.bf16.mxu0 %v13322_v28  ;;  %9170 = vmatprep.subr.bf16.mxu1 %v13324_v30  ;;  %v2243_v28 = vld [vmem:[%s14433_s20 + $0x1288] sm:$0xff]  ;;  %v13517_v30 = vcombine.low %v2434_v62, %v2530_v51  ;;  %v13326_v33 = vcombine.high %v2242_v25, %v2338_v26  ;;  %v13325_v40 = vcombine.low %v2242_v25, %v2338_v26 }
 0x1c5   : > { %v13327_v41 = vcombine.low %v2243_v28, %v2339_v29  ;;  %v602_v62 = vcombine.high %v362_v10, %v362_v10  ;;  %v1765_v10 = vld [vmem:[%s14433_s20 + $0x398] sm:$0xff] }
 0x1c7   : > { %v14824_v3 = vrot.slane %v602_v62, %v14467_v24  ;;  %v363_v62 = vld [vmem:[%s14451_s13 + $0x50] sm:$0xff] }
 0x1cb   : > { %9131 = vmatpush1.bf16.xpose.msra.mxu0 %v13321_v35  ;;  %9171 = vmatpush1.bf16.xpose.msra.mxu1 %v13323_v36  ;;  %v13328_v35 = vcombine.high %v2243_v28, %v2339_v29  ;;  %v2050_v36 = vld [vmem:[%s14433_s20 + $0xc80] sm:$0xff] }
 0x1cc   : > { %9132 = vmatprep.subr.bf16.mxu0 %v13130_v37  ;;  %9172 = vmatprep.subr.bf16.mxu1 %v13132_v38  ;;  %v2146_v37 = vld [vmem:[%s14433_s20 + $0xf80] sm:$0xff]  ;;  %v2051_v38 = vld [vmem:[%s14433_s20 + $0xc88] sm:$0xff] }
 0x1cd   : > { %v13134_v42 = vcombine.high %v2050_v36, %v2146_v37  ;;  %v13133_v48 = vcombine.low %v2050_v36, %v2146_v37  ;;  %v13135_v49 = vcombine.low %v2051_v38, %v2147_v39 }
 0x1d3   : > { %9133 = vmatpush1.bf16.xpose.msra.mxu0 %v13129_v43  ;;  %9173 = vmatpush1.bf16.xpose.msra.mxu1 %v13131_v44  ;;  %v13136_v43 = vcombine.high %v2051_v38, %v2147_v39  ;;  %v1858_v44 = vld [vmem:[%s14433_s20 + $0x680] sm:$0xff] }
 0x1d4   : > { %9134 = vmatprep.subr.bf16.mxu0 %v12938_v45  ;;  %9174 = vmatprep.subr.bf16.mxu1 %v12940_v46  ;;  %v1954_v45 = vld [vmem:[%s14433_s20 + $0x980] sm:$0xff]  ;;  %v1859_v46 = vld [vmem:[%s14433_s20 + $0x688] sm:$0xff] }
 0x1d5   : > { %v12942_v50 = vcombine.high %v1858_v44, %v1954_v45  ;;  %v12941_v0 = vcombine.low %v1858_v44, %v1954_v45  ;;  %v12943_v1 = vcombine.low %v1859_v46, %v1955_v47  ;;  %v2149_v44 = vld [vmem:[%s14433_s20 + $0xf98] sm:$0xff] }
 0x1db   : > { %9135 = vmatpush1.bf16.xpose.msra.mxu0 %v12937_v53  ;;  %9175 = vmatpush1.bf16.xpose.msra.mxu1 %v12939_v54  ;;  %v12944_v53 = vcombine.high %v1859_v46, %v1955_v47  ;;  %v1666_v54 = vld [vmem:[%s14433_s20 + $0x80] sm:$0xff] }
 0x1dc   : > { %9136 = vmatprep.subr.bf16.mxu0 %v12746_v55  ;;  %9176 = vmatprep.subr.bf16.mxu1 %v12748_v58  ;;  %v1762_v55 = vld [vmem:[%s14433_s20 + $0x380] sm:$0xff]  ;;  %v1667_v58 = vld [vmem:[%s14433_s20 + $0x88] sm:$0xff] }
 0x1dd   : > { %v12750_v4 = vcombine.high %v1666_v54, %v1762_v55  ;;  %v12752_v5 = vcombine.high %v1667_v58, %v1763_v63  ;;  %v12749_v51 = vcombine.low %v1666_v54, %v1762_v55  ;;  %v12751_v15 = vcombine.low %v1667_v58, %v1763_v63  ;;  %v1957_v54 = vld [vmem:[%s14433_s20 + $0x998] sm:$0xff] }
 0x1e3   : > { %9137 = vmatpush1.bf16.xpose.msra.mxu0 %v12745_v56  ;;  %9177 = vmatpush1.bf16.xpose.msra.mxu1 %v12747_v11  ;;  %v2628_v56 = vld [vmem:[%s14433_s20 + $0x1e90] sm:$0xff] }
 0x1e4   : > { %9206 = vmatprep.subr.bf16.mxu0 %v13710_v13  ;;  %9246 = vmatprep.subr.bf16.mxu1 %v13712_v57  ;;  %v2724_v11 = vld [vmem:[%s14433_s20 + $0x2190] sm:$0xff]  ;;  %v2629_v13 = vld [vmem:[%s14433_s20 + $0x1e98] sm:$0xff] }
 0x1e5   : > { %v2725_v57 = vld [vmem:[%s14433_s20 + $0x2198] sm:$0xff] }
 0x1e6   : > { %v13716_v2 = vcombine.high %v2629_v13, %v2725_v57 }
 0x1ea   : > { %v8836_v8 = vpop.f32.mrf.mxu0  ;;  %9155 = vmatmul.mubr.bf16.vlgmr.msra.gmra.mxu0 %v1485_v16  ;;  %v8876_v22 = vpop.f32.mrf.mxu1  ;;  %9195 = vmatmul.mubr.bf16.vlgmr.msra.gmra.mxu1 %v1487_v18  ;;  %v13714_v16 = vcombine.high %v2628_v56, %v2724_v11  ;;  %v2436_v18 = vld [vmem:[%s14433_s20 + $0x1890] sm:$0xff] }
 0x1eb   : > { %v8837_v6 = vadd.f32 %v8836_v8, %v14755_v60  ;;  %9207 = vmatpush1.bf16.xpose.msra.mxu0 %v13709_v59  ;;  %9247 = vmatpush1.bf16.xpose.msra.mxu1 %v13711_v19  ;;  %v2532_v59 = vld [vmem:[%s14433_s20 + $0x1b90] sm:$0xff]  ;;  %v617_v19 = vcombine.high %v14821_v17, %v14821_v17  ;;  %v618_v8 = vcombine.high %v14824_v3, %v14824_v3 }
 0x1ec   : > { %v8838_v23 = vpop.f32.mrf.mxu0  ;;  %9208 = vmatprep.subr.bf16.mxu0 %v13518_v7  ;;  %v8878_v52 = vpop.f32.mrf.mxu1  ;;  %9248 = vmatprep.subr.bf16.mxu1 %v13520_v12  ;;  %v1489_v7 = vpack.c.bf16 %v14779_v61, %v14779_v61  ;;  %v2437_v12 = vld [vmem:[%s14433_s20 + $0x1898] sm:$0xff] }
 0x1ed   : > { %v14797_v9 = vadd.f32 %v8876_v22, %v8837_v6  ;;  %9234 = vmatprep.mubr.bf16.mxu0 %v1490_v20  ;;  %9274 = vmatprep.mubr.bf16.mxu1 %v1492_v21  ;;  %v2533_v20 = vld [vmem:[%s14433_s20 + $0x1b98] sm:$0xff]  ;;  %v1491_v21 = vpack.c.bf16 %v14782_v14, %v14782_v14  ;;  %v13713_v6 = vcombine.low %v2628_v56, %v2724_v11 }
 0x1ee   : > { %v8839_v27 = vpop.f32.mrf.mxu0  ;;  %v8879_v60 = vpop.f32.mrf.mxu1  ;;  %v13715_v22 = vcombine.low %v2629_v13, %v2725_v57  ;;  %v13522_v23 = vcombine.high %v2436_v18, %v2532_v59  ;;  %v13524_v52 = vcombine.high %v2437_v12, %v2533_v20  ;;  %v1494_v25 = vpack.c.bf16 %v617_v19, %v617_v19 }
 0x1ef   : > { %v1496_v27 = vpack.c.bf16 %v618_v8, %v618_v8  ;;  %v13523_v37 = vcombine.low %v2437_v12, %v2533_v20  ;;  %v14863_v20 = vrot.slane %v363_v62, %v14467_v24 }
 0x1f0   : > { %v8840_v31 = vpop.f32.mrf.mxu0  ;;  %v8880_v34 = vpop.f32.mrf.mxu1 }
 0x1f1   : > { %v2340_v31 = vld [vmem:[%s14433_s20 + $0x1590] sm:$0xff]  ;;  %v2341_v34 = vld [vmem:[%s14433_s20 + $0x1598] sm:$0xff] }
 0x1f3   : > { %9209 = vmatpush1.bf16.xpose.msra.mxu0 %v13517_v30  ;;  %9249 = vmatpush1.bf16.xpose.msra.mxu1 %v13519_v32  ;;  %v2244_v30 = vld [vmem:[%s14433_s20 + $0x1290] sm:$0xff] }
 0x1f4   : > { %9210 = vmatprep.subr.bf16.mxu0 %v13326_v33  ;;  %9250 = vmatprep.subr.bf16.mxu1 %v13328_v35  ;;  %v2245_v33 = vld [vmem:[%s14433_s20 + $0x1298] sm:$0xff]  ;;  %v13521_v35 = vcombine.low %v2436_v18, %v2532_v59  ;;  %v13330_v38 = vcombine.high %v2244_v30, %v2340_v31  ;;  %v13329_v45 = vcombine.low %v2244_v30, %v2340_v31 }
 0x1f5   : > { %v13331_v46 = vcombine.low %v2245_v33, %v2341_v34  ;;  %v619_v18 = vcombine.high %v363_v62, %v363_v62  ;;  %v1767_v62 = vld [vmem:[%s14433_s20 + $0x3a8] sm:$0xff] }
 0x1f7   : > { %v14866_v8 = vrot.slane %v619_v18, %v14467_v24  ;;  %v364_v18 = vld [vmem:[%s14451_s13 + $0x58] sm:$0xff] }
 0x1fb   : > { %9211 = vmatpush1.bf16.xpose.msra.mxu0 %v13325_v40  ;;  %9251 = vmatpush1.bf16.xpose.msra.mxu1 %v13327_v41  ;;  %v13332_v40 = vcombine.high %v2245_v33, %v2341_v34  ;;  %v2052_v41 = vld [vmem:[%s14433_s20 + $0xc90] sm:$0xff] }
 0x1fc   : > { %9212 = vmatprep.subr.bf16.mxu0 %v13134_v42  ;;  %9252 = vmatprep.subr.bf16.mxu1 %v13136_v43  ;;  %v2148_v42 = vld [vmem:[%s14433_s20 + $0xf90] sm:$0xff]  ;;  %v2053_v43 = vld [vmem:[%s14433_s20 + $0xc98] sm:$0xff] }
 0x1fd   : > { %v13138_v47 = vcombine.high %v2052_v41, %v2148_v42  ;;  %v13137_v55 = vcombine.low %v2052_v41, %v2148_v42  ;;  %v13139_v58 = vcombine.low %v2053_v43, %v2149_v44 }
 0x203   : > { %9213 = vmatpush1.bf16.xpose.msra.mxu0 %v13133_v48  ;;  %9253 = vmatpush1.bf16.xpose.msra.mxu1 %v13135_v49  ;;  %v13140_v48 = vcombine.high %v2053_v43, %v2149_v44  ;;  %v1860_v49 = vld [vmem:[%s14433_s20 + $0x690] sm:$0xff] }
 0x204   : > { %9214 = vmatprep.subr.bf16.mxu0 %v12942_v50  ;;  %9254 = vmatprep.subr.bf16.mxu1 %v12944_v53  ;;  %v1956_v50 = vld [vmem:[%s14433_s20 + $0x990] sm:$0xff]  ;;  %v1861_v53 = vld [vmem:[%s14433_s20 + $0x698] sm:$0xff] }
 0x205   : > { %v12946_v63 = vcombine.high %v1860_v49, %v1956_v50  ;;  %v12945_v56 = vcombine.low %v1860_v49, %v1956_v50  ;;  %v12947_v11 = vcombine.low %v1861_v53, %v1957_v54  ;;  %v2151_v49 = vld [vmem:[%s14433_s20 + $0xfa8] sm:$0xff] }
 0x20b   : > { %9215 = vmatpush1.bf16.xpose.msra.mxu0 %v12941_v0  ;;  %9255 = vmatpush1.bf16.xpose.msra.mxu1 %v12943_v1  ;;  %v12948_v0 = vcombine.high %v1861_v53, %v1957_v54  ;;  %v1668_v1 = vld [vmem:[%s14433_s20 + $0x90] sm:$0xff] }
 0x20c   : > { %9216 = vmatprep.subr.bf16.mxu0 %v12750_v4  ;;  %9256 = vmatprep.subr.bf16.mxu1 %v12752_v5  ;;  %v1764_v4 = vld [vmem:[%s14433_s20 + $0x390] sm:$0xff]  ;;  %v1669_v5 = vld [vmem:[%s14433_s20 + $0x98] sm:$0xff] }
 0x20d   : > { %v12754_v13 = vcombine.high %v1668_v1, %v1764_v4  ;;  %v12756_v57 = vcombine.high %v1669_v5, %v1765_v10  ;;  %v12753_v59 = vcombine.low %v1668_v1, %v1764_v4  ;;  %v12755_v19 = vcombine.low %v1669_v5, %v1765_v10  ;;  %v1959_v1 = vld [vmem:[%s14433_s20 + $0x9a8] sm:$0xff] }
 0x213   : > { %9217 = vmatpush1.bf16.xpose.msra.mxu0 %v12749_v51  ;;  %9257 = vmatpush1.bf16.xpose.msra.mxu1 %v12751_v15  ;;  %v2630_v51 = vld [vmem:[%s14433_s20 + $0x1ea0] sm:$0xff] }
 0x214   : > { %9286 = vmatprep.subr.bf16.mxu0 %v13714_v16  ;;  %9326 = vmatprep.subr.bf16.mxu1 %v13716_v2  ;;  %v2726_v15 = vld [vmem:[%s14433_s20 + $0x21a0] sm:$0xff]  ;;  %v2631_v16 = vld [vmem:[%s14433_s20 + $0x1ea8] sm:$0xff] }
 0x215   : > { %v2727_v2 = vld [vmem:[%s14433_s20 + $0x21a8] sm:$0xff] }
 0x216   : > { %v13720_v12 = vcombine.high %v2631_v16, %v2727_v2 }
 0x21a   : > { %v8916_v26 = vpop.f32.mrf.mxu0  ;;  %9235 = vmatmul.mubr.bf16.vlgmr.msra.gmra.mxu0 %v1489_v7  ;;  %v8956_v28 = vpop.f32.mrf.mxu1  ;;  %9275 = vmatmul.mubr.bf16.vlgmr.msra.gmra.mxu1 %v1491_v21  ;;  %v13718_v7 = vcombine.high %v2630_v51, %v2726_v15  ;;  %v2438_v21 = vld [vmem:[%s14433_s20 + $0x18a0] sm:$0xff] }
 0x21b   : > { %v8917_v61 = vadd.f32 %v8916_v26, %v14797_v9  ;;  %9287 = vmatpush1.bf16.xpose.msra.mxu0 %v13713_v6  ;;  %9327 = vmatpush1.bf16.xpose.msra.mxu1 %v13715_v22  ;;  %v2534_v6 = vld [vmem:[%s14433_s20 + $0x1ba0] sm:$0xff]  ;;  %v634_v22 = vcombine.high %v14863_v20, %v14863_v20  ;;  %v635_v26 = vcombine.high %v14866_v8, %v14866_v8 }
 0x21c   : > { %v8918_v29 = vpop.f32.mrf.mxu0  ;;  %9288 = vmatprep.subr.bf16.mxu0 %v13522_v23  ;;  %v8958_v60 = vpop.f32.mrf.mxu1  ;;  %9328 = vmatprep.subr.bf16.mxu1 %v13524_v52  ;;  %v1493_v23 = vpack.c.bf16 %v14821_v17, %v14821_v17  ;;  %v2439_v52 = vld [vmem:[%s14433_s20 + $0x18a8] sm:$0xff] }
 0x21d   : > { %v14839_v14 = vadd.f32 %v8956_v28, %v8917_v61  ;;  %9314 = vmatprep.mubr.bf16.mxu0 %v1494_v25  ;;  %9354 = vmatprep.mubr.bf16.mxu1 %v1496_v27  ;;  %v2535_v25 = vld [vmem:[%s14433_s20 + $0x1ba8] sm:$0xff]  ;;  %v1495_v27 = vpack.c.bf16 %v14824_v3, %v14824_v3  ;;  %v13717_v61 = vcombine.low %v2630_v51, %v2726_v15 }
 0x21e   : > { %v8919_v32 = vpop.f32.mrf.mxu0  ;;  %v8959_v9 = vpop.f32.mrf.mxu1  ;;  %v13719_v28 = vcombine.low %v2631_v16, %v2727_v2  ;;  %v13526_v29 = vcombine.high %v2438_v21, %v2534_v6  ;;  %v13528_v60 = vcombine.high %v2439_v52, %v2535_v25  ;;  %v1498_v30 = vpack.c.bf16 %v634_v22, %v634_v22 }
 0x21f   : > { %v1500_v32 = vpack.c.bf16 %v635_v26, %v635_v26  ;;  %v13527_v42 = vcombine.low %v2439_v52, %v2535_v25  ;;  %v14905_v25 = vrot.slane %v364_v18, %v14467_v24 }
 0x220   : > { %v8920_v36 = vpop.f32.mrf.mxu0  ;;  %v8960_v39 = vpop.f32.mrf.mxu1 }
 0x221   : > { %v2342_v36 = vld [vmem:[%s14433_s20 + $0x15a0] sm:$0xff]  ;;  %v2343_v39 = vld [vmem:[%s14433_s20 + $0x15a8] sm:$0xff] }
 0x223   : > { %9289 = vmatpush1.bf16.xpose.msra.mxu0 %v13521_v35  ;;  %9329 = vmatpush1.bf16.xpose.msra.mxu1 %v13523_v37  ;;  %v2246_v35 = vld [vmem:[%s14433_s20 + $0x12a0] sm:$0xff] }
 0x224   : > { %9290 = vmatprep.subr.bf16.mxu0 %v13330_v38  ;;  %9330 = vmatprep.subr.bf16.mxu1 %v13332_v40  ;;  %v2247_v38 = vld [vmem:[%s14433_s20 + $0x12a8] sm:$0xff]  ;;  %v13525_v40 = vcombine.low %v2438_v21, %v2534_v6  ;;  %v13334_v43 = vcombine.high %v2246_v35, %v2342_v36  ;;  %v13333_v50 = vcombine.low %v2246_v35, %v2342_v36 }
 0x225   : > { %v13335_v53 = vcombine.low %v2247_v38, %v2343_v39  ;;  %v636_v21 = vcombine.high %v364_v18, %v364_v18  ;;  %v1769_v18 = vld [vmem:[%s14433_s20 + $0x3b8] sm:$0xff] }
 0x227   : > { %v14908_v26 = vrot.slane %v636_v21, %v14467_v24  ;;  %v365_v21 = vld [vmem:[%s14451_s13 + $0x60] sm:$0xff] }
 0x22b   : > { %9291 = vmatpush1.bf16.xpose.msra.mxu0 %v13329_v45  ;;  %9331 = vmatpush1.bf16.xpose.msra.mxu1 %v13331_v46  ;;  %v13336_v45 = vcombine.high %v2247_v38, %v2343_v39  ;;  %v2054_v46 = vld [vmem:[%s14433_s20 + $0xca0] sm:$0xff] }
 0x22c   : > { %9292 = vmatprep.subr.bf16.mxu0 %v13138_v47  ;;  %9332 = vmatprep.subr.bf16.mxu1 %v13140_v48  ;;  %v2150_v47 = vld [vmem:[%s14433_s20 + $0xfa0] sm:$0xff]  ;;  %v2055_v48 = vld [vmem:[%s14433_s20 + $0xca8] sm:$0xff] }
 0x22d   : > { %v13142_v54 = vcombine.high %v2054_v46, %v2150_v47  ;;  %v13141_v4 = vcombine.low %v2054_v46, %v2150_v47  ;;  %v13143_v5 = vcombine.low %v2055_v48, %v2151_v49 }
 0x233   : > { %9293 = vmatpush1.bf16.xpose.msra.mxu0 %v13137_v55  ;;  %9333 = vmatpush1.bf16.xpose.msra.mxu1 %v13139_v58  ;;  %v13144_v55 = vcombine.high %v2055_v48, %v2151_v49  ;;  %v1862_v58 = vld [vmem:[%s14433_s20 + $0x6a0] sm:$0xff] }
 0x234   : > { %9294 = vmatprep.subr.bf16.mxu0 %v12946_v63  ;;  %9334 = vmatprep.subr.bf16.mxu1 %v12948_v0  ;;  %v1958_v63 = vld [vmem:[%s14433_s20 + $0x9a0] sm:$0xff]  ;;  %v1863_v0 = vld [vmem:[%s14433_s20 + $0x6a8] sm:$0xff] }
 0x235   : > { %v12950_v10 = vcombine.high %v1862_v58, %v1958_v63  ;;  %v12949_v51 = vcombine.low %v1862_v58, %v1958_v63  ;;  %v12951_v15 = vcombine.low %v1863_v0, %v1959_v1  ;;  %v2153_v58 = vld [vmem:[%s14433_s20 + $0xfb8] sm:$0xff] }
 0x23b   : > { %9295 = vmatpush1.bf16.xpose.msra.mxu0 %v12945_v56  ;;  %9335 = vmatpush1.bf16.xpose.msra.mxu1 %v12947_v11  ;;  %v12952_v56 = vcombine.high %v1863_v0, %v1959_v1  ;;  %v1670_v11 = vld [vmem:[%s14433_s20 + $0xa0] sm:$0xff] }
 0x23c   : > { %9296 = vmatprep.subr.bf16.mxu0 %v12754_v13  ;;  %9336 = vmatprep.subr.bf16.mxu1 %v12756_v57  ;;  %v1766_v13 = vld [vmem:[%s14433_s20 + $0x3a0] sm:$0xff]  ;;  %v1671_v57 = vld [vmem:[%s14433_s20 + $0xa8] sm:$0xff] }
 0x23d   : > { %v12758_v16 = vcombine.high %v1670_v11, %v1766_v13  ;;  %v12760_v2 = vcombine.high %v1671_v57, %v1767_v62  ;;  %v12757_v6 = vcombine.low %v1670_v11, %v1766_v13  ;;  %v12759_v22 = vcombine.low %v1671_v57, %v1767_v62  ;;  %v1961_v11 = vld [vmem:[%s14433_s20 + $0x9b8] sm:$0xff] }
 0x243   : > { %9297 = vmatpush1.bf16.xpose.msra.mxu0 %v12753_v59  ;;  %9337 = vmatpush1.bf16.xpose.msra.mxu1 %v12755_v19  ;;  %v2632_v59 = vld [vmem:[%s14433_s20 + $0x1eb0] sm:$0xff] }
 0x244   : > { %9366 = vmatprep.subr.bf16.mxu0 %v13718_v7  ;;  %9406 = vmatprep.subr.bf16.mxu1 %v13720_v12  ;;  %v2728_v19 = vld [vmem:[%s14433_s20 + $0x21b0] sm:$0xff]  ;;  %v2633_v7 = vld [vmem:[%s14433_s20 + $0x1eb8] sm:$0xff] }
 0x245   : > { %v2729_v12 = vld [vmem:[%s14433_s20 + $0x21b8] sm:$0xff] }
 0x246   : > { %v13724_v52 = vcombine.high %v2633_v7, %v2729_v12 }
 0x24a   : > { %v8996_v31 = vpop.f32.mrf.mxu0  ;;  %9315 = vmatmul.mubr.bf16.vlgmr.msra.gmra.mxu0 %v1493_v23  ;;  %v9036_v33 = vpop.f32.mrf.mxu1  ;;  %9355 = vmatmul.mubr.bf16.vlgmr.msra.gmra.mxu1 %v1495_v27  ;;  %v13722_v23 = vcombine.high %v2632_v59, %v2728_v19  ;;  %v2440_v27 = vld [vmem:[%s14433_s20 + $0x18b0] sm:$0xff] }
 0x24b   : > { %v8997_v17 = vadd.f32 %v8996_v31, %v14839_v14  ;;  %9367 = vmatpush1.bf16.xpose.msra.mxu0 %v13717_v61  ;;  %9407 = vmatpush1.bf16.xpose.msra.mxu1 %v13719_v28  ;;  %v2536_v61 = vld [vmem:[%s14433_s20 + $0x1bb0] sm:$0xff]  ;;  %v651_v28 = vcombine.high %v14905_v25, %v14905_v25  ;;  %v652_v31 = vcombine.high %v14908_v26, %v14908_v26 }
 0x24c   : > { %v8998_v34 = vpop.f32.mrf.mxu0  ;;  %9368 = vmatprep.subr.bf16.mxu0 %v13526_v29  ;;  %v9038_v9 = vpop.f32.mrf.mxu1  ;;  %9408 = vmatprep.subr.bf16.mxu1 %v13528_v60  ;;  %v1497_v29 = vpack.c.bf16 %v14863_v20, %v14863_v20  ;;  %v2441_v60 = vld [vmem:[%s14433_s20 + $0x18b8] sm:$0xff] }
 0x24d   : > { %v14881_v3 = vadd.f32 %v9036_v33, %v8997_v17  ;;  %9394 = vmatprep.mubr.bf16.mxu0 %v1498_v30  ;;  %9434 = vmatprep.mubr.bf16.mxu1 %v1500_v32  ;;  %v2537_v30 = vld [vmem:[%s14433_s20 + $0x1bb8] sm:$0xff]  ;;  %v1499_v32 = vpack.c.bf16 %v14866_v8, %v14866_v8  ;;  %v13721_v17 = vcombine.low %v2632_v59, %v2728_v19 }
 0x24e   : > { %v8999_v37 = vpop.f32.mrf.mxu0  ;;  %v9039_v14 = vpop.f32.mrf.mxu1  ;;  %v13723_v33 = vcombine.low %v2633_v7, %v2729_v12  ;;  %v13530_v34 = vcombine.high %v2440_v27, %v2536_v61  ;;  %v13532_v9 = vcombine.high %v2441_v60, %v2537_v30  ;;  %v1502_v35 = vpack.c.bf16 %v651_v28, %v651_v28 }
 0x24f   : > { %v1504_v37 = vpack.c.bf16 %v652_v31, %v652_v31  ;;  %v13531_v47 = vcombine.low %v2441_v60, %v2537_v30  ;;  %v14947_v30 = vrot.slane %v365_v21, %v14467_v24 }
 0x250   : > { %v9000_v41 = vpop.f32.mrf.mxu0  ;;  %v9040_v44 = vpop.f32.mrf.mxu1 }
 0x251   : > { %v2344_v41 = vld [vmem:[%s14433_s20 + $0x15b0] sm:$0xff]  ;;  %v2345_v44 = vld [vmem:[%s14433_s20 + $0x15b8] sm:$0xff] }
 0x253   : > { %9369 = vmatpush1.bf16.xpose.msra.mxu0 %v13525_v40  ;;  %9409 = vmatpush1.bf16.xpose.msra.mxu1 %v13527_v42  ;;  %v2248_v40 = vld [vmem:[%s14433_s20 + $0x12b0] sm:$0xff] }
 0x254   : > { %9370 = vmatprep.subr.bf16.mxu0 %v13334_v43  ;;  %9410 = vmatprep.subr.bf16.mxu1 %v13336_v45  ;;  %v2249_v43 = vld [vmem:[%s14433_s20 + $0x12b8] sm:$0xff]  ;;  %v13529_v45 = vcombine.low %v2440_v27, %v2536_v61  ;;  %v13338_v48 = vcombine.high %v2248_v40, %v2344_v41  ;;  %v13337_v63 = vcombine.low %v2248_v40, %v2344_v41 }
 0x255   : > { %v13339_v0 = vcombine.low %v2249_v43, %v2345_v44  ;;  %v653_v27 = vcombine.high %v365_v21, %v365_v21  ;;  %v1771_v21 = vld [vmem:[%s14433_s20 + $0x3c8] sm:$0xff] }
 0x257   : > { %v14950_v31 = vrot.slane %v653_v27, %v14467_v24  ;;  %v366_v27 = vld [vmem:[%s14451_s13 + $0x68] sm:$0xff] }
 0x25b   : > { %9371 = vmatpush1.bf16.xpose.msra.mxu0 %v13333_v50  ;;  %9411 = vmatpush1.bf16.xpose.msra.mxu1 %v13335_v53  ;;  %v13340_v50 = vcombine.high %v2249_v43, %v2345_v44  ;;  %v2056_v53 = vld [vmem:[%s14433_s20 + $0xcb0] sm:$0xff] }
 0x25c   : > { %9372 = vmatprep.subr.bf16.mxu0 %v13142_v54  ;;  %9412 = vmatprep.subr.bf16.mxu1 %v13144_v55  ;;  %v2152_v54 = vld [vmem:[%s14433_s20 + $0xfb0] sm:$0xff]  ;;  %v2057_v55 = vld [vmem:[%s14433_s20 + $0xcb8] sm:$0xff] }
 0x25d   : > { %v13146_v1 = vcombine.high %v2056_v53, %v2152_v54  ;;  %v13145_v13 = vcombine.low %v2056_v53, %v2152_v54  ;;  %v13147_v57 = vcombine.low %v2057_v55, %v2153_v58 }
 0x263   : > { %9373 = vmatpush1.bf16.xpose.msra.mxu0 %v13141_v4  ;;  %9413 = vmatpush1.bf16.xpose.msra.mxu1 %v13143_v5  ;;  %v13148_v4 = vcombine.high %v2057_v55, %v2153_v58  ;;  %v1864_v5 = vld [vmem:[%s14433_s20 + $0x6b0] sm:$0xff] }
 0x264   : > { %9374 = vmatprep.subr.bf16.mxu0 %v12950_v10  ;;  %9414 = vmatprep.subr.bf16.mxu1 %v12952_v56  ;;  %v1960_v10 = vld [vmem:[%s14433_s20 + $0x9b0] sm:$0xff]  ;;  %v1865_v56 = vld [vmem:[%s14433_s20 + $0x6b8] sm:$0xff] }
 0x265   : > { %v12954_v62 = vcombine.high %v1864_v5, %v1960_v10  ;;  %v12953_v59 = vcombine.low %v1864_v5, %v1960_v10  ;;  %v12955_v19 = vcombine.low %v1865_v56, %v1961_v11  ;;  %v2155_v5 = vld [vmem:[%s14433_s20 + $0xfc8] sm:$0xff] }
 0x26b   : > { %9375 = vmatpush1.bf16.xpose.msra.mxu0 %v12949_v51  ;;  %9415 = vmatpush1.bf16.xpose.msra.mxu1 %v12951_v15  ;;  %v12956_v51 = vcombine.high %v1865_v56, %v1961_v11  ;;  %v1672_v15 = vld [vmem:[%s14433_s20 + $0xb0] sm:$0xff] }
 0x26c   : > { %9376 = vmatprep.subr.bf16.mxu0 %v12758_v16  ;;  %9416 = vmatprep.subr.bf16.mxu1 %v12760_v2  ;;  %v1768_v16 = vld [vmem:[%s14433_s20 + $0x3b0] sm:$0xff]  ;;  %v1673_v2 = vld [vmem:[%s14433_s20 + $0xb8] sm:$0xff] }
 0x26d   : > { %v12762_v7 = vcombine.high %v1672_v15, %v1768_v16  ;;  %v12764_v12 = vcombine.high %v1673_v2, %v1769_v18  ;;  %v12761_v61 = vcombine.low %v1672_v15, %v1768_v16  ;;  %v12763_v28 = vcombine.low %v1673_v2, %v1769_v18  ;;  %v1963_v15 = vld [vmem:[%s14433_s20 + $0x9c8] sm:$0xff] }
 0x273   : > { %9377 = vmatpush1.bf16.xpose.msra.mxu0 %v12757_v6  ;;  %9417 = vmatpush1.bf16.xpose.msra.mxu1 %v12759_v22  ;;  %v2634_v6 = vld [vmem:[%s14433_s20 + $0x1ec0] sm:$0xff] }
 0x274   : > { %9446 = vmatprep.subr.bf16.mxu0 %v13722_v23  ;;  %9486 = vmatprep.subr.bf16.mxu1 %v13724_v52  ;;  %v2730_v22 = vld [vmem:[%s14433_s20 + $0x21c0] sm:$0xff]  ;;  %v2635_v23 = vld [vmem:[%s14433_s20 + $0x1ec8] sm:$0xff] }
 0x275   : > { %v2731_v52 = vld [vmem:[%s14433_s20 + $0x21c8] sm:$0xff] }
 0x276   : > { %v13728_v60 = vcombine.high %v2635_v23, %v2731_v52 }
 0x27a   : > { %v9076_v36 = vpop.f32.mrf.mxu0  ;;  %9395 = vmatmul.mubr.bf16.vlgmr.msra.gmra.mxu0 %v1497_v29  ;;  %v9116_v38 = vpop.f32.mrf.mxu1  ;;  %9435 = vmatmul.mubr.bf16.vlgmr.msra.gmra.mxu1 %v1499_v32  ;;  %v13726_v29 = vcombine.high %v2634_v6, %v2730_v22  ;;  %v2442_v32 = vld [vmem:[%s14433_s20 + $0x18c0] sm:$0xff] }
 0x27b   : > { %v9077_v20 = vadd.f32 %v9076_v36, %v14881_v3  ;;  %9447 = vmatpush1.bf16.xpose.msra.mxu0 %v13721_v17  ;;  %9487 = vmatpush1.bf16.xpose.msra.mxu1 %v13723_v33  ;;  %v2538_v17 = vld [vmem:[%s14433_s20 + $0x1bc0] sm:$0xff]  ;;  %v668_v33 = vcombine.high %v14947_v30, %v14947_v30  ;;  %v669_v36 = vcombine.high %v14950_v31, %v14950_v31 }
 0x27c   : > { %v9078_v39 = vpop.f32.mrf.mxu0  ;;  %9448 = vmatprep.subr.bf16.mxu0 %v13530_v34  ;;  %v9118_v14 = vpop.f32.mrf.mxu1  ;;  %9488 = vmatprep.subr.bf16.mxu1 %v13532_v9  ;;  %v1501_v34 = vpack.c.bf16 %v14905_v25, %v14905_v25  ;;  %v2443_v9 = vld [vmem:[%s14433_s20 + $0x18c8] sm:$0xff] }
 0x27d   : > { %v14923_v8 = vadd.f32 %v9116_v38, %v9077_v20  ;;  %9474 = vmatprep.mubr.bf16.mxu0 %v1502_v35  ;;  %9514 = vmatprep.mubr.bf16.mxu1 %v1504_v37  ;;  %v2539_v35 = vld [vmem:[%s14433_s20 + $0x1bc8] sm:$0xff]  ;;  %v1503_v37 = vpack.c.bf16 %v14908_v26, %v14908_v26  ;;  %v13725_v20 = vcombine.low %v2634_v6, %v2730_v22 }
 0x27e   : > { %v9079_v42 = vpop.f32.mrf.mxu0  ;;  %v9119_v3 = vpop.f32.mrf.mxu1  ;;  %v13727_v38 = vcombine.low %v2635_v23, %v2731_v52  ;;  %v13534_v39 = vcombine.high %v2442_v32, %v2538_v17  ;;  %v13536_v14 = vcombine.high %v2443_v9, %v2539_v35  ;;  %v1506_v40 = vpack.c.bf16 %v668_v33, %v668_v33 }
 0x27f   : > { %v1508_v42 = vpack.c.bf16 %v669_v36, %v669_v36  ;;  %v13535_v54 = vcombine.low %v2443_v9, %v2539_v35  ;;  %v14989_v35 = vrot.slane %v366_v27, %v14467_v24 }
 0x280   : > { %v9080_v46 = vpop.f32.mrf.mxu0  ;;  %v9120_v49 = vpop.f32.mrf.mxu1 }
 0x281   : > { %v2346_v46 = vld [vmem:[%s14433_s20 + $0x15c0] sm:$0xff]  ;;  %v2347_v49 = vld [vmem:[%s14433_s20 + $0x15c8] sm:$0xff] }
 0x283   : > { %9449 = vmatpush1.bf16.xpose.msra.mxu0 %v13529_v45  ;;  %9489 = vmatpush1.bf16.xpose.msra.mxu1 %v13531_v47  ;;  %v2250_v45 = vld [vmem:[%s14433_s20 + $0x12c0] sm:$0xff] }
 0x284   : > { %9450 = vmatprep.subr.bf16.mxu0 %v13338_v48  ;;  %9490 = vmatprep.subr.bf16.mxu1 %v13340_v50  ;;  %v2251_v48 = vld [vmem:[%s14433_s20 + $0x12c8] sm:$0xff]  ;;  %v13533_v50 = vcombine.low %v2442_v32, %v2538_v17  ;;  %v13342_v55 = vcombine.high %v2250_v45, %v2346_v46  ;;  %v13341_v10 = vcombine.low %v2250_v45, %v2346_v46 }
 0x285   : > { %v13343_v56 = vcombine.low %v2251_v48, %v2347_v49  ;;  %v670_v32 = vcombine.high %v366_v27, %v366_v27  ;;  %v1773_v27 = vld [vmem:[%s14433_s20 + $0x3d8] sm:$0xff] }
 0x287   : > { %v14992_v36 = vrot.slane %v670_v32, %v14467_v24  ;;  %v367_v32 = vld [vmem:[%s14451_s13 + $0x70] sm:$0xff] }
 0x28b   : > { %9451 = vmatpush1.bf16.xpose.msra.mxu0 %v13337_v63  ;;  %9491 = vmatpush1.bf16.xpose.msra.mxu1 %v13339_v0  ;;  %v13344_v63 = vcombine.high %v2251_v48, %v2347_v49  ;;  %v2058_v0 = vld [vmem:[%s14433_s20 + $0xcc0] sm:$0xff] }
 0x28c   : > { %9452 = vmatprep.subr.bf16.mxu0 %v13146_v1  ;;  %9492 = vmatprep.subr.bf16.mxu1 %v13148_v4  ;;  %v2154_v1 = vld [vmem:[%s14433_s20 + $0xfc0] sm:$0xff]  ;;  %v2059_v4 = vld [vmem:[%s14433_s20 + $0xcc8] sm:$0xff] }
 0x28d   : > { %v13150_v11 = vcombine.high %v2058_v0, %v2154_v1  ;;  %v13149_v16 = vcombine.low %v2058_v0, %v2154_v1  ;;  %v13151_v2 = vcombine.low %v2059_v4, %v2155_v5 }
 0x293   : > { %9453 = vmatpush1.bf16.xpose.msra.mxu0 %v13145_v13  ;;  %9493 = vmatpush1.bf16.xpose.msra.mxu1 %v13147_v57  ;;  %v13152_v13 = vcombine.high %v2059_v4, %v2155_v5  ;;  %v1866_v57 = vld [vmem:[%s14433_s20 + $0x6c0] sm:$0xff] }
 0x294   : > { %9454 = vmatprep.subr.bf16.mxu0 %v12954_v62  ;;  %9494 = vmatprep.subr.bf16.mxu1 %v12956_v51  ;;  %v1962_v62 = vld [vmem:[%s14433_s20 + $0x9c0] sm:$0xff]  ;;  %v1867_v51 = vld [vmem:[%s14433_s20 + $0x6c8] sm:$0xff] }
 0x295   : > { %v12958_v18 = vcombine.high %v1866_v57, %v1962_v62  ;;  %v12957_v6 = vcombine.low %v1866_v57, %v1962_v62  ;;  %v12959_v22 = vcombine.low %v1867_v51, %v1963_v15  ;;  %v2157_v57 = vld [vmem:[%s14433_s20 + $0xfd8] sm:$0xff] }
 0x29b   : > { %9455 = vmatpush1.bf16.xpose.msra.mxu0 %v12953_v59  ;;  %9495 = vmatpush1.bf16.xpose.msra.mxu1 %v12955_v19  ;;  %v12960_v59 = vcombine.high %v1867_v51, %v1963_v15  ;;  %v1674_v19 = vld [vmem:[%s14433_s20 + $0xc0] sm:$0xff] }
 0x29c   : > { %9456 = vmatprep.subr.bf16.mxu0 %v12762_v7  ;;  %9496 = vmatprep.subr.bf16.mxu1 %v12764_v12  ;;  %v1770_v7 = vld [vmem:[%s14433_s20 + $0x3c0] sm:$0xff]  ;;  %v1675_v12 = vld [vmem:[%s14433_s20 + $0xc8] sm:$0xff] }
 0x29d   : > { %v12766_v23 = vcombine.high %v1674_v19, %v1770_v7  ;;  %v12768_v52 = vcombine.high %v1675_v12, %v1771_v21  ;;  %v12765_v17 = vcombine.low %v1674_v19, %v1770_v7  ;;  %v12767_v33 = vcombine.low %v1675_v12, %v1771_v21  ;;  %v1965_v19 = vld [vmem:[%s14433_s20 + $0x9d8] sm:$0xff] }
 0x2a3   : > { %9457 = vmatpush1.bf16.xpose.msra.mxu0 %v12761_v61  ;;  %9497 = vmatpush1.bf16.xpose.msra.mxu1 %v12763_v28  ;;  %v2636_v61 = vld [vmem:[%s14433_s20 + $0x1ed0] sm:$0xff] }
 0x2a4   : > { %9526 = vmatprep.subr.bf16.mxu0 %v13726_v29  ;;  %9566 = vmatprep.subr.bf16.mxu1 %v13728_v60  ;;  %v2732_v28 = vld [vmem:[%s14433_s20 + $0x21d0] sm:$0xff]  ;;  %v2637_v29 = vld [vmem:[%s14433_s20 + $0x1ed8] sm:$0xff] }
 0x2a5   : > { %v2733_v60 = vld [vmem:[%s14433_s20 + $0x21d8] sm:$0xff] }
 0x2a6   : > { %v13732_v9 = vcombine.high %v2637_v29, %v2733_v60 }
 0x2aa   : > { %v9156_v41 = vpop.f32.mrf.mxu0  ;;  %9475 = vmatmul.mubr.bf16.vlgmr.msra.gmra.mxu0 %v1501_v34  ;;  %v9196_v43 = vpop.f32.mrf.mxu1  ;;  %9515 = vmatmul.mubr.bf16.vlgmr.msra.gmra.mxu1 %v1503_v37  ;;  %v13730_v34 = vcombine.high %v2636_v61, %v2732_v28  ;;  %v2444_v37 = vld [vmem:[%s14433_s20 + $0x18d0] sm:$0xff] }
 0x2ab   : > { %v9157_v25 = vadd.f32 %v9156_v41, %v14923_v8  ;;  %9527 = vmatpush1.bf16.xpose.msra.mxu0 %v13725_v20  ;;  %9567 = vmatpush1.bf16.xpose.msra.mxu1 %v13727_v38  ;;  %v2540_v20 = vld [vmem:[%s14433_s20 + $0x1bd0] sm:$0xff]  ;;  %v685_v38 = vcombine.high %v14989_v35, %v14989_v35  ;;  %v686_v41 = vcombine.high %v14992_v36, %v14992_v36 }
 0x2ac   : > { %v9158_v44 = vpop.f32.mrf.mxu0  ;;  %9528 = vmatprep.subr.bf16.mxu0 %v13534_v39  ;;  %v9198_v3 = vpop.f32.mrf.mxu1  ;;  %9568 = vmatprep.subr.bf16.mxu1 %v13536_v14  ;;  %v1505_v39 = vpack.c.bf16 %v14947_v30, %v14947_v30  ;;  %v2445_v14 = vld [vmem:[%s14433_s20 + $0x18d8] sm:$0xff] }
 0x2ad   : > { %v14965_v26 = vadd.f32 %v9196_v43, %v9157_v25  ;;  %9554 = vmatprep.mubr.bf16.mxu0 %v1506_v40  ;;  %9594 = vmatprep.mubr.bf16.mxu1 %v1508_v42  ;;  %v2541_v40 = vld [vmem:[%s14433_s20 + $0x1bd8] sm:$0xff]  ;;  %v1507_v42 = vpack.c.bf16 %v14950_v31, %v14950_v31  ;;  %v13729_v25 = vcombine.low %v2636_v61, %v2732_v28 }
 0x2ae   : > { %v9159_v47 = vpop.f32.mrf.mxu0  ;;  %v9199_v8 = vpop.f32.mrf.mxu1  ;;  %v13731_v43 = vcombine.low %v2637_v29, %v2733_v60  ;;  %v13538_v44 = vcombine.high %v2444_v37, %v2540_v20  ;;  %v13540_v3 = vcombine.high %v2445_v14, %v2541_v40  ;;  %v1510_v45 = vpack.c.bf16 %v685_v38, %v685_v38 }
 0x2af   : > { %v1512_v47 = vpack.c.bf16 %v686_v41, %v686_v41  ;;  %v13539_v1 = vcombine.low %v2445_v14, %v2541_v40  ;;  %v15031_v40 = vrot.slane %v367_v32, %v14467_v24 }
 0x2b0   : > { %v9160_v53 = vpop.f32.mrf.mxu0  ;;  %v9200_v58 = vpop.f32.mrf.mxu1 }
 0x2b1   : > { %v2348_v53 = vld [vmem:[%s14433_s20 + $0x15d0] sm:$0xff]  ;;  %v2349_v58 = vld [vmem:[%s14433_s20 + $0x15d8] sm:$0xff] }
 0x2b3   : > { %9529 = vmatpush1.bf16.xpose.msra.mxu0 %v13533_v50  ;;  %9569 = vmatpush1.bf16.xpose.msra.mxu1 %v13535_v54  ;;  %v2252_v50 = vld [vmem:[%s14433_s20 + $0x12d0] sm:$0xff] }
 0x2b4   : > { %9530 = vmatprep.subr.bf16.mxu0 %v13342_v55  ;;  %9570 = vmatprep.subr.bf16.mxu1 %v13344_v63  ;;  %v2253_v55 = vld [vmem:[%s14433_s20 + $0x12d8] sm:$0xff]  ;;  %v13537_v63 = vcombine.low %v2444_v37, %v2540_v20  ;;  %v13346_v4 = vcombine.high %v2252_v50, %v2348_v53  ;;  %v13345_v62 = vcombine.low %v2252_v50, %v2348_v53 }
 0x2b5   : > { %v13347_v51 = vcombine.low %v2253_v55, %v2349_v58  ;;  %v687_v37 = vcombine.high %v367_v32, %v367_v32  ;;  %v1775_v32 = vld [vmem:[%s14433_s20 + $0x3e8] sm:$0xff] }
 0x2b7   : > { %v15034_v41 = vrot.slane %v687_v37, %v14467_v24  ;;  %v368_v37 = vld [vmem:[%s14451_s13 + $0x78] sm:$0xff] }
 0x2bb   : > { %9531 = vmatpush1.bf16.xpose.msra.mxu0 %v13341_v10  ;;  %9571 = vmatpush1.bf16.xpose.msra.mxu1 %v13343_v56  ;;  %v13348_v10 = vcombine.high %v2253_v55, %v2349_v58  ;;  %v2060_v56 = vld [vmem:[%s14433_s20 + $0xcd0] sm:$0xff] }
 0x2bc   : > { %9532 = vmatprep.subr.bf16.mxu0 %v13150_v11  ;;  %9572 = vmatprep.subr.bf16.mxu1 %v13152_v13  ;;  %v2156_v11 = vld [vmem:[%s14433_s20 + $0xfd0] sm:$0xff]  ;;  %v2061_v13 = vld [vmem:[%s14433_s20 + $0xcd8] sm:$0xff] }
 0x2bd   : > { %v13154_v15 = vcombine.high %v2060_v56, %v2156_v11  ;;  %v13153_v7 = vcombine.low %v2060_v56, %v2156_v11  ;;  %v13155_v12 = vcombine.low %v2061_v13, %v2157_v57 }
 0x2c3   : > { %9533 = vmatpush1.bf16.xpose.msra.mxu0 %v13149_v16  ;;  %9573 = vmatpush1.bf16.xpose.msra.mxu1 %v13151_v2  ;;  %v13156_v16 = vcombine.high %v2061_v13, %v2157_v57  ;;  %v1868_v2 = vld [vmem:[%s14433_s20 + $0x6d0] sm:$0xff] }
 0x2c4   : > { %9534 = vmatprep.subr.bf16.mxu0 %v12958_v18  ;;  %9574 = vmatprep.subr.bf16.mxu1 %v12960_v59  ;;  %v1964_v18 = vld [vmem:[%s14433_s20 + $0x9d0] sm:$0xff]  ;;  %v1869_v59 = vld [vmem:[%s14433_s20 + $0x6d8] sm:$0xff] }
 0x2c5   : > { %v12962_v21 = vcombine.high %v1868_v2, %v1964_v18  ;;  %v12961_v61 = vcombine.low %v1868_v2, %v1964_v18  ;;  %v12963_v28 = vcombine.low %v1869_v59, %v1965_v19  ;;  %v2159_v2 = vld [vmem:[%s14433_s20 + $0xfe8] sm:$0xff] }
 0x2cb   : > { %9535 = vmatpush1.bf16.xpose.msra.mxu0 %v12957_v6  ;;  %9575 = vmatpush1.bf16.xpose.msra.mxu1 %v12959_v22  ;;  %v12964_v6 = vcombine.high %v1869_v59, %v1965_v19  ;;  %v1676_v22 = vld [vmem:[%s14433_s20 + $0xd0] sm:$0xff] }
 0x2cc   : > { %9536 = vmatprep.subr.bf16.mxu0 %v12766_v23  ;;  %9576 = vmatprep.subr.bf16.mxu1 %v12768_v52  ;;  %v1772_v23 = vld [vmem:[%s14433_s20 + $0x3d0] sm:$0xff]  ;;  %v1677_v52 = vld [vmem:[%s14433_s20 + $0xd8] sm:$0xff] }
 0x2cd   : > { %v12770_v29 = vcombine.high %v1676_v22, %v1772_v23  ;;  %v12772_v60 = vcombine.high %v1677_v52, %v1773_v27  ;;  %v12769_v20 = vcombine.low %v1676_v22, %v1772_v23  ;;  %v12771_v38 = vcombine.low %v1677_v52, %v1773_v27  ;;  %v1967_v22 = vld [vmem:[%s14433_s20 + $0x9e8] sm:$0xff] }
 0x2d3   : > { %9537 = vmatpush1.bf16.xpose.msra.mxu0 %v12765_v17  ;;  %9577 = vmatpush1.bf16.xpose.msra.mxu1 %v12767_v33  ;;  %v2638_v17 = vld [vmem:[%s14433_s20 + $0x1ee0] sm:$0xff] }
 0x2d4   : > { %9606 = vmatprep.subr.bf16.mxu0 %v13730_v34  ;;  %9646 = vmatprep.subr.bf16.mxu1 %v13732_v9  ;;  %v2734_v33 = vld [vmem:[%s14433_s20 + $0x21e0] sm:$0xff]  ;;  %v2639_v34 = vld [vmem:[%s14433_s20 + $0x1ee8] sm:$0xff] }
 0x2d5   : > { %v2735_v9 = vld [vmem:[%s14433_s20 + $0x21e8] sm:$0xff] }
 0x2d6   : > { %v13736_v14 = vcombine.high %v2639_v34, %v2735_v9 }
 0x2da   : > { %v9236_v46 = vpop.f32.mrf.mxu0  ;;  %9555 = vmatmul.mubr.bf16.vlgmr.msra.gmra.mxu0 %v1505_v39  ;;  %v9276_v48 = vpop.f32.mrf.mxu1  ;;  %9595 = vmatmul.mubr.bf16.vlgmr.msra.gmra.mxu1 %v1507_v42  ;;  %v13734_v39 = vcombine.high %v2638_v17, %v2734_v33  ;;  %v2446_v42 = vld [vmem:[%s14433_s20 + $0x18e0] sm:$0xff] }
 0x2db   : > { %v9237_v30 = vadd.f32 %v9236_v46, %v14965_v26  ;;  %9607 = vmatpush1.bf16.xpose.msra.mxu0 %v13729_v25  ;;  %9647 = vmatpush1.bf16.xpose.msra.mxu1 %v13731_v43  ;;  %v2542_v25 = vld [vmem:[%s14433_s20 + $0x1be0] sm:$0xff]  ;;  %v702_v43 = vcombine.high %v15031_v40, %v15031_v40  ;;  %v703_v46 = vcombine.high %v15034_v41, %v15034_v41 }
 0x2dc   : > { %v9238_v49 = vpop.f32.mrf.mxu0  ;;  %9608 = vmatprep.subr.bf16.mxu0 %v13538_v44  ;;  %v9278_v8 = vpop.f32.mrf.mxu1  ;;  %9648 = vmatprep.subr.bf16.mxu1 %v13540_v3  ;;  %v1509_v44 = vpack.c.bf16 %v14989_v35, %v14989_v35  ;;  %v2447_v3 = vld [vmem:[%s14433_s20 + $0x18e8] sm:$0xff] }
 0x2dd   : > { %v15007_v31 = vadd.f32 %v9276_v48, %v9237_v30  ;;  %9634 = vmatprep.mubr.bf16.mxu0 %v1510_v45  ;;  %9674 = vmatprep.mubr.bf16.mxu1 %v1512_v47  ;;  %v2543_v45 = vld [vmem:[%s14433_s20 + $0x1be8] sm:$0xff]  ;;  %v1511_v47 = vpack.c.bf16 %v14992_v36, %v14992_v36  ;;  %v13733_v30 = vcombine.low %v2638_v17, %v2734_v33 }
 0x2de   : > { %v9239_v54 = vpop.f32.mrf.mxu0  ;;  %v9279_v26 = vpop.f32.mrf.mxu1  ;;  %v13735_v48 = vcombine.low %v2639_v34, %v2735_v9  ;;  %v13542_v49 = vcombine.high %v2446_v42, %v2542_v25  ;;  %v13544_v8 = vcombine.high %v2447_v3, %v2543_v45  ;;  %v1514_v50 = vpack.c.bf16 %v702_v43, %v702_v43 }
 0x2df   : > { %v1516_v54 = vpack.c.bf16 %v703_v46, %v703_v46  ;;  %v13543_v11 = vcombine.low %v2447_v3, %v2543_v45  ;;  %v15073_v45 = vrot.slane %v368_v37, %v14467_v24 }
 0x2e0   : > { %v9240_v0 = vpop.f32.mrf.mxu0  ;;  %v9280_v5 = vpop.f32.mrf.mxu1 }
 0x2e1   : > { %v2350_v0 = vld [vmem:[%s14433_s20 + $0x15e0] sm:$0xff]  ;;  %v2351_v5 = vld [vmem:[%s14433_s20 + $0x15e8] sm:$0xff] }
 0x2e3   : > { %9609 = vmatpush1.bf16.xpose.msra.mxu0 %v13537_v63  ;;  %9649 = vmatpush1.bf16.xpose.msra.mxu1 %v13539_v1  ;;  %v2254_v63 = vld [vmem:[%s14433_s20 + $0x12e0] sm:$0xff] }
 0x2e4   : > { %9610 = vmatprep.subr.bf16.mxu0 %v13346_v4  ;;  %9650 = vmatprep.subr.bf16.mxu1 %v13348_v10  ;;  %v2255_v4 = vld [vmem:[%s14433_s20 + $0x12e8] sm:$0xff]  ;;  %v13541_v10 = vcombine.low %v2446_v42, %v2542_v25  ;;  %v13350_v13 = vcombine.high %v2254_v63, %v2350_v0  ;;  %v13349_v18 = vcombine.low %v2254_v63, %v2350_v0 }
 0x2e5   : > { %v13351_v59 = vcombine.low %v2255_v4, %v2351_v5  ;;  %v704_v42 = vcombine.high %v368_v37, %v368_v37  ;;  %v1777_v37 = vld [vmem:[%s14433_s20 + $0x3f8] sm:$0xff] }
 0x2e7   : > { %v15076_v46 = vrot.slane %v704_v42, %v14467_v24  ;;  %v369_v42 = vld [vmem:[%s14451_s13 + $0x80] sm:$0xff] }
 0x2eb   : > { %9611 = vmatpush1.bf16.xpose.msra.mxu0 %v13345_v62  ;;  %9651 = vmatpush1.bf16.xpose.msra.mxu1 %v13347_v51  ;;  %v13352_v62 = vcombine.high %v2255_v4, %v2351_v5  ;;  %v2062_v51 = vld [vmem:[%s14433_s20 + $0xce0] sm:$0xff] }
 0x2ec   : > { %9612 = vmatprep.subr.bf16.mxu0 %v13154_v15  ;;  %9652 = vmatprep.subr.bf16.mxu1 %v13156_v16  ;;  %v2158_v15 = vld [vmem:[%s14433_s20 + $0xfe0] sm:$0xff]  ;;  %v2063_v16 = vld [vmem:[%s14433_s20 + $0xce8] sm:$0xff] }
 0x2ed   : > { %v13158_v19 = vcombine.high %v2062_v51, %v2158_v15  ;;  %v13157_v23 = vcombine.low %v2062_v51, %v2158_v15  ;;  %v13159_v52 = vcombine.low %v2063_v16, %v2159_v2 }
 0x2f3   : > { %9613 = vmatpush1.bf16.xpose.msra.mxu0 %v13153_v7  ;;  %9653 = vmatpush1.bf16.xpose.msra.mxu1 %v13155_v12  ;;  %v13160_v7 = vcombine.high %v2063_v16, %v2159_v2  ;;  %v1870_v12 = vld [vmem:[%s14433_s20 + $0x6e0] sm:$0xff] }
 0x2f4   : > { %9614 = vmatprep.subr.bf16.mxu0 %v12962_v21  ;;  %9654 = vmatprep.subr.bf16.mxu1 %v12964_v6  ;;  %v1966_v21 = vld [vmem:[%s14433_s20 + $0x9e0] sm:$0xff]  ;;  %v1871_v6 = vld [vmem:[%s14433_s20 + $0x6e8] sm:$0xff] }
 0x2f5   : > { %v12966_v27 = vcombine.high %v1870_v12, %v1966_v21  ;;  %v12965_v17 = vcombine.low %v1870_v12, %v1966_v21  ;;  %v12967_v33 = vcombine.low %v1871_v6, %v1967_v22  ;;  %v2161_v12 = vld [vmem:[%s14433_s20 + $0xff8] sm:$0xff] }
 0x2fb   : > { %9615 = vmatpush1.bf16.xpose.msra.mxu0 %v12961_v61  ;;  %9655 = vmatpush1.bf16.xpose.msra.mxu1 %v12963_v28  ;;  %v12968_v61 = vcombine.high %v1871_v6, %v1967_v22  ;;  %v1678_v28 = vld [vmem:[%s14433_s20 + $0xe0] sm:$0xff] }
 0x2fc   : > { %9616 = vmatprep.subr.bf16.mxu0 %v12770_v29  ;;  %9656 = vmatprep.subr.bf16.mxu1 %v12772_v60  ;;  %v1774_v29 = vld [vmem:[%s14433_s20 + $0x3e0] sm:$0xff]  ;;  %v1679_v60 = vld [vmem:[%s14433_s20 + $0xe8] sm:$0xff] }
 0x2fd   : > { %v12774_v34 = vcombine.high %v1678_v28, %v1774_v29  ;;  %v12776_v9 = vcombine.high %v1679_v60, %v1775_v32  ;;  %v12773_v25 = vcombine.low %v1678_v28, %v1774_v29  ;;  %v12775_v43 = vcombine.low %v1679_v60, %v1775_v32  ;;  %v1969_v28 = vld [vmem:[%s14433_s20 + $0x9f8] sm:$0xff] }
 0x303   : > { %9617 = vmatpush1.bf16.xpose.msra.mxu0 %v12769_v20  ;;  %9657 = vmatpush1.bf16.xpose.msra.mxu1 %v12771_v38  ;;  %v2640_v20 = vld [vmem:[%s14433_s20 + $0x1ef0] sm:$0xff] }
 0x304   : > { %9686 = vmatprep.subr.bf16.mxu0 %v13734_v39  ;;  %9726 = vmatprep.subr.bf16.mxu1 %v13736_v14  ;;  %v2736_v38 = vld [vmem:[%s14433_s20 + $0x21f0] sm:$0xff]  ;;  %v2641_v39 = vld [vmem:[%s14433_s20 + $0x1ef8] sm:$0xff] }
 0x305   : > { %v2737_v14 = vld [vmem:[%s14433_s20 + $0x21f8] sm:$0xff] }
 0x306   : > { %v13740_v3 = vcombine.high %v2641_v39, %v2737_v14 }
 0x30a   : > { %v9316_v53 = vpop.f32.mrf.mxu0  ;;  %9635 = vmatmul.mubr.bf16.vlgmr.msra.gmra.mxu0 %v1509_v44  ;;  %v9356_v55 = vpop.f32.mrf.mxu1  ;;  %9675 = vmatmul.mubr.bf16.vlgmr.msra.gmra.mxu1 %v1511_v47  ;;  %v13738_v44 = vcombine.high %v2640_v20, %v2736_v38  ;;  %v2448_v47 = vld [vmem:[%s14433_s20 + $0x18f0] sm:$0xff] }
 0x30b   : > { %v9317_v35 = vadd.f32 %v9316_v53, %v15007_v31  ;;  %9687 = vmatpush1.bf16.xpose.msra.mxu0 %v13733_v30  ;;  %9727 = vmatpush1.bf16.xpose.msra.mxu1 %v13735_v48  ;;  %v2544_v30 = vld [vmem:[%s14433_s20 + $0x1bf0] sm:$0xff]  ;;  %v719_v48 = vcombine.high %v15073_v45, %v15073_v45  ;;  %v720_v53 = vcombine.high %v15076_v46, %v15076_v46 }
 0x30c   : > { %v9318_v58 = vpop.f32.mrf.mxu0  ;;  %9688 = vmatprep.subr.bf16.mxu0 %v13542_v49  ;;  %v9358_v26 = vpop.f32.mrf.mxu1  ;;  %9728 = vmatprep.subr.bf16.mxu1 %v13544_v8  ;;  %v1513_v49 = vpack.c.bf16 %v15031_v40, %v15031_v40  ;;  %v2449_v8 = vld [vmem:[%s14433_s20 + $0x18f8] sm:$0xff] }
 0x30d   : > { %v15049_v36 = vadd.f32 %v9356_v55, %v9317_v35  ;;  %9714 = vmatprep.mubr.bf16.mxu0 %v1514_v50  ;;  %9754 = vmatprep.mubr.bf16.mxu1 %v1516_v54  ;;  %v2545_v50 = vld [vmem:[%s14433_s20 + $0x1bf8] sm:$0xff]  ;;  %v1515_v54 = vpack.c.bf16 %v15034_v41, %v15034_v41  ;;  %v13737_v35 = vcombine.low %v2640_v20, %v2736_v38 }
 0x30e   : > { %v9319_v1 = vpop.f32.mrf.mxu0  ;;  %v9359_v31 = vpop.f32.mrf.mxu1  ;;  %v13739_v55 = vcombine.low %v2641_v39, %v2737_v14  ;;  %v13546_v58 = vcombine.high %v2448_v47, %v2544_v30  ;;  %v13548_v26 = vcombine.high %v2449_v8, %v2545_v50  ;;  %v1518_v63 = vpack.c.bf16 %v719_v48, %v719_v48 }
 0x30f   : > { %v1520_v1 = vpack.c.bf16 %v720_v53, %v720_v53  ;;  %v13547_v15 = vcombine.low %v2449_v8, %v2545_v50  ;;  %v15115_v50 = vrot.slane %v369_v42, %v14467_v24 }
 0x310   : > { %v9320_v56 = vpop.f32.mrf.mxu0  ;;  %v9360_v57 = vpop.f32.mrf.mxu1 }
 0x311   : > { %v2352_v56 = vld [vmem:[%s14433_s20 + $0x15f0] sm:$0xff]  ;;  %v2353_v57 = vld [vmem:[%s14433_s20 + $0x15f8] sm:$0xff] }
 0x313   : > { %9689 = vmatpush1.bf16.xpose.msra.mxu0 %v13541_v10  ;;  %9729 = vmatpush1.bf16.xpose.msra.mxu1 %v13543_v11  ;;  %v2256_v10 = vld [vmem:[%s14433_s20 + $0x12f0] sm:$0xff] }
 0x314   : > { %9690 = vmatprep.subr.bf16.mxu0 %v13350_v13  ;;  %9730 = vmatprep.subr.bf16.mxu1 %v13352_v62  ;;  %v2257_v13 = vld [vmem:[%s14433_s20 + $0x12f8] sm:$0xff]  ;;  %v13545_v62 = vcombine.low %v2448_v47, %v2544_v30  ;;  %v13354_v16 = vcombine.high %v2256_v10, %v2352_v56  ;;  %v13353_v21 = vcombine.low %v2256_v10, %v2352_v56 }
 0x315   : > { %v13355_v6 = vcombine.low %v2257_v13, %v2353_v57  ;;  %v721_v47 = vcombine.high %v369_v42, %v369_v42  ;;  %v1779_v42 = vld [vmem:[%s14433_s20 + $0x408] sm:$0xff] }
 0x317   : > { %v15118_v53 = vrot.slane %v721_v47, %v14467_v24  ;;  %v370_v47 = vld [vmem:[%s14451_s13 + $0x88] sm:$0xff] }
 0x31b   : > { %9691 = vmatpush1.bf16.xpose.msra.mxu0 %v13349_v18  ;;  %9731 = vmatpush1.bf16.xpose.msra.mxu1 %v13351_v59  ;;  %v13356_v18 = vcombine.high %v2257_v13, %v2353_v57  ;;  %v2064_v59 = vld [vmem:[%s14433_s20 + $0xcf0] sm:$0xff] }
 0x31c   : > { %9692 = vmatprep.subr.bf16.mxu0 %v13158_v19  ;;  %9732 = vmatprep.subr.bf16.mxu1 %v13160_v7  ;;  %v2160_v19 = vld [vmem:[%s14433_s20 + $0xff0] sm:$0xff]  ;;  %v2065_v7 = vld [vmem:[%s14433_s20 + $0xcf8] sm:$0xff] }
 0x31d   : > { %v13162_v22 = vcombine.high %v2064_v59, %v2160_v19  ;;  %v13161_v29 = vcombine.low %v2064_v59, %v2160_v19  ;;  %v13163_v60 = vcombine.low %v2065_v7, %v2161_v12 }
 0x323   : > { %9693 = vmatpush1.bf16.xpose.msra.mxu0 %v13157_v23  ;;  %9733 = vmatpush1.bf16.xpose.msra.mxu1 %v13159_v52  ;;  %v13164_v23 = vcombine.high %v2065_v7, %v2161_v12  ;;  %v1872_v52 = vld [vmem:[%s14433_s20 + $0x6f0] sm:$0xff] }
 0x324   : > { %9694 = vmatprep.subr.bf16.mxu0 %v12966_v27  ;;  %9734 = vmatprep.subr.bf16.mxu1 %v12968_v61  ;;  %v1968_v27 = vld [vmem:[%s14433_s20 + $0x9f0] sm:$0xff]  ;;  %v1873_v61 = vld [vmem:[%s14433_s20 + $0x6f8] sm:$0xff] }
 0x325   : > { %v12970_v32 = vcombine.high %v1872_v52, %v1968_v27  ;;  %v12969_v20 = vcombine.low %v1872_v52, %v1968_v27  ;;  %v12971_v38 = vcombine.low %v1873_v61, %v1969_v28  ;;  %v2163_v52 = vld [vmem:[%s14433_s20 + $0x1008] sm:$0xff] }
 0x32b   : > { %9695 = vmatpush1.bf16.xpose.msra.mxu0 %v12965_v17  ;;  %9735 = vmatpush1.bf16.xpose.msra.mxu1 %v12967_v33  ;;  %v12972_v17 = vcombine.high %v1873_v61, %v1969_v28  ;;  %v1680_v33 = vld [vmem:[%s14433_s20 + $0xf0] sm:$0xff] }
 0x32c   : > { %9696 = vmatprep.subr.bf16.mxu0 %v12774_v34  ;;  %9736 = vmatprep.subr.bf16.mxu1 %v12776_v9  ;;  %v1776_v34 = vld [vmem:[%s14433_s20 + $0x3f0] sm:$0xff]  ;;  %v1681_v9 = vld [vmem:[%s14433_s20 + $0xf8] sm:$0xff] }
 0x32d   : > { %v12778_v39 = vcombine.high %v1680_v33, %v1776_v34  ;;  %v12780_v14 = vcombine.high %v1681_v9, %v1777_v37  ;;  %v12777_v30 = vcombine.low %v1680_v33, %v1776_v34  ;;  %v12779_v48 = vcombine.low %v1681_v9, %v1777_v37  ;;  %v1971_v33 = vld [vmem:[%s14433_s20 + $0xa08] sm:$0xff] }
 0x333   : > { %9697 = vmatpush1.bf16.xpose.msra.mxu0 %v12773_v25  ;;  %9737 = vmatpush1.bf16.xpose.msra.mxu1 %v12775_v43  ;;  %v2642_v25 = vld [vmem:[%s14433_s20 + $0x1f00] sm:$0xff] }
 0x334   : > { %9766 = vmatprep.subr.bf16.mxu0 %v13738_v44  ;;  %9806 = vmatprep.subr.bf16.mxu1 %v13740_v3  ;;  %v2738_v43 = vld [vmem:[%s14433_s20 + $0x2200] sm:$0xff]  ;;  %v2643_v44 = vld [vmem:[%s14433_s20 + $0x1f08] sm:$0xff] }
 0x335   : > { %v2739_v3 = vld [vmem:[%s14433_s20 + $0x2208] sm:$0xff] }
 0x336   : > { %v13744_v8 = vcombine.high %v2643_v44, %v2739_v3 }
 0x33a   : > { %v9396_v0 = vpop.f32.mrf.mxu0  ;;  %9715 = vmatmul.mubr.bf16.vlgmr.msra.gmra.mxu0 %v1513_v49  ;;  %v9436_v4 = vpop.f32.mrf.mxu1  ;;  %9755 = vmatmul.mubr.bf16.vlgmr.msra.gmra.mxu1 %v1515_v54  ;;  %v13742_v49 = vcombine.high %v2642_v25, %v2738_v43  ;;  %v2450_v54 = vld [vmem:[%s14433_s20 + $0x1900] sm:$0xff] }
 0x33b   : > { %v9397_v40 = vadd.f32 %v9396_v0, %v15049_v36  ;;  %9767 = vmatpush1.bf16.xpose.msra.mxu0 %v13737_v35  ;;  %9807 = vmatpush1.bf16.xpose.msra.mxu1 %v13739_v55  ;;  %v2546_v35 = vld [vmem:[%s14433_s20 + $0x1c00] sm:$0xff]  ;;  %v736_v55 = vcombine.high %v15115_v50, %v15115_v50  ;;  %v737_v0 = vcombine.high %v15118_v53, %v15118_v53 }
 0x33c   : > { %v9398_v5 = vpop.f32.mrf.mxu0  ;;  %9768 = vmatprep.subr.bf16.mxu0 %v13546_v58  ;;  %v9438_v31 = vpop.f32.mrf.mxu1  ;;  %9808 = vmatprep.subr.bf16.mxu1 %v13548_v26  ;;  %v1517_v58 = vpack.c.bf16 %v15073_v45, %v15073_v45  ;;  %v2451_v26 = vld [vmem:[%s14433_s20 + $0x1908] sm:$0xff] }
 0x33d   : > { %v15091_v41 = vadd.f32 %v9436_v4, %v9397_v40  ;;  %9794 = vmatprep.mubr.bf16.mxu0 %v1518_v63  ;;  %9834 = vmatprep.mubr.bf16.mxu1 %v1520_v1  ;;  %v2547_v63 = vld [vmem:[%s14433_s20 + $0x1c08] sm:$0xff]  ;;  %v1519_v1 = vpack.c.bf16 %v15076_v46, %v15076_v46  ;;  %v13741_v40 = vcombine.low %v2642_v25, %v2738_v43 }
 0x33e   : > { %v9399_v11 = vpop.f32.mrf.mxu0  ;;  %v9439_v36 = vpop.f32.mrf.mxu1  ;;  %v13743_v4 = vcombine.low %v2643_v44, %v2739_v3  ;;  %v13550_v5 = vcombine.high %v2450_v54, %v2546_v35  ;;  %v13552_v31 = vcombine.high %v2451_v26, %v2547_v63  ;;  %v1522_v10 = vpack.c.bf16 %v736_v55, %v736_v55 }
 0x33f   : > { %v1524_v11 = vpack.c.bf16 %v737_v0, %v737_v0  ;;  %v13551_v19 = vcombine.low %v2451_v26, %v2547_v63  ;;  %v15157_v63 = vrot.slane %v370_v47, %v14467_v24 }
 0x340   : > { %v9400_v51 = vpop.f32.mrf.mxu0  ;;  %v9440_v2 = vpop.f32.mrf.mxu1 }
 0x341   : > { %v2354_v51 = vld [vmem:[%s14433_s20 + $0x1600] sm:$0xff]  ;;  %v2355_v2 = vld [vmem:[%s14433_s20 + $0x1608] sm:$0xff] }
 0x343   : > { %9769 = vmatpush1.bf16.xpose.msra.mxu0 %v13545_v62  ;;  %9809 = vmatpush1.bf16.xpose.msra.mxu1 %v13547_v15  ;;  %v2258_v62 = vld [vmem:[%s14433_s20 + $0x1300] sm:$0xff] }
 0x344   : > { %9770 = vmatprep.subr.bf16.mxu0 %v13354_v16  ;;  %9810 = vmatprep.subr.bf16.mxu1 %v13356_v18  ;;  %v2259_v16 = vld [vmem:[%s14433_s20 + $0x1308] sm:$0xff]  ;;  %v13549_v18 = vcombine.low %v2450_v54, %v2546_v35  ;;  %v13358_v7 = vcombine.high %v2258_v62, %v2354_v51  ;;  %v13357_v27 = vcombine.low %v2258_v62, %v2354_v51 }
 0x345   : > { %v13359_v61 = vcombine.low %v2259_v16, %v2355_v2  ;;  %v738_v54 = vcombine.high %v370_v47, %v370_v47  ;;  %v1781_v47 = vld [vmem:[%s14433_s20 + $0x418] sm:$0xff] }
 0x347   : > { %v15160_v0 = vrot.slane %v738_v54, %v14467_v24  ;;  %v371_v54 = vld [vmem:[%s14451_s13 + $0x90] sm:$0xff] }
 0x34b   : > { %9771 = vmatpush1.bf16.xpose.msra.mxu0 %v13353_v21  ;;  %9811 = vmatpush1.bf16.xpose.msra.mxu1 %v13355_v6  ;;  %v13360_v21 = vcombine.high %v2259_v16, %v2355_v2  ;;  %v2066_v6 = vld [vmem:[%s14433_s20 + $0xd00] sm:$0xff] }
 0x34c   : > { %9772 = vmatprep.subr.bf16.mxu0 %v13162_v22  ;;  %9812 = vmatprep.subr.bf16.mxu1 %v13164_v23  ;;  %v2162_v22 = vld [vmem:[%s14433_s20 + $0x1000] sm:$0xff]  ;;  %v2067_v23 = vld [vmem:[%s14433_s20 + $0xd08] sm:$0xff] }
 0x34d   : > { %v13166_v28 = vcombine.high %v2066_v6, %v2162_v22  ;;  %v13165_v34 = vcombine.low %v2066_v6, %v2162_v22  ;;  %v13167_v9 = vcombine.low %v2067_v23, %v2163_v52 }
 0x353   : > { %9773 = vmatpush1.bf16.xpose.msra.mxu0 %v13161_v29  ;;  %9813 = vmatpush1.bf16.xpose.msra.mxu1 %v13163_v60  ;;  %v13168_v29 = vcombine.high %v2067_v23, %v2163_v52  ;;  %v1874_v60 = vld [vmem:[%s14433_s20 + $0x700] sm:$0xff] }
 0x354   : > { %9774 = vmatprep.subr.bf16.mxu0 %v12970_v32  ;;  %9814 = vmatprep.subr.bf16.mxu1 %v12972_v17  ;;  %v1970_v32 = vld [vmem:[%s14433_s20 + $0xa00] sm:$0xff]  ;;  %v1875_v17 = vld [vmem:[%s14433_s20 + $0x708] sm:$0xff] }
 0x355   : > { %v12974_v37 = vcombine.high %v1874_v60, %v1970_v32  ;;  %v12973_v25 = vcombine.low %v1874_v60, %v1970_v32  ;;  %v12975_v43 = vcombine.low %v1875_v17, %v1971_v33  ;;  %v2165_v60 = vld [vmem:[%s14433_s20 + $0x1018] sm:$0xff] }
 0x35b   : > { %9775 = vmatpush1.bf16.xpose.msra.mxu0 %v12969_v20  ;;  %9815 = vmatpush1.bf16.xpose.msra.mxu1 %v12971_v38  ;;  %v12976_v20 = vcombine.high %v1875_v17, %v1971_v33  ;;  %v1682_v38 = vld [vmem:[%s14433_s20 + $0x100] sm:$0xff] }
 0x35c   : > { %9776 = vmatprep.subr.bf16.mxu0 %v12778_v39  ;;  %9816 = vmatprep.subr.bf16.mxu1 %v12780_v14  ;;  %v1778_v39 = vld [vmem:[%s14433_s20 + $0x400] sm:$0xff]  ;;  %v1683_v14 = vld [vmem:[%s14433_s20 + $0x108] sm:$0xff] }
 0x35d   : > { %v12782_v44 = vcombine.high %v1682_v38, %v1778_v39  ;;  %v12784_v3 = vcombine.high %v1683_v14, %v1779_v42  ;;  %v12781_v35 = vcombine.low %v1682_v38, %v1778_v39  ;;  %v12783_v55 = vcombine.low %v1683_v14, %v1779_v42  ;;  %v1973_v38 = vld [vmem:[%s14433_s20 + $0xa18] sm:$0xff] }
 0x363   : > { %9777 = vmatpush1.bf16.xpose.msra.mxu0 %v12777_v30  ;;  %9817 = vmatpush1.bf16.xpose.msra.mxu1 %v12779_v48  ;;  %v2644_v30 = vld [vmem:[%s14433_s20 + $0x1f10] sm:$0xff] }
 0x364   : > { %9846 = vmatprep.subr.bf16.mxu0 %v13742_v49  ;;  %9886 = vmatprep.subr.bf16.mxu1 %v13744_v8  ;;  %v2740_v48 = vld [vmem:[%s14433_s20 + $0x2210] sm:$0xff]  ;;  %v2645_v49 = vld [vmem:[%s14433_s20 + $0x1f18] sm:$0xff] }
 0x365   : > { %v2741_v8 = vld [vmem:[%s14433_s20 + $0x2218] sm:$0xff] }
 0x366   : > { %v13748_v26 = vcombine.high %v2645_v49, %v2741_v8 }
 0x36a   : > { %v9476_v56 = vpop.f32.mrf.mxu0  ;;  %9795 = vmatmul.mubr.bf16.vlgmr.msra.gmra.mxu0 %v1517_v58  ;;  %v9516_v13 = vpop.f32.mrf.mxu1  ;;  %9835 = vmatmul.mubr.bf16.vlgmr.msra.gmra.mxu1 %v1519_v1  ;;  %v13746_v58 = vcombine.high %v2644_v30, %v2740_v48  ;;  %v2452_v1 = vld [vmem:[%s14433_s20 + $0x1910] sm:$0xff] }
 0x36b   : > { %v9477_v45 = vadd.f32 %v9476_v56, %v15091_v41  ;;  %9847 = vmatpush1.bf16.xpose.msra.mxu0 %v13741_v40  ;;  %9887 = vmatpush1.bf16.xpose.msra.mxu1 %v13743_v4  ;;  %v2548_v40 = vld [vmem:[%s14433_s20 + $0x1c10] sm:$0xff]  ;;  %v753_v4 = vcombine.high %v15157_v63, %v15157_v63  ;;  %v754_v56 = vcombine.high %v15160_v0, %v15160_v0 }
 0x36c   : > { %v9478_v57 = vpop.f32.mrf.mxu0  ;;  %9848 = vmatprep.subr.bf16.mxu0 %v13550_v5  ;;  %v9518_v36 = vpop.f32.mrf.mxu1  ;;  %9888 = vmatprep.subr.bf16.mxu1 %v13552_v31  ;;  %v1521_v5 = vpack.c.bf16 %v15115_v50, %v15115_v50  ;;  %v2453_v31 = vld [vmem:[%s14433_s20 + $0x1918] sm:$0xff] }
 0x36d   : > { %v15133_v46 = vadd.f32 %v9516_v13, %v9477_v45  ;;  %9874 = vmatprep.mubr.bf16.mxu0 %v1522_v10  ;;  %9914 = vmatprep.mubr.bf16.mxu1 %v1524_v11  ;;  %v2549_v10 = vld [vmem:[%s14433_s20 + $0x1c18] sm:$0xff]  ;;  %v1523_v11 = vpack.c.bf16 %v15118_v53, %v15118_v53  ;;  %v13745_v45 = vcombine.low %v2644_v30, %v2740_v48 }
 0x36e   : > { %v9479_v15 = vpop.f32.mrf.mxu0  ;;  %v9519_v41 = vpop.f32.mrf.mxu1  ;;  %v13747_v13 = vcombine.low %v2645_v49, %v2741_v8  ;;  %v13554_v57 = vcombine.high %v2452_v1, %v2548_v40  ;;  %v13556_v36 = vcombine.high %v2453_v31, %v2549_v10  ;;  %v1526_v62 = vpack.c.bf16 %v753_v4, %v753_v4 }
 0x36f   : > { %v1528_v15 = vpack.c.bf16 %v754_v56, %v754_v56  ;;  %v13555_v22 = vcombine.low %v2453_v31, %v2549_v10  ;;  %v15199_v10 = vrot.slane %v371_v54, %v14467_v24 }
 0x370   : > { %v9480_v59 = vpop.f32.mrf.mxu0  ;;  %v9520_v12 = vpop.f32.mrf.mxu1 }
 0x371   : > { %v2356_v59 = vld [vmem:[%s14433_s20 + $0x1610] sm:$0xff]  ;;  %v2357_v12 = vld [vmem:[%s14433_s20 + $0x1618] sm:$0xff] }
 0x373   : > { %9849 = vmatpush1.bf16.xpose.msra.mxu0 %v13549_v18  ;;  %9889 = vmatpush1.bf16.xpose.msra.mxu1 %v13551_v19  ;;  %v2260_v18 = vld [vmem:[%s14433_s20 + $0x1310] sm:$0xff] }
 0x374   : > { %9850 = vmatprep.subr.bf16.mxu0 %v13358_v7  ;;  %9890 = vmatprep.subr.bf16.mxu1 %v13360_v21  ;;  %v2261_v7 = vld [vmem:[%s14433_s20 + $0x1318] sm:$0xff]  ;;  %v13553_v21 = vcombine.low %v2452_v1, %v2548_v40  ;;  %v13362_v23 = vcombine.high %v2260_v18, %v2356_v59  ;;  %v13361_v32 = vcombine.low %v2260_v18, %v2356_v59 }
 0x375   : > { %v13363_v17 = vcombine.low %v2261_v7, %v2357_v12  ;;  %v755_v1 = vcombine.high %v371_v54, %v371_v54  ;;  %v1783_v54 = vld [vmem:[%s14433_s20 + $0x428] sm:$0xff] }
 0x377   : > { %v15202_v56 = vrot.slane %v755_v1, %v14467_v24  ;;  %v372_v1 = vld [vmem:[%s14451_s13 + $0x98] sm:$0xff] }
 0x37b   : > { %9851 = vmatpush1.bf16.xpose.msra.mxu0 %v13357_v27  ;;  %9891 = vmatpush1.bf16.xpose.msra.mxu1 %v13359_v61  ;;  %v13364_v27 = vcombine.high %v2261_v7, %v2357_v12  ;;  %v2068_v61 = vld [vmem:[%s14433_s20 + $0xd10] sm:$0xff] }
 0x37c   : > { %9852 = vmatprep.subr.bf16.mxu0 %v13166_v28  ;;  %9892 = vmatprep.subr.bf16.mxu1 %v13168_v29  ;;  %v2164_v28 = vld [vmem:[%s14433_s20 + $0x1010] sm:$0xff]  ;;  %v2069_v29 = vld [vmem:[%s14433_s20 + $0xd18] sm:$0xff] }
 0x37d   : > { %v13170_v33 = vcombine.high %v2068_v61, %v2164_v28  ;;  %v13169_v39 = vcombine.low %v2068_v61, %v2164_v28  ;;  %v13171_v14 = vcombine.low %v2069_v29, %v2165_v60 }
 0x383   : > { %9853 = vmatpush1.bf16.xpose.msra.mxu0 %v13165_v34  ;;  %9893 = vmatpush1.bf16.xpose.msra.mxu1 %v13167_v9  ;;  %v13172_v34 = vcombine.high %v2069_v29, %v2165_v60  ;;  %v1876_v9 = vld [vmem:[%s14433_s20 + $0x710] sm:$0xff] }
 0x384   : > { %9854 = vmatprep.subr.bf16.mxu0 %v12974_v37  ;;  %9894 = vmatprep.subr.bf16.mxu1 %v12976_v20  ;;  %v1972_v37 = vld [vmem:[%s14433_s20 + $0xa10] sm:$0xff]  ;;  %v1877_v20 = vld [vmem:[%s14433_s20 + $0x718] sm:$0xff] }
 0x385   : > { %v12978_v42 = vcombine.high %v1876_v9, %v1972_v37  ;;  %v12977_v30 = vcombine.low %v1876_v9, %v1972_v37  ;;  %v12979_v48 = vcombine.low %v1877_v20, %v1973_v38  ;;  %v2167_v9 = vld [vmem:[%s14433_s20 + $0x1028] sm:$0xff] }
 0x38b   : > { %9855 = vmatpush1.bf16.xpose.msra.mxu0 %v12973_v25  ;;  %9895 = vmatpush1.bf16.xpose.msra.mxu1 %v12975_v43  ;;  %v12980_v25 = vcombine.high %v1877_v20, %v1973_v38  ;;  %v1684_v43 = vld [vmem:[%s14433_s20 + $0x110] sm:$0xff] }
 0x38c   : > { %9856 = vmatprep.subr.bf16.mxu0 %v12782_v44  ;;  %9896 = vmatprep.subr.bf16.mxu1 %v12784_v3  ;;  %v1780_v44 = vld [vmem:[%s14433_s20 + $0x410] sm:$0xff]  ;;  %v1685_v3 = vld [vmem:[%s14433_s20 + $0x118] sm:$0xff] }
 0x38d   : > { %v12786_v49 = vcombine.high %v1684_v43, %v1780_v44  ;;  %v12788_v8 = vcombine.high %v1685_v3, %v1781_v47  ;;  %v12785_v40 = vcombine.low %v1684_v43, %v1780_v44  ;;  %v12787_v4 = vcombine.low %v1685_v3, %v1781_v47  ;;  %v1975_v43 = vld [vmem:[%s14433_s20 + $0xa28] sm:$0xff] }
 0x393   : > { %9857 = vmatpush1.bf16.xpose.msra.mxu0 %v12781_v35  ;;  %9897 = vmatpush1.bf16.xpose.msra.mxu1 %v12783_v55  ;;  %v2646_v35 = vld [vmem:[%s14433_s20 + $0x1f20] sm:$0xff] }
 0x394   : > { %9926 = vmatprep.subr.bf16.mxu0 %v13746_v58  ;;  %9966 = vmatprep.subr.bf16.mxu1 %v13748_v26  ;;  %v2742_v55 = vld [vmem:[%s14433_s20 + $0x2220] sm:$0xff]  ;;  %v2647_v58 = vld [vmem:[%s14433_s20 + $0x1f28] sm:$0xff] }
 0x395   : > { %v2743_v26 = vld [vmem:[%s14433_s20 + $0x2228] sm:$0xff] }
 0x396   : > { %v13752_v31 = vcombine.high %v2647_v58, %v2743_v26 }
 0x39a   : > { %v9556_v51 = vpop.f32.mrf.mxu0  ;;  %9875 = vmatmul.mubr.bf16.vlgmr.msra.gmra.mxu0 %v1521_v5  ;;  %v9596_v16 = vpop.f32.mrf.mxu1  ;;  %9915 = vmatmul.mubr.bf16.vlgmr.msra.gmra.mxu1 %v1523_v11  ;;  %v13750_v5 = vcombine.high %v2646_v35, %v2742_v55  ;;  %v2454_v11 = vld [vmem:[%s14433_s20 + $0x1920] sm:$0xff] }
 0x39b   : > { %v9557_v50 = vadd.f32 %v9556_v51, %v15133_v46  ;;  %9927 = vmatpush1.bf16.xpose.msra.mxu0 %v13745_v45  ;;  %9967 = vmatpush1.bf16.xpose.msra.mxu1 %v13747_v13  ;;  %v2550_v45 = vld [vmem:[%s14433_s20 + $0x1c20] sm:$0xff]  ;;  %v770_v13 = vcombine.high %v15199_v10, %v15199_v10  ;;  %v771_v51 = vcombine.high %v15202_v56, %v15202_v56 }
 0x39c   : > { %v9558_v2 = vpop.f32.mrf.mxu0  ;;  %9928 = vmatprep.subr.bf16.mxu0 %v13554_v57  ;;  %v9598_v41 = vpop.f32.mrf.mxu1  ;;  %9968 = vmatprep.subr.bf16.mxu1 %v13556_v36  ;;  %v1525_v57 = vpack.c.bf16 %v15157_v63, %v15157_v63  ;;  %v2455_v36 = vld [vmem:[%s14433_s20 + $0x1928] sm:$0xff] }
 0x39d   : > { %v15175_v53 = vadd.f32 %v9596_v16, %v9557_v50  ;;  %9954 = vmatprep.mubr.bf16.mxu0 %v1526_v62  ;;  %9994 = vmatprep.mubr.bf16.mxu1 %v1528_v15  ;;  %v2551_v62 = vld [vmem:[%s14433_s20 + $0x1c28] sm:$0xff]  ;;  %v1527_v15 = vpack.c.bf16 %v15160_v0, %v15160_v0  ;;  %v13749_v50 = vcombine.low %v2646_v35, %v2742_v55 }
 0x39e   : > { %v9559_v19 = vpop.f32.mrf.mxu0  ;;  %v9599_v46 = vpop.f32.mrf.mxu1  ;;  %v13751_v16 = vcombine.low %v2647_v58, %v2743_v26  ;;  %v13558_v2 = vcombine.high %v2454_v11, %v2550_v45  ;;  %v13560_v41 = vcombine.high %v2455_v36, %v2551_v62  ;;  %v1530_v18 = vpack.c.bf16 %v770_v13, %v770_v13 }
 0x39f   : > { %v1532_v19 = vpack.c.bf16 %v771_v51, %v771_v51  ;;  %v13559_v28 = vcombine.low %v2455_v36, %v2551_v62  ;;  %v15241_v62 = vrot.slane %v372_v1, %v14467_v24 }
 0x3a0   : > { %v9560_v6 = vpop.f32.mrf.mxu0  ;;  %v9600_v52 = vpop.f32.mrf.mxu1 }
 0x3a1   : > { %v2358_v6 = vld [vmem:[%s14433_s20 + $0x1620] sm:$0xff]  ;;  %v2359_v52 = vld [vmem:[%s14433_s20 + $0x1628] sm:$0xff] }
 0x3a3   : > { %9929 = vmatpush1.bf16.xpose.msra.mxu0 %v13553_v21  ;;  %9969 = vmatpush1.bf16.xpose.msra.mxu1 %v13555_v22  ;;  %v2262_v21 = vld [vmem:[%s14433_s20 + $0x1320] sm:$0xff] }
 0x3a4   : > { %9930 = vmatprep.subr.bf16.mxu0 %v13362_v23  ;;  %9970 = vmatprep.subr.bf16.mxu1 %v13364_v27  ;;  %v2263_v23 = vld [vmem:[%s14433_s20 + $0x1328] sm:$0xff]  ;;  %v13557_v27 = vcombine.low %v2454_v11, %v2550_v45  ;;  %v13366_v29 = vcombine.high %v2262_v21, %v2358_v6  ;;  %v13365_v37 = vcombine.low %v2262_v21, %v2358_v6 }
 0x3a5   : > { %v13367_v20 = vcombine.low %v2263_v23, %v2359_v52  ;;  %v772_v11 = vcombine.high %v372_v1, %v372_v1  ;;  %v1785_v1 = vld [vmem:[%s14433_s20 + $0x438] sm:$0xff] }
 0x3a7   : > { %v15244_v51 = vrot.slane %v772_v11, %v14467_v24  ;;  %v373_v11 = vld [vmem:[%s14451_s13 + $0xa0] sm:$0xff] }
 0x3ab   : > { %9931 = vmatpush1.bf16.xpose.msra.mxu0 %v13361_v32  ;;  %9971 = vmatpush1.bf16.xpose.msra.mxu1 %v13363_v17  ;;  %v13368_v32 = vcombine.high %v2263_v23, %v2359_v52  ;;  %v2070_v17 = vld [vmem:[%s14433_s20 + $0xd20] sm:$0xff] }
 0x3ac   : > { %9932 = vmatprep.subr.bf16.mxu0 %v13170_v33  ;;  %9972 = vmatprep.subr.bf16.mxu1 %v13172_v34  ;;  %v2166_v33 = vld [vmem:[%s14433_s20 + $0x1020] sm:$0xff]  ;;  %v2071_v34 = vld [vmem:[%s14433_s20 + $0xd28] sm:$0xff] }
 0x3ad   : > { %v13174_v38 = vcombine.high %v2070_v17, %v2166_v33  ;;  %v13173_v44 = vcombine.low %v2070_v17, %v2166_v33  ;;  %v13175_v3 = vcombine.low %v2071_v34, %v2167_v9 }
 0x3b3   : > { %9933 = vmatpush1.bf16.xpose.msra.mxu0 %v13169_v39  ;;  %9973 = vmatpush1.bf16.xpose.msra.mxu1 %v13171_v14  ;;  %v13176_v39 = vcombine.high %v2071_v34, %v2167_v9  ;;  %v1878_v14 = vld [vmem:[%s14433_s20 + $0x720] sm:$0xff] }
 0x3b4   : > { %9934 = vmatprep.subr.bf16.mxu0 %v12978_v42  ;;  %9974 = vmatprep.subr.bf16.mxu1 %v12980_v25  ;;  %v1974_v42 = vld [vmem:[%s14433_s20 + $0xa20] sm:$0xff]  ;;  %v1879_v25 = vld [vmem:[%s14433_s20 + $0x728] sm:$0xff] }
 0x3b5   : > { %v12982_v47 = vcombine.high %v1878_v14, %v1974_v42  ;;  %v12981_v35 = vcombine.low %v1878_v14, %v1974_v42  ;;  %v12983_v55 = vcombine.low %v1879_v25, %v1975_v43  ;;  %v2169_v14 = vld [vmem:[%s14433_s20 + $0x1038] sm:$0xff] }
 0x3bb   : > { %9935 = vmatpush1.bf16.xpose.msra.mxu0 %v12977_v30  ;;  %9975 = vmatpush1.bf16.xpose.msra.mxu1 %v12979_v48  ;;  %v12984_v30 = vcombine.high %v1879_v25, %v1975_v43  ;;  %v1686_v48 = vld [vmem:[%s14433_s20 + $0x120] sm:$0xff] }
 0x3bc   : > { %9936 = vmatprep.subr.bf16.mxu0 %v12786_v49  ;;  %9976 = vmatprep.subr.bf16.mxu1 %v12788_v8  ;;  %v1782_v49 = vld [vmem:[%s14433_s20 + $0x420] sm:$0xff]  ;;  %v1687_v8 = vld [vmem:[%s14433_s20 + $0x128] sm:$0xff] }
 0x3bd   : > { %v12790_v58 = vcombine.high %v1686_v48, %v1782_v49  ;;  %v12792_v26 = vcombine.high %v1687_v8, %v1783_v54  ;;  %v12789_v45 = vcombine.low %v1686_v48, %v1782_v49  ;;  %v12791_v13 = vcombine.low %v1687_v8, %v1783_v54  ;;  %v1977_v48 = vld [vmem:[%s14433_s20 + $0xa38] sm:$0xff] }
 0x3c3   : > { %9937 = vmatpush1.bf16.xpose.msra.mxu0 %v12785_v40  ;;  %9977 = vmatpush1.bf16.xpose.msra.mxu1 %v12787_v4  ;;  %v2648_v40 = vld [vmem:[%s14433_s20 + $0x1f30] sm:$0xff] }
 0x3c4   : > { %10006 = vmatprep.subr.bf16.mxu0 %v13750_v5  ;;  %10046 = vmatprep.subr.bf16.mxu1 %v13752_v31  ;;  %v2744_v4 = vld [vmem:[%s14433_s20 + $0x2230] sm:$0xff]  ;;  %v2649_v5 = vld [vmem:[%s14433_s20 + $0x1f38] sm:$0xff] }
 0x3c5   : > { %v2745_v31 = vld [vmem:[%s14433_s20 + $0x2238] sm:$0xff] }
 0x3c6   : > { %v13756_v36 = vcombine.high %v2649_v5, %v2745_v31 }
 0x3ca   : > { %v9636_v59 = vpop.f32.mrf.mxu0  ;;  %9955 = vmatmul.mubr.bf16.vlgmr.msra.gmra.mxu0 %v1525_v57  ;;  %v9676_v7 = vpop.f32.mrf.mxu1  ;;  %9995 = vmatmul.mubr.bf16.vlgmr.msra.gmra.mxu1 %v1527_v15  ;;  %v13754_v57 = vcombine.high %v2648_v40, %v2744_v4  ;;  %v2456_v15 = vld [vmem:[%s14433_s20 + $0x1930] sm:$0xff] }
 0x3cb   : > { %v9637_v63 = vadd.f32 %v9636_v59, %v15175_v53  ;;  %10007 = vmatpush1.bf16.xpose.msra.mxu0 %v13749_v50  ;;  %10047 = vmatpush1.bf16.xpose.msra.mxu1 %v13751_v16  ;;  %v2552_v50 = vld [vmem:[%s14433_s20 + $0x1c30] sm:$0xff]  ;;  %v787_v16 = vcombine.high %v15241_v62, %v15241_v62  ;;  %v788_v59 = vcombine.high %v15244_v51, %v15244_v51 }
 0x3cc   : > { %v9638_v12 = vpop.f32.mrf.mxu0  ;;  %10008 = vmatprep.subr.bf16.mxu0 %v13558_v2  ;;  %v9678_v46 = vpop.f32.mrf.mxu1  ;;  %10048 = vmatprep.subr.bf16.mxu1 %v13560_v41  ;;  %v1529_v2 = vpack.c.bf16 %v15199_v10, %v15199_v10  ;;  %v2457_v41 = vld [vmem:[%s14433_s20 + $0x1938] sm:$0xff] }
 0x3cd   : > { %v15217_v0 = vadd.f32 %v9676_v7, %v9637_v63  ;;  %10034 = vmatprep.mubr.bf16.mxu0 %v1530_v18  ;;  %10074 = vmatprep.mubr.bf16.mxu1 %v1532_v19  ;;  %v2553_v18 = vld [vmem:[%s14433_s20 + $0x1c38] sm:$0xff]  ;;  %v1531_v19 = vpack.c.bf16 %v15202_v56, %v15202_v56  ;;  %v13753_v63 = vcombine.low %v2648_v40, %v2744_v4 }
 0x3ce   : > { %v9639_v22 = vpop.f32.mrf.mxu0  ;;  %v9679_v53 = vpop.f32.mrf.mxu1  ;;  %v13755_v7 = vcombine.low %v2649_v5, %v2745_v31  ;;  %v13562_v12 = vcombine.high %v2456_v15, %v2552_v50  ;;  %v13564_v46 = vcombine.high %v2457_v41, %v2553_v18  ;;  %v1534_v21 = vpack.c.bf16 %v787_v16, %v787_v16 }
 0x3cf   : > { %v1536_v22 = vpack.c.bf16 %v788_v59, %v788_v59  ;;  %v13563_v33 = vcombine.low %v2457_v41, %v2553_v18  ;;  %v15283_v18 = vrot.slane %v373_v11, %v14467_v24 }
 0x3d0   : > { %v9640_v61 = vpop.f32.mrf.mxu0  ;;  %v9680_v60 = vpop.f32.mrf.mxu1 }
 0x3d1   : > { %v2360_v61 = vld [vmem:[%s14433_s20 + $0x1630] sm:$0xff]  ;;  %v2361_v60 = vld [vmem:[%s14433_s20 + $0x1638] sm:$0xff] }
 0x3d3   : > { %10009 = vmatpush1.bf16.xpose.msra.mxu0 %v13557_v27  ;;  %10049 = vmatpush1.bf16.xpose.msra.mxu1 %v13559_v28  ;;  %v2264_v27 = vld [vmem:[%s14433_s20 + $0x1330] sm:$0xff] }
 0x3d4   : > { %10010 = vmatprep.subr.bf16.mxu0 %v13366_v29  ;;  %10050 = vmatprep.subr.bf16.mxu1 %v13368_v32  ;;  %v2265_v29 = vld [vmem:[%s14433_s20 + $0x1338] sm:$0xff]  ;;  %v13561_v32 = vcombine.low %v2456_v15, %v2552_v50  ;;  %v13370_v34 = vcombine.high %v2264_v27, %v2360_v61  ;;  %v13369_v42 = vcombine.low %v2264_v27, %v2360_v61 }
 0x3d5   : > { %v13371_v25 = vcombine.low %v2265_v29, %v2361_v60  ;;  %v789_v15 = vcombine.high %v373_v11, %v373_v11  ;;  %v1787_v11 = vld [vmem:[%s14433_s20 + $0x448] sm:$0xff] }
 0x3d7   : > { %v15286_v59 = vrot.slane %v789_v15, %v14467_v24  ;;  %v374_v15 = vld [vmem:[%s14451_s13 + $0xa8] sm:$0xff] }
 0x3db   : > { %10011 = vmatpush1.bf16.xpose.msra.mxu0 %v13365_v37  ;;  %10051 = vmatpush1.bf16.xpose.msra.mxu1 %v13367_v20  ;;  %v13372_v37 = vcombine.high %v2265_v29, %v2361_v60  ;;  %v2072_v20 = vld [vmem:[%s14433_s20 + $0xd30] sm:$0xff] }
 0x3dc   : > { %10012 = vmatprep.subr.bf16.mxu0 %v13174_v38  ;;  %10052 = vmatprep.subr.bf16.mxu1 %v13176_v39  ;;  %v2168_v38 = vld [vmem:[%s14433_s20 + $0x1030] sm:$0xff]  ;;  %v2073_v39 = vld [vmem:[%s14433_s20 + $0xd38] sm:$0xff] }
 0x3dd   : > { %v13178_v43 = vcombine.high %v2072_v20, %v2168_v38  ;;  %v13177_v49 = vcombine.low %v2072_v20, %v2168_v38  ;;  %v13179_v8 = vcombine.low %v2073_v39, %v2169_v14 }
 0x3e3   : > { %10013 = vmatpush1.bf16.xpose.msra.mxu0 %v13173_v44  ;;  %10053 = vmatpush1.bf16.xpose.msra.mxu1 %v13175_v3  ;;  %v13180_v44 = vcombine.high %v2073_v39, %v2169_v14  ;;  %v1880_v3 = vld [vmem:[%s14433_s20 + $0x730] sm:$0xff] }
 0x3e4   : > { %10014 = vmatprep.subr.bf16.mxu0 %v12982_v47  ;;  %10054 = vmatprep.subr.bf16.mxu1 %v12984_v30  ;;  %v1976_v47 = vld [vmem:[%s14433_s20 + $0xa30] sm:$0xff]  ;;  %v1881_v30 = vld [vmem:[%s14433_s20 + $0x738] sm:$0xff] }
 0x3e5   : > { %v12986_v54 = vcombine.high %v1880_v3, %v1976_v47  ;;  %v12985_v40 = vcombine.low %v1880_v3, %v1976_v47  ;;  %v12987_v4 = vcombine.low %v1881_v30, %v1977_v48  ;;  %v2171_v3 = vld [vmem:[%s14433_s20 + $0x1048] sm:$0xff] }
 0x3eb   : > { %10015 = vmatpush1.bf16.xpose.msra.mxu0 %v12981_v35  ;;  %10055 = vmatpush1.bf16.xpose.msra.mxu1 %v12983_v55  ;;  %v12988_v35 = vcombine.high %v1881_v30, %v1977_v48  ;;  %v1688_v55 = vld [vmem:[%s14433_s20 + $0x130] sm:$0xff] }
 0x3ec   : > { %10016 = vmatprep.subr.bf16.mxu0 %v12790_v58  ;;  %10056 = vmatprep.subr.bf16.mxu1 %v12792_v26  ;;  %v1784_v58 = vld [vmem:[%s14433_s20 + $0x430] sm:$0xff]  ;;  %v1689_v26 = vld [vmem:[%s14433_s20 + $0x138] sm:$0xff] }
 0x3ed   : > { %v12794_v5 = vcombine.high %v1688_v55, %v1784_v58  ;;  %v12796_v31 = vcombine.high %v1689_v26, %v1785_v1  ;;  %v12793_v50 = vcombine.low %v1688_v55, %v1784_v58  ;;  %v12795_v16 = vcombine.low %v1689_v26, %v1785_v1  ;;  %v1979_v55 = vld [vmem:[%s14433_s20 + $0xa48] sm:$0xff] }
 0x3f3   : > { %10017 = vmatpush1.bf16.xpose.msra.mxu0 %v12789_v45  ;;  %10057 = vmatpush1.bf16.xpose.msra.mxu1 %v12791_v13  ;;  %v2650_v45 = vld [vmem:[%s14433_s20 + $0x1f40] sm:$0xff] }
 0x3f4   : > { %10086 = vmatprep.subr.bf16.mxu0 %v13754_v57  ;;  %10126 = vmatprep.subr.bf16.mxu1 %v13756_v36  ;;  %v2746_v13 = vld [vmem:[%s14433_s20 + $0x2240] sm:$0xff]  ;;  %v2651_v57 = vld [vmem:[%s14433_s20 + $0x1f48] sm:$0xff] }
 0x3f5   : > { %v2747_v36 = vld [vmem:[%s14433_s20 + $0x2248] sm:$0xff] }
 0x3f6   : > { %v13760_v41 = vcombine.high %v2651_v57, %v2747_v36 }
 0x3fa   : > { %v9716_v6 = vpop.f32.mrf.mxu0  ;;  %10035 = vmatmul.mubr.bf16.vlgmr.msra.gmra.mxu0 %v1529_v2  ;;  %v9756_v23 = vpop.f32.mrf.mxu1  ;;  %10075 = vmatmul.mubr.bf16.vlgmr.msra.gmra.mxu1 %v1531_v19  ;;  %v13758_v2 = vcombine.high %v2650_v45, %v2746_v13  ;;  %v2458_v19 = vld [vmem:[%s14433_s20 + $0x1940] sm:$0xff] }
 0x3fb   : > { %v9717_v10 = vadd.f32 %v9716_v6, %v15217_v0  ;;  %10087 = vmatpush1.bf16.xpose.msra.mxu0 %v13753_v63  ;;  %10127 = vmatpush1.bf16.xpose.msra.mxu1 %v13755_v7  ;;  %v2554_v63 = vld [vmem:[%s14433_s20 + $0x1c40] sm:$0xff]  ;;  %v804_v7 = vcombine.high %v15283_v18, %v15283_v18  ;;  %v805_v6 = vcombine.high %v15286_v59, %v15286_v59 }
 0x3fc   : > { %v9718_v52 = vpop.f32.mrf.mxu0  ;;  %10088 = vmatprep.subr.bf16.mxu0 %v13562_v12  ;;  %v9758_v53 = vpop.f32.mrf.mxu1  ;;  %10128 = vmatprep.subr.bf16.mxu1 %v13564_v46  ;;  %v1533_v12 = vpack.c.bf16 %v15241_v62, %v15241_v62  ;;  %v2459_v46 = vld [vmem:[%s14433_s20 + $0x1948] sm:$0xff] }
 0x3fd   : > { %v15259_v56 = vadd.f32 %v9756_v23, %v9717_v10  ;;  %10114 = vmatprep.mubr.bf16.mxu0 %v1534_v21  ;;  %10154 = vmatprep.mubr.bf16.mxu1 %v1536_v22  ;;  %v2555_v21 = vld [vmem:[%s14433_s20 + $0x1c48] sm:$0xff]  ;;  %v1535_v22 = vpack.c.bf16 %v15244_v51, %v15244_v51  ;;  %v13757_v10 = vcombine.low %v2650_v45, %v2746_v13 }
 0x3fe   : > { %v9719_v28 = vpop.f32.mrf.mxu0  ;;  %v9759_v0 = vpop.f32.mrf.mxu1  ;;  %v13759_v23 = vcombine.low %v2651_v57, %v2747_v36  ;;  %v13566_v52 = vcombine.high %v2458_v19, %v2554_v63  ;;  %v13568_v53 = vcombine.high %v2459_v46, %v2555_v21  ;;  %v1538_v27 = vpack.c.bf16 %v804_v7, %v804_v7 }
 0x3ff   : > { %v1540_v28 = vpack.c.bf16 %v805_v6, %v805_v6  ;;  %v13567_v38 = vcombine.low %v2459_v46, %v2555_v21  ;;  %v15325_v21 = vrot.slane %v374_v15, %v14467_v24 }
 0x400   : > { %v9720_v17 = vpop.f32.mrf.mxu0  ;;  %v9760_v9 = vpop.f32.mrf.mxu1 }
 0x401   : > { %v2362_v17 = vld [vmem:[%s14433_s20 + $0x1640] sm:$0xff]  ;;  %v2363_v9 = vld [vmem:[%s14433_s20 + $0x1648] sm:$0xff] }
 0x403   : > { %10089 = vmatpush1.bf16.xpose.msra.mxu0 %v13561_v32  ;;  %10129 = vmatpush1.bf16.xpose.msra.mxu1 %v13563_v33  ;;  %v2266_v32 = vld [vmem:[%s14433_s20 + $0x1340] sm:$0xff] }
 0x404   : > { %10090 = vmatprep.subr.bf16.mxu0 %v13370_v34  ;;  %10130 = vmatprep.subr.bf16.mxu1 %v13372_v37  ;;  %v2267_v34 = vld [vmem:[%s14433_s20 + $0x1348] sm:$0xff]  ;;  %v13565_v37 = vcombine.low %v2458_v19, %v2554_v63  ;;  %v13374_v39 = vcombine.high %v2266_v32, %v2362_v17  ;;  %v13373_v47 = vcombine.low %v2266_v32, %v2362_v17 }
 0x405   : > { %v13375_v30 = vcombine.low %v2267_v34, %v2363_v9  ;;  %v806_v19 = vcombine.high %v374_v15, %v374_v15  ;;  %v1789_v15 = vld [vmem:[%s14433_s20 + $0x458] sm:$0xff] }
 0x407   : > { %v15328_v6 = vrot.slane %v806_v19, %v14467_v24  ;;  %v375_v19 = vld [vmem:[%s14451_s13 + $0xb0] sm:$0xff] }
 0x40b   : > { %10091 = vmatpush1.bf16.xpose.msra.mxu0 %v13369_v42  ;;  %10131 = vmatpush1.bf16.xpose.msra.mxu1 %v13371_v25  ;;  %v13376_v42 = vcombine.high %v2267_v34, %v2363_v9  ;;  %v2074_v25 = vld [vmem:[%s14433_s20 + $0xd40] sm:$0xff] }
 0x40c   : > { %10092 = vmatprep.subr.bf16.mxu0 %v13178_v43  ;;  %10132 = vmatprep.subr.bf16.mxu1 %v13180_v44  ;;  %v2170_v43 = vld [vmem:[%s14433_s20 + $0x1040] sm:$0xff]  ;;  %v2075_v44 = vld [vmem:[%s14433_s20 + $0xd48] sm:$0xff] }
 0x40d   : > { %v13182_v48 = vcombine.high %v2074_v25, %v2170_v43  ;;  %v13181_v58 = vcombine.low %v2074_v25, %v2170_v43  ;;  %v13183_v26 = vcombine.low %v2075_v44, %v2171_v3 }
 0x413   : > { %10093 = vmatpush1.bf16.xpose.msra.mxu0 %v13177_v49  ;;  %10133 = vmatpush1.bf16.xpose.msra.mxu1 %v13179_v8  ;;  %v13184_v49 = vcombine.high %v2075_v44, %v2171_v3  ;;  %v1882_v8 = vld [vmem:[%s14433_s20 + $0x740] sm:$0xff] }
 0x414   : > { %10094 = vmatprep.subr.bf16.mxu0 %v12986_v54  ;;  %10134 = vmatprep.subr.bf16.mxu1 %v12988_v35  ;;  %v1978_v54 = vld [vmem:[%s14433_s20 + $0xa40] sm:$0xff]  ;;  %v1883_v35 = vld [vmem:[%s14433_s20 + $0x748] sm:$0xff] }
 0x415   : > { %v12990_v1 = vcombine.high %v1882_v8, %v1978_v54  ;;  %v12989_v45 = vcombine.low %v1882_v8, %v1978_v54  ;;  %v12991_v13 = vcombine.low %v1883_v35, %v1979_v55  ;;  %v2173_v8 = vld [vmem:[%s14433_s20 + $0x1058] sm:$0xff] }
 0x41b   : > { %10095 = vmatpush1.bf16.xpose.msra.mxu0 %v12985_v40  ;;  %10135 = vmatpush1.bf16.xpose.msra.mxu1 %v12987_v4  ;;  %v12992_v40 = vcombine.high %v1883_v35, %v1979_v55  ;;  %v1690_v4 = vld [vmem:[%s14433_s20 + $0x140] sm:$0xff] }
 0x41c   : > { %10096 = vmatprep.subr.bf16.mxu0 %v12794_v5  ;;  %10136 = vmatprep.subr.bf16.mxu1 %v12796_v31  ;;  %v1786_v5 = vld [vmem:[%s14433_s20 + $0x440] sm:$0xff]  ;;  %v1691_v31 = vld [vmem:[%s14433_s20 + $0x148] sm:$0xff] }
 0x41d   : > { %v12798_v57 = vcombine.high %v1690_v4, %v1786_v5  ;;  %v12800_v36 = vcombine.high %v1691_v31, %v1787_v11  ;;  %v12797_v63 = vcombine.low %v1690_v4, %v1786_v5  ;;  %v12799_v7 = vcombine.low %v1691_v31, %v1787_v11  ;;  %v1981_v4 = vld [vmem:[%s14433_s20 + $0xa58] sm:$0xff] }
 0x423   : > { %10097 = vmatpush1.bf16.xpose.msra.mxu0 %v12793_v50  ;;  %10137 = vmatpush1.bf16.xpose.msra.mxu1 %v12795_v16  ;;  %v2652_v50 = vld [vmem:[%s14433_s20 + $0x1f50] sm:$0xff] }
 0x424   : > { %10166 = vmatprep.subr.bf16.mxu0 %v13758_v2  ;;  %10206 = vmatprep.subr.bf16.mxu1 %v13760_v41  ;;  %v2748_v16 = vld [vmem:[%s14433_s20 + $0x2250] sm:$0xff]  ;;  %v2653_v2 = vld [vmem:[%s14433_s20 + $0x1f58] sm:$0xff] }
 0x425   : > { %v2749_v41 = vld [vmem:[%s14433_s20 + $0x2258] sm:$0xff] }
 0x426   : > { %v13764_v46 = vcombine.high %v2653_v2, %v2749_v41 }
 0x42a   : > { %v9796_v61 = vpop.f32.mrf.mxu0  ;;  %10115 = vmatmul.mubr.bf16.vlgmr.msra.gmra.mxu0 %v1533_v12  ;;  %v9836_v29 = vpop.f32.mrf.mxu1  ;;  %10155 = vmatmul.mubr.bf16.vlgmr.msra.gmra.mxu1 %v1535_v22  ;;  %v13762_v12 = vcombine.high %v2652_v50, %v2748_v16  ;;  %v2460_v22 = vld [vmem:[%s14433_s20 + $0x1950] sm:$0xff] }
 0x42b   : > { %v9797_v62 = vadd.f32 %v9796_v61, %v15259_v56  ;;  %10167 = vmatpush1.bf16.xpose.msra.mxu0 %v13757_v10  ;;  %10207 = vmatpush1.bf16.xpose.msra.mxu1 %v13759_v23  ;;  %v2556_v10 = vld [vmem:[%s14433_s20 + $0x1c50] sm:$0xff]  ;;  %v821_v23 = vcombine.high %v15325_v21, %v15325_v21  ;;  %v822_v61 = vcombine.high %v15328_v6, %v15328_v6 }
 0x42c   : > { %v9798_v60 = vpop.f32.mrf.mxu0  ;;  %10168 = vmatprep.subr.bf16.mxu0 %v13566_v52  ;;  %v9838_v0 = vpop.f32.mrf.mxu1  ;;  %10208 = vmatprep.subr.bf16.mxu1 %v13568_v53  ;;  %v1537_v52 = vpack.c.bf16 %v15283_v18, %v15283_v18  ;;  %v2461_v53 = vld [vmem:[%s14433_s20 + $0x1958] sm:$0xff] }
 0x42d   : > { %v15301_v51 = vadd.f32 %v9836_v29, %v9797_v62  ;;  %10194 = vmatprep.mubr.bf16.mxu0 %v1538_v27  ;;  %10234 = vmatprep.mubr.bf16.mxu1 %v1540_v28  ;;  %v2557_v27 = vld [vmem:[%s14433_s20 + $0x1c58] sm:$0xff]  ;;  %v1539_v28 = vpack.c.bf16 %v15286_v59, %v15286_v59  ;;  %v13761_v62 = vcombine.low %v2652_v50, %v2748_v16 }
 0x42e   : > { %v9799_v33 = vpop.f32.mrf.mxu0  ;;  %v9839_v56 = vpop.f32.mrf.mxu1  ;;  %v13763_v29 = vcombine.low %v2653_v2, %v2749_v41  ;;  %v13570_v60 = vcombine.high %v2460_v22, %v2556_v10  ;;  %v13572_v0 = vcombine.high %v2461_v53, %v2557_v27  ;;  %v1542_v32 = vpack.c.bf16 %v821_v23, %v821_v23 }
 0x42f   : > { %v1544_v33 = vpack.c.bf16 %v822_v61, %v822_v61  ;;  %v13571_v43 = vcombine.low %v2461_v53, %v2557_v27  ;;  %v15367_v27 = vrot.slane %v375_v19, %v14467_v24 }
 0x430   : > { %v9800_v20 = vpop.f32.mrf.mxu0  ;;  %v9840_v14 = vpop.f32.mrf.mxu1 }
 0x431   : > { %v2364_v20 = vld [vmem:[%s14433_s20 + $0x1650] sm:$0xff]  ;;  %v2365_v14 = vld [vmem:[%s14433_s20 + $0x1658] sm:$0xff] }
 0x433   : > { %10169 = vmatpush1.bf16.xpose.msra.mxu0 %v13565_v37  ;;  %10209 = vmatpush1.bf16.xpose.msra.mxu1 %v13567_v38  ;;  %v2268_v37 = vld [vmem:[%s14433_s20 + $0x1350] sm:$0xff] }
 0x434   : > { %10170 = vmatprep.subr.bf16.mxu0 %v13374_v39  ;;  %10210 = vmatprep.subr.bf16.mxu1 %v13376_v42  ;;  %v2269_v39 = vld [vmem:[%s14433_s20 + $0x1358] sm:$0xff]  ;;  %v13569_v42 = vcombine.low %v2460_v22, %v2556_v10  ;;  %v13378_v44 = vcombine.high %v2268_v37, %v2364_v20  ;;  %v13377_v54 = vcombine.low %v2268_v37, %v2364_v20 }
 0x435   : > { %v13379_v35 = vcombine.low %v2269_v39, %v2365_v14  ;;  %v823_v22 = vcombine.high %v375_v19, %v375_v19  ;;  %v1791_v19 = vld [vmem:[%s14433_s20 + $0x468] sm:$0xff] }
 0x437   : > { %v15370_v61 = vrot.slane %v823_v22, %v14467_v24  ;;  %v376_v22 = vld [vmem:[%s14451_s13 + $0xb8] sm:$0xff] }
 0x43b   : > { %10171 = vmatpush1.bf16.xpose.msra.mxu0 %v13373_v47  ;;  %10211 = vmatpush1.bf16.xpose.msra.mxu1 %v13375_v30  ;;  %v13380_v47 = vcombine.high %v2269_v39, %v2365_v14  ;;  %v2076_v30 = vld [vmem:[%s14433_s20 + $0xd50] sm:$0xff] }
 0x43c   : > { %10172 = vmatprep.subr.bf16.mxu0 %v13182_v48  ;;  %10212 = vmatprep.subr.bf16.mxu1 %v13184_v49  ;;  %v2172_v48 = vld [vmem:[%s14433_s20 + $0x1050] sm:$0xff]  ;;  %v2077_v49 = vld [vmem:[%s14433_s20 + $0xd58] sm:$0xff] }
 0x43d   : > { %v13186_v55 = vcombine.high %v2076_v30, %v2172_v48  ;;  %v13185_v5 = vcombine.low %v2076_v30, %v2172_v48  ;;  %v13187_v31 = vcombine.low %v2077_v49, %v2173_v8 }
 0x443   : > { %10173 = vmatpush1.bf16.xpose.msra.mxu0 %v13181_v58  ;;  %10213 = vmatpush1.bf16.xpose.msra.mxu1 %v13183_v26  ;;  %v13188_v58 = vcombine.high %v2077_v49, %v2173_v8  ;;  %v1884_v26 = vld [vmem:[%s14433_s20 + $0x750] sm:$0xff] }
 0x444   : > { %10174 = vmatprep.subr.bf16.mxu0 %v12990_v1  ;;  %10214 = vmatprep.subr.bf16.mxu1 %v12992_v40  ;;  %v1980_v1 = vld [vmem:[%s14433_s20 + $0xa50] sm:$0xff]  ;;  %v1885_v40 = vld [vmem:[%s14433_s20 + $0x758] sm:$0xff] }
 0x445   : > { %v12994_v11 = vcombine.high %v1884_v26, %v1980_v1  ;;  %v12993_v50 = vcombine.low %v1884_v26, %v1980_v1  ;;  %v12995_v16 = vcombine.low %v1885_v40, %v1981_v4  ;;  %v2175_v26 = vld [vmem:[%s14433_s20 + $0x1068] sm:$0xff] }
 0x44b   : > { %10175 = vmatpush1.bf16.xpose.msra.mxu0 %v12989_v45  ;;  %10215 = vmatpush1.bf16.xpose.msra.mxu1 %v12991_v13  ;;  %v12996_v45 = vcombine.high %v1885_v40, %v1981_v4  ;;  %v1692_v13 = vld [vmem:[%s14433_s20 + $0x150] sm:$0xff] }
 0x44c   : > { %10176 = vmatprep.subr.bf16.mxu0 %v12798_v57  ;;  %10216 = vmatprep.subr.bf16.mxu1 %v12800_v36  ;;  %v1788_v57 = vld [vmem:[%s14433_s20 + $0x450] sm:$0xff]  ;;  %v1693_v36 = vld [vmem:[%s14433_s20 + $0x158] sm:$0xff] }
 0x44d   : > { %v12802_v2 = vcombine.high %v1692_v13, %v1788_v57  ;;  %v12804_v41 = vcombine.high %v1693_v36, %v1789_v15  ;;  %v12801_v10 = vcombine.low %v1692_v13, %v1788_v57  ;;  %v12803_v23 = vcombine.low %v1693_v36, %v1789_v15  ;;  %v1983_v13 = vld [vmem:[%s14433_s20 + $0xa68] sm:$0xff] }
 0x453   : > { %10177 = vmatpush1.bf16.xpose.msra.mxu0 %v12797_v63  ;;  %10217 = vmatpush1.bf16.xpose.msra.mxu1 %v12799_v7  ;;  %v2654_v63 = vld [vmem:[%s14433_s20 + $0x1f60] sm:$0xff] }
 0x454   : > { %10246 = vmatprep.subr.bf16.mxu0 %v13762_v12  ;;  %10286 = vmatprep.subr.bf16.mxu1 %v13764_v46  ;;  %v2750_v7 = vld [vmem:[%s14433_s20 + $0x2260] sm:$0xff]  ;;  %v2655_v12 = vld [vmem:[%s14433_s20 + $0x1f68] sm:$0xff] }
 0x455   : > { %v2751_v46 = vld [vmem:[%s14433_s20 + $0x2268] sm:$0xff] }
 0x456   : > { %v13768_v53 = vcombine.high %v2655_v12, %v2751_v46 }
 0x45a   : > { %v9876_v17 = vpop.f32.mrf.mxu0  ;;  %10195 = vmatmul.mubr.bf16.vlgmr.msra.gmra.mxu0 %v1537_v52  ;;  %v9916_v34 = vpop.f32.mrf.mxu1  ;;  %10235 = vmatmul.mubr.bf16.vlgmr.msra.gmra.mxu1 %v1539_v28  ;;  %v13766_v52 = vcombine.high %v2654_v63, %v2750_v7  ;;  %v2462_v28 = vld [vmem:[%s14433_s20 + $0x1960] sm:$0xff] }
 0x45b   : > { %v9877_v18 = vadd.f32 %v9876_v17, %v15301_v51  ;;  %10247 = vmatpush1.bf16.xpose.msra.mxu0 %v13761_v62  ;;  %10287 = vmatpush1.bf16.xpose.msra.mxu1 %v13763_v29  ;;  %v2558_v62 = vld [vmem:[%s14433_s20 + $0x1c60] sm:$0xff]  ;;  %v838_v29 = vcombine.high %v15367_v27, %v15367_v27  ;;  %v839_v17 = vcombine.high %v15370_v61, %v15370_v61 }
 0x45c   : > { %v9878_v9 = vpop.f32.mrf.mxu0  ;;  %10248 = vmatprep.subr.bf16.mxu0 %v13570_v60  ;;  %v9918_v56 = vpop.f32.mrf.mxu1  ;;  %10288 = vmatprep.subr.bf16.mxu1 %v13572_v0  ;;  %v1541_v60 = vpack.c.bf16 %v15325_v21, %v15325_v21  ;;  %v2463_v0 = vld [vmem:[%s14433_s20 + $0x1968] sm:$0xff] }
 0x45d   : > { %v15343_v59 = vadd.f32 %v9916_v34, %v9877_v18  ;;  %10274 = vmatprep.mubr.bf16.mxu0 %v1542_v32  ;;  %10314 = vmatprep.mubr.bf16.mxu1 %v1544_v33  ;;  %v2559_v32 = vld [vmem:[%s14433_s20 + $0x1c68] sm:$0xff]  ;;  %v1543_v33 = vpack.c.bf16 %v15328_v6, %v15328_v6  ;;  %v13765_v18 = vcombine.low %v2654_v63, %v2750_v7 }
 0x45e   : > { %v9879_v38 = vpop.f32.mrf.mxu0  ;;  %v9919_v51 = vpop.f32.mrf.mxu1  ;;  %v13767_v34 = vcombine.low %v2655_v12, %v2751_v46  ;;  %v13574_v9 = vcombine.high %v2462_v28, %v2558_v62  ;;  %v13576_v56 = vcombine.high %v2463_v0, %v2559_v32  ;;  %v1546_v37 = vpack.c.bf16 %v838_v29, %v838_v29 }
 0x45f   : > { %v1548_v38 = vpack.c.bf16 %v839_v17, %v839_v17  ;;  %v13575_v48 = vcombine.low %v2463_v0, %v2559_v32  ;;  %v15409_v32 = vrot.slane %v376_v22, %v14467_v24 }
 0x460   : > { %v9880_v25 = vpop.f32.mrf.mxu0  ;;  %v9920_v3 = vpop.f32.mrf.mxu1 }
 0x461   : > { %v2366_v25 = vld [vmem:[%s14433_s20 + $0x1660] sm:$0xff]  ;;  %v2367_v3 = vld [vmem:[%s14433_s20 + $0x1668] sm:$0xff] }
 0x463   : > { %10249 = vmatpush1.bf16.xpose.msra.mxu0 %v13569_v42  ;;  %10289 = vmatpush1.bf16.xpose.msra.mxu1 %v13571_v43  ;;  %v2270_v42 = vld [vmem:[%s14433_s20 + $0x1360] sm:$0xff] }
 0x464   : > { %10250 = vmatprep.subr.bf16.mxu0 %v13378_v44  ;;  %10290 = vmatprep.subr.bf16.mxu1 %v13380_v47  ;;  %v2271_v44 = vld [vmem:[%s14433_s20 + $0x1368] sm:$0xff]  ;;  %v13573_v47 = vcombine.low %v2462_v28, %v2558_v62  ;;  %v13382_v49 = vcombine.high %v2270_v42, %v2366_v25  ;;  %v13381_v1 = vcombine.low %v2270_v42, %v2366_v25 }
 0x465   : > { %v13383_v40 = vcombine.low %v2271_v44, %v2367_v3  ;;  %v840_v28 = vcombine.high %v376_v22, %v376_v22  ;;  %v1793_v22 = vld [vmem:[%s14433_s20 + $0x478] sm:$0xff] }
 0x467   : > { %v15412_v17 = vrot.slane %v840_v28, %v14467_v24  ;;  %v377_v28 = vld [vmem:[%s14451_s13 + $0xc0] sm:$0xff] }
 0x46b   : > { %10251 = vmatpush1.bf16.xpose.msra.mxu0 %v13377_v54  ;;  %10291 = vmatpush1.bf16.xpose.msra.mxu1 %v13379_v35  ;;  %v13384_v54 = vcombine.high %v2271_v44, %v2367_v3  ;;  %v2078_v35 = vld [vmem:[%s14433_s20 + $0xd60] sm:$0xff] }
 0x46c   : > { %10252 = vmatprep.subr.bf16.mxu0 %v13186_v55  ;;  %10292 = vmatprep.subr.bf16.mxu1 %v13188_v58  ;;  %v2174_v55 = vld [vmem:[%s14433_s20 + $0x1060] sm:$0xff]  ;;  %v2079_v58 = vld [vmem:[%s14433_s20 + $0xd68] sm:$0xff] }
 0x46d   : > { %v13190_v4 = vcombine.high %v2078_v35, %v2174_v55  ;;  %v13189_v57 = vcombine.low %v2078_v35, %v2174_v55  ;;  %v13191_v36 = vcombine.low %v2079_v58, %v2175_v26 }
 0x473   : > { %10253 = vmatpush1.bf16.xpose.msra.mxu0 %v13185_v5  ;;  %10293 = vmatpush1.bf16.xpose.msra.mxu1 %v13187_v31  ;;  %v13192_v5 = vcombine.high %v2079_v58, %v2175_v26  ;;  %v1886_v31 = vld [vmem:[%s14433_s20 + $0x760] sm:$0xff] }
 0x474   : > { %10254 = vmatprep.subr.bf16.mxu0 %v12994_v11  ;;  %10294 = vmatprep.subr.bf16.mxu1 %v12996_v45  ;;  %v1982_v11 = vld [vmem:[%s14433_s20 + $0xa60] sm:$0xff]  ;;  %v1887_v45 = vld [vmem:[%s14433_s20 + $0x768] sm:$0xff] }
 0x475   : > { %v12998_v15 = vcombine.high %v1886_v31, %v1982_v11  ;;  %v12997_v63 = vcombine.low %v1886_v31, %v1982_v11  ;;  %v12999_v7 = vcombine.low %v1887_v45, %v1983_v13  ;;  %v2177_v31 = vld [vmem:[%s14433_s20 + $0x1078] sm:$0xff] }
 0x47b   : > { %10255 = vmatpush1.bf16.xpose.msra.mxu0 %v12993_v50  ;;  %10295 = vmatpush1.bf16.xpose.msra.mxu1 %v12995_v16  ;;  %v13000_v50 = vcombine.high %v1887_v45, %v1983_v13  ;;  %v1694_v16 = vld [vmem:[%s14433_s20 + $0x160] sm:$0xff] }
 0x47c   : > { %10256 = vmatprep.subr.bf16.mxu0 %v12802_v2  ;;  %10296 = vmatprep.subr.bf16.mxu1 %v12804_v41  ;;  %v1790_v2 = vld [vmem:[%s14433_s20 + $0x460] sm:$0xff]  ;;  %v1695_v41 = vld [vmem:[%s14433_s20 + $0x168] sm:$0xff] }
 0x47d   : > { %v12806_v12 = vcombine.high %v1694_v16, %v1790_v2  ;;  %v12808_v46 = vcombine.high %v1695_v41, %v1791_v19  ;;  %v12805_v62 = vcombine.low %v1694_v16, %v1790_v2  ;;  %v12807_v29 = vcombine.low %v1695_v41, %v1791_v19  ;;  %v1985_v16 = vld [vmem:[%s14433_s20 + $0xa78] sm:$0xff] }
 0x483   : > { %10257 = vmatpush1.bf16.xpose.msra.mxu0 %v12801_v10  ;;  %10297 = vmatpush1.bf16.xpose.msra.mxu1 %v12803_v23  ;;  %v2656_v10 = vld [vmem:[%s14433_s20 + $0x1f70] sm:$0xff] }
 0x484   : > { %10326 = vmatprep.subr.bf16.mxu0 %v13766_v52  ;;  %10366 = vmatprep.subr.bf16.mxu1 %v13768_v53  ;;  %v2752_v23 = vld [vmem:[%s14433_s20 + $0x2270] sm:$0xff]  ;;  %v2657_v52 = vld [vmem:[%s14433_s20 + $0x1f78] sm:$0xff] }
 0x485   : > { %v2753_v53 = vld [vmem:[%s14433_s20 + $0x2278] sm:$0xff] }
 0x486   : > { %v13772_v0 = vcombine.high %v2657_v52, %v2753_v53 }
 0x48a   : > { %v9956_v20 = vpop.f32.mrf.mxu0  ;;  %10275 = vmatmul.mubr.bf16.vlgmr.msra.gmra.mxu0 %v1541_v60  ;;  %v9996_v39 = vpop.f32.mrf.mxu1  ;;  %10315 = vmatmul.mubr.bf16.vlgmr.msra.gmra.mxu1 %v1543_v33  ;;  %v13770_v60 = vcombine.high %v2656_v10, %v2752_v23  ;;  %v2464_v33 = vld [vmem:[%s14433_s20 + $0x1970] sm:$0xff] }
 0x48b   : > { %v9957_v21 = vadd.f32 %v9956_v20, %v15343_v59  ;;  %10327 = vmatpush1.bf16.xpose.msra.mxu0 %v13765_v18  ;;  %10367 = vmatpush1.bf16.xpose.msra.mxu1 %v13767_v34  ;;  %v2560_v18 = vld [vmem:[%s14433_s20 + $0x1c70] sm:$0xff]  ;;  %v855_v34 = vcombine.high %v15409_v32, %v15409_v32  ;;  %v856_v20 = vcombine.high %v15412_v17, %v15412_v17 }
 0x48c   : > { %v9958_v14 = vpop.f32.mrf.mxu0  ;;  %10328 = vmatprep.subr.bf16.mxu0 %v13574_v9  ;;  %v9998_v51 = vpop.f32.mrf.mxu1  ;;  %10368 = vmatprep.subr.bf16.mxu1 %v13576_v56  ;;  %v1545_v9 = vpack.c.bf16 %v15367_v27, %v15367_v27  ;;  %v2465_v56 = vld [vmem:[%s14433_s20 + $0x1978] sm:$0xff] }
 0x48d   : > { %v15385_v6 = vadd.f32 %v9996_v39, %v9957_v21  ;;  %10354 = vmatprep.mubr.bf16.mxu0 %v1546_v37  ;;  %10394 = vmatprep.mubr.bf16.mxu1 %v1548_v38  ;;  %v2561_v37 = vld [vmem:[%s14433_s20 + $0x1c78] sm:$0xff]  ;;  %v1547_v38 = vpack.c.bf16 %v15370_v61, %v15370_v61  ;;  %v13769_v21 = vcombine.low %v2656_v10, %v2752_v23 }
 0x48e   : > { %v9959_v43 = vpop.f32.mrf.mxu0  ;;  %v9999_v59 = vpop.f32.mrf.mxu1  ;;  %v13771_v39 = vcombine.low %v2657_v52, %v2753_v53  ;;  %v13578_v14 = vcombine.high %v2464_v33, %v2560_v18  ;;  %v13580_v51 = vcombine.high %v2465_v56, %v2561_v37  ;;  %v1550_v42 = vpack.c.bf16 %v855_v34, %v855_v34 }
 0x48f   : > { %v1552_v43 = vpack.c.bf16 %v856_v20, %v856_v20  ;;  %v13579_v55 = vcombine.low %v2465_v56, %v2561_v37  ;;  %v15451_v37 = vrot.slane %v377_v28, %v14467_v24 }
 0x490   : > { %v9960_v30 = vpop.f32.mrf.mxu0  ;;  %v10000_v8 = vpop.f32.mrf.mxu1 }
 0x491   : > { %v2368_v30 = vld [vmem:[%s14433_s20 + $0x1670] sm:$0xff]  ;;  %v2369_v8 = vld [vmem:[%s14433_s20 + $0x1678] sm:$0xff] }
 0x493   : > { %10329 = vmatpush1.bf16.xpose.msra.mxu0 %v13573_v47  ;;  %10369 = vmatpush1.bf16.xpose.msra.mxu1 %v13575_v48  ;;  %v2272_v47 = vld [vmem:[%s14433_s20 + $0x1370] sm:$0xff] }
 0x494   : > { %10330 = vmatprep.subr.bf16.mxu0 %v13382_v49  ;;  %10370 = vmatprep.subr.bf16.mxu1 %v13384_v54  ;;  %v2273_v49 = vld [vmem:[%s14433_s20 + $0x1378] sm:$0xff]  ;;  %v13577_v54 = vcombine.low %v2464_v33, %v2560_v18  ;;  %v13386_v58 = vcombine.high %v2272_v47, %v2368_v30  ;;  %v13385_v11 = vcombine.low %v2272_v47, %v2368_v30 }
 0x495   : > { %v13387_v45 = vcombine.low %v2273_v49, %v2369_v8  ;;  %v857_v33 = vcombine.high %v377_v28, %v377_v28  ;;  %v1795_v28 = vld [vmem:[%s14433_s20 + $0x488] sm:$0xff] }
 0x497   : > { %v15454_v20 = vrot.slane %v857_v33, %v14467_v24  ;;  %v378_v33 = vld [vmem:[%s14451_s13 + $0xc8] sm:$0xff] }
 0x49b   : > { %10331 = vmatpush1.bf16.xpose.msra.mxu0 %v13381_v1  ;;  %10371 = vmatpush1.bf16.xpose.msra.mxu1 %v13383_v40  ;;  %v13388_v1 = vcombine.high %v2273_v49, %v2369_v8  ;;  %v2080_v40 = vld [vmem:[%s14433_s20 + $0xd70] sm:$0xff] }
 0x49c   : > { %10332 = vmatprep.subr.bf16.mxu0 %v13190_v4  ;;  %10372 = vmatprep.subr.bf16.mxu1 %v13192_v5  ;;  %v2176_v4 = vld [vmem:[%s14433_s20 + $0x1070] sm:$0xff]  ;;  %v2081_v5 = vld [vmem:[%s14433_s20 + $0xd78] sm:$0xff] }
 0x49d   : > { %v13194_v13 = vcombine.high %v2080_v40, %v2176_v4  ;;  %v13193_v2 = vcombine.low %v2080_v40, %v2176_v4  ;;  %v13195_v41 = vcombine.low %v2081_v5, %v2177_v31 }
 0x4a3   : > { %10333 = vmatpush1.bf16.xpose.msra.mxu0 %v13189_v57  ;;  %10373 = vmatpush1.bf16.xpose.msra.mxu1 %v13191_v36  ;;  %v13196_v57 = vcombine.high %v2081_v5, %v2177_v31  ;;  %v1888_v36 = vld [vmem:[%s14433_s20 + $0x770] sm:$0xff] }
 0x4a4   : > { %10334 = vmatprep.subr.bf16.mxu0 %v12998_v15  ;;  %10374 = vmatprep.subr.bf16.mxu1 %v13000_v50  ;;  %v1984_v15 = vld [vmem:[%s14433_s20 + $0xa70] sm:$0xff]  ;;  %v1889_v50 = vld [vmem:[%s14433_s20 + $0x778] sm:$0xff] }
 0x4a5   : > { %v13002_v19 = vcombine.high %v1888_v36, %v1984_v15  ;;  %v13001_v10 = vcombine.low %v1888_v36, %v1984_v15  ;;  %v13003_v23 = vcombine.low %v1889_v50, %v1985_v16  ;;  %v2179_v36 = vld [vmem:[%s14433_s20 + $0x1088] sm:$0xff] }
 0x4ab   : > { %10335 = vmatpush1.bf16.xpose.msra.mxu0 %v12997_v63  ;;  %10375 = vmatpush1.bf16.xpose.msra.mxu1 %v12999_v7  ;;  %v13004_v63 = vcombine.high %v1889_v50, %v1985_v16  ;;  %v1696_v7 = vld [vmem:[%s14433_s20 + $0x170] sm:$0xff] }
 0x4ac   : > { %10336 = vmatprep.subr.bf16.mxu0 %v12806_v12  ;;  %10376 = vmatprep.subr.bf16.mxu1 %v12808_v46  ;;  %v1792_v12 = vld [vmem:[%s14433_s20 + $0x470] sm:$0xff]  ;;  %v1697_v46 = vld [vmem:[%s14433_s20 + $0x178] sm:$0xff] }
 0x4ad   : > { %v12810_v52 = vcombine.high %v1696_v7, %v1792_v12  ;;  %v12812_v53 = vcombine.high %v1697_v46, %v1793_v22  ;;  %v12809_v18 = vcombine.low %v1696_v7, %v1792_v12  ;;  %v12811_v34 = vcombine.low %v1697_v46, %v1793_v22  ;;  %v1987_v7 = vld [vmem:[%s14433_s20 + $0xa88] sm:$0xff] }
 0x4b3   : > { %10337 = vmatpush1.bf16.xpose.msra.mxu0 %v12805_v62  ;;  %10377 = vmatpush1.bf16.xpose.msra.mxu1 %v12807_v29  ;;  %v2658_v62 = vld [vmem:[%s14433_s20 + $0x1f80] sm:$0xff] }
 0x4b4   : > { %10406 = vmatprep.subr.bf16.mxu0 %v13770_v60  ;;  %10446 = vmatprep.subr.bf16.mxu1 %v13772_v0  ;;  %v2754_v29 = vld [vmem:[%s14433_s20 + $0x2280] sm:$0xff]  ;;  %v2659_v60 = vld [vmem:[%s14433_s20 + $0x1f88] sm:$0xff] }
 0x4b5   : > { %v2755_v0 = vld [vmem:[%s14433_s20 + $0x2288] sm:$0xff] }
 0x4b6   : > { %v13776_v56 = vcombine.high %v2659_v60, %v2755_v0 }
 0x4ba   : > { %v10036_v25 = vpop.f32.mrf.mxu0  ;;  %10355 = vmatmul.mubr.bf16.vlgmr.msra.gmra.mxu0 %v1545_v9  ;;  %v10076_v44 = vpop.f32.mrf.mxu1  ;;  %10395 = vmatmul.mubr.bf16.vlgmr.msra.gmra.mxu1 %v1547_v38  ;;  %v13774_v9 = vcombine.high %v2658_v62, %v2754_v29  ;;  %v2466_v38 = vld [vmem:[%s14433_s20 + $0x1980] sm:$0xff] }
 0x4bb   : > { %v10037_v27 = vadd.f32 %v10036_v25, %v15385_v6  ;;  %10407 = vmatpush1.bf16.xpose.msra.mxu0 %v13769_v21  ;;  %10447 = vmatpush1.bf16.xpose.msra.mxu1 %v13771_v39  ;;  %v2562_v21 = vld [vmem:[%s14433_s20 + $0x1c80] sm:$0xff]  ;;  %v872_v39 = vcombine.high %v15451_v37, %v15451_v37  ;;  %v873_v25 = vcombine.high %v15454_v20, %v15454_v20 }
 0x4bc   : > { %v10038_v3 = vpop.f32.mrf.mxu0  ;;  %10408 = vmatprep.subr.bf16.mxu0 %v13578_v14  ;;  %v10078_v59 = vpop.f32.mrf.mxu1  ;;  %10448 = vmatprep.subr.bf16.mxu1 %v13580_v51  ;;  %v1549_v14 = vpack.c.bf16 %v15409_v32, %v15409_v32  ;;  %v2467_v51 = vld [vmem:[%s14433_s20 + $0x1988] sm:$0xff] }
 0x4bd   : > { %v15427_v61 = vadd.f32 %v10076_v44, %v10037_v27  ;;  %10434 = vmatprep.mubr.bf16.mxu0 %v1550_v42  ;;  %10474 = vmatprep.mubr.bf16.mxu1 %v1552_v43  ;;  %v2563_v42 = vld [vmem:[%s14433_s20 + $0x1c88] sm:$0xff]  ;;  %v1551_v43 = vpack.c.bf16 %v15412_v17, %v15412_v17  ;;  %v13773_v27 = vcombine.low %v2658_v62, %v2754_v29 }
 0x4be   : > { %v10039_v48 = vpop.f32.mrf.mxu0  ;;  %v10079_v6 = vpop.f32.mrf.mxu1  ;;  %v13775_v44 = vcombine.low %v2659_v60, %v2755_v0  ;;  %v13582_v3 = vcombine.high %v2466_v38, %v2562_v21  ;;  %v13584_v59 = vcombine.high %v2467_v51, %v2563_v42  ;;  %v1554_v47 = vpack.c.bf16 %v872_v39, %v872_v39 }
 0x4bf   : > { %v1556_v48 = vpack.c.bf16 %v873_v25, %v873_v25  ;;  %v13583_v4 = vcombine.low %v2467_v51, %v2563_v42  ;;  %v15493_v42 = vrot.slane %v378_v33, %v14467_v24 }
 0x4c0   : > { %v10040_v35 = vpop.f32.mrf.mxu0  ;;  %v10080_v26 = vpop.f32.mrf.mxu1 }
 0x4c1   : > { %v2370_v35 = vld [vmem:[%s14433_s20 + $0x1680] sm:$0xff]  ;;  %v2371_v26 = vld [vmem:[%s14433_s20 + $0x1688] sm:$0xff] }
 0x4c3   : > { %10409 = vmatpush1.bf16.xpose.msra.mxu0 %v13577_v54  ;;  %10449 = vmatpush1.bf16.xpose.msra.mxu1 %v13579_v55  ;;  %v2274_v54 = vld [vmem:[%s14433_s20 + $0x1380] sm:$0xff] }
 0x4c4   : > { %10410 = vmatprep.subr.bf16.mxu0 %v13386_v58  ;;  %10450 = vmatprep.subr.bf16.mxu1 %v13388_v1  ;;  %v2275_v58 = vld [vmem:[%s14433_s20 + $0x1388] sm:$0xff]  ;;  %v13581_v1 = vcombine.low %v2466_v38, %v2562_v21  ;;  %v13390_v5 = vcombine.high %v2274_v54, %v2370_v35  ;;  %v13389_v15 = vcombine.low %v2274_v54, %v2370_v35 }
 0x4c5   : > { %v13391_v50 = vcombine.low %v2275_v58, %v2371_v26  ;;  %v874_v38 = vcombine.high %v378_v33, %v378_v33  ;;  %v1797_v33 = vld [vmem:[%s14433_s20 + $0x498] sm:$0xff] }
 0x4c7   : > { %v15496_v25 = vrot.slane %v874_v38, %v14467_v24  ;;  %v379_v38 = vld [vmem:[%s14451_s13 + $0xd0] sm:$0xff] }
 0x4cb   : > { %10411 = vmatpush1.bf16.xpose.msra.mxu0 %v13385_v11  ;;  %10451 = vmatpush1.bf16.xpose.msra.mxu1 %v13387_v45  ;;  %v13392_v11 = vcombine.high %v2275_v58, %v2371_v26  ;;  %v2082_v45 = vld [vmem:[%s14433_s20 + $0xd80] sm:$0xff] }
 0x4cc   : > { %10412 = vmatprep.subr.bf16.mxu0 %v13194_v13  ;;  %10452 = vmatprep.subr.bf16.mxu1 %v13196_v57  ;;  %v2178_v13 = vld [vmem:[%s14433_s20 + $0x1080] sm:$0xff]  ;;  %v2083_v57 = vld [vmem:[%s14433_s20 + $0xd88] sm:$0xff] }
 0x4cd   : > { %v13198_v16 = vcombine.high %v2082_v45, %v2178_v13  ;;  %v13197_v12 = vcombine.low %v2082_v45, %v2178_v13  ;;  %v13199_v46 = vcombine.low %v2083_v57, %v2179_v36 }
 0x4d3   : > { %10413 = vmatpush1.bf16.xpose.msra.mxu0 %v13193_v2  ;;  %10453 = vmatpush1.bf16.xpose.msra.mxu1 %v13195_v41  ;;  %v13200_v2 = vcombine.high %v2083_v57, %v2179_v36  ;;  %v1890_v41 = vld [vmem:[%s14433_s20 + $0x780] sm:$0xff] }
 0x4d4   : > { %10414 = vmatprep.subr.bf16.mxu0 %v13002_v19  ;;  %10454 = vmatprep.subr.bf16.mxu1 %v13004_v63  ;;  %v1986_v19 = vld [vmem:[%s14433_s20 + $0xa80] sm:$0xff]  ;;  %v1891_v63 = vld [vmem:[%s14433_s20 + $0x788] sm:$0xff] }
 0x4d5   : > { %v13006_v22 = vcombine.high %v1890_v41, %v1986_v19  ;;  %v13005_v62 = vcombine.low %v1890_v41, %v1986_v19  ;;  %v13007_v29 = vcombine.low %v1891_v63, %v1987_v7  ;;  %v2181_v41 = vld [vmem:[%s14433_s20 + $0x1098] sm:$0xff] }
 0x4db   : > { %10415 = vmatpush1.bf16.xpose.msra.mxu0 %v13001_v10  ;;  %10455 = vmatpush1.bf16.xpose.msra.mxu1 %v13003_v23  ;;  %v13008_v10 = vcombine.high %v1891_v63, %v1987_v7  ;;  %v1698_v23 = vld [vmem:[%s14433_s20 + $0x180] sm:$0xff] }
 0x4dc   : > { %10416 = vmatprep.subr.bf16.mxu0 %v12810_v52  ;;  %10456 = vmatprep.subr.bf16.mxu1 %v12812_v53  ;;  %v1794_v52 = vld [vmem:[%s14433_s20 + $0x480] sm:$0xff]  ;;  %v1699_v53 = vld [vmem:[%s14433_s20 + $0x188] sm:$0xff] }
 0x4dd   : > { %v12814_v60 = vcombine.high %v1698_v23, %v1794_v52  ;;  %v12816_v0 = vcombine.high %v1699_v53, %v1795_v28  ;;  %v12813_v21 = vcombine.low %v1698_v23, %v1794_v52  ;;  %v12815_v39 = vcombine.low %v1699_v53, %v1795_v28  ;;  %v1989_v23 = vld [vmem:[%s14433_s20 + $0xa98] sm:$0xff] }
 0x4e3   : > { %10417 = vmatpush1.bf16.xpose.msra.mxu0 %v12809_v18  ;;  %10457 = vmatpush1.bf16.xpose.msra.mxu1 %v12811_v34  ;;  %v2660_v18 = vld [vmem:[%s14433_s20 + $0x1f90] sm:$0xff] }
 0x4e4   : > { %10486 = vmatprep.subr.bf16.mxu0 %v13774_v9  ;;  %10526 = vmatprep.subr.bf16.mxu1 %v13776_v56  ;;  %v2756_v34 = vld [vmem:[%s14433_s20 + $0x2290] sm:$0xff]  ;;  %v2661_v9 = vld [vmem:[%s14433_s20 + $0x1f98] sm:$0xff] }
 0x4e5   : > { %v2757_v56 = vld [vmem:[%s14433_s20 + $0x2298] sm:$0xff] }
 0x4e6   : > { %v13780_v51 = vcombine.high %v2661_v9, %v2757_v56 }
 0x4ea   : > { %v10116_v30 = vpop.f32.mrf.mxu0  ;;  %10435 = vmatmul.mubr.bf16.vlgmr.msra.gmra.mxu0 %v1549_v14  ;;  %v10156_v49 = vpop.f32.mrf.mxu1  ;;  %10475 = vmatmul.mubr.bf16.vlgmr.msra.gmra.mxu1 %v1551_v43  ;;  %v13778_v14 = vcombine.high %v2660_v18, %v2756_v34  ;;  %v2468_v43 = vld [vmem:[%s14433_s20 + $0x1990] sm:$0xff] }
 0x4eb   : > { %v10117_v32 = vadd.f32 %v10116_v30, %v15427_v61  ;;  %10487 = vmatpush1.bf16.xpose.msra.mxu0 %v13773_v27  ;;  %10527 = vmatpush1.bf16.xpose.msra.mxu1 %v13775_v44  ;;  %v2564_v27 = vld [vmem:[%s14433_s20 + $0x1c90] sm:$0xff]  ;;  %v889_v44 = vcombine.high %v15493_v42, %v15493_v42  ;;  %v890_v30 = vcombine.high %v15496_v25, %v15496_v25 }
 0x4ec   : > { %v10118_v8 = vpop.f32.mrf.mxu0  ;;  %10488 = vmatprep.subr.bf16.mxu0 %v13582_v3  ;;  %v10158_v6 = vpop.f32.mrf.mxu1  ;;  %10528 = vmatprep.subr.bf16.mxu1 %v13584_v59  ;;  %v1553_v3 = vpack.c.bf16 %v15451_v37, %v15451_v37  ;;  %v2469_v59 = vld [vmem:[%s14433_s20 + $0x1998] sm:$0xff] }
 0x4ed   : > { %v15469_v17 = vadd.f32 %v10156_v49, %v10117_v32  ;;  %10514 = vmatprep.mubr.bf16.mxu0 %v1554_v47  ;;  %10554 = vmatprep.mubr.bf16.mxu1 %v1556_v48  ;;  %v2565_v47 = vld [vmem:[%s14433_s20 + $0x1c98] sm:$0xff]  ;;  %v1555_v48 = vpack.c.bf16 %v15454_v20, %v15454_v20  ;;  %v13777_v32 = vcombine.low %v2660_v18, %v2756_v34 }
 0x4ee   : > { %v10119_v55 = vpop.f32.mrf.mxu0  ;;  %v10159_v61 = vpop.f32.mrf.mxu1  ;;  %v13779_v49 = vcombine.low %v2661_v9, %v2757_v56  ;;  %v13586_v8 = vcombine.high %v2468_v43, %v2564_v27  ;;  %v13588_v6 = vcombine.high %v2469_v59, %v2565_v47  ;;  %v1558_v54 = vpack.c.bf16 %v889_v44, %v889_v44 }
 0x4ef   : > { %v1560_v55 = vpack.c.bf16 %v890_v30, %v890_v30  ;;  %v13587_v13 = vcombine.low %v2469_v59, %v2565_v47  ;;  %v15535_v47 = vrot.slane %v379_v38, %v14467_v24 }
 0x4f0   : > { %v10120_v40 = vpop.f32.mrf.mxu0  ;;  %v10160_v31 = vpop.f32.mrf.mxu1 }
 0x4f1   : > { %v2372_v40 = vld [vmem:[%s14433_s20 + $0x1690] sm:$0xff]  ;;  %v2373_v31 = vld [vmem:[%s14433_s20 + $0x1698] sm:$0xff] }
 0x4f3   : > { %10489 = vmatpush1.bf16.xpose.msra.mxu0 %v13581_v1  ;;  %10529 = vmatpush1.bf16.xpose.msra.mxu1 %v13583_v4  ;;  %v2276_v1 = vld [vmem:[%s14433_s20 + $0x1390] sm:$0xff] }
 0x4f4   : > { %10490 = vmatprep.subr.bf16.mxu0 %v13390_v5  ;;  %10530 = vmatprep.subr.bf16.mxu1 %v13392_v11  ;;  %v2277_v5 = vld [vmem:[%s14433_s20 + $0x1398] sm:$0xff]  ;;  %v13585_v11 = vcombine.low %v2468_v43, %v2564_v27  ;;  %v13394_v57 = vcombine.high %v2276_v1, %v2372_v40  ;;  %v13393_v19 = vcombine.low %v2276_v1, %v2372_v40 }
 0x4f5   : > { %v13395_v63 = vcombine.low %v2277_v5, %v2373_v31  ;;  %v891_v43 = vcombine.high %v379_v38, %v379_v38  ;;  %v1799_v38 = vld [vmem:[%s14433_s20 + $0x4a8] sm:$0xff] }
 0x4f7   : > { %v15538_v30 = vrot.slane %v891_v43, %v14467_v24  ;;  %v380_v43 = vld [vmem:[%s14451_s13 + $0xd8] sm:$0xff] }
 0x4fb   : > { %10491 = vmatpush1.bf16.xpose.msra.mxu0 %v13389_v15  ;;  %10531 = vmatpush1.bf16.xpose.msra.mxu1 %v13391_v50  ;;  %v13396_v15 = vcombine.high %v2277_v5, %v2373_v31  ;;  %v2084_v50 = vld [vmem:[%s14433_s20 + $0xd90] sm:$0xff] }
 0x4fc   : > { %10492 = vmatprep.subr.bf16.mxu0 %v13198_v16  ;;  %10532 = vmatprep.subr.bf16.mxu1 %v13200_v2  ;;  %v2180_v16 = vld [vmem:[%s14433_s20 + $0x1090] sm:$0xff]  ;;  %v2085_v2 = vld [vmem:[%s14433_s20 + $0xd98] sm:$0xff] }
 0x4fd   : > { %v13202_v7 = vcombine.high %v2084_v50, %v2180_v16  ;;  %v13201_v52 = vcombine.low %v2084_v50, %v2180_v16  ;;  %v13203_v53 = vcombine.low %v2085_v2, %v2181_v41 }
 0x503   : > { %10493 = vmatpush1.bf16.xpose.msra.mxu0 %v13197_v12  ;;  %10533 = vmatpush1.bf16.xpose.msra.mxu1 %v13199_v46  ;;  %v13204_v12 = vcombine.high %v2085_v2, %v2181_v41  ;;  %v1892_v46 = vld [vmem:[%s14433_s20 + $0x790] sm:$0xff] }
 0x504   : > { %10494 = vmatprep.subr.bf16.mxu0 %v13006_v22  ;;  %10534 = vmatprep.subr.bf16.mxu1 %v13008_v10  ;;  %v1988_v22 = vld [vmem:[%s14433_s20 + $0xa90] sm:$0xff]  ;;  %v1893_v10 = vld [vmem:[%s14433_s20 + $0x798] sm:$0xff] }
 0x505   : > { %v13010_v28 = vcombine.high %v1892_v46, %v1988_v22  ;;  %v13009_v18 = vcombine.low %v1892_v46, %v1988_v22  ;;  %v13011_v34 = vcombine.low %v1893_v10, %v1989_v23  ;;  %v2183_v46 = vld [vmem:[%s14433_s20 + $0x10a8] sm:$0xff] }
 0x50b   : > { %10495 = vmatpush1.bf16.xpose.msra.mxu0 %v13005_v62  ;;  %10535 = vmatpush1.bf16.xpose.msra.mxu1 %v13007_v29  ;;  %v13012_v62 = vcombine.high %v1893_v10, %v1989_v23  ;;  %v1700_v29 = vld [vmem:[%s14433_s20 + $0x190] sm:$0xff] }
 0x50c   : > { %10496 = vmatprep.subr.bf16.mxu0 %v12814_v60  ;;  %10536 = vmatprep.subr.bf16.mxu1 %v12816_v0  ;;  %v1796_v60 = vld [vmem:[%s14433_s20 + $0x490] sm:$0xff]  ;;  %v1701_v0 = vld [vmem:[%s14433_s20 + $0x198] sm:$0xff] }
 0x50d   : > { %v12818_v9 = vcombine.high %v1700_v29, %v1796_v60  ;;  %v12820_v56 = vcombine.high %v1701_v0, %v1797_v33  ;;  %v12817_v27 = vcombine.low %v1700_v29, %v1796_v60  ;;  %v12819_v44 = vcombine.low %v1701_v0, %v1797_v33  ;;  %v1991_v29 = vld [vmem:[%s14433_s20 + $0xaa8] sm:$0xff] }
 0x513   : > { %10497 = vmatpush1.bf16.xpose.msra.mxu0 %v12813_v21  ;;  %10537 = vmatpush1.bf16.xpose.msra.mxu1 %v12815_v39  ;;  %v2662_v21 = vld [vmem:[%s14433_s20 + $0x1fa0] sm:$0xff] }
 0x514   : > { %10566 = vmatprep.subr.bf16.mxu0 %v13778_v14  ;;  %10606 = vmatprep.subr.bf16.mxu1 %v13780_v51  ;;  %v2758_v39 = vld [vmem:[%s14433_s20 + $0x22a0] sm:$0xff]  ;;  %v2663_v14 = vld [vmem:[%s14433_s20 + $0x1fa8] sm:$0xff] }
 0x515   : > { %v2759_v51 = vld [vmem:[%s14433_s20 + $0x22a8] sm:$0xff] }
 0x516   : > { %v13784_v59 = vcombine.high %v2663_v14, %v2759_v51 }
 0x51a   : > { %v10196_v35 = vpop.f32.mrf.mxu0  ;;  %10515 = vmatmul.mubr.bf16.vlgmr.msra.gmra.mxu0 %v1553_v3  ;;  %v10236_v58 = vpop.f32.mrf.mxu1  ;;  %10555 = vmatmul.mubr.bf16.vlgmr.msra.gmra.mxu1 %v1555_v48  ;;  %v13782_v3 = vcombine.high %v2662_v21, %v2758_v39  ;;  %v2470_v48 = vld [vmem:[%s14433_s20 + $0x19a0] sm:$0xff] }
 0x51b   : > { %v10197_v37 = vadd.f32 %v10196_v35, %v15469_v17  ;;  %10567 = vmatpush1.bf16.xpose.msra.mxu0 %v13777_v32  ;;  %10607 = vmatpush1.bf16.xpose.msra.mxu1 %v13779_v49  ;;  %v2566_v32 = vld [vmem:[%s14433_s20 + $0x1ca0] sm:$0xff]  ;;  %v906_v49 = vcombine.high %v15535_v47, %v15535_v47  ;;  %v907_v35 = vcombine.high %v15538_v30, %v15538_v30 }
 0x51c   : > { %v10198_v26 = vpop.f32.mrf.mxu0  ;;  %10568 = vmatprep.subr.bf16.mxu0 %v13586_v8  ;;  %v10238_v61 = vpop.f32.mrf.mxu1  ;;  %10608 = vmatprep.subr.bf16.mxu1 %v13588_v6  ;;  %v1557_v8 = vpack.c.bf16 %v15493_v42, %v15493_v42  ;;  %v2471_v6 = vld [vmem:[%s14433_s20 + $0x19a8] sm:$0xff] }
 0x51d   : > { %v15511_v20 = vadd.f32 %v10236_v58, %v10197_v37  ;;  %10594 = vmatprep.mubr.bf16.mxu0 %v1558_v54  ;;  %10634 = vmatprep.mubr.bf16.mxu1 %v1560_v55  ;;  %v2567_v54 = vld [vmem:[%s14433_s20 + $0x1ca8] sm:$0xff]  ;;  %v1559_v55 = vpack.c.bf16 %v15496_v25, %v15496_v25  ;;  %v13781_v37 = vcombine.low %v2662_v21, %v2758_v39 }
 0x51e   : > { %v10199_v4 = vpop.f32.mrf.mxu0  ;;  %v10239_v17 = vpop.f32.mrf.mxu1  ;;  %v13783_v58 = vcombine.low %v2663_v14, %v2759_v51  ;;  %v13590_v26 = vcombine.high %v2470_v48, %v2566_v32  ;;  %v13592_v61 = vcombine.high %v2471_v6, %v2567_v54  ;;  %v1562_v1 = vpack.c.bf16 %v906_v49, %v906_v49 }
 0x51f   : > { %v1564_v4 = vpack.c.bf16 %v907_v35, %v907_v35  ;;  %v13591_v16 = vcombine.low %v2471_v6, %v2567_v54  ;;  %v15577_v54 = vrot.slane %v380_v43, %v14467_v24 }
 0x520   : > { %v10200_v45 = vpop.f32.mrf.mxu0  ;;  %v10240_v36 = vpop.f32.mrf.mxu1 }
 0x521   : > { %v2374_v45 = vld [vmem:[%s14433_s20 + $0x16a0] sm:$0xff]  ;;  %v2375_v36 = vld [vmem:[%s14433_s20 + $0x16a8] sm:$0xff] }
 0x523   : > { %10569 = vmatpush1.bf16.xpose.msra.mxu0 %v13585_v11  ;;  %10609 = vmatpush1.bf16.xpose.msra.mxu1 %v13587_v13  ;;  %v2278_v11 = vld [vmem:[%s14433_s20 + $0x13a0] sm:$0xff] }
 0x524   : > { %10570 = vmatprep.subr.bf16.mxu0 %v13394_v57  ;;  %10610 = vmatprep.subr.bf16.mxu1 %v13396_v15  ;;  %v2279_v57 = vld [vmem:[%s14433_s20 + $0x13a8] sm:$0xff]  ;;  %v13589_v15 = vcombine.low %v2470_v48, %v2566_v32  ;;  %v13398_v2 = vcombine.high %v2278_v11, %v2374_v45  ;;  %v13397_v22 = vcombine.low %v2278_v11, %v2374_v45 }
 0x525   : > { %v13399_v10 = vcombine.low %v2279_v57, %v2375_v36  ;;  %v908_v48 = vcombine.high %v380_v43, %v380_v43  ;;  %v1801_v43 = vld [vmem:[%s14433_s20 + $0x4b8] sm:$0xff] }
 0x527   : > { %v15580_v35 = vrot.slane %v908_v48, %v14467_v24  ;;  %v381_v48 = vld [vmem:[%s14451_s13 + $0xe0] sm:$0xff] }
 0x52b   : > { %10571 = vmatpush1.bf16.xpose.msra.mxu0 %v13393_v19  ;;  %10611 = vmatpush1.bf16.xpose.msra.mxu1 %v13395_v63  ;;  %v13400_v19 = vcombine.high %v2279_v57, %v2375_v36  ;;  %v2086_v63 = vld [vmem:[%s14433_s20 + $0xda0] sm:$0xff] }
 0x52c   : > { %10572 = vmatprep.subr.bf16.mxu0 %v13202_v7  ;;  %10612 = vmatprep.subr.bf16.mxu1 %v13204_v12  ;;  %v2182_v7 = vld [vmem:[%s14433_s20 + $0x10a0] sm:$0xff]  ;;  %v2087_v12 = vld [vmem:[%s14433_s20 + $0xda8] sm:$0xff] }
 0x52d   : > { %v13206_v23 = vcombine.high %v2086_v63, %v2182_v7  ;;  %v13205_v60 = vcombine.low %v2086_v63, %v2182_v7  ;;  %v13207_v0 = vcombine.low %v2087_v12, %v2183_v46 }
 0x533   : > { %10573 = vmatpush1.bf16.xpose.msra.mxu0 %v13201_v52  ;;  %10613 = vmatpush1.bf16.xpose.msra.mxu1 %v13203_v53  ;;  %v13208_v52 = vcombine.high %v2087_v12, %v2183_v46  ;;  %v1894_v53 = vld [vmem:[%s14433_s20 + $0x7a0] sm:$0xff] }
 0x534   : > { %10574 = vmatprep.subr.bf16.mxu0 %v13010_v28  ;;  %10614 = vmatprep.subr.bf16.mxu1 %v13012_v62  ;;  %v1990_v28 = vld [vmem:[%s14433_s20 + $0xaa0] sm:$0xff]  ;;  %v1895_v62 = vld [vmem:[%s14433_s20 + $0x7a8] sm:$0xff] }
 0x535   : > { %v13014_v33 = vcombine.high %v1894_v53, %v1990_v28  ;;  %v13013_v21 = vcombine.low %v1894_v53, %v1990_v28  ;;  %v13015_v39 = vcombine.low %v1895_v62, %v1991_v29  ;;  %v2185_v53 = vld [vmem:[%s14433_s20 + $0x10b8] sm:$0xff] }
 0x53b   : > { %10575 = vmatpush1.bf16.xpose.msra.mxu0 %v13009_v18  ;;  %10615 = vmatpush1.bf16.xpose.msra.mxu1 %v13011_v34  ;;  %v13016_v18 = vcombine.high %v1895_v62, %v1991_v29  ;;  %v1702_v34 = vld [vmem:[%s14433_s20 + $0x1a0] sm:$0xff] }
 0x53c   : > { %10576 = vmatprep.subr.bf16.mxu0 %v12818_v9  ;;  %10616 = vmatprep.subr.bf16.mxu1 %v12820_v56  ;;  %v1798_v9 = vld [vmem:[%s14433_s20 + $0x4a0] sm:$0xff]  ;;  %v1703_v56 = vld [vmem:[%s14433_s20 + $0x1a8] sm:$0xff] }
 0x53d   : > { %v12822_v14 = vcombine.high %v1702_v34, %v1798_v9  ;;  %v12824_v51 = vcombine.high %v1703_v56, %v1799_v38  ;;  %v12821_v32 = vcombine.low %v1702_v34, %v1798_v9  ;;  %v12823_v49 = vcombine.low %v1703_v56, %v1799_v38  ;;  %v1993_v34 = vld [vmem:[%s14433_s20 + $0xab8] sm:$0xff] }
 0x543   : > { %10577 = vmatpush1.bf16.xpose.msra.mxu0 %v12817_v27  ;;  %10617 = vmatpush1.bf16.xpose.msra.mxu1 %v12819_v44  ;;  %v2664_v27 = vld [vmem:[%s14433_s20 + $0x1fb0] sm:$0xff] }
 0x544   : > { %10646 = vmatprep.subr.bf16.mxu0 %v13782_v3  ;;  %10686 = vmatprep.subr.bf16.mxu1 %v13784_v59  ;;  %v2760_v44 = vld [vmem:[%s14433_s20 + $0x22b0] sm:$0xff]  ;;  %v2665_v3 = vld [vmem:[%s14433_s20 + $0x1fb8] sm:$0xff] }
 0x545   : > { %v2761_v59 = vld [vmem:[%s14433_s20 + $0x22b8] sm:$0xff] }
 0x546   : > { %v13788_v6 = vcombine.high %v2665_v3, %v2761_v59 }
 0x54a   : > { %v10276_v40 = vpop.f32.mrf.mxu0  ;;  %10595 = vmatmul.mubr.bf16.vlgmr.msra.gmra.mxu0 %v1557_v8  ;;  %v10316_v5 = vpop.f32.mrf.mxu1  ;;  %10635 = vmatmul.mubr.bf16.vlgmr.msra.gmra.mxu1 %v1559_v55  ;;  %v13786_v8 = vcombine.high %v2664_v27, %v2760_v44  ;;  %v2472_v55 = vld [vmem:[%s14433_s20 + $0x19b0] sm:$0xff] }
 0x54b   : > { %v10277_v42 = vadd.f32 %v10276_v40, %v15511_v20  ;;  %10647 = vmatpush1.bf16.xpose.msra.mxu0 %v13781_v37  ;;  %10687 = vmatpush1.bf16.xpose.msra.mxu1 %v13783_v58  ;;  %v2568_v37 = vld [vmem:[%s14433_s20 + $0x1cb0] sm:$0xff]  ;;  %v923_v58 = vcombine.high %v15577_v54, %v15577_v54  ;;  %v924_v40 = vcombine.high %v15580_v35, %v15580_v35 }
 0x54c   : > { %v10278_v31 = vpop.f32.mrf.mxu0  ;;  %10648 = vmatprep.subr.bf16.mxu0 %v13590_v26  ;;  %v10318_v17 = vpop.f32.mrf.mxu1  ;;  %10688 = vmatprep.subr.bf16.mxu1 %v13592_v61  ;;  %v1561_v26 = vpack.c.bf16 %v15535_v47, %v15535_v47  ;;  %v2473_v61 = vld [vmem:[%s14433_s20 + $0x19b8] sm:$0xff] }
 0x54d   : > { %v15553_v25 = vadd.f32 %v10316_v5, %v10277_v42  ;;  %10674 = vmatprep.mubr.bf16.mxu0 %v1562_v1  ;;  %10714 = vmatprep.mubr.bf16.mxu1 %v1564_v4  ;;  %v2569_v1 = vld [vmem:[%s14433_s20 + $0x1cb8] sm:$0xff]  ;;  %v1563_v4 = vpack.c.bf16 %v15538_v30, %v15538_v30  ;;  %v13785_v42 = vcombine.low %v2664_v27, %v2760_v44 }
 0x54e   : > { %v10279_v13 = vpop.f32.mrf.mxu0  ;;  %v10319_v20 = vpop.f32.mrf.mxu1  ;;  %v13787_v5 = vcombine.low %v2665_v3, %v2761_v59  ;;  %v13594_v31 = vcombine.high %v2472_v55, %v2568_v37  ;;  %v13596_v17 = vcombine.high %v2473_v61, %v2569_v1  ;;  %v1566_v11 = vpack.c.bf16 %v923_v58, %v923_v58 }
 0x54f   : > { %v1568_v13 = vpack.c.bf16 %v924_v40, %v924_v40  ;;  %v13595_v7 = vcombine.low %v2473_v61, %v2569_v1  ;;  %v15619_v1 = vrot.slane %v381_v48, %v14467_v24 }
 0x550   : > { %v10280_v50 = vpop.f32.mrf.mxu0  ;;  %v10320_v41 = vpop.f32.mrf.mxu1 }
 0x551   : > { %v2376_v50 = vld [vmem:[%s14433_s20 + $0x16b0] sm:$0xff]  ;;  %v2377_v41 = vld [vmem:[%s14433_s20 + $0x16b8] sm:$0xff] }
 0x553   : > { %10649 = vmatpush1.bf16.xpose.msra.mxu0 %v13589_v15  ;;  %10689 = vmatpush1.bf16.xpose.msra.mxu1 %v13591_v16  ;;  %v2280_v15 = vld [vmem:[%s14433_s20 + $0x13b0] sm:$0xff] }
 0x554   : > { %10650 = vmatprep.subr.bf16.mxu0 %v13398_v2  ;;  %10690 = vmatprep.subr.bf16.mxu1 %v13400_v19  ;;  %v2281_v2 = vld [vmem:[%s14433_s20 + $0x13b8] sm:$0xff]  ;;  %v13593_v19 = vcombine.low %v2472_v55, %v2568_v37  ;;  %v13402_v12 = vcombine.high %v2280_v15, %v2376_v50  ;;  %v13401_v28 = vcombine.low %v2280_v15, %v2376_v50 }
 0x555   : > { %v13403_v62 = vcombine.low %v2281_v2, %v2377_v41  ;;  %v925_v55 = vcombine.high %v381_v48, %v381_v48  ;;  %v1803_v48 = vld [vmem:[%s14433_s20 + $0x4c8] sm:$0xff] }
 0x557   : > { %v15622_v40 = vrot.slane %v925_v55, %v14467_v24  ;;  %v382_v55 = vld [vmem:[%s14451_s13 + $0xe8] sm:$0xff] }
 0x55b   : > { %10651 = vmatpush1.bf16.xpose.msra.mxu0 %v13397_v22  ;;  %10691 = vmatpush1.bf16.xpose.msra.mxu1 %v13399_v10  ;;  %v13404_v22 = vcombine.high %v2281_v2, %v2377_v41  ;;  %v2088_v10 = vld [vmem:[%s14433_s20 + $0xdb0] sm:$0xff] }
 0x55c   : > { %10652 = vmatprep.subr.bf16.mxu0 %v13206_v23  ;;  %10692 = vmatprep.subr.bf16.mxu1 %v13208_v52  ;;  %v2184_v23 = vld [vmem:[%s14433_s20 + $0x10b0] sm:$0xff]  ;;  %v2089_v52 = vld [vmem:[%s14433_s20 + $0xdb8] sm:$0xff] }
 0x55d   : > { %v13210_v29 = vcombine.high %v2088_v10, %v2184_v23  ;;  %v13209_v9 = vcombine.low %v2088_v10, %v2184_v23  ;;  %v13211_v56 = vcombine.low %v2089_v52, %v2185_v53 }
 0x563   : > { %10653 = vmatpush1.bf16.xpose.msra.mxu0 %v13205_v60  ;;  %10693 = vmatpush1.bf16.xpose.msra.mxu1 %v13207_v0  ;;  %v13212_v60 = vcombine.high %v2089_v52, %v2185_v53  ;;  %v1896_v0 = vld [vmem:[%s14433_s20 + $0x7b0] sm:$0xff] }
 0x564   : > { %10654 = vmatprep.subr.bf16.mxu0 %v13014_v33  ;;  %10694 = vmatprep.subr.bf16.mxu1 %v13016_v18  ;;  %v1992_v33 = vld [vmem:[%s14433_s20 + $0xab0] sm:$0xff]  ;;  %v1897_v18 = vld [vmem:[%s14433_s20 + $0x7b8] sm:$0xff] }
 0x565   : > { %v13018_v38 = vcombine.high %v1896_v0, %v1992_v33  ;;  %v13017_v27 = vcombine.low %v1896_v0, %v1992_v33  ;;  %v13019_v44 = vcombine.low %v1897_v18, %v1993_v34  ;;  %v2187_v0 = vld [vmem:[%s14433_s20 + $0x10c8] sm:$0xff] }
 0x56b   : > { %10655 = vmatpush1.bf16.xpose.msra.mxu0 %v13013_v21  ;;  %10695 = vmatpush1.bf16.xpose.msra.mxu1 %v13015_v39  ;;  %v13020_v21 = vcombine.high %v1897_v18, %v1993_v34  ;;  %v1704_v39 = vld [vmem:[%s14433_s20 + $0x1b0] sm:$0xff] }
 0x56c   : > { %10656 = vmatprep.subr.bf16.mxu0 %v12822_v14  ;;  %10696 = vmatprep.subr.bf16.mxu1 %v12824_v51  ;;  %v1800_v14 = vld [vmem:[%s14433_s20 + $0x4b0] sm:$0xff]  ;;  %v1705_v51 = vld [vmem:[%s14433_s20 + $0x1b8] sm:$0xff] }
 0x56d   : > { %v12826_v3 = vcombine.high %v1704_v39, %v1800_v14  ;;  %v12828_v59 = vcombine.high %v1705_v51, %v1801_v43  ;;  %v12825_v37 = vcombine.low %v1704_v39, %v1800_v14  ;;  %v12827_v58 = vcombine.low %v1705_v51, %v1801_v43  ;;  %v1995_v39 = vld [vmem:[%s14433_s20 + $0xac8] sm:$0xff] }
 0x573   : > { %10657 = vmatpush1.bf16.xpose.msra.mxu0 %v12821_v32  ;;  %10697 = vmatpush1.bf16.xpose.msra.mxu1 %v12823_v49  ;;  %v2666_v32 = vld [vmem:[%s14433_s20 + $0x1fc0] sm:$0xff] }
 0x574   : > { %10726 = vmatprep.subr.bf16.mxu0 %v13786_v8  ;;  %10766 = vmatprep.subr.bf16.mxu1 %v13788_v6  ;;  %v2762_v49 = vld [vmem:[%s14433_s20 + $0x22c0] sm:$0xff]  ;;  %v2667_v8 = vld [vmem:[%s14433_s20 + $0x1fc8] sm:$0xff] }
 0x575   : > { %v2763_v6 = vld [vmem:[%s14433_s20 + $0x22c8] sm:$0xff] }
 0x576   : > { %v13792_v61 = vcombine.high %v2667_v8, %v2763_v6 }
 0x57a   : > { %v10356_v45 = vpop.f32.mrf.mxu0  ;;  %10675 = vmatmul.mubr.bf16.vlgmr.msra.gmra.mxu0 %v1561_v26  ;;  %v10396_v57 = vpop.f32.mrf.mxu1  ;;  %10715 = vmatmul.mubr.bf16.vlgmr.msra.gmra.mxu1 %v1563_v4  ;;  %v13790_v26 = vcombine.high %v2666_v32, %v2762_v49  ;;  %v2474_v4 = vld [vmem:[%s14433_s20 + $0x19c0] sm:$0xff] }
 0x57b   : > { %v10357_v47 = vadd.f32 %v10356_v45, %v15553_v25  ;;  %10727 = vmatpush1.bf16.xpose.msra.mxu0 %v13785_v42  ;;  %10767 = vmatpush1.bf16.xpose.msra.mxu1 %v13787_v5  ;;  %v2570_v42 = vld [vmem:[%s14433_s20 + $0x1cc0] sm:$0xff]  ;;  %v940_v5 = vcombine.high %v15619_v1, %v15619_v1  ;;  %v941_v45 = vcombine.high %v15622_v40, %v15622_v40 }
 0x57c   : > { %v10358_v36 = vpop.f32.mrf.mxu0  ;;  %10728 = vmatprep.subr.bf16.mxu0 %v13594_v31  ;;  %v10398_v20 = vpop.f32.mrf.mxu1  ;;  %10768 = vmatprep.subr.bf16.mxu1 %v13596_v17  ;;  %v1565_v31 = vpack.c.bf16 %v15577_v54, %v15577_v54  ;;  %v2475_v17 = vld [vmem:[%s14433_s20 + $0x19c8] sm:$0xff] }
 0x57d   : > { %v15595_v30 = vadd.f32 %v10396_v57, %v10357_v47  ;;  %10754 = vmatprep.mubr.bf16.mxu0 %v1566_v11  ;;  %10794 = vmatprep.mubr.bf16.mxu1 %v1568_v13  ;;  %v2571_v11 = vld [vmem:[%s14433_s20 + $0x1cc8] sm:$0xff]  ;;  %v1567_v13 = vpack.c.bf16 %v15580_v35, %v15580_v35  ;;  %v13789_v47 = vcombine.low %v2666_v32, %v2762_v49 }
 0x57e   : > { %v10359_v16 = vpop.f32.mrf.mxu0  ;;  %v10399_v25 = vpop.f32.mrf.mxu1  ;;  %v13791_v57 = vcombine.low %v2667_v8, %v2763_v6  ;;  %v13598_v36 = vcombine.high %v2474_v4, %v2570_v42  ;;  %v13600_v20 = vcombine.high %v2475_v17, %v2571_v11  ;;  %v1570_v15 = vpack.c.bf16 %v940_v5, %v940_v5 }
 0x57f   : > { %v1572_v16 = vpack.c.bf16 %v941_v45, %v941_v45  ;;  %v13599_v23 = vcombine.low %v2475_v17, %v2571_v11  ;;  %v15661_v11 = vrot.slane %v382_v55, %v14467_v24 }
 0x580   : > { %v10360_v63 = vpop.f32.mrf.mxu0  ;;  %v10400_v46 = vpop.f32.mrf.mxu1 }
 0x581   : > { %v2378_v63 = vld [vmem:[%s14433_s20 + $0x16c0] sm:$0xff]  ;;  %v2379_v46 = vld [vmem:[%s14433_s20 + $0x16c8] sm:$0xff] }
 0x583   : > { %10729 = vmatpush1.bf16.xpose.msra.mxu0 %v13593_v19  ;;  %10769 = vmatpush1.bf16.xpose.msra.mxu1 %v13595_v7  ;;  %v2282_v19 = vld [vmem:[%s14433_s20 + $0x13c0] sm:$0xff] }
 0x584   : > { %10730 = vmatprep.subr.bf16.mxu0 %v13402_v12  ;;  %10770 = vmatprep.subr.bf16.mxu1 %v13404_v22  ;;  %v2283_v12 = vld [vmem:[%s14433_s20 + $0x13c8] sm:$0xff]  ;;  %v13597_v22 = vcombine.low %v2474_v4, %v2570_v42  ;;  %v13406_v52 = vcombine.high %v2282_v19, %v2378_v63  ;;  %v13405_v33 = vcombine.low %v2282_v19, %v2378_v63 }
 0x585   : > { %v13407_v18 = vcombine.low %v2283_v12, %v2379_v46  ;;  %v942_v4 = vcombine.high %v382_v55, %v382_v55  ;;  %v1805_v55 = vld [vmem:[%s14433_s20 + $0x4d8] sm:$0xff] }
 0x587   : > { %v15664_v45 = vrot.slane %v942_v4, %v14467_v24  ;;  %v383_v4 = vld [vmem:[%s14451_s13 + $0xf0] sm:$0xff] }
 0x58b   : > { %10731 = vmatpush1.bf16.xpose.msra.mxu0 %v13401_v28  ;;  %10771 = vmatpush1.bf16.xpose.msra.mxu1 %v13403_v62  ;;  %v13408_v28 = vcombine.high %v2283_v12, %v2379_v46  ;;  %v2090_v62 = vld [vmem:[%s14433_s20 + $0xdc0] sm:$0xff] }
 0x58c   : > { %10732 = vmatprep.subr.bf16.mxu0 %v13210_v29  ;;  %10772 = vmatprep.subr.bf16.mxu1 %v13212_v60  ;;  %v2186_v29 = vld [vmem:[%s14433_s20 + $0x10c0] sm:$0xff]  ;;  %v2091_v60 = vld [vmem:[%s14433_s20 + $0xdc8] sm:$0xff] }
 0x58d   : > { %v13214_v34 = vcombine.high %v2090_v62, %v2186_v29  ;;  %v13213_v14 = vcombine.low %v2090_v62, %v2186_v29  ;;  %v13215_v51 = vcombine.low %v2091_v60, %v2187_v0 }
 0x593   : > { %10733 = vmatpush1.bf16.xpose.msra.mxu0 %v13209_v9  ;;  %10773 = vmatpush1.bf16.xpose.msra.mxu1 %v13211_v56  ;;  %v13216_v9 = vcombine.high %v2091_v60, %v2187_v0  ;;  %v1898_v56 = vld [vmem:[%s14433_s20 + $0x7c0] sm:$0xff] }
 0x594   : > { %10734 = vmatprep.subr.bf16.mxu0 %v13018_v38  ;;  %10774 = vmatprep.subr.bf16.mxu1 %v13020_v21  ;;  %v1994_v38 = vld [vmem:[%s14433_s20 + $0xac0] sm:$0xff]  ;;  %v1899_v21 = vld [vmem:[%s14433_s20 + $0x7c8] sm:$0xff] }
 0x595   : > { %v13022_v43 = vcombine.high %v1898_v56, %v1994_v38  ;;  %v13021_v32 = vcombine.low %v1898_v56, %v1994_v38  ;;  %v13023_v49 = vcombine.low %v1899_v21, %v1995_v39  ;;  %v2189_v56 = vld [vmem:[%s14433_s20 + $0x10d8] sm:$0xff] }
 0x59b   : > { %10735 = vmatpush1.bf16.xpose.msra.mxu0 %v13017_v27  ;;  %10775 = vmatpush1.bf16.xpose.msra.mxu1 %v13019_v44  ;;  %v13024_v27 = vcombine.high %v1899_v21, %v1995_v39  ;;  %v1706_v44 = vld [vmem:[%s14433_s20 + $0x1c0] sm:$0xff] }
 0x59c   : > { %10736 = vmatprep.subr.bf16.mxu0 %v12826_v3  ;;  %10776 = vmatprep.subr.bf16.mxu1 %v12828_v59  ;;  %v1802_v3 = vld [vmem:[%s14433_s20 + $0x4c0] sm:$0xff]  ;;  %v1707_v59 = vld [vmem:[%s14433_s20 + $0x1c8] sm:$0xff] }
 0x59d   : > { %v12830_v8 = vcombine.high %v1706_v44, %v1802_v3  ;;  %v12832_v6 = vcombine.high %v1707_v59, %v1803_v48  ;;  %v12829_v42 = vcombine.low %v1706_v44, %v1802_v3  ;;  %v12831_v5 = vcombine.low %v1707_v59, %v1803_v48  ;;  %v1997_v44 = vld [vmem:[%s14433_s20 + $0xad8] sm:$0xff] }
 0x5a3   : > { %10737 = vmatpush1.bf16.xpose.msra.mxu0 %v12825_v37  ;;  %10777 = vmatpush1.bf16.xpose.msra.mxu1 %v12827_v58  ;;  %v2668_v37 = vld [vmem:[%s14433_s20 + $0x1fd0] sm:$0xff] }
 0x5a4   : > { %10806 = vmatprep.subr.bf16.mxu0 %v13790_v26  ;;  %10846 = vmatprep.subr.bf16.mxu1 %v13792_v61  ;;  %v2764_v58 = vld [vmem:[%s14433_s20 + $0x22d0] sm:$0xff]  ;;  %v2669_v26 = vld [vmem:[%s14433_s20 + $0x1fd8] sm:$0xff] }
 0x5a5   : > { %v2765_v61 = vld [vmem:[%s14433_s20 + $0x22d8] sm:$0xff] }
 0x5a6   : > { %v13796_v17 = vcombine.high %v2669_v26, %v2765_v61 }
 0x5aa   : > { %v10436_v50 = vpop.f32.mrf.mxu0  ;;  %10755 = vmatmul.mubr.bf16.vlgmr.msra.gmra.mxu0 %v1565_v31  ;;  %v10476_v2 = vpop.f32.mrf.mxu1  ;;  %10795 = vmatmul.mubr.bf16.vlgmr.msra.gmra.mxu1 %v1567_v13  ;;  %v13794_v31 = vcombine.high %v2668_v37, %v2764_v58  ;;  %v2476_v13 = vld [vmem:[%s14433_s20 + $0x19d0] sm:$0xff] }
 0x5ab   : > { %v10437_v54 = vadd.f32 %v10436_v50, %v15595_v30  ;;  %10807 = vmatpush1.bf16.xpose.msra.mxu0 %v13789_v47  ;;  %10847 = vmatpush1.bf16.xpose.msra.mxu1 %v13791_v57  ;;  %v2572_v47 = vld [vmem:[%s14433_s20 + $0x1cd0] sm:$0xff]  ;;  %v957_v57 = vcombine.high %v15661_v11, %v15661_v11  ;;  %v958_v50 = vcombine.high %v15664_v45, %v15664_v45 }
 0x5ac   : > { %v10438_v41 = vpop.f32.mrf.mxu0  ;;  %10808 = vmatprep.subr.bf16.mxu0 %v13598_v36  ;;  %v10478_v25 = vpop.f32.mrf.mxu1  ;;  %10848 = vmatprep.subr.bf16.mxu1 %v13600_v20  ;;  %v1569_v36 = vpack.c.bf16 %v15619_v1, %v15619_v1  ;;  %v2477_v20 = vld [vmem:[%s14433_s20 + $0x19d8] sm:$0xff] }
 0x5ad   : > { %v15637_v35 = vadd.f32 %v10476_v2, %v10437_v54  ;;  %10834 = vmatprep.mubr.bf16.mxu0 %v1570_v15  ;;  %10874 = vmatprep.mubr.bf16.mxu1 %v1572_v16  ;;  %v2573_v15 = vld [vmem:[%s14433_s20 + $0x1cd8] sm:$0xff]  ;;  %v1571_v16 = vpack.c.bf16 %v15622_v40, %v15622_v40  ;;  %v13793_v54 = vcombine.low %v2668_v37, %v2764_v58 }
 0x5ae   : > { %v10439_v7 = vpop.f32.mrf.mxu0  ;;  %v10479_v30 = vpop.f32.mrf.mxu1  ;;  %v13795_v2 = vcombine.low %v2669_v26, %v2765_v61  ;;  %v13602_v41 = vcombine.high %v2476_v13, %v2572_v47  ;;  %v13604_v25 = vcombine.high %v2477_v20, %v2573_v15  ;;  %v1574_v19 = vpack.c.bf16 %v957_v57, %v957_v57 }
 0x5af   : > { %v1576_v7 = vpack.c.bf16 %v958_v50, %v958_v50  ;;  %v13603_v29 = vcombine.low %v2477_v20, %v2573_v15  ;;  %v15703_v15 = vrot.slane %v383_v4, %v14467_v24 }
 0x5b0   : > { %v10440_v10 = vpop.f32.mrf.mxu0  ;;  %v10480_v53 = vpop.f32.mrf.mxu1 }
 0x5b1   : > { %v2380_v10 = vld [vmem:[%s14433_s20 + $0x16d0] sm:$0xff]  ;;  %v2381_v53 = vld [vmem:[%s14433_s20 + $0x16d8] sm:$0xff] }
 0x5b3   : > { %10809 = vmatpush1.bf16.xpose.msra.mxu0 %v13597_v22  ;;  %10849 = vmatpush1.bf16.xpose.msra.mxu1 %v13599_v23  ;;  %v2284_v22 = vld [vmem:[%s14433_s20 + $0x13d0] sm:$0xff] }
 0x5b4   : > { %10810 = vmatprep.subr.bf16.mxu0 %v13406_v52  ;;  %10850 = vmatprep.subr.bf16.mxu1 %v13408_v28  ;;  %v2285_v52 = vld [vmem:[%s14433_s20 + $0x13d8] sm:$0xff]  ;;  %v13601_v28 = vcombine.low %v2476_v13, %v2572_v47  ;;  %v13410_v60 = vcombine.high %v2284_v22, %v2380_v10  ;;  %v13409_v38 = vcombine.low %v2284_v22, %v2380_v10 }
 0x5b5   : > { %v13411_v21 = vcombine.low %v2285_v52, %v2381_v53  ;;  %v959_v13 = vcombine.high %v383_v4, %v383_v4  ;;  %v1807_v4 = vld [vmem:[%s14433_s20 + $0x4e8] sm:$0xff] }
 0x5b7   : > { %v15706_v50 = vrot.slane %v959_v13, %v14467_v24  ;;  %v384_v13 = vld [vmem:[%s14451_s13 + $0xf8] sm:$0xff] }
 0x5bb   : > { %10811 = vmatpush1.bf16.xpose.msra.mxu0 %v13405_v33  ;;  %10851 = vmatpush1.bf16.xpose.msra.mxu1 %v13407_v18  ;;  %v13412_v33 = vcombine.high %v2285_v52, %v2381_v53  ;;  %v2092_v18 = vld [vmem:[%s14433_s20 + $0xdd0] sm:$0xff] }
 0x5bc   : > { %10812 = vmatprep.subr.bf16.mxu0 %v13214_v34  ;;  %10852 = vmatprep.subr.bf16.mxu1 %v13216_v9  ;;  %v2188_v34 = vld [vmem:[%s14433_s20 + $0x10d0] sm:$0xff]  ;;  %v2093_v9 = vld [vmem:[%s14433_s20 + $0xdd8] sm:$0xff] }
 0x5bd   : > { %v13218_v39 = vcombine.high %v2092_v18, %v2188_v34  ;;  %v13217_v3 = vcombine.low %v2092_v18, %v2188_v34  ;;  %v13219_v59 = vcombine.low %v2093_v9, %v2189_v56 }
 0x5c3   : > { %10813 = vmatpush1.bf16.xpose.msra.mxu0 %v13213_v14  ;;  %10853 = vmatpush1.bf16.xpose.msra.mxu1 %v13215_v51  ;;  %v13220_v14 = vcombine.high %v2093_v9, %v2189_v56  ;;  %v1900_v51 = vld [vmem:[%s14433_s20 + $0x7d0] sm:$0xff] }
 0x5c4   : > { %10814 = vmatprep.subr.bf16.mxu0 %v13022_v43  ;;  %10854 = vmatprep.subr.bf16.mxu1 %v13024_v27  ;;  %v1996_v43 = vld [vmem:[%s14433_s20 + $0xad0] sm:$0xff]  ;;  %v1901_v27 = vld [vmem:[%s14433_s20 + $0x7d8] sm:$0xff] }
 0x5c5   : > { %v13026_v48 = vcombine.high %v1900_v51, %v1996_v43  ;;  %v13025_v37 = vcombine.low %v1900_v51, %v1996_v43  ;;  %v13027_v58 = vcombine.low %v1901_v27, %v1997_v44  ;;  %v2191_v51 = vld [vmem:[%s14433_s20 + $0x10e8] sm:$0xff] }
 0x5cb   : > { %10815 = vmatpush1.bf16.xpose.msra.mxu0 %v13021_v32  ;;  %10855 = vmatpush1.bf16.xpose.msra.mxu1 %v13023_v49  ;;  %v13028_v32 = vcombine.high %v1901_v27, %v1997_v44  ;;  %v1708_v49 = vld [vmem:[%s14433_s20 + $0x1d0] sm:$0xff] }
 0x5cc   : > { %10816 = vmatprep.subr.bf16.mxu0 %v12830_v8  ;;  %10856 = vmatprep.subr.bf16.mxu1 %v12832_v6  ;;  %v1804_v8 = vld [vmem:[%s14433_s20 + $0x4d0] sm:$0xff]  ;;  %v1709_v6 = vld [vmem:[%s14433_s20 + $0x1d8] sm:$0xff] }
 0x5cd   : > { %v12834_v26 = vcombine.high %v1708_v49, %v1804_v8  ;;  %v12836_v61 = vcombine.high %v1709_v6, %v1805_v55  ;;  %v12833_v47 = vcombine.low %v1708_v49, %v1804_v8  ;;  %v12835_v57 = vcombine.low %v1709_v6, %v1805_v55  ;;  %v1999_v49 = vld [vmem:[%s14433_s20 + $0xae8] sm:$0xff] }
 0x5d3   : > { %10817 = vmatpush1.bf16.xpose.msra.mxu0 %v12829_v42  ;;  %10857 = vmatpush1.bf16.xpose.msra.mxu1 %v12831_v5  ;;  %v2670_v42 = vld [vmem:[%s14433_s20 + $0x1fe0] sm:$0xff] }
 0x5d4   : > { %10886 = vmatprep.subr.bf16.mxu0 %v13794_v31  ;;  %10926 = vmatprep.subr.bf16.mxu1 %v13796_v17  ;;  %v2766_v5 = vld [vmem:[%s14433_s20 + $0x22e0] sm:$0xff]  ;;  %v2671_v31 = vld [vmem:[%s14433_s20 + $0x1fe8] sm:$0xff] }
 0x5d5   : > { %v2767_v17 = vld [vmem:[%s14433_s20 + $0x22e8] sm:$0xff] }
 0x5d6   : > { %v13800_v20 = vcombine.high %v2671_v31, %v2767_v17 }
 0x5da   : > { %v10516_v63 = vpop.f32.mrf.mxu0  ;;  %10835 = vmatmul.mubr.bf16.vlgmr.msra.gmra.mxu0 %v1569_v36  ;;  %v10556_v12 = vpop.f32.mrf.mxu1  ;;  %10875 = vmatmul.mubr.bf16.vlgmr.msra.gmra.mxu1 %v1571_v16  ;;  %v13798_v36 = vcombine.high %v2670_v42, %v2766_v5  ;;  %v2478_v16 = vld [vmem:[%s14433_s20 + $0x19e0] sm:$0xff] }
 0x5db   : > { %v10517_v1 = vadd.f32 %v10516_v63, %v15637_v35  ;;  %10887 = vmatpush1.bf16.xpose.msra.mxu0 %v13793_v54  ;;  %10927 = vmatpush1.bf16.xpose.msra.mxu1 %v13795_v2  ;;  %v2574_v54 = vld [vmem:[%s14433_s20 + $0x1ce0] sm:$0xff]  ;;  %v974_v2 = vcombine.high %v15703_v15, %v15703_v15  ;;  %v975_v63 = vcombine.high %v15706_v50, %v15706_v50 }
 0x5dc   : > { %v10518_v46 = vpop.f32.mrf.mxu0  ;;  %10888 = vmatprep.subr.bf16.mxu0 %v13602_v41  ;;  %v10558_v30 = vpop.f32.mrf.mxu1  ;;  %10928 = vmatprep.subr.bf16.mxu1 %v13604_v25  ;;  %v1573_v41 = vpack.c.bf16 %v15661_v11, %v15661_v11  ;;  %v2479_v25 = vld [vmem:[%s14433_s20 + $0x19e8] sm:$0xff] }
 0x5dd   : > { %v15679_v40 = vadd.f32 %v10556_v12, %v10517_v1  ;;  %10914 = vmatprep.mubr.bf16.mxu0 %v1574_v19  ;;  %10954 = vmatprep.mubr.bf16.mxu1 %v1576_v7  ;;  %v2575_v19 = vld [vmem:[%s14433_s20 + $0x1ce8] sm:$0xff]  ;;  %v1575_v7 = vpack.c.bf16 %v15664_v45, %v15664_v45  ;;  %v13797_v1 = vcombine.low %v2670_v42, %v2766_v5 }
 0x5de   : > { %v10519_v23 = vpop.f32.mrf.mxu0  ;;  %v10559_v35 = vpop.f32.mrf.mxu1  ;;  %v13799_v12 = vcombine.low %v2671_v31, %v2767_v17  ;;  %v13606_v46 = vcombine.high %v2478_v16, %v2574_v54  ;;  %v13608_v30 = vcombine.high %v2479_v25, %v2575_v19  ;;  %v1578_v22 = vpack.c.bf16 %v974_v2, %v974_v2 }
 0x5df   : > { %v1580_v23 = vpack.c.bf16 %v975_v63, %v975_v63  ;;  %v13607_v34 = vcombine.low %v2479_v25, %v2575_v19  ;;  %v15745_v19 = vrot.slane %v384_v13, %v14467_v24 }
 0x5e0   : > { %v10520_v62 = vpop.f32.mrf.mxu0  ;;  %v10560_v0 = vpop.f32.mrf.mxu1 }
 0x5e1   : > { %v2382_v62 = vld [vmem:[%s14433_s20 + $0x16e0] sm:$0xff]  ;;  %v2383_v0 = vld [vmem:[%s14433_s20 + $0x16e8] sm:$0xff] }
 0x5e3   : > { %10889 = vmatpush1.bf16.xpose.msra.mxu0 %v13601_v28  ;;  %10929 = vmatpush1.bf16.xpose.msra.mxu1 %v13603_v29  ;;  %v2286_v28 = vld [vmem:[%s14433_s20 + $0x13e0] sm:$0xff] }
 0x5e4   : > { %10890 = vmatprep.subr.bf16.mxu0 %v13410_v60  ;;  %10930 = vmatprep.subr.bf16.mxu1 %v13412_v33  ;;  %v2287_v60 = vld [vmem:[%s14433_s20 + $0x13e8] sm:$0xff]  ;;  %v13605_v33 = vcombine.low %v2478_v16, %v2574_v54  ;;  %v13414_v9 = vcombine.high %v2286_v28, %v2382_v62  ;;  %v13413_v43 = vcombine.low %v2286_v28, %v2382_v62 }
 0x5e5   : > { %v13415_v27 = vcombine.low %v2287_v60, %v2383_v0  ;;  %v976_v16 = vcombine.high %v384_v13, %v384_v13  ;;  %v1809_v13 = vld [vmem:[%s14433_s20 + $0x4f8] sm:$0xff] }
 0x5e7   : > { %v15748_v63 = vrot.slane %v976_v16, %v14467_v24  ;;  %v385_v16 = vld [vmem:[%s14451_s13 + $0x100] sm:$0xff] }
 0x5eb   : > { %10891 = vmatpush1.bf16.xpose.msra.mxu0 %v13409_v38  ;;  %10931 = vmatpush1.bf16.xpose.msra.mxu1 %v13411_v21  ;;  %v13416_v38 = vcombine.high %v2287_v60, %v2383_v0  ;;  %v2094_v21 = vld [vmem:[%s14433_s20 + $0xde0] sm:$0xff] }
 0x5ec   : > { %10892 = vmatprep.subr.bf16.mxu0 %v13218_v39  ;;  %10932 = vmatprep.subr.bf16.mxu1 %v13220_v14  ;;  %v2190_v39 = vld [vmem:[%s14433_s20 + $0x10e0] sm:$0xff]  ;;  %v2095_v14 = vld [vmem:[%s14433_s20 + $0xde8] sm:$0xff] }
 0x5ed   : > { %v13222_v44 = vcombine.high %v2094_v21, %v2190_v39  ;;  %v13221_v8 = vcombine.low %v2094_v21, %v2190_v39  ;;  %v13223_v6 = vcombine.low %v2095_v14, %v2191_v51 }
 0x5f3   : > { %10893 = vmatpush1.bf16.xpose.msra.mxu0 %v13217_v3  ;;  %10933 = vmatpush1.bf16.xpose.msra.mxu1 %v13219_v59  ;;  %v13224_v3 = vcombine.high %v2095_v14, %v2191_v51  ;;  %v1902_v59 = vld [vmem:[%s14433_s20 + $0x7e0] sm:$0xff] }
 0x5f4   : > { %10894 = vmatprep.subr.bf16.mxu0 %v13026_v48  ;;  %10934 = vmatprep.subr.bf16.mxu1 %v13028_v32  ;;  %v1998_v48 = vld [vmem:[%s14433_s20 + $0xae0] sm:$0xff]  ;;  %v1903_v32 = vld [vmem:[%s14433_s20 + $0x7e8] sm:$0xff] }
 0x5f5   : > { %v13030_v55 = vcombine.high %v1902_v59, %v1998_v48  ;;  %v13029_v42 = vcombine.low %v1902_v59, %v1998_v48  ;;  %v13031_v5 = vcombine.low %v1903_v32, %v1999_v49  ;;  %v2193_v59 = vld [vmem:[%s14433_s20 + $0x10f8] sm:$0xff] }
 0x5fb   : > { %10895 = vmatpush1.bf16.xpose.msra.mxu0 %v13025_v37  ;;  %10935 = vmatpush1.bf16.xpose.msra.mxu1 %v13027_v58  ;;  %v13032_v37 = vcombine.high %v1903_v32, %v1999_v49  ;;  %v1710_v58 = vld [vmem:[%s14433_s20 + $0x1e0] sm:$0xff] }
 0x5fc   : > { %10896 = vmatprep.subr.bf16.mxu0 %v12834_v26  ;;  %10936 = vmatprep.subr.bf16.mxu1 %v12836_v61  ;;  %v1806_v26 = vld [vmem:[%s14433_s20 + $0x4e0] sm:$0xff]  ;;  %v1711_v61 = vld [vmem:[%s14433_s20 + $0x1e8] sm:$0xff] }
 0x5fd   : > { %v12838_v31 = vcombine.high %v1710_v58, %v1806_v26  ;;  %v12840_v17 = vcombine.high %v1711_v61, %v1807_v4  ;;  %v12837_v54 = vcombine.low %v1710_v58, %v1806_v26  ;;  %v12839_v2 = vcombine.low %v1711_v61, %v1807_v4  ;;  %v2001_v58 = vld [vmem:[%s14433_s20 + $0xaf8] sm:$0xff] }
 0x603   : > { %10897 = vmatpush1.bf16.xpose.msra.mxu0 %v12833_v47  ;;  %10937 = vmatpush1.bf16.xpose.msra.mxu1 %v12835_v57  ;;  %v2672_v47 = vld [vmem:[%s14433_s20 + $0x1ff0] sm:$0xff] }
 0x604   : > { %10966 = vmatprep.subr.bf16.mxu0 %v13798_v36  ;;  %11006 = vmatprep.subr.bf16.mxu1 %v13800_v20  ;;  %v2768_v57 = vld [vmem:[%s14433_s20 + $0x22f0] sm:$0xff]  ;;  %v2673_v36 = vld [vmem:[%s14433_s20 + $0x1ff8] sm:$0xff] }
 0x605   : > { %v2769_v20 = vld [vmem:[%s14433_s20 + $0x22f8] sm:$0xff] }
 0x606   : > { %v13804_v25 = vcombine.high %v2673_v36, %v2769_v20 }
 0x60a   : > { %v10596_v10 = vpop.f32.mrf.mxu0  ;;  %10915 = vmatmul.mubr.bf16.vlgmr.msra.gmra.mxu0 %v1573_v41  ;;  %v10636_v52 = vpop.f32.mrf.mxu1  ;;  %10955 = vmatmul.mubr.bf16.vlgmr.msra.gmra.mxu1 %v1575_v7  ;;  %v13802_v41 = vcombine.high %v2672_v47, %v2768_v57  ;;  %v2480_v7 = vld [vmem:[%s14433_s20 + $0x19f0] sm:$0xff] }
 0x60b   : > { %v10597_v11 = vadd.f32 %v10596_v10, %v15679_v40  ;;  %10967 = vmatpush1.bf16.xpose.msra.mxu0 %v13797_v1  ;;  %11007 = vmatpush1.bf16.xpose.msra.mxu1 %v13799_v12  ;;  %v2576_v1 = vld [vmem:[%s14433_s20 + $0x1cf0] sm:$0xff]  ;;  %v991_v12 = vcombine.high %v15745_v19, %v15745_v19  ;;  %v992_v10 = vcombine.high %v15748_v63, %v15748_v63 }
 0x60c   : > { %v10598_v53 = vpop.f32.mrf.mxu0  ;;  %10968 = vmatprep.subr.bf16.mxu0 %v13606_v46  ;;  %v10638_v35 = vpop.f32.mrf.mxu1  ;;  %11008 = vmatprep.subr.bf16.mxu1 %v13608_v30  ;;  %v1577_v46 = vpack.c.bf16 %v15703_v15, %v15703_v15  ;;  %v2481_v30 = vld [vmem:[%s14433_s20 + $0x19f8] sm:$0xff] }
 0x60d   : > { %v15721_v45 = vadd.f32 %v10636_v52, %v10597_v11  ;;  %10994 = vmatprep.mubr.bf16.mxu0 %v1578_v22  ;;  %11034 = vmatprep.mubr.bf16.mxu1 %v1580_v23  ;;  %v2577_v22 = vld [vmem:[%s14433_s20 + $0x1cf8] sm:$0xff]  ;;  %v1579_v23 = vpack.c.bf16 %v15706_v50, %v15706_v50  ;;  %v13801_v11 = vcombine.low %v2672_v47, %v2768_v57 }
 0x60e   : > { %v10599_v29 = vpop.f32.mrf.mxu0  ;;  %v10639_v40 = vpop.f32.mrf.mxu1  ;;  %v13803_v52 = vcombine.low %v2673_v36, %v2769_v20  ;;  %v13610_v53 = vcombine.high %v2480_v7, %v2576_v1  ;;  %v13612_v35 = vcombine.high %v2481_v30, %v2577_v22  ;;  %v1582_v28 = vpack.c.bf16 %v991_v12, %v991_v12 }
 0x60f   : > { %v1584_v29 = vpack.c.bf16 %v992_v10, %v992_v10  ;;  %v13611_v39 = vcombine.low %v2481_v30, %v2577_v22  ;;  %v15787_v22 = vrot.slane %v385_v16, %v14467_v24 }
 0x610   : > { %v10600_v18 = vpop.f32.mrf.mxu0  ;;  %v10640_v56 = vpop.f32.mrf.mxu1 }
 0x611   : > { %v2384_v18 = vld [vmem:[%s14433_s20 + $0x16f0] sm:$0xff]  ;;  %v2385_v56 = vld [vmem:[%s14433_s20 + $0x16f8] sm:$0xff] }
 0x613   : > { %10969 = vmatpush1.bf16.xpose.msra.mxu0 %v13605_v33  ;;  %11009 = vmatpush1.bf16.xpose.msra.mxu1 %v13607_v34  ;;  %v2288_v33 = vld [vmem:[%s14433_s20 + $0x13f0] sm:$0xff] }
 0x614   : > { %10970 = vmatprep.subr.bf16.mxu0 %v13414_v9  ;;  %11010 = vmatprep.subr.bf16.mxu1 %v13416_v38  ;;  %v2289_v9 = vld [vmem:[%s14433_s20 + $0x13f8] sm:$0xff]  ;;  %v13609_v38 = vcombine.low %v2480_v7, %v2576_v1  ;;  %v13418_v14 = vcombine.high %v2288_v33, %v2384_v18  ;;  %v13417_v48 = vcombine.low %v2288_v33, %v2384_v18 }
 0x615   : > { %v13419_v32 = vcombine.low %v2289_v9, %v2385_v56  ;;  %v993_v7 = vcombine.high %v385_v16, %v385_v16  ;;  %v1811_v16 = vld [vmem:[%s14433_s20 + $0x508] sm:$0xff] }
 0x617   : > { %v15790_v10 = vrot.slane %v993_v7, %v14467_v24  ;;  %v386_v7 = vld [vmem:[%s14451_s13 + $0x108] sm:$0xff] }
 0x61b   : > { %10971 = vmatpush1.bf16.xpose.msra.mxu0 %v13413_v43  ;;  %11011 = vmatpush1.bf16.xpose.msra.mxu1 %v13415_v27  ;;  %v13420_v43 = vcombine.high %v2289_v9, %v2385_v56  ;;  %v2096_v27 = vld [vmem:[%s14433_s20 + $0xdf0] sm:$0xff] }
 0x61c   : > { %10972 = vmatprep.subr.bf16.mxu0 %v13222_v44  ;;  %11012 = vmatprep.subr.bf16.mxu1 %v13224_v3  ;;  %v2192_v44 = vld [vmem:[%s14433_s20 + $0x10f0] sm:$0xff]  ;;  %v2097_v3 = vld [vmem:[%s14433_s20 + $0xdf8] sm:$0xff] }
 0x61d   : > { %v13226_v49 = vcombine.high %v2096_v27, %v2192_v44  ;;  %v13225_v26 = vcombine.low %v2096_v27, %v2192_v44  ;;  %v13227_v61 = vcombine.low %v2097_v3, %v2193_v59 }
 0x623   : > { %10973 = vmatpush1.bf16.xpose.msra.mxu0 %v13221_v8  ;;  %11013 = vmatpush1.bf16.xpose.msra.mxu1 %v13223_v6  ;;  %v13228_v8 = vcombine.high %v2097_v3, %v2193_v59  ;;  %v1904_v6 = vld [vmem:[%s14433_s20 + $0x7f0] sm:$0xff] }
 0x624   : > { %10974 = vmatprep.subr.bf16.mxu0 %v13030_v55  ;;  %11014 = vmatprep.subr.bf16.mxu1 %v13032_v37  ;;  %v2000_v55 = vld [vmem:[%s14433_s20 + $0xaf0] sm:$0xff]  ;;  %v1905_v37 = vld [vmem:[%s14433_s20 + $0x7f8] sm:$0xff] }
 0x625   : > { %v13034_v4 = vcombine.high %v1904_v6, %v2000_v55  ;;  %v13033_v47 = vcombine.low %v1904_v6, %v2000_v55  ;;  %v13035_v57 = vcombine.low %v1905_v37, %v2001_v58  ;;  %v2195_v6 = vld [vmem:[%s14433_s20 + $0x1108] sm:$0xff] }
 0x62b   : > { %10975 = vmatpush1.bf16.xpose.msra.mxu0 %v13029_v42  ;;  %11015 = vmatpush1.bf16.xpose.msra.mxu1 %v13031_v5  ;;  %v13036_v42 = vcombine.high %v1905_v37, %v2001_v58  ;;  %v1712_v5 = vld [vmem:[%s14433_s20 + $0x1f0] sm:$0xff] }
 0x62c   : > { %10976 = vmatprep.subr.bf16.mxu0 %v12838_v31  ;;  %11016 = vmatprep.subr.bf16.mxu1 %v12840_v17  ;;  %v1808_v31 = vld [vmem:[%s14433_s20 + $0x4f0] sm:$0xff]  ;;  %v1713_v17 = vld [vmem:[%s14433_s20 + $0x1f8] sm:$0xff] }
 0x62d   : > { %v12842_v36 = vcombine.high %v1712_v5, %v1808_v31  ;;  %v12844_v20 = vcombine.high %v1713_v17, %v1809_v13  ;;  %v12841_v1 = vcombine.low %v1712_v5, %v1808_v31  ;;  %v12843_v12 = vcombine.low %v1713_v17, %v1809_v13  ;;  %v2003_v5 = vld [vmem:[%s14433_s20 + $0xb08] sm:$0xff] }
 0x633   : > { %10977 = vmatpush1.bf16.xpose.msra.mxu0 %v12837_v54  ;;  %11017 = vmatpush1.bf16.xpose.msra.mxu1 %v12839_v2  ;;  %v2674_v54 = vld [vmem:[%s14433_s20 + $0x2000] sm:$0xff] }
 0x634   : > { %11046 = vmatprep.subr.bf16.mxu0 %v13802_v41  ;;  %11086 = vmatprep.subr.bf16.mxu1 %v13804_v25  ;;  %v2770_v2 = vld [vmem:[%s14433_s20 + $0x2300] sm:$0xff]  ;;  %v2675_v41 = vld [vmem:[%s14433_s20 + $0x2008] sm:$0xff] }
 0x635   : > { %v2771_v25 = vld [vmem:[%s14433_s20 + $0x2308] sm:$0xff] }
 0x636   : > { %v13808_v30 = vcombine.high %v2675_v41, %v2771_v25 }
 0x63a   : > { %v10676_v62 = vpop.f32.mrf.mxu0  ;;  %10995 = vmatmul.mubr.bf16.vlgmr.msra.gmra.mxu0 %v1577_v46  ;;  %v10716_v60 = vpop.f32.mrf.mxu1  ;;  %11035 = vmatmul.mubr.bf16.vlgmr.msra.gmra.mxu1 %v1579_v23  ;;  %v13806_v46 = vcombine.high %v2674_v54, %v2770_v2  ;;  %v2482_v23 = vld [vmem:[%s14433_s20 + $0x1a00] sm:$0xff] }
 0x63b   : > { %v10677_v15 = vadd.f32 %v10676_v62, %v15721_v45  ;;  %11047 = vmatpush1.bf16.xpose.msra.mxu0 %v13801_v11  ;;  %11087 = vmatpush1.bf16.xpose.msra.mxu1 %v13803_v52  ;;  %v2578_v11 = vld [vmem:[%s14433_s20 + $0x1d00] sm:$0xff]  ;;  %v1008_v52 = vcombine.high %v15787_v22, %v15787_v22  ;;  %v1009_v62 = vcombine.high %v15790_v10, %v15790_v10 }
 0x63c   : > { %v10678_v0 = vpop.f32.mrf.mxu0  ;;  %11048 = vmatprep.subr.bf16.mxu0 %v13610_v53  ;;  %v10718_v40 = vpop.f32.mrf.mxu1  ;;  %11088 = vmatprep.subr.bf16.mxu1 %v13612_v35  ;;  %v1581_v53 = vpack.c.bf16 %v15745_v19, %v15745_v19  ;;  %v2483_v35 = vld [vmem:[%s14433_s20 + $0x1a08] sm:$0xff] }
 0x63d   : > { %v15763_v50 = vadd.f32 %v10716_v60, %v10677_v15  ;;  %11074 = vmatprep.mubr.bf16.mxu0 %v1582_v28  ;;  %11114 = vmatprep.mubr.bf16.mxu1 %v1584_v29  ;;  %v2579_v28 = vld [vmem:[%s14433_s20 + $0x1d08] sm:$0xff]  ;;  %v1583_v29 = vpack.c.bf16 %v15748_v63, %v15748_v63  ;;  %v13805_v15 = vcombine.low %v2674_v54, %v2770_v2 }
 0x63e   : > { %v10679_v34 = vpop.f32.mrf.mxu0  ;;  %v10719_v45 = vpop.f32.mrf.mxu1  ;;  %v13807_v60 = vcombine.low %v2675_v41, %v2771_v25  ;;  %v13614_v0 = vcombine.high %v2482_v23, %v2578_v11  ;;  %v13616_v40 = vcombine.high %v2483_v35, %v2579_v28  ;;  %v1586_v33 = vpack.c.bf16 %v1008_v52, %v1008_v52 }
 0x63f   : > { %v1588_v34 = vpack.c.bf16 %v1009_v62, %v1009_v62  ;;  %v13615_v44 = vcombine.low %v2483_v35, %v2579_v28  ;;  %v15829_v28 = vrot.slane %v386_v7, %v14467_v24 }
 0x640   : > { %v10680_v21 = vpop.f32.mrf.mxu0  ;;  %v10720_v51 = vpop.f32.mrf.mxu1 }
 0x641   : > { %v2386_v21 = vld [vmem:[%s14433_s20 + $0x1700] sm:$0xff]  ;;  %v2387_v51 = vld [vmem:[%s14433_s20 + $0x1708] sm:$0xff] }
 0x643   : > { %11049 = vmatpush1.bf16.xpose.msra.mxu0 %v13609_v38  ;;  %11089 = vmatpush1.bf16.xpose.msra.mxu1 %v13611_v39  ;;  %v2290_v38 = vld [vmem:[%s14433_s20 + $0x1400] sm:$0xff] }
 0x644   : > { %11050 = vmatprep.subr.bf16.mxu0 %v13418_v14  ;;  %11090 = vmatprep.subr.bf16.mxu1 %v13420_v43  ;;  %v2291_v14 = vld [vmem:[%s14433_s20 + $0x1408] sm:$0xff]  ;;  %v13613_v43 = vcombine.low %v2482_v23, %v2578_v11  ;;  %v13422_v3 = vcombine.high %v2290_v38, %v2386_v21  ;;  %v13421_v55 = vcombine.low %v2290_v38, %v2386_v21 }
 0x645   : > { %v13423_v37 = vcombine.low %v2291_v14, %v2387_v51  ;;  %v1010_v23 = vcombine.high %v386_v7, %v386_v7  ;;  %v1813_v7 = vld [vmem:[%s14433_s20 + $0x518] sm:$0xff] }
 0x647   : > { %v15832_v62 = vrot.slane %v1010_v23, %v14467_v24  ;;  %v387_v23 = vld [vmem:[%s14451_s13 + $0x110] sm:$0xff] }
 0x64b   : > { %11051 = vmatpush1.bf16.xpose.msra.mxu0 %v13417_v48  ;;  %11091 = vmatpush1.bf16.xpose.msra.mxu1 %v13419_v32  ;;  %v13424_v48 = vcombine.high %v2291_v14, %v2387_v51  ;;  %v2098_v32 = vld [vmem:[%s14433_s20 + $0xe00] sm:$0xff] }
 0x64c   : > { %11052 = vmatprep.subr.bf16.mxu0 %v13226_v49  ;;  %11092 = vmatprep.subr.bf16.mxu1 %v13228_v8  ;;  %v2194_v49 = vld [vmem:[%s14433_s20 + $0x1100] sm:$0xff]  ;;  %v2099_v8 = vld [vmem:[%s14433_s20 + $0xe08] sm:$0xff] }
 0x64d   : > { %v13230_v58 = vcombine.high %v2098_v32, %v2194_v49  ;;  %v13229_v31 = vcombine.low %v2098_v32, %v2194_v49  ;;  %v13231_v17 = vcombine.low %v2099_v8, %v2195_v6 }
 0x653   : > { %11053 = vmatpush1.bf16.xpose.msra.mxu0 %v13225_v26  ;;  %11093 = vmatpush1.bf16.xpose.msra.mxu1 %v13227_v61  ;;  %v13232_v26 = vcombine.high %v2099_v8, %v2195_v6  ;;  %v1906_v61 = vld [vmem:[%s14433_s20 + $0x800] sm:$0xff] }
 0x654   : > { %11054 = vmatprep.subr.bf16.mxu0 %v13034_v4  ;;  %11094 = vmatprep.subr.bf16.mxu1 %v13036_v42  ;;  %v2002_v4 = vld [vmem:[%s14433_s20 + $0xb00] sm:$0xff]  ;;  %v1907_v42 = vld [vmem:[%s14433_s20 + $0x808] sm:$0xff] }
 0x655   : > { %v13038_v13 = vcombine.high %v1906_v61, %v2002_v4  ;;  %v13037_v54 = vcombine.low %v1906_v61, %v2002_v4  ;;  %v13039_v2 = vcombine.low %v1907_v42, %v2003_v5  ;;  %v2197_v61 = vld [vmem:[%s14433_s20 + $0x1118] sm:$0xff] }
 0x65b   : > { %11055 = vmatpush1.bf16.xpose.msra.mxu0 %v13033_v47  ;;  %11095 = vmatpush1.bf16.xpose.msra.mxu1 %v13035_v57  ;;  %v13040_v47 = vcombine.high %v1907_v42, %v2003_v5  ;;  %v1714_v57 = vld [vmem:[%s14433_s20 + $0x200] sm:$0xff] }
 0x65c   : > { %11056 = vmatprep.subr.bf16.mxu0 %v12842_v36  ;;  %11096 = vmatprep.subr.bf16.mxu1 %v12844_v20  ;;  %v1810_v36 = vld [vmem:[%s14433_s20 + $0x500] sm:$0xff]  ;;  %v1715_v20 = vld [vmem:[%s14433_s20 + $0x208] sm:$0xff] }
 0x65d   : > { %v12846_v41 = vcombine.high %v1714_v57, %v1810_v36  ;;  %v12848_v25 = vcombine.high %v1715_v20, %v1811_v16  ;;  %v12845_v11 = vcombine.low %v1714_v57, %v1810_v36  ;;  %v12847_v52 = vcombine.low %v1715_v20, %v1811_v16  ;;  %v2005_v57 = vld [vmem:[%s14433_s20 + $0xb18] sm:$0xff] }
 0x663   : > { %11057 = vmatpush1.bf16.xpose.msra.mxu0 %v12841_v1  ;;  %11097 = vmatpush1.bf16.xpose.msra.mxu1 %v12843_v12  ;;  %v2676_v1 = vld [vmem:[%s14433_s20 + $0x2010] sm:$0xff] }
 0x664   : > { %11126 = vmatprep.subr.bf16.mxu0 %v13806_v46  ;;  %11166 = vmatprep.subr.bf16.mxu1 %v13808_v30  ;;  %v2772_v12 = vld [vmem:[%s14433_s20 + $0x2310] sm:$0xff]  ;;  %v2677_v46 = vld [vmem:[%s14433_s20 + $0x2018] sm:$0xff] }
 0x665   : > { %v2773_v30 = vld [vmem:[%s14433_s20 + $0x2318] sm:$0xff] }
 0x666   : > { %v13812_v35 = vcombine.high %v2677_v46, %v2773_v30 }
 0x66a   : > { %v10756_v18 = vpop.f32.mrf.mxu0  ;;  %11075 = vmatmul.mubr.bf16.vlgmr.msra.gmra.mxu0 %v1581_v53  ;;  %v10796_v9 = vpop.f32.mrf.mxu1  ;;  %11115 = vmatmul.mubr.bf16.vlgmr.msra.gmra.mxu1 %v1583_v29  ;;  %v13810_v53 = vcombine.high %v2676_v1, %v2772_v12  ;;  %v2484_v29 = vld [vmem:[%s14433_s20 + $0x1a10] sm:$0xff] }
 0x66b   : > { %v10757_v19 = vadd.f32 %v10756_v18, %v15763_v50  ;;  %11127 = vmatpush1.bf16.xpose.msra.mxu0 %v13805_v15  ;;  %11167 = vmatpush1.bf16.xpose.msra.mxu1 %v13807_v60  ;;  %v2580_v15 = vld [vmem:[%s14433_s20 + $0x1d10] sm:$0xff]  ;;  %v1025_v60 = vcombine.high %v15829_v28, %v15829_v28  ;;  %v1026_v18 = vcombine.high %v15832_v62, %v15832_v62 }
 0x66c   : > { %v10758_v56 = vpop.f32.mrf.mxu0  ;;  %11128 = vmatprep.subr.bf16.mxu0 %v13614_v0  ;;  %v10798_v45 = vpop.f32.mrf.mxu1  ;;  %11168 = vmatprep.subr.bf16.mxu1 %v13616_v40  ;;  %v1585_v0 = vpack.c.bf16 %v15787_v22, %v15787_v22  ;;  %v2485_v40 = vld [vmem:[%s14433_s20 + $0x1a18] sm:$0xff] }
 0x66d   : > { %v15805_v63 = vadd.f32 %v10796_v9, %v10757_v19  ;;  %11154 = vmatprep.mubr.bf16.mxu0 %v1586_v33  ;;  %11194 = vmatprep.mubr.bf16.mxu1 %v1588_v34  ;;  %v2581_v33 = vld [vmem:[%s14433_s20 + $0x1d18] sm:$0xff]  ;;  %v1587_v34 = vpack.c.bf16 %v15790_v10, %v15790_v10  ;;  %v13809_v19 = vcombine.low %v2676_v1, %v2772_v12 }
 0x66e   : > { %v10759_v39 = vpop.f32.mrf.mxu0  ;;  %v10799_v50 = vpop.f32.mrf.mxu1  ;;  %v13811_v9 = vcombine.low %v2677_v46, %v2773_v30  ;;  %v13618_v56 = vcombine.high %v2484_v29, %v2580_v15  ;;  %v13620_v45 = vcombine.high %v2485_v40, %v2581_v33  ;;  %v1590_v38 = vpack.c.bf16 %v1025_v60, %v1025_v60 }
 0x66f   : > { %v1592_v39 = vpack.c.bf16 %v1026_v18, %v1026_v18  ;;  %v13619_v49 = vcombine.low %v2485_v40, %v2581_v33  ;;  %v15871_v33 = vrot.slane %v387_v23, %v14467_v24 }
 0x670   : > { %v10760_v27 = vpop.f32.mrf.mxu0  ;;  %v10800_v59 = vpop.f32.mrf.mxu1 }
 0x671   : > { %v2388_v27 = vld [vmem:[%s14433_s20 + $0x1710] sm:$0xff]  ;;  %v2389_v59 = vld [vmem:[%s14433_s20 + $0x1718] sm:$0xff] }
 0x673   : > { %11129 = vmatpush1.bf16.xpose.msra.mxu0 %v13613_v43  ;;  %11169 = vmatpush1.bf16.xpose.msra.mxu1 %v13615_v44  ;;  %v2292_v43 = vld [vmem:[%s14433_s20 + $0x1410] sm:$0xff] }
 0x674   : > { %11130 = vmatprep.subr.bf16.mxu0 %v13422_v3  ;;  %11170 = vmatprep.subr.bf16.mxu1 %v13424_v48  ;;  %v2293_v3 = vld [vmem:[%s14433_s20 + $0x1418] sm:$0xff]  ;;  %v13617_v48 = vcombine.low %v2484_v29, %v2580_v15  ;;  %v13426_v8 = vcombine.high %v2292_v43, %v2388_v27  ;;  %v13425_v4 = vcombine.low %v2292_v43, %v2388_v27 }
 0x675   : > { %v13427_v42 = vcombine.low %v2293_v3, %v2389_v59  ;;  %v1027_v29 = vcombine.high %v387_v23, %v387_v23  ;;  %v1815_v23 = vld [vmem:[%s14433_s20 + $0x528] sm:$0xff] }
 0x677   : > { %v15874_v18 = vrot.slane %v1027_v29, %v14467_v24  ;;  %v388_v29 = vld [vmem:[%s14451_s13 + $0x118] sm:$0xff] }
 0x67b   : > { %11131 = vmatpush1.bf16.xpose.msra.mxu0 %v13421_v55  ;;  %11171 = vmatpush1.bf16.xpose.msra.mxu1 %v13423_v37  ;;  %v13428_v55 = vcombine.high %v2293_v3, %v2389_v59  ;;  %v2100_v37 = vld [vmem:[%s14433_s20 + $0xe10] sm:$0xff] }
 0x67c   : > { %11132 = vmatprep.subr.bf16.mxu0 %v13230_v58  ;;  %11172 = vmatprep.subr.bf16.mxu1 %v13232_v26  ;;  %v2196_v58 = vld [vmem:[%s14433_s20 + $0x1110] sm:$0xff]  ;;  %v2101_v26 = vld [vmem:[%s14433_s20 + $0xe18] sm:$0xff] }
 0x67d   : > { %v13234_v5 = vcombine.high %v2100_v37, %v2196_v58  ;;  %v13233_v36 = vcombine.low %v2100_v37, %v2196_v58  ;;  %v13235_v20 = vcombine.low %v2101_v26, %v2197_v61 }
 0x683   : > { %11133 = vmatpush1.bf16.xpose.msra.mxu0 %v13229_v31  ;;  %11173 = vmatpush1.bf16.xpose.msra.mxu1 %v13231_v17  ;;  %v13236_v31 = vcombine.high %v2101_v26, %v2197_v61  ;;  %v1908_v17 = vld [vmem:[%s14433_s20 + $0x810] sm:$0xff] }
 0x684   : > { %11134 = vmatprep.subr.bf16.mxu0 %v13038_v13  ;;  %11174 = vmatprep.subr.bf16.mxu1 %v13040_v47  ;;  %v2004_v13 = vld [vmem:[%s14433_s20 + $0xb10] sm:$0xff]  ;;  %v1909_v47 = vld [vmem:[%s14433_s20 + $0x818] sm:$0xff] }
 0x685   : > { %v13042_v16 = vcombine.high %v1908_v17, %v2004_v13  ;;  %v13041_v1 = vcombine.low %v1908_v17, %v2004_v13  ;;  %v13043_v12 = vcombine.low %v1909_v47, %v2005_v57  ;;  %v2199_v17 = vld [vmem:[%s14433_s20 + $0x1128] sm:$0xff] }
 0x68b   : > { %11135 = vmatpush1.bf16.xpose.msra.mxu0 %v13037_v54  ;;  %11175 = vmatpush1.bf16.xpose.msra.mxu1 %v13039_v2  ;;  %v13044_v54 = vcombine.high %v1909_v47, %v2005_v57  ;;  %v1716_v2 = vld [vmem:[%s14433_s20 + $0x210] sm:$0xff] }
 0x68c   : > { %11136 = vmatprep.subr.bf16.mxu0 %v12846_v41  ;;  %11176 = vmatprep.subr.bf16.mxu1 %v12848_v25  ;;  %v1812_v41 = vld [vmem:[%s14433_s20 + $0x510] sm:$0xff]  ;;  %v1717_v25 = vld [vmem:[%s14433_s20 + $0x218] sm:$0xff] }
 0x68d   : > { %v12850_v46 = vcombine.high %v1716_v2, %v1812_v41  ;;  %v12852_v30 = vcombine.high %v1717_v25, %v1813_v7  ;;  %v12849_v15 = vcombine.low %v1716_v2, %v1812_v41  ;;  %v12851_v60 = vcombine.low %v1717_v25, %v1813_v7  ;;  %v2007_v2 = vld [vmem:[%s14433_s20 + $0xb28] sm:$0xff] }
 0x693   : > { %11137 = vmatpush1.bf16.xpose.msra.mxu0 %v12845_v11  ;;  %11177 = vmatpush1.bf16.xpose.msra.mxu1 %v12847_v52  ;;  %v2678_v11 = vld [vmem:[%s14433_s20 + $0x2020] sm:$0xff] }
 0x694   : > { %11206 = vmatprep.subr.bf16.mxu0 %v13810_v53  ;;  %11246 = vmatprep.subr.bf16.mxu1 %v13812_v35  ;;  %v2774_v52 = vld [vmem:[%s14433_s20 + $0x2320] sm:$0xff]  ;;  %v2679_v53 = vld [vmem:[%s14433_s20 + $0x2028] sm:$0xff] }
 0x695   : > { %v2775_v35 = vld [vmem:[%s14433_s20 + $0x2328] sm:$0xff] }
 0x696   : > { %v13816_v40 = vcombine.high %v2679_v53, %v2775_v35 }
 0x69a   : > { %v10836_v21 = vpop.f32.mrf.mxu0  ;;  %11155 = vmatmul.mubr.bf16.vlgmr.msra.gmra.mxu0 %v1585_v0  ;;  %v10876_v14 = vpop.f32.mrf.mxu1  ;;  %11195 = vmatmul.mubr.bf16.vlgmr.msra.gmra.mxu1 %v1587_v34  ;;  %v13814_v0 = vcombine.high %v2678_v11, %v2774_v52  ;;  %v2486_v34 = vld [vmem:[%s14433_s20 + $0x1a20] sm:$0xff] }
 0x69b   : > { %v10837_v22 = vadd.f32 %v10836_v21, %v15805_v63  ;;  %11207 = vmatpush1.bf16.xpose.msra.mxu0 %v13809_v19  ;;  %11247 = vmatpush1.bf16.xpose.msra.mxu1 %v13811_v9  ;;  %v2582_v19 = vld [vmem:[%s14433_s20 + $0x1d20] sm:$0xff]  ;;  %v1042_v9 = vcombine.high %v15871_v33, %v15871_v33  ;;  %v1043_v21 = vcombine.high %v15874_v18, %v15874_v18 }
 0x69c   : > { %v10838_v51 = vpop.f32.mrf.mxu0  ;;  %11208 = vmatprep.subr.bf16.mxu0 %v13618_v56  ;;  %v10878_v50 = vpop.f32.mrf.mxu1  ;;  %11248 = vmatprep.subr.bf16.mxu1 %v13620_v45  ;;  %v1589_v56 = vpack.c.bf16 %v15829_v28, %v15829_v28  ;;  %v2487_v45 = vld [vmem:[%s14433_s20 + $0x1a28] sm:$0xff] }
 0x69d   : > { %v15847_v10 = vadd.f32 %v10876_v14, %v10837_v22  ;;  %11234 = vmatprep.mubr.bf16.mxu0 %v1590_v38  ;;  %11274 = vmatprep.mubr.bf16.mxu1 %v1592_v39  ;;  %v2583_v38 = vld [vmem:[%s14433_s20 + $0x1d28] sm:$0xff]  ;;  %v1591_v39 = vpack.c.bf16 %v15832_v62, %v15832_v62  ;;  %v13813_v22 = vcombine.low %v2678_v11, %v2774_v52 }
 0x69e   : > { %v10839_v44 = vpop.f32.mrf.mxu0  ;;  %v10879_v63 = vpop.f32.mrf.mxu1  ;;  %v13815_v14 = vcombine.low %v2679_v53, %v2775_v35  ;;  %v13622_v51 = vcombine.high %v2486_v34, %v2582_v19  ;;  %v13624_v50 = vcombine.high %v2487_v45, %v2583_v38  ;;  %v1594_v43 = vpack.c.bf16 %v1042_v9, %v1042_v9 }
 0x69f   : > { %v1596_v44 = vpack.c.bf16 %v1043_v21, %v1043_v21  ;;  %v13623_v58 = vcombine.low %v2487_v45, %v2583_v38  ;;  %v15913_v38 = vrot.slane %v388_v29, %v14467_v24 }
 0x6a0   : > { %v10840_v32 = vpop.f32.mrf.mxu0  ;;  %v10880_v6 = vpop.f32.mrf.mxu1 }
 0x6a1   : > { %v2390_v32 = vld [vmem:[%s14433_s20 + $0x1720] sm:$0xff]  ;;  %v2391_v6 = vld [vmem:[%s14433_s20 + $0x1728] sm:$0xff] }
 0x6a3   : > { %11209 = vmatpush1.bf16.xpose.msra.mxu0 %v13617_v48  ;;  %11249 = vmatpush1.bf16.xpose.msra.mxu1 %v13619_v49  ;;  %v2294_v48 = vld [vmem:[%s14433_s20 + $0x1420] sm:$0xff] }
 0x6a4   : > { %11210 = vmatprep.subr.bf16.mxu0 %v13426_v8  ;;  %11250 = vmatprep.subr.bf16.mxu1 %v13428_v55  ;;  %v2295_v8 = vld [vmem:[%s14433_s20 + $0x1428] sm:$0xff]  ;;  %v13621_v55 = vcombine.low %v2486_v34, %v2582_v19  ;;  %v13430_v26 = vcombine.high %v2294_v48, %v2390_v32  ;;  %v13429_v13 = vcombine.low %v2294_v48, %v2390_v32 }
 0x6a5   : > { %v13431_v47 = vcombine.low %v2295_v8, %v2391_v6  ;;  %v1044_v34 = vcombine.high %v388_v29, %v388_v29  ;;  %v1817_v29 = vld [vmem:[%s14433_s20 + $0x538] sm:$0xff] }
 0x6a7   : > { %v15916_v21 = vrot.slane %v1044_v34, %v14467_v24  ;;  %v389_v34 = vld [vmem:[%s14451_s13 + $0x120] sm:$0xff] }
 0x6ab   : > { %11211 = vmatpush1.bf16.xpose.msra.mxu0 %v13425_v4  ;;  %11251 = vmatpush1.bf16.xpose.msra.mxu1 %v13427_v42  ;;  %v13432_v4 = vcombine.high %v2295_v8, %v2391_v6  ;;  %v2102_v42 = vld [vmem:[%s14433_s20 + $0xe20] sm:$0xff] }
 0x6ac   : > { %11212 = vmatprep.subr.bf16.mxu0 %v13234_v5  ;;  %11252 = vmatprep.subr.bf16.mxu1 %v13236_v31  ;;  %v2198_v5 = vld [vmem:[%s14433_s20 + $0x1120] sm:$0xff]  ;;  %v2103_v31 = vld [vmem:[%s14433_s20 + $0xe28] sm:$0xff] }
 0x6ad   : > { %v13238_v57 = vcombine.high %v2102_v42, %v2198_v5  ;;  %v13237_v41 = vcombine.low %v2102_v42, %v2198_v5  ;;  %v13239_v25 = vcombine.low %v2103_v31, %v2199_v17 }
 0x6b3   : > { %11213 = vmatpush1.bf16.xpose.msra.mxu0 %v13233_v36  ;;  %11253 = vmatpush1.bf16.xpose.msra.mxu1 %v13235_v20  ;;  %v13240_v36 = vcombine.high %v2103_v31, %v2199_v17  ;;  %v1910_v20 = vld [vmem:[%s14433_s20 + $0x820] sm:$0xff] }
 0x6b4   : > { %11214 = vmatprep.subr.bf16.mxu0 %v13042_v16  ;;  %11254 = vmatprep.subr.bf16.mxu1 %v13044_v54  ;;  %v2006_v16 = vld [vmem:[%s14433_s20 + $0xb20] sm:$0xff]  ;;  %v1911_v54 = vld [vmem:[%s14433_s20 + $0x828] sm:$0xff] }
 0x6b5   : > { %v13046_v7 = vcombine.high %v1910_v20, %v2006_v16  ;;  %v13045_v11 = vcombine.low %v1910_v20, %v2006_v16  ;;  %v13047_v52 = vcombine.low %v1911_v54, %v2007_v2  ;;  %v2201_v20 = vld [vmem:[%s14433_s20 + $0x1138] sm:$0xff] }
 0x6bb   : > { %11215 = vmatpush1.bf16.xpose.msra.mxu0 %v13041_v1  ;;  %11255 = vmatpush1.bf16.xpose.msra.mxu1 %v13043_v12  ;;  %v13048_v1 = vcombine.high %v1911_v54, %v2007_v2  ;;  %v1718_v12 = vld [vmem:[%s14433_s20 + $0x220] sm:$0xff] }
 0x6bc   : > { %11216 = vmatprep.subr.bf16.mxu0 %v12850_v46  ;;  %11256 = vmatprep.subr.bf16.mxu1 %v12852_v30  ;;  %v1814_v46 = vld [vmem:[%s14433_s20 + $0x520] sm:$0xff]  ;;  %v1719_v30 = vld [vmem:[%s14433_s20 + $0x228] sm:$0xff] }
 0x6bd   : > { %v12854_v53 = vcombine.high %v1718_v12, %v1814_v46  ;;  %v12856_v35 = vcombine.high %v1719_v30, %v1815_v23  ;;  %v12853_v19 = vcombine.low %v1718_v12, %v1814_v46  ;;  %v12855_v9 = vcombine.low %v1719_v30, %v1815_v23  ;;  %v2009_v12 = vld [vmem:[%s14433_s20 + $0xb38] sm:$0xff] }
 0x6c3   : > { %11217 = vmatpush1.bf16.xpose.msra.mxu0 %v12849_v15  ;;  %11257 = vmatpush1.bf16.xpose.msra.mxu1 %v12851_v60  ;;  %v2680_v15 = vld [vmem:[%s14433_s20 + $0x2030] sm:$0xff] }
 0x6c4   : > { %11286 = vmatprep.subr.bf16.mxu0 %v13814_v0  ;;  %11326 = vmatprep.subr.bf16.mxu1 %v13816_v40  ;;  %v2776_v60 = vld [vmem:[%s14433_s20 + $0x2330] sm:$0xff]  ;;  %v2681_v0 = vld [vmem:[%s14433_s20 + $0x2038] sm:$0xff] }
 0x6c5   : > { %v2777_v40 = vld [vmem:[%s14433_s20 + $0x2338] sm:$0xff] }
 0x6c6   : > { %v13820_v45 = vcombine.high %v2681_v0, %v2777_v40 }
 0x6ca   : > { %v10916_v27 = vpop.f32.mrf.mxu0  ;;  %11235 = vmatmul.mubr.bf16.vlgmr.msra.gmra.mxu0 %v1589_v56  ;;  %v10956_v3 = vpop.f32.mrf.mxu1  ;;  %11275 = vmatmul.mubr.bf16.vlgmr.msra.gmra.mxu1 %v1591_v39  ;;  %v13818_v56 = vcombine.high %v2680_v15, %v2776_v60  ;;  %v2488_v39 = vld [vmem:[%s14433_s20 + $0x1a30] sm:$0xff] }
 0x6cb   : > { %v10917_v28 = vadd.f32 %v10916_v27, %v15847_v10  ;;  %11287 = vmatpush1.bf16.xpose.msra.mxu0 %v13813_v22  ;;  %11327 = vmatpush1.bf16.xpose.msra.mxu1 %v13815_v14  ;;  %v2584_v22 = vld [vmem:[%s14433_s20 + $0x1d30] sm:$0xff]  ;;  %v1059_v14 = vcombine.high %v15913_v38, %v15913_v38  ;;  %v1060_v27 = vcombine.high %v15916_v21, %v15916_v21 }
 0x6cc   : > { %v10918_v59 = vpop.f32.mrf.mxu0  ;;  %11288 = vmatprep.subr.bf16.mxu0 %v13622_v51  ;;  %v10958_v63 = vpop.f32.mrf.mxu1  ;;  %11328 = vmatprep.subr.bf16.mxu1 %v13624_v50  ;;  %v1593_v51 = vpack.c.bf16 %v15871_v33, %v15871_v33  ;;  %v2489_v50 = vld [vmem:[%s14433_s20 + $0x1a38] sm:$0xff] }
 0x6cd   : > { %v15889_v62 = vadd.f32 %v10956_v3, %v10917_v28  ;;  %11314 = vmatprep.mubr.bf16.mxu0 %v1594_v43  ;;  %11354 = vmatprep.mubr.bf16.mxu1 %v1596_v44  ;;  %v2585_v43 = vld [vmem:[%s14433_s20 + $0x1d38] sm:$0xff]  ;;  %v1595_v44 = vpack.c.bf16 %v15874_v18, %v15874_v18  ;;  %v13817_v28 = vcombine.low %v2680_v15, %v2776_v60 }
 0x6ce   : > { %v10919_v49 = vpop.f32.mrf.mxu0  ;;  %v10959_v10 = vpop.f32.mrf.mxu1  ;;  %v13819_v3 = vcombine.low %v2681_v0, %v2777_v40  ;;  %v13626_v59 = vcombine.high %v2488_v39, %v2584_v22  ;;  %v13628_v63 = vcombine.high %v2489_v50, %v2585_v43  ;;  %v1598_v48 = vpack.c.bf16 %v1059_v14, %v1059_v14 }
 0x6cf   : > { %v1600_v49 = vpack.c.bf16 %v1060_v27, %v1060_v27  ;;  %v13627_v5 = vcombine.low %v2489_v50, %v2585_v43  ;;  %v15955_v43 = vrot.slane %v389_v34, %v14467_v24 }
 0x6d0   : > { %v10920_v37 = vpop.f32.mrf.mxu0  ;;  %v10960_v61 = vpop.f32.mrf.mxu1 }
 0x6d1   : > { %v2392_v37 = vld [vmem:[%s14433_s20 + $0x1730] sm:$0xff]  ;;  %v2393_v61 = vld [vmem:[%s14433_s20 + $0x1738] sm:$0xff] }
 0x6d3   : > { %11289 = vmatpush1.bf16.xpose.msra.mxu0 %v13621_v55  ;;  %11329 = vmatpush1.bf16.xpose.msra.mxu1 %v13623_v58  ;;  %v2296_v55 = vld [vmem:[%s14433_s20 + $0x1430] sm:$0xff] }
 0x6d4   : > { %11290 = vmatprep.subr.bf16.mxu0 %v13430_v26  ;;  %11330 = vmatprep.subr.bf16.mxu1 %v13432_v4  ;;  %v2297_v26 = vld [vmem:[%s14433_s20 + $0x1438] sm:$0xff]  ;;  %v13625_v4 = vcombine.low %v2488_v39, %v2584_v22  ;;  %v13434_v31 = vcombine.high %v2296_v55, %v2392_v37  ;;  %v13433_v16 = vcombine.low %v2296_v55, %v2392_v37 }
 0x6d5   : > { %v13435_v54 = vcombine.low %v2297_v26, %v2393_v61  ;;  %v1061_v39 = vcombine.high %v389_v34, %v389_v34  ;;  %v1819_v34 = vld [vmem:[%s14433_s20 + $0x548] sm:$0xff] }
 0x6d7   : > { %v15958_v27 = vrot.slane %v1061_v39, %v14467_v24  ;;  %v390_v39 = vld [vmem:[%s14451_s13 + $0x128] sm:$0xff] }
 0x6db   : > { %11291 = vmatpush1.bf16.xpose.msra.mxu0 %v13429_v13  ;;  %11331 = vmatpush1.bf16.xpose.msra.mxu1 %v13431_v47  ;;  %v13436_v13 = vcombine.high %v2297_v26, %v2393_v61  ;;  %v2104_v47 = vld [vmem:[%s14433_s20 + $0xe30] sm:$0xff] }
 0x6dc   : > { %11292 = vmatprep.subr.bf16.mxu0 %v13238_v57  ;;  %11332 = vmatprep.subr.bf16.mxu1 %v13240_v36  ;;  %v2200_v57 = vld [vmem:[%s14433_s20 + $0x1130] sm:$0xff]  ;;  %v2105_v36 = vld [vmem:[%s14433_s20 + $0xe38] sm:$0xff] }
 0x6dd   : > { %v13242_v2 = vcombine.high %v2104_v47, %v2200_v57  ;;  %v13241_v46 = vcombine.low %v2104_v47, %v2200_v57  ;;  %v13243_v30 = vcombine.low %v2105_v36, %v2201_v20 }
 0x6e3   : > { %11293 = vmatpush1.bf16.xpose.msra.mxu0 %v13237_v41  ;;  %11333 = vmatpush1.bf16.xpose.msra.mxu1 %v13239_v25  ;;  %v13244_v41 = vcombine.high %v2105_v36, %v2201_v20  ;;  %v1912_v25 = vld [vmem:[%s14433_s20 + $0x830] sm:$0xff] }
 0x6e4   : > { %11294 = vmatprep.subr.bf16.mxu0 %v13046_v7  ;;  %11334 = vmatprep.subr.bf16.mxu1 %v13048_v1  ;;  %v2008_v7 = vld [vmem:[%s14433_s20 + $0xb30] sm:$0xff]  ;;  %v1913_v1 = vld [vmem:[%s14433_s20 + $0x838] sm:$0xff] }
 0x6e5   : > { %v13050_v23 = vcombine.high %v1912_v25, %v2008_v7  ;;  %v13049_v15 = vcombine.low %v1912_v25, %v2008_v7  ;;  %v13051_v60 = vcombine.low %v1913_v1, %v2009_v12  ;;  %v2203_v25 = vld [vmem:[%s14433_s20 + $0x1148] sm:$0xff] }
 0x6eb   : > { %11295 = vmatpush1.bf16.xpose.msra.mxu0 %v13045_v11  ;;  %11335 = vmatpush1.bf16.xpose.msra.mxu1 %v13047_v52  ;;  %v13052_v11 = vcombine.high %v1913_v1, %v2009_v12  ;;  %v1720_v52 = vld [vmem:[%s14433_s20 + $0x230] sm:$0xff] }
 0x6ec   : > { %11296 = vmatprep.subr.bf16.mxu0 %v12854_v53  ;;  %11336 = vmatprep.subr.bf16.mxu1 %v12856_v35  ;;  %v1816_v53 = vld [vmem:[%s14433_s20 + $0x530] sm:$0xff]  ;;  %v1721_v35 = vld [vmem:[%s14433_s20 + $0x238] sm:$0xff] }
 0x6ed   : > { %v12858_v0 = vcombine.high %v1720_v52, %v1816_v53  ;;  %v12860_v40 = vcombine.high %v1721_v35, %v1817_v29  ;;  %v12857_v22 = vcombine.low %v1720_v52, %v1816_v53  ;;  %v12859_v14 = vcombine.low %v1721_v35, %v1817_v29  ;;  %v2011_v52 = vld [vmem:[%s14433_s20 + $0xb48] sm:$0xff] }
 0x6f3   : > { %11297 = vmatpush1.bf16.xpose.msra.mxu0 %v12853_v19  ;;  %11337 = vmatpush1.bf16.xpose.msra.mxu1 %v12855_v9  ;;  %v2682_v19 = vld [vmem:[%s14433_s20 + $0x2040] sm:$0xff] }
 0x6f4   : > { %11366 = vmatprep.subr.bf16.mxu0 %v13818_v56  ;;  %11406 = vmatprep.subr.bf16.mxu1 %v13820_v45  ;;  %v2778_v9 = vld [vmem:[%s14433_s20 + $0x2340] sm:$0xff]  ;;  %v2683_v56 = vld [vmem:[%s14433_s20 + $0x2048] sm:$0xff] }
 0x6f5   : > { %v2779_v45 = vld [vmem:[%s14433_s20 + $0x2348] sm:$0xff] }
 0x6f6   : > { %v13824_v50 = vcombine.high %v2683_v56, %v2779_v45 }
 0x6fa   : > { %v10996_v32 = vpop.f32.mrf.mxu0  ;;  %11315 = vmatmul.mubr.bf16.vlgmr.msra.gmra.mxu0 %v1593_v51  ;;  %v11036_v8 = vpop.f32.mrf.mxu1  ;;  %11355 = vmatmul.mubr.bf16.vlgmr.msra.gmra.mxu1 %v1595_v44  ;;  %v13822_v51 = vcombine.high %v2682_v19, %v2778_v9  ;;  %v2490_v44 = vld [vmem:[%s14433_s20 + $0x1a40] sm:$0xff] }
 0x6fb   : > { %v10997_v33 = vadd.f32 %v10996_v32, %v15889_v62  ;;  %11367 = vmatpush1.bf16.xpose.msra.mxu0 %v13817_v28  ;;  %11407 = vmatpush1.bf16.xpose.msra.mxu1 %v13819_v3  ;;  %v2586_v28 = vld [vmem:[%s14433_s20 + $0x1d40] sm:$0xff]  ;;  %v1076_v3 = vcombine.high %v15955_v43, %v15955_v43  ;;  %v1077_v32 = vcombine.high %v15958_v27, %v15958_v27 }
 0x6fc   : > { %v10998_v6 = vpop.f32.mrf.mxu0  ;;  %11368 = vmatprep.subr.bf16.mxu0 %v13626_v59  ;;  %v11038_v10 = vpop.f32.mrf.mxu1  ;;  %11408 = vmatprep.subr.bf16.mxu1 %v13628_v63  ;;  %v1597_v59 = vpack.c.bf16 %v15913_v38, %v15913_v38  ;;  %v2491_v63 = vld [vmem:[%s14433_s20 + $0x1a48] sm:$0xff] }
 0x6fd   : > { %v15931_v18 = vadd.f32 %v11036_v8, %v10997_v33  ;;  %11394 = vmatprep.mubr.bf16.mxu0 %v1598_v48  ;;  %11434 = vmatprep.mubr.bf16.mxu1 %v1600_v49  ;;  %v2587_v48 = vld [vmem:[%s14433_s20 + $0x1d48] sm:$0xff]  ;;  %v1599_v49 = vpack.c.bf16 %v15916_v21, %v15916_v21  ;;  %v13821_v33 = vcombine.low %v2682_v19, %v2778_v9 }
 0x6fe   : > { %v10999_v58 = vpop.f32.mrf.mxu0  ;;  %v11039_v62 = vpop.f32.mrf.mxu1  ;;  %v13823_v8 = vcombine.low %v2683_v56, %v2779_v45  ;;  %v13630_v6 = vcombine.high %v2490_v44, %v2586_v28  ;;  %v13632_v10 = vcombine.high %v2491_v63, %v2587_v48  ;;  %v1602_v55 = vpack.c.bf16 %v1076_v3, %v1076_v3 }
 0x6ff   : > { %v1604_v58 = vpack.c.bf16 %v1077_v32, %v1077_v32  ;;  %v13631_v57 = vcombine.low %v2491_v63, %v2587_v48  ;;  %v15997_v48 = vrot.slane %v390_v39, %v14467_v24 }
 0x700   : > { %v11000_v42 = vpop.f32.mrf.mxu0  ;;  %v11040_v17 = vpop.f32.mrf.mxu1 }
 0x701   : > { %v2394_v42 = vld [vmem:[%s14433_s20 + $0x1740] sm:$0xff]  ;;  %v2395_v17 = vld [vmem:[%s14433_s20 + $0x1748] sm:$0xff] }
 0x703   : > { %11369 = vmatpush1.bf16.xpose.msra.mxu0 %v13625_v4  ;;  %11409 = vmatpush1.bf16.xpose.msra.mxu1 %v13627_v5  ;;  %v2298_v4 = vld [vmem:[%s14433_s20 + $0x1440] sm:$0xff] }
 0x704   : > { %11370 = vmatprep.subr.bf16.mxu0 %v13434_v31  ;;  %11410 = vmatprep.subr.bf16.mxu1 %v13436_v13  ;;  %v2299_v31 = vld [vmem:[%s14433_s20 + $0x1448] sm:$0xff]  ;;  %v13629_v13 = vcombine.low %v2490_v44, %v2586_v28  ;;  %v13438_v36 = vcombine.high %v2298_v4, %v2394_v42  ;;  %v13437_v7 = vcombine.low %v2298_v4, %v2394_v42 }
 0x705   : > { %v13439_v1 = vcombine.low %v2299_v31, %v2395_v17  ;;  %v1078_v44 = vcombine.high %v390_v39, %v390_v39  ;;  %v1821_v39 = vld [vmem:[%s14433_s20 + $0x558] sm:$0xff] }
 0x707   : > { %v16000_v32 = vrot.slane %v1078_v44, %v14467_v24  ;;  %v391_v44 = vld [vmem:[%s14451_s13 + $0x130] sm:$0xff] }
 0x70b   : > { %11371 = vmatpush1.bf16.xpose.msra.mxu0 %v13433_v16  ;;  %11411 = vmatpush1.bf16.xpose.msra.mxu1 %v13435_v54  ;;  %v13440_v16 = vcombine.high %v2299_v31, %v2395_v17  ;;  %v2106_v54 = vld [vmem:[%s14433_s20 + $0xe40] sm:$0xff] }
 0x70c   : > { %11372 = vmatprep.subr.bf16.mxu0 %v13242_v2  ;;  %11412 = vmatprep.subr.bf16.mxu1 %v13244_v41  ;;  %v2202_v2 = vld [vmem:[%s14433_s20 + $0x1140] sm:$0xff]  ;;  %v2107_v41 = vld [vmem:[%s14433_s20 + $0xe48] sm:$0xff] }
 0x70d   : > { %v13246_v12 = vcombine.high %v2106_v54, %v2202_v2  ;;  %v13245_v53 = vcombine.low %v2106_v54, %v2202_v2  ;;  %v13247_v35 = vcombine.low %v2107_v41, %v2203_v25 }
 0x713   : > { %11373 = vmatpush1.bf16.xpose.msra.mxu0 %v13241_v46  ;;  %11413 = vmatpush1.bf16.xpose.msra.mxu1 %v13243_v30  ;;  %v13248_v46 = vcombine.high %v2107_v41, %v2203_v25  ;;  %v1914_v30 = vld [vmem:[%s14433_s20 + $0x840] sm:$0xff] }
 0x714   : > { %11374 = vmatprep.subr.bf16.mxu0 %v13050_v23  ;;  %11414 = vmatprep.subr.bf16.mxu1 %v13052_v11  ;;  %v2010_v23 = vld [vmem:[%s14433_s20 + $0xb40] sm:$0xff]  ;;  %v1915_v11 = vld [vmem:[%s14433_s20 + $0x848] sm:$0xff] }
 0x715   : > { %v13054_v29 = vcombine.high %v1914_v30, %v2010_v23  ;;  %v13053_v19 = vcombine.low %v1914_v30, %v2010_v23  ;;  %v13055_v9 = vcombine.low %v1915_v11, %v2011_v52  ;;  %v2205_v30 = vld [vmem:[%s14433_s20 + $0x1158] sm:$0xff] }
 0x71b   : > { %11375 = vmatpush1.bf16.xpose.msra.mxu0 %v13049_v15  ;;  %11415 = vmatpush1.bf16.xpose.msra.mxu1 %v13051_v60  ;;  %v13056_v15 = vcombine.high %v1915_v11, %v2011_v52  ;;  %v1722_v60 = vld [vmem:[%s14433_s20 + $0x240] sm:$0xff] }
 0x71c   : > { %11376 = vmatprep.subr.bf16.mxu0 %v12858_v0  ;;  %11416 = vmatprep.subr.bf16.mxu1 %v12860_v40  ;;  %v1818_v0 = vld [vmem:[%s14433_s20 + $0x540] sm:$0xff]  ;;  %v1723_v40 = vld [vmem:[%s14433_s20 + $0x248] sm:$0xff] }
 0x71d   : > { %v12862_v56 = vcombine.high %v1722_v60, %v1818_v0  ;;  %v12864_v45 = vcombine.high %v1723_v40, %v1819_v34  ;;  %v12861_v28 = vcombine.low %v1722_v60, %v1818_v0  ;;  %v12863_v3 = vcombine.low %v1723_v40, %v1819_v34  ;;  %v2013_v60 = vld [vmem:[%s14433_s20 + $0xb58] sm:$0xff] }
 0x723   : > { %11377 = vmatpush1.bf16.xpose.msra.mxu0 %v12857_v22  ;;  %11417 = vmatpush1.bf16.xpose.msra.mxu1 %v12859_v14  ;;  %v2684_v22 = vld [vmem:[%s14433_s20 + $0x2050] sm:$0xff] }
 0x724   : > { %11446 = vmatprep.subr.bf16.mxu0 %v13822_v51  ;;  %11486 = vmatprep.subr.bf16.mxu1 %v13824_v50  ;;  %v2780_v14 = vld [vmem:[%s14433_s20 + $0x2350] sm:$0xff]  ;;  %v2685_v51 = vld [vmem:[%s14433_s20 + $0x2058] sm:$0xff] }
 0x725   : > { %v2781_v50 = vld [vmem:[%s14433_s20 + $0x2358] sm:$0xff] }
 0x726   : > { %v13828_v63 = vcombine.high %v2685_v51, %v2781_v50 }
 0x72a   : > { %v11076_v37 = vpop.f32.mrf.mxu0  ;;  %11395 = vmatmul.mubr.bf16.vlgmr.msra.gmra.mxu0 %v1597_v59  ;;  %v11116_v26 = vpop.f32.mrf.mxu1  ;;  %11435 = vmatmul.mubr.bf16.vlgmr.msra.gmra.mxu1 %v1599_v49  ;;  %v13826_v59 = vcombine.high %v2684_v22, %v2780_v14  ;;  %v2492_v49 = vld [vmem:[%s14433_s20 + $0x1a50] sm:$0xff] }
 0x72b   : > { %v11077_v38 = vadd.f32 %v11076_v37, %v15931_v18  ;;  %11447 = vmatpush1.bf16.xpose.msra.mxu0 %v13821_v33  ;;  %11487 = vmatpush1.bf16.xpose.msra.mxu1 %v13823_v8  ;;  %v2588_v33 = vld [vmem:[%s14433_s20 + $0x1d50] sm:$0xff]  ;;  %v1093_v8 = vcombine.high %v15997_v48, %v15997_v48  ;;  %v1094_v37 = vcombine.high %v16000_v32, %v16000_v32 }
 0x72c   : > { %v11078_v61 = vpop.f32.mrf.mxu0  ;;  %11448 = vmatprep.subr.bf16.mxu0 %v13630_v6  ;;  %v11118_v62 = vpop.f32.mrf.mxu1  ;;  %11488 = vmatprep.subr.bf16.mxu1 %v13632_v10  ;;  %v1601_v6 = vpack.c.bf16 %v15955_v43, %v15955_v43  ;;  %v2493_v10 = vld [vmem:[%s14433_s20 + $0x1a58] sm:$0xff] }
 0x72d   : > { %v15973_v21 = vadd.f32 %v11116_v26, %v11077_v38  ;;  %11474 = vmatprep.mubr.bf16.mxu0 %v1602_v55  ;;  %11514 = vmatprep.mubr.bf16.mxu1 %v1604_v58  ;;  %v2589_v55 = vld [vmem:[%s14433_s20 + $0x1d58] sm:$0xff]  ;;  %v1603_v58 = vpack.c.bf16 %v15958_v27, %v15958_v27  ;;  %v13825_v38 = vcombine.low %v2684_v22, %v2780_v14 }
 0x72e   : > { %v11079_v5 = vpop.f32.mrf.mxu0  ;;  %v11119_v18 = vpop.f32.mrf.mxu1  ;;  %v13827_v26 = vcombine.low %v2685_v51, %v2781_v50  ;;  %v13634_v61 = vcombine.high %v2492_v49, %v2588_v33  ;;  %v13636_v62 = vcombine.high %v2493_v10, %v2589_v55  ;;  %v1606_v4 = vpack.c.bf16 %v1093_v8, %v1093_v8 }
 0x72f   : > { %v1608_v5 = vpack.c.bf16 %v1094_v37, %v1094_v37  ;;  %v13635_v2 = vcombine.low %v2493_v10, %v2589_v55  ;;  %v16039_v55 = vrot.slane %v391_v44, %v14467_v24 }
 0x730   : > { %v11080_v47 = vpop.f32.mrf.mxu0  ;;  %v11120_v20 = vpop.f32.mrf.mxu1 }
 0x731   : > { %v2396_v47 = vld [vmem:[%s14433_s20 + $0x1750] sm:$0xff]  ;;  %v2397_v20 = vld [vmem:[%s14433_s20 + $0x1758] sm:$0xff] }
 0x733   : > { %11449 = vmatpush1.bf16.xpose.msra.mxu0 %v13629_v13  ;;  %11489 = vmatpush1.bf16.xpose.msra.mxu1 %v13631_v57  ;;  %v2300_v13 = vld [vmem:[%s14433_s20 + $0x1450] sm:$0xff] }
 0x734   : > { %11450 = vmatprep.subr.bf16.mxu0 %v13438_v36  ;;  %11490 = vmatprep.subr.bf16.mxu1 %v13440_v16  ;;  %v2301_v36 = vld [vmem:[%s14433_s20 + $0x1458] sm:$0xff]  ;;  %v13633_v16 = vcombine.low %v2492_v49, %v2588_v33  ;;  %v13442_v41 = vcombine.high %v2300_v13, %v2396_v47  ;;  %v13441_v23 = vcombine.low %v2300_v13, %v2396_v47 }
 0x735   : > { %v13443_v11 = vcombine.low %v2301_v36, %v2397_v20  ;;  %v1095_v49 = vcombine.high %v391_v44, %v391_v44  ;;  %v1823_v44 = vld [vmem:[%s14433_s20 + $0x568] sm:$0xff] }
 0x737   : > { %v16042_v37 = vrot.slane %v1095_v49, %v14467_v24  ;;  %v392_v49 = vld [vmem:[%s14451_s13 + $0x138] sm:$0xff] }
 0x73b   : > { %11451 = vmatpush1.bf16.xpose.msra.mxu0 %v13437_v7  ;;  %11491 = vmatpush1.bf16.xpose.msra.mxu1 %v13439_v1  ;;  %v13444_v7 = vcombine.high %v2301_v36, %v2397_v20  ;;  %v2108_v1 = vld [vmem:[%s14433_s20 + $0xe50] sm:$0xff] }
 0x73c   : > { %11452 = vmatprep.subr.bf16.mxu0 %v13246_v12  ;;  %11492 = vmatprep.subr.bf16.mxu1 %v13248_v46  ;;  %v2204_v12 = vld [vmem:[%s14433_s20 + $0x1150] sm:$0xff]  ;;  %v2109_v46 = vld [vmem:[%s14433_s20 + $0xe58] sm:$0xff] }
 0x73d   : > { %v13250_v52 = vcombine.high %v2108_v1, %v2204_v12  ;;  %v13249_v0 = vcombine.low %v2108_v1, %v2204_v12  ;;  %v13251_v40 = vcombine.low %v2109_v46, %v2205_v30 }
 0x743   : > { %11453 = vmatpush1.bf16.xpose.msra.mxu0 %v13245_v53  ;;  %11493 = vmatpush1.bf16.xpose.msra.mxu1 %v13247_v35  ;;  %v13252_v53 = vcombine.high %v2109_v46, %v2205_v30  ;;  %v1916_v35 = vld [vmem:[%s14433_s20 + $0x850] sm:$0xff] }
 0x744   : > { %11454 = vmatprep.subr.bf16.mxu0 %v13054_v29  ;;  %11494 = vmatprep.subr.bf16.mxu1 %v13056_v15  ;;  %v2012_v29 = vld [vmem:[%s14433_s20 + $0xb50] sm:$0xff]  ;;  %v1917_v15 = vld [vmem:[%s14433_s20 + $0x858] sm:$0xff] }
 0x745   : > { %v13058_v34 = vcombine.high %v1916_v35, %v2012_v29  ;;  %v13057_v22 = vcombine.low %v1916_v35, %v2012_v29  ;;  %v13059_v14 = vcombine.low %v1917_v15, %v2013_v60  ;;  %v2207_v35 = vld [vmem:[%s14433_s20 + $0x1168] sm:$0xff] }
 0x74b   : > { %11455 = vmatpush1.bf16.xpose.msra.mxu0 %v13053_v19  ;;  %11495 = vmatpush1.bf16.xpose.msra.mxu1 %v13055_v9  ;;  %v13060_v19 = vcombine.high %v1917_v15, %v2013_v60  ;;  %v1724_v9 = vld [vmem:[%s14433_s20 + $0x250] sm:$0xff] }
 0x74c   : > { %11456 = vmatprep.subr.bf16.mxu0 %v12862_v56  ;;  %11496 = vmatprep.subr.bf16.mxu1 %v12864_v45  ;;  %v1820_v56 = vld [vmem:[%s14433_s20 + $0x550] sm:$0xff]  ;;  %v1725_v45 = vld [vmem:[%s14433_s20 + $0x258] sm:$0xff] }
 0x74d   : > { %v12866_v51 = vcombine.high %v1724_v9, %v1820_v56  ;;  %v12868_v50 = vcombine.high %v1725_v45, %v1821_v39  ;;  %v12865_v33 = vcombine.low %v1724_v9, %v1820_v56  ;;  %v12867_v8 = vcombine.low %v1725_v45, %v1821_v39  ;;  %v2015_v9 = vld [vmem:[%s14433_s20 + $0xb68] sm:$0xff] }
 0x753   : > { %11457 = vmatpush1.bf16.xpose.msra.mxu0 %v12861_v28  ;;  %11497 = vmatpush1.bf16.xpose.msra.mxu1 %v12863_v3  ;;  %v2686_v28 = vld [vmem:[%s14433_s20 + $0x2060] sm:$0xff] }
 0x754   : > { %11526 = vmatprep.subr.bf16.mxu0 %v13826_v59  ;;  %11566 = vmatprep.subr.bf16.mxu1 %v13828_v63  ;;  %v2782_v3 = vld [vmem:[%s14433_s20 + $0x2360] sm:$0xff]  ;;  %v2687_v59 = vld [vmem:[%s14433_s20 + $0x2068] sm:$0xff] }
 0x755   : > { %v2783_v63 = vld [vmem:[%s14433_s20 + $0x2368] sm:$0xff] }
 0x756   : > { %v13832_v10 = vcombine.high %v2687_v59, %v2783_v63 }
 0x75a   : > { %v11156_v42 = vpop.f32.mrf.mxu0  ;;  %11475 = vmatmul.mubr.bf16.vlgmr.msra.gmra.mxu0 %v1601_v6  ;;  %v11196_v31 = vpop.f32.mrf.mxu1  ;;  %11515 = vmatmul.mubr.bf16.vlgmr.msra.gmra.mxu1 %v1603_v58  ;;  %v13830_v6 = vcombine.high %v2686_v28, %v2782_v3  ;;  %v2494_v58 = vld [vmem:[%s14433_s20 + $0x1a60] sm:$0xff] }
 0x75b   : > { %v11157_v43 = vadd.f32 %v11156_v42, %v15973_v21  ;;  %11527 = vmatpush1.bf16.xpose.msra.mxu0 %v13825_v38  ;;  %11567 = vmatpush1.bf16.xpose.msra.mxu1 %v13827_v26  ;;  %v2590_v38 = vld [vmem:[%s14433_s20 + $0x1d60] sm:$0xff]  ;;  %v1110_v26 = vcombine.high %v16039_v55, %v16039_v55  ;;  %v1111_v42 = vcombine.high %v16042_v37, %v16042_v37 }
 0x75c   : > { %v11158_v17 = vpop.f32.mrf.mxu0  ;;  %11528 = vmatprep.subr.bf16.mxu0 %v13634_v61  ;;  %v11198_v18 = vpop.f32.mrf.mxu1  ;;  %11568 = vmatprep.subr.bf16.mxu1 %v13636_v62  ;;  %v1605_v61 = vpack.c.bf16 %v15997_v48, %v15997_v48  ;;  %v2495_v62 = vld [vmem:[%s14433_s20 + $0x1a68] sm:$0xff] }
 0x75d   : > { %v16015_v27 = vadd.f32 %v11196_v31, %v11157_v43  ;;  %11554 = vmatprep.mubr.bf16.mxu0 %v1606_v4  ;;  %11594 = vmatprep.mubr.bf16.mxu1 %v1608_v5  ;;  %v2591_v4 = vld [vmem:[%s14433_s20 + $0x1d68] sm:$0xff]  ;;  %v1607_v5 = vpack.c.bf16 %v16000_v32, %v16000_v32  ;;  %v13829_v43 = vcombine.low %v2686_v28, %v2782_v3 }
 0x75e   : > { %v11159_v57 = vpop.f32.mrf.mxu0  ;;  %v11199_v21 = vpop.f32.mrf.mxu1  ;;  %v13831_v31 = vcombine.low %v2687_v59, %v2783_v63  ;;  %v13638_v17 = vcombine.high %v2494_v58, %v2590_v38  ;;  %v13640_v18 = vcombine.high %v2495_v62, %v2591_v4  ;;  %v1610_v13 = vpack.c.bf16 %v1110_v26, %v1110_v26 }
 0x75f   : > { %v1612_v57 = vpack.c.bf16 %v1111_v42, %v1111_v42  ;;  %v13639_v12 = vcombine.low %v2495_v62, %v2591_v4  ;;  %v16081_v4 = vrot.slane %v392_v49, %v14467_v24 }
 0x760   : > { %v11160_v54 = vpop.f32.mrf.mxu0  ;;  %v11200_v25 = vpop.f32.mrf.mxu1 }
 0x761   : > { %v2398_v54 = vld [vmem:[%s14433_s20 + $0x1760] sm:$0xff]  ;;  %v2399_v25 = vld [vmem:[%s14433_s20 + $0x1768] sm:$0xff] }
 0x763   : > { %11529 = vmatpush1.bf16.xpose.msra.mxu0 %v13633_v16  ;;  %11569 = vmatpush1.bf16.xpose.msra.mxu1 %v13635_v2  ;;  %v2302_v16 = vld [vmem:[%s14433_s20 + $0x1460] sm:$0xff] }
 0x764   : > { %11530 = vmatprep.subr.bf16.mxu0 %v13442_v41  ;;  %11570 = vmatprep.subr.bf16.mxu1 %v13444_v7  ;;  %v2303_v41 = vld [vmem:[%s14433_s20 + $0x1468] sm:$0xff]  ;;  %v13637_v7 = vcombine.low %v2494_v58, %v2590_v38  ;;  %v13446_v46 = vcombine.high %v2302_v16, %v2398_v54  ;;  %v13445_v29 = vcombine.low %v2302_v16, %v2398_v54 }
 0x765   : > { %v13447_v15 = vcombine.low %v2303_v41, %v2399_v25  ;;  %v1112_v58 = vcombine.high %v392_v49, %v392_v49  ;;  %v1825_v49 = vld [vmem:[%s14433_s20 + $0x578] sm:$0xff] }
 0x767   : > { %v16084_v42 = vrot.slane %v1112_v58, %v14467_v24  ;;  %v393_v58 = vld [vmem:[%s14451_s13 + $0x140] sm:$0xff] }
 0x76b   : > { %11531 = vmatpush1.bf16.xpose.msra.mxu0 %v13441_v23  ;;  %11571 = vmatpush1.bf16.xpose.msra.mxu1 %v13443_v11  ;;  %v13448_v23 = vcombine.high %v2303_v41, %v2399_v25  ;;  %v2110_v11 = vld [vmem:[%s14433_s20 + $0xe60] sm:$0xff] }
 0x76c   : > { %11532 = vmatprep.subr.bf16.mxu0 %v13250_v52  ;;  %11572 = vmatprep.subr.bf16.mxu1 %v13252_v53  ;;  %v2206_v52 = vld [vmem:[%s14433_s20 + $0x1160] sm:$0xff]  ;;  %v2111_v53 = vld [vmem:[%s14433_s20 + $0xe68] sm:$0xff] }
 0x76d   : > { %v13254_v60 = vcombine.high %v2110_v11, %v2206_v52  ;;  %v13253_v56 = vcombine.low %v2110_v11, %v2206_v52  ;;  %v13255_v45 = vcombine.low %v2111_v53, %v2207_v35 }
 0x773   : > { %11533 = vmatpush1.bf16.xpose.msra.mxu0 %v13249_v0  ;;  %11573 = vmatpush1.bf16.xpose.msra.mxu1 %v13251_v40  ;;  %v13256_v0 = vcombine.high %v2111_v53, %v2207_v35  ;;  %v1918_v40 = vld [vmem:[%s14433_s20 + $0x860] sm:$0xff] }
 0x774   : > { %11534 = vmatprep.subr.bf16.mxu0 %v13058_v34  ;;  %11574 = vmatprep.subr.bf16.mxu1 %v13060_v19  ;;  %v2014_v34 = vld [vmem:[%s14433_s20 + $0xb60] sm:$0xff]  ;;  %v1919_v19 = vld [vmem:[%s14433_s20 + $0x868] sm:$0xff] }
 0x775   : > { %v13062_v39 = vcombine.high %v1918_v40, %v2014_v34  ;;  %v13061_v28 = vcombine.low %v1918_v40, %v2014_v34  ;;  %v13063_v3 = vcombine.low %v1919_v19, %v2015_v9  ;;  %v2209_v40 = vld [vmem:[%s14433_s20 + $0x1178] sm:$0xff] }
 0x77b   : > { %11535 = vmatpush1.bf16.xpose.msra.mxu0 %v13057_v22  ;;  %11575 = vmatpush1.bf16.xpose.msra.mxu1 %v13059_v14  ;;  %v13064_v22 = vcombine.high %v1919_v19, %v2015_v9  ;;  %v1726_v14 = vld [vmem:[%s14433_s20 + $0x260] sm:$0xff] }
 0x77c   : > { %11536 = vmatprep.subr.bf16.mxu0 %v12866_v51  ;;  %11576 = vmatprep.subr.bf16.mxu1 %v12868_v50  ;;  %v1822_v51 = vld [vmem:[%s14433_s20 + $0x560] sm:$0xff]  ;;  %v1727_v50 = vld [vmem:[%s14433_s20 + $0x268] sm:$0xff] }
 0x77d   : > { %v12870_v59 = vcombine.high %v1726_v14, %v1822_v51  ;;  %v12872_v63 = vcombine.high %v1727_v50, %v1823_v44  ;;  %v12869_v38 = vcombine.low %v1726_v14, %v1822_v51  ;;  %v12871_v26 = vcombine.low %v1727_v50, %v1823_v44  ;;  %v2017_v14 = vld [vmem:[%s14433_s20 + $0xb78] sm:$0xff] }
 0x783   : > { %11537 = vmatpush1.bf16.xpose.msra.mxu0 %v12865_v33  ;;  %11577 = vmatpush1.bf16.xpose.msra.mxu1 %v12867_v8  ;;  %v2688_v33 = vld [vmem:[%s14433_s20 + $0x2070] sm:$0xff] }
 0x784   : > { %11606 = vmatprep.subr.bf16.mxu0 %v13830_v6  ;;  %11646 = vmatprep.subr.bf16.mxu1 %v13832_v10  ;;  %v2784_v8 = vld [vmem:[%s14433_s20 + $0x2370] sm:$0xff]  ;;  %v2689_v6 = vld [vmem:[%s14433_s20 + $0x2078] sm:$0xff] }
 0x785   : > { %v2785_v10 = vld [vmem:[%s14433_s20 + $0x2378] sm:$0xff] }
 0x786   : > { %v13836_v62 = vcombine.high %v2689_v6, %v2785_v10 }
 0x78a   : > { %v11236_v47 = vpop.f32.mrf.mxu0  ;;  %11555 = vmatmul.mubr.bf16.vlgmr.msra.gmra.mxu0 %v1605_v61  ;;  %v11276_v36 = vpop.f32.mrf.mxu1  ;;  %11595 = vmatmul.mubr.bf16.vlgmr.msra.gmra.mxu1 %v1607_v5  ;;  %v13834_v61 = vcombine.high %v2688_v33, %v2784_v8  ;;  %v2496_v5 = vld [vmem:[%s14433_s20 + $0x1a70] sm:$0xff] }
 0x78b   : > { %v11237_v48 = vadd.f32 %v11236_v47, %v16015_v27  ;;  %11607 = vmatpush1.bf16.xpose.msra.mxu0 %v13829_v43  ;;  %11647 = vmatpush1.bf16.xpose.msra.mxu1 %v13831_v31  ;;  %v2592_v43 = vld [vmem:[%s14433_s20 + $0x1d70] sm:$0xff]  ;;  %v1127_v31 = vcombine.high %v16081_v4, %v16081_v4  ;;  %v1128_v47 = vcombine.high %v16084_v42, %v16084_v42 }
 0x78c   : > { %v11238_v20 = vpop.f32.mrf.mxu0  ;;  %11608 = vmatprep.subr.bf16.mxu0 %v13638_v17  ;;  %v11278_v21 = vpop.f32.mrf.mxu1  ;;  %11648 = vmatprep.subr.bf16.mxu1 %v13640_v18  ;;  %v1609_v17 = vpack.c.bf16 %v16039_v55, %v16039_v55  ;;  %v2497_v18 = vld [vmem:[%s14433_s20 + $0x1a78] sm:$0xff] }
 0x78d   : > { %v16057_v32 = vadd.f32 %v11276_v36, %v11237_v48  ;;  %11634 = vmatprep.mubr.bf16.mxu0 %v1610_v13  ;;  %11674 = vmatprep.mubr.bf16.mxu1 %v1612_v57  ;;  %v2593_v13 = vld [vmem:[%s14433_s20 + $0x1d78] sm:$0xff]  ;;  %v1611_v57 = vpack.c.bf16 %v16042_v37, %v16042_v37  ;;  %v13833_v48 = vcombine.low %v2688_v33, %v2784_v8 }
 0x78e   : > { %v11239_v2 = vpop.f32.mrf.mxu0  ;;  %v11279_v27 = vpop.f32.mrf.mxu1  ;;  %v13835_v36 = vcombine.low %v2689_v6, %v2785_v10  ;;  %v13642_v20 = vcombine.high %v2496_v5, %v2592_v43  ;;  %v13644_v21 = vcombine.high %v2497_v18, %v2593_v13  ;;  %v1614_v16 = vpack.c.bf16 %v1127_v31, %v1127_v31 }
 0x78f   : > { %v1616_v2 = vpack.c.bf16 %v1128_v47, %v1128_v47  ;;  %v13643_v52 = vcombine.low %v2497_v18, %v2593_v13  ;;  %v16123_v13 = vrot.slane %v393_v58, %v14467_v24 }
 0x790   : > { %v11240_v1 = vpop.f32.mrf.mxu0  ;;  %v11280_v30 = vpop.f32.mrf.mxu1 }
 0x791   : > { %v2400_v1 = vld [vmem:[%s14433_s20 + $0x1770] sm:$0xff]  ;;  %v2401_v30 = vld [vmem:[%s14433_s20 + $0x1778] sm:$0xff] }
 0x793   : > { %11609 = vmatpush1.bf16.xpose.msra.mxu0 %v13637_v7  ;;  %11649 = vmatpush1.bf16.xpose.msra.mxu1 %v13639_v12  ;;  %v2304_v7 = vld [vmem:[%s14433_s20 + $0x1470] sm:$0xff] }
 0x794   : > { %11610 = vmatprep.subr.bf16.mxu0 %v13446_v46  ;;  %11650 = vmatprep.subr.bf16.mxu1 %v13448_v23  ;;  %v2305_v46 = vld [vmem:[%s14433_s20 + $0x1478] sm:$0xff]  ;;  %v13641_v23 = vcombine.low %v2496_v5, %v2592_v43  ;;  %v13450_v53 = vcombine.high %v2304_v7, %v2400_v1  ;;  %v13449_v34 = vcombine.low %v2304_v7, %v2400_v1 }
 0x795   : > { %v13451_v19 = vcombine.low %v2305_v46, %v2401_v30  ;;  %v1129_v5 = vcombine.high %v393_v58, %v393_v58  ;;  %v1827_v58 = vld [vmem:[%s14433_s20 + $0x588] sm:$0xff] }
 0x797   : > { %v16126_v47 = vrot.slane %v1129_v5, %v14467_v24  ;;  %v394_v5 = vld [vmem:[%s14451_s13 + $0x148] sm:$0xff] }
 0x79b   : > { %11611 = vmatpush1.bf16.xpose.msra.mxu0 %v13445_v29  ;;  %11651 = vmatpush1.bf16.xpose.msra.mxu1 %v13447_v15  ;;  %v13452_v29 = vcombine.high %v2305_v46, %v2401_v30  ;;  %v2112_v15 = vld [vmem:[%s14433_s20 + $0xe70] sm:$0xff] }
 0x79c   : > { %11612 = vmatprep.subr.bf16.mxu0 %v13254_v60  ;;  %11652 = vmatprep.subr.bf16.mxu1 %v13256_v0  ;;  %v2208_v60 = vld [vmem:[%s14433_s20 + $0x1170] sm:$0xff]  ;;  %v2113_v0 = vld [vmem:[%s14433_s20 + $0xe78] sm:$0xff] }
 0x79d   : > { %v13258_v9 = vcombine.high %v2112_v15, %v2208_v60  ;;  %v13257_v51 = vcombine.low %v2112_v15, %v2208_v60  ;;  %v13259_v50 = vcombine.low %v2113_v0, %v2209_v40 }
 0x7a3   : > { %11613 = vmatpush1.bf16.xpose.msra.mxu0 %v13253_v56  ;;  %11653 = vmatpush1.bf16.xpose.msra.mxu1 %v13255_v45  ;;  %v13260_v56 = vcombine.high %v2113_v0, %v2209_v40  ;;  %v1920_v45 = vld [vmem:[%s14433_s20 + $0x870] sm:$0xff] }
 0x7a4   : > { %11614 = vmatprep.subr.bf16.mxu0 %v13062_v39  ;;  %11654 = vmatprep.subr.bf16.mxu1 %v13064_v22  ;;  %v2016_v39 = vld [vmem:[%s14433_s20 + $0xb70] sm:$0xff]  ;;  %v1921_v22 = vld [vmem:[%s14433_s20 + $0x878] sm:$0xff] }
 0x7a5   : > { %v13066_v44 = vcombine.high %v1920_v45, %v2016_v39  ;;  %v13065_v33 = vcombine.low %v1920_v45, %v2016_v39  ;;  %v13067_v8 = vcombine.low %v1921_v22, %v2017_v14  ;;  %v2211_v45 = vld [vmem:[%s14433_s20 + $0x1188] sm:$0xff] }
 0x7ab   : > { %11615 = vmatpush1.bf16.xpose.msra.mxu0 %v13061_v28  ;;  %11655 = vmatpush1.bf16.xpose.msra.mxu1 %v13063_v3  ;;  %v13068_v28 = vcombine.high %v1921_v22, %v2017_v14  ;;  %v1728_v3 = vld [vmem:[%s14433_s20 + $0x270] sm:$0xff] }
 0x7ac   : > { %11616 = vmatprep.subr.bf16.mxu0 %v12870_v59  ;;  %11656 = vmatprep.subr.bf16.mxu1 %v12872_v63  ;;  %v1824_v59 = vld [vmem:[%s14433_s20 + $0x570] sm:$0xff]  ;;  %v1729_v63 = vld [vmem:[%s14433_s20 + $0x278] sm:$0xff] }
 0x7ad   : > { %v12874_v6 = vcombine.high %v1728_v3, %v1824_v59  ;;  %v12876_v10 = vcombine.high %v1729_v63, %v1825_v49  ;;  %v12873_v43 = vcombine.low %v1728_v3, %v1824_v59  ;;  %v12875_v31 = vcombine.low %v1729_v63, %v1825_v49  ;;  %v2019_v3 = vld [vmem:[%s14433_s20 + $0xb88] sm:$0xff] }
 0x7b3   : > { %11617 = vmatpush1.bf16.xpose.msra.mxu0 %v12869_v38  ;;  %11657 = vmatpush1.bf16.xpose.msra.mxu1 %v12871_v26  ;;  %v2690_v38 = vld [vmem:[%s14433_s20 + $0x2080] sm:$0xff] }
 0x7b4   : > { %11686 = vmatprep.subr.bf16.mxu0 %v13834_v61  ;;  %11726 = vmatprep.subr.bf16.mxu1 %v13836_v62  ;;  %v2786_v26 = vld [vmem:[%s14433_s20 + $0x2380] sm:$0xff]  ;;  %v2691_v61 = vld [vmem:[%s14433_s20 + $0x2088] sm:$0xff] }
 0x7b5   : > { %v2787_v62 = vld [vmem:[%s14433_s20 + $0x2388] sm:$0xff] }
 0x7b6   : > { %v13840_v18 = vcombine.high %v2691_v61, %v2787_v62 }
 0x7ba   : > { %v11316_v54 = vpop.f32.mrf.mxu0  ;;  %11635 = vmatmul.mubr.bf16.vlgmr.msra.gmra.mxu0 %v1609_v17  ;;  %v11356_v41 = vpop.f32.mrf.mxu1  ;;  %11675 = vmatmul.mubr.bf16.vlgmr.msra.gmra.mxu1 %v1611_v57  ;;  %v13838_v17 = vcombine.high %v2690_v38, %v2786_v26  ;;  %v2498_v57 = vld [vmem:[%s14433_s20 + $0x1a80] sm:$0xff] }
 0x7bb   : > { %v11317_v55 = vadd.f32 %v11316_v54, %v16057_v32  ;;  %11687 = vmatpush1.bf16.xpose.msra.mxu0 %v13833_v48  ;;  %11727 = vmatpush1.bf16.xpose.msra.mxu1 %v13835_v36  ;;  %v2594_v48 = vld [vmem:[%s14433_s20 + $0x1d80] sm:$0xff]  ;;  %v1144_v36 = vcombine.high %v16123_v13, %v16123_v13  ;;  %v1145_v54 = vcombine.high %v16126_v47, %v16126_v47 }
 0x7bc   : > { %v11318_v25 = vpop.f32.mrf.mxu0  ;;  %11688 = vmatprep.subr.bf16.mxu0 %v13642_v20  ;;  %v11358_v27 = vpop.f32.mrf.mxu1  ;;  %11728 = vmatprep.subr.bf16.mxu1 %v13644_v21  ;;  %v1613_v20 = vpack.c.bf16 %v16081_v4, %v16081_v4  ;;  %v2499_v21 = vld [vmem:[%s14433_s20 + $0x1a88] sm:$0xff] }
 0x7bd   : > { %v16099_v37 = vadd.f32 %v11356_v41, %v11317_v55  ;;  %11714 = vmatprep.mubr.bf16.mxu0 %v1614_v16  ;;  %11754 = vmatprep.mubr.bf16.mxu1 %v1616_v2  ;;  %v2595_v16 = vld [vmem:[%s14433_s20 + $0x1d88] sm:$0xff]  ;;  %v1615_v2 = vpack.c.bf16 %v16084_v42, %v16084_v42  ;;  %v13837_v55 = vcombine.low %v2690_v38, %v2786_v26 }
 0x7be   : > { %v11319_v12 = vpop.f32.mrf.mxu0  ;;  %v11359_v32 = vpop.f32.mrf.mxu1  ;;  %v13839_v41 = vcombine.low %v2691_v61, %v2787_v62  ;;  %v13646_v25 = vcombine.high %v2498_v57, %v2594_v48  ;;  %v13648_v27 = vcombine.high %v2499_v21, %v2595_v16  ;;  %v1618_v7 = vpack.c.bf16 %v1144_v36, %v1144_v36 }
 0x7bf   : > { %v1620_v12 = vpack.c.bf16 %v1145_v54, %v1145_v54  ;;  %v13647_v60 = vcombine.low %v2499_v21, %v2595_v16  ;;  %v16165_v16 = vrot.slane %v394_v5, %v14467_v24 }
 0x7c0   : > { %v11320_v11 = vpop.f32.mrf.mxu0  ;;  %v11360_v35 = vpop.f32.mrf.mxu1 }
 0x7c1   : > { %v2402_v11 = vld [vmem:[%s14433_s20 + $0x1780] sm:$0xff]  ;;  %v2403_v35 = vld [vmem:[%s14433_s20 + $0x1788] sm:$0xff] }
 0x7c3   : > { %11689 = vmatpush1.bf16.xpose.msra.mxu0 %v13641_v23  ;;  %11729 = vmatpush1.bf16.xpose.msra.mxu1 %v13643_v52  ;;  %v2306_v23 = vld [vmem:[%s14433_s20 + $0x1480] sm:$0xff] }
 0x7c4   : > { %11690 = vmatprep.subr.bf16.mxu0 %v13450_v53  ;;  %11730 = vmatprep.subr.bf16.mxu1 %v13452_v29  ;;  %v2307_v53 = vld [vmem:[%s14433_s20 + $0x1488] sm:$0xff]  ;;  %v13645_v29 = vcombine.low %v2498_v57, %v2594_v48  ;;  %v13454_v0 = vcombine.high %v2306_v23, %v2402_v11  ;;  %v13453_v39 = vcombine.low %v2306_v23, %v2402_v11 }
 0x7c5   : > { %v13455_v22 = vcombine.low %v2307_v53, %v2403_v35  ;;  %v1146_v57 = vcombine.high %v394_v5, %v394_v5  ;;  %v1829_v5 = vld [vmem:[%s14433_s20 + $0x598] sm:$0xff] }
 0x7c7   : > { %v16168_v54 = vrot.slane %v1146_v57, %v14467_v24  ;;  %v395_v57 = vld [vmem:[%s14451_s13 + $0x150] sm:$0xff] }
 0x7cb   : > { %11691 = vmatpush1.bf16.xpose.msra.mxu0 %v13449_v34  ;;  %11731 = vmatpush1.bf16.xpose.msra.mxu1 %v13451_v19  ;;  %v13456_v34 = vcombine.high %v2307_v53, %v2403_v35  ;;  %v2114_v19 = vld [vmem:[%s14433_s20 + $0xe80] sm:$0xff] }
 0x7cc   : > { %11692 = vmatprep.subr.bf16.mxu0 %v13258_v9  ;;  %11732 = vmatprep.subr.bf16.mxu1 %v13260_v56  ;;  %v2210_v9 = vld [vmem:[%s14433_s20 + $0x1180] sm:$0xff]  ;;  %v2115_v56 = vld [vmem:[%s14433_s20 + $0xe88] sm:$0xff] }
 0x7cd   : > { %v13262_v14 = vcombine.high %v2114_v19, %v2210_v9  ;;  %v13261_v59 = vcombine.low %v2114_v19, %v2210_v9  ;;  %v13263_v63 = vcombine.low %v2115_v56, %v2211_v45 }
 0x7d3   : > { %11693 = vmatpush1.bf16.xpose.msra.mxu0 %v13257_v51  ;;  %11733 = vmatpush1.bf16.xpose.msra.mxu1 %v13259_v50  ;;  %v13264_v51 = vcombine.high %v2115_v56, %v2211_v45  ;;  %v1922_v50 = vld [vmem:[%s14433_s20 + $0x880] sm:$0xff] }
 0x7d4   : > { %11694 = vmatprep.subr.bf16.mxu0 %v13066_v44  ;;  %11734 = vmatprep.subr.bf16.mxu1 %v13068_v28  ;;  %v2018_v44 = vld [vmem:[%s14433_s20 + $0xb80] sm:$0xff]  ;;  %v1923_v28 = vld [vmem:[%s14433_s20 + $0x888] sm:$0xff] }
 0x7d5   : > { %v13070_v49 = vcombine.high %v1922_v50, %v2018_v44  ;;  %v13069_v38 = vcombine.low %v1922_v50, %v2018_v44  ;;  %v13071_v26 = vcombine.low %v1923_v28, %v2019_v3  ;;  %v2213_v50 = vld [vmem:[%s14433_s20 + $0x1198] sm:$0xff] }
 0x7db   : > { %11695 = vmatpush1.bf16.xpose.msra.mxu0 %v13065_v33  ;;  %11735 = vmatpush1.bf16.xpose.msra.mxu1 %v13067_v8  ;;  %v13072_v33 = vcombine.high %v1923_v28, %v2019_v3  ;;  %v1730_v8 = vld [vmem:[%s14433_s20 + $0x280] sm:$0xff] }
 0x7dc   : > { %11696 = vmatprep.subr.bf16.mxu0 %v12874_v6  ;;  %11736 = vmatprep.subr.bf16.mxu1 %v12876_v10  ;;  %v1826_v6 = vld [vmem:[%s14433_s20 + $0x580] sm:$0xff]  ;;  %v1731_v10 = vld [vmem:[%s14433_s20 + $0x288] sm:$0xff] }
 0x7dd   : > { %v12878_v61 = vcombine.high %v1730_v8, %v1826_v6  ;;  %v12880_v62 = vcombine.high %v1731_v10, %v1827_v58  ;;  %v12877_v48 = vcombine.low %v1730_v8, %v1826_v6  ;;  %v12879_v36 = vcombine.low %v1731_v10, %v1827_v58  ;;  %v2021_v8 = vld [vmem:[%s14433_s20 + $0xb98] sm:$0xff] }
 0x7e3   : > { %11697 = vmatpush1.bf16.xpose.msra.mxu0 %v12873_v43  ;;  %11737 = vmatpush1.bf16.xpose.msra.mxu1 %v12875_v31  ;;  %v2692_v43 = vld [vmem:[%s14433_s20 + $0x2090] sm:$0xff] }
 0x7e4   : > { %11766 = vmatprep.subr.bf16.mxu0 %v13838_v17  ;;  %11806 = vmatprep.subr.bf16.mxu1 %v13840_v18  ;;  %v2788_v31 = vld [vmem:[%s14433_s20 + $0x2390] sm:$0xff]  ;;  %v2693_v17 = vld [vmem:[%s14433_s20 + $0x2098] sm:$0xff] }
 0x7e5   : > { %v2789_v18 = vld [vmem:[%s14433_s20 + $0x2398] sm:$0xff] }
 0x7e6   : > { %v13844_v21 = vcombine.high %v2693_v17, %v2789_v18 }
 0x7ea   : > { %v11396_v1 = vpop.f32.mrf.mxu0  ;;  %11715 = vmatmul.mubr.bf16.vlgmr.msra.gmra.mxu0 %v1613_v20  ;;  %v11436_v46 = vpop.f32.mrf.mxu1  ;;  %11755 = vmatmul.mubr.bf16.vlgmr.msra.gmra.mxu1 %v1615_v2  ;;  %v13842_v20 = vcombine.high %v2692_v43, %v2788_v31  ;;  %v2500_v2 = vld [vmem:[%s14433_s20 + $0x1a90] sm:$0xff] }
 0x7eb   : > { %v11397_v4 = vadd.f32 %v11396_v1, %v16099_v37  ;;  %11767 = vmatpush1.bf16.xpose.msra.mxu0 %v13837_v55  ;;  %11807 = vmatpush1.bf16.xpose.msra.mxu1 %v13839_v41  ;;  %v2596_v55 = vld [vmem:[%s14433_s20 + $0x1d90] sm:$0xff]  ;;  %v1161_v41 = vcombine.high %v16165_v16, %v16165_v16  ;;  %v1162_v1 = vcombine.high %v16168_v54, %v16168_v54 }
 0x7ec   : > { %v11398_v30 = vpop.f32.mrf.mxu0  ;;  %11768 = vmatprep.subr.bf16.mxu0 %v13646_v25  ;;  %v11438_v32 = vpop.f32.mrf.mxu1  ;;  %11808 = vmatprep.subr.bf16.mxu1 %v13648_v27  ;;  %v1617_v25 = vpack.c.bf16 %v16123_v13, %v16123_v13  ;;  %v2501_v27 = vld [vmem:[%s14433_s20 + $0x1a98] sm:$0xff] }
 0x7ed   : > { %v16141_v42 = vadd.f32 %v11436_v46, %v11397_v4  ;;  %11794 = vmatprep.mubr.bf16.mxu0 %v1618_v7  ;;  %11834 = vmatprep.mubr.bf16.mxu1 %v1620_v12  ;;  %v2597_v7 = vld [vmem:[%s14433_s20 + $0x1d98] sm:$0xff]  ;;  %v1619_v12 = vpack.c.bf16 %v16126_v47, %v16126_v47  ;;  %v13841_v4 = vcombine.low %v2692_v43, %v2788_v31 }
 0x7ee   : > { %v11399_v52 = vpop.f32.mrf.mxu0  ;;  %v11439_v37 = vpop.f32.mrf.mxu1  ;;  %v13843_v46 = vcombine.low %v2693_v17, %v2789_v18  ;;  %v13650_v30 = vcombine.high %v2500_v2, %v2596_v55  ;;  %v13652_v32 = vcombine.high %v2501_v27, %v2597_v7  ;;  %v1622_v23 = vpack.c.bf16 %v1161_v41, %v1161_v41 }
 0x7ef   : > { %v1624_v52 = vpack.c.bf16 %v1162_v1, %v1162_v1  ;;  %v13651_v9 = vcombine.low %v2501_v27, %v2597_v7  ;;  %v16207_v7 = vrot.slane %v395_v57, %v14467_v24 }
 0x7f0   : > { %v11400_v15 = vpop.f32.mrf.mxu0  ;;  %v11440_v40 = vpop.f32.mrf.mxu1 }
 0x7f1   : > { %v2404_v15 = vld [vmem:[%s14433_s20 + $0x1790] sm:$0xff]  ;;  %v2405_v40 = vld [vmem:[%s14433_s20 + $0x1798] sm:$0xff] }
 0x7f3   : > { %11769 = vmatpush1.bf16.xpose.msra.mxu0 %v13645_v29  ;;  %11809 = vmatpush1.bf16.xpose.msra.mxu1 %v13647_v60  ;;  %v2308_v29 = vld [vmem:[%s14433_s20 + $0x1490] sm:$0xff] }
 0x7f4   : > { %11770 = vmatprep.subr.bf16.mxu0 %v13454_v0  ;;  %11810 = vmatprep.subr.bf16.mxu1 %v13456_v34  ;;  %v2309_v0 = vld [vmem:[%s14433_s20 + $0x1498] sm:$0xff]  ;;  %v13649_v34 = vcombine.low %v2500_v2, %v2596_v55  ;;  %v13458_v56 = vcombine.high %v2308_v29, %v2404_v15  ;;  %v13457_v44 = vcombine.low %v2308_v29, %v2404_v15 }
 0x7f5   : > { %v13459_v28 = vcombine.low %v2309_v0, %v2405_v40  ;;  %v1163_v2 = vcombine.high %v395_v57, %v395_v57  ;;  %v1831_v57 = vld [vmem:[%s14433_s20 + $0x5a8] sm:$0xff] }
 0x7f7   : > { %v16210_v1 = vrot.slane %v1163_v2, %v14467_v24  ;;  %v396_v2 = vld [vmem:[%s14451_s13 + $0x158] sm:$0xff] }
 0x7fb   : > { %11771 = vmatpush1.bf16.xpose.msra.mxu0 %v13453_v39  ;;  %11811 = vmatpush1.bf16.xpose.msra.mxu1 %v13455_v22  ;;  %v13460_v39 = vcombine.high %v2309_v0, %v2405_v40  ;;  %v2116_v22 = vld [vmem:[%s14433_s20 + $0xe90] sm:$0xff] }
 0x7fc   : > { %11772 = vmatprep.subr.bf16.mxu0 %v13262_v14  ;;  %11812 = vmatprep.subr.bf16.mxu1 %v13264_v51  ;;  %v2212_v14 = vld [vmem:[%s14433_s20 + $0x1190] sm:$0xff]  ;;  %v2117_v51 = vld [vmem:[%s14433_s20 + $0xe98] sm:$0xff] }
 0x7fd   : > { %v13266_v3 = vcombine.high %v2116_v22, %v2212_v14  ;;  %v13265_v6 = vcombine.low %v2116_v22, %v2212_v14  ;;  %v13267_v10 = vcombine.low %v2117_v51, %v2213_v50 }
 0x803   : > { %11773 = vmatpush1.bf16.xpose.msra.mxu0 %v13261_v59  ;;  %11813 = vmatpush1.bf16.xpose.msra.mxu1 %v13263_v63  ;;  %v13268_v59 = vcombine.high %v2117_v51, %v2213_v50  ;;  %v1924_v63 = vld [vmem:[%s14433_s20 + $0x890] sm:$0xff] }
 0x804   : > { %11774 = vmatprep.subr.bf16.mxu0 %v13070_v49  ;;  %11814 = vmatprep.subr.bf16.mxu1 %v13072_v33  ;;  %v2020_v49 = vld [vmem:[%s14433_s20 + $0xb90] sm:$0xff]  ;;  %v1925_v33 = vld [vmem:[%s14433_s20 + $0x898] sm:$0xff] }
 0x805   : > { %v13074_v58 = vcombine.high %v1924_v63, %v2020_v49  ;;  %v13073_v43 = vcombine.low %v1924_v63, %v2020_v49  ;;  %v13075_v31 = vcombine.low %v1925_v33, %v2021_v8  ;;  %v2215_v63 = vld [vmem:[%s14433_s20 + $0x11a8] sm:$0xff] }
 0x80b   : > { %11775 = vmatpush1.bf16.xpose.msra.mxu0 %v13069_v38  ;;  %11815 = vmatpush1.bf16.xpose.msra.mxu1 %v13071_v26  ;;  %v13076_v38 = vcombine.high %v1925_v33, %v2021_v8  ;;  %v1732_v26 = vld [vmem:[%s14433_s20 + $0x290] sm:$0xff] }
 0x80c   : > { %11776 = vmatprep.subr.bf16.mxu0 %v12878_v61  ;;  %11816 = vmatprep.subr.bf16.mxu1 %v12880_v62  ;;  %v1828_v61 = vld [vmem:[%s14433_s20 + $0x590] sm:$0xff]  ;;  %v1733_v62 = vld [vmem:[%s14433_s20 + $0x298] sm:$0xff] }
 0x80d   : > { %v12882_v17 = vcombine.high %v1732_v26, %v1828_v61  ;;  %v12884_v18 = vcombine.high %v1733_v62, %v1829_v5  ;;  %v12881_v55 = vcombine.low %v1732_v26, %v1828_v61  ;;  %v12883_v41 = vcombine.low %v1733_v62, %v1829_v5  ;;  %v2023_v26 = vld [vmem:[%s14433_s20 + $0xba8] sm:$0xff] }
 0x813   : > { %11777 = vmatpush1.bf16.xpose.msra.mxu0 %v12877_v48  ;;  %11817 = vmatpush1.bf16.xpose.msra.mxu1 %v12879_v36  ;;  %v2694_v48 = vld [vmem:[%s14433_s20 + $0x20a0] sm:$0xff] }
 0x814   : > { %11846 = vmatprep.subr.bf16.mxu0 %v13842_v20  ;;  %11886 = vmatprep.subr.bf16.mxu1 %v13844_v21  ;;  %v2790_v36 = vld [vmem:[%s14433_s20 + $0x23a0] sm:$0xff]  ;;  %v2695_v20 = vld [vmem:[%s14433_s20 + $0x20a8] sm:$0xff] }
 0x815   : > { %v2791_v21 = vld [vmem:[%s14433_s20 + $0x23a8] sm:$0xff] }
 0x816   : > { %v13848_v27 = vcombine.high %v2695_v20, %v2791_v21 }
 0x81a   : > { %v11476_v11 = vpop.f32.mrf.mxu0  ;;  %11795 = vmatmul.mubr.bf16.vlgmr.msra.gmra.mxu0 %v1617_v25  ;;  %v11516_v53 = vpop.f32.mrf.mxu1  ;;  %11835 = vmatmul.mubr.bf16.vlgmr.msra.gmra.mxu1 %v1619_v12  ;;  %v13846_v25 = vcombine.high %v2694_v48, %v2790_v36  ;;  %v2502_v12 = vld [vmem:[%s14433_s20 + $0x1aa0] sm:$0xff] }
 0x81b   : > { %v11477_v13 = vadd.f32 %v11476_v11, %v16141_v42  ;;  %11847 = vmatpush1.bf16.xpose.msra.mxu0 %v13841_v4  ;;  %11887 = vmatpush1.bf16.xpose.msra.mxu1 %v13843_v46  ;;  %v2598_v4 = vld [vmem:[%s14433_s20 + $0x1da0] sm:$0xff]  ;;  %v1178_v46 = vcombine.high %v16207_v7, %v16207_v7  ;;  %v1179_v11 = vcombine.high %v16210_v1, %v16210_v1 }
 0x81c   : > { %v11478_v35 = vpop.f32.mrf.mxu0  ;;  %11848 = vmatprep.subr.bf16.mxu0 %v13650_v30  ;;  %v11518_v37 = vpop.f32.mrf.mxu1  ;;  %11888 = vmatprep.subr.bf16.mxu1 %v13652_v32  ;;  %v1621_v30 = vpack.c.bf16 %v16165_v16, %v16165_v16  ;;  %v2503_v32 = vld [vmem:[%s14433_s20 + $0x1aa8] sm:$0xff] }
 0x81d   : > { %v16183_v47 = vadd.f32 %v11516_v53, %v11477_v13  ;;  %11874 = vmatprep.mubr.bf16.mxu0 %v1622_v23  ;;  %11914 = vmatprep.mubr.bf16.mxu1 %v1624_v52  ;;  %v2599_v23 = vld [vmem:[%s14433_s20 + $0x1da8] sm:$0xff]  ;;  %v1623_v52 = vpack.c.bf16 %v16168_v54, %v16168_v54  ;;  %v13845_v13 = vcombine.low %v2694_v48, %v2790_v36 }
 0x81e   : > { %v11479_v60 = vpop.f32.mrf.mxu0  ;;  %v11519_v42 = vpop.f32.mrf.mxu1  ;;  %v13847_v53 = vcombine.low %v2695_v20, %v2791_v21  ;;  %v13654_v35 = vcombine.high %v2502_v12, %v2598_v4  ;;  %v13656_v37 = vcombine.high %v2503_v32, %v2599_v23  ;;  %v1626_v29 = vpack.c.bf16 %v1178_v46, %v1178_v46 }
 0x81f   : > { %v1628_v60 = vpack.c.bf16 %v1179_v11, %v1179_v11  ;;  %v13655_v14 = vcombine.low %v2503_v32, %v2599_v23  ;;  %v16249_v23 = vrot.slane %v396_v2, %v14467_v24 }
 0x820   : > { %v11480_v19 = vpop.f32.mrf.mxu0  ;;  %v11520_v45 = vpop.f32.mrf.mxu1 }
 0x821   : > { %v2406_v19 = vld [vmem:[%s14433_s20 + $0x17a0] sm:$0xff]  ;;  %v2407_v45 = vld [vmem:[%s14433_s20 + $0x17a8] sm:$0xff] }
 0x823   : > { %11849 = vmatpush1.bf16.xpose.msra.mxu0 %v13649_v34  ;;  %11889 = vmatpush1.bf16.xpose.msra.mxu1 %v13651_v9  ;;  %v2310_v34 = vld [vmem:[%s14433_s20 + $0x14a0] sm:$0xff] }
 0x824   : > { %11850 = vmatprep.subr.bf16.mxu0 %v13458_v56  ;;  %11890 = vmatprep.subr.bf16.mxu1 %v13460_v39  ;;  %v2311_v56 = vld [vmem:[%s14433_s20 + $0x14a8] sm:$0xff]  ;;  %v13653_v39 = vcombine.low %v2502_v12, %v2598_v4  ;;  %v13462_v51 = vcombine.high %v2310_v34, %v2406_v19  ;;  %v13461_v49 = vcombine.low %v2310_v34, %v2406_v19 }
 0x825   : > { %v13463_v33 = vcombine.low %v2311_v56, %v2407_v45  ;;  %v1180_v12 = vcombine.high %v396_v2, %v396_v2  ;;  %v1833_v2 = vld [vmem:[%s14433_s20 + $0x5b8] sm:$0xff] }
 0x827   : > { %v16252_v11 = vrot.slane %v1180_v12, %v14467_v24  ;;  %v397_v12 = vld [vmem:[%s14451_s13 + $0x160] sm:$0xff] }
 0x82b   : > { %11851 = vmatpush1.bf16.xpose.msra.mxu0 %v13457_v44  ;;  %11891 = vmatpush1.bf16.xpose.msra.mxu1 %v13459_v28  ;;  %v13464_v44 = vcombine.high %v2311_v56, %v2407_v45  ;;  %v2118_v28 = vld [vmem:[%s14433_s20 + $0xea0] sm:$0xff] }
 0x82c   : > { %11852 = vmatprep.subr.bf16.mxu0 %v13266_v3  ;;  %11892 = vmatprep.subr.bf16.mxu1 %v13268_v59  ;;  %v2214_v3 = vld [vmem:[%s14433_s20 + $0x11a0] sm:$0xff]  ;;  %v2119_v59 = vld [vmem:[%s14433_s20 + $0xea8] sm:$0xff] }
 0x82d   : > { %v13270_v8 = vcombine.high %v2118_v28, %v2214_v3  ;;  %v13269_v61 = vcombine.low %v2118_v28, %v2214_v3  ;;  %v13271_v62 = vcombine.low %v2119_v59, %v2215_v63 }
 0x833   : > { %11853 = vmatpush1.bf16.xpose.msra.mxu0 %v13265_v6  ;;  %11893 = vmatpush1.bf16.xpose.msra.mxu1 %v13267_v10  ;;  %v13272_v6 = vcombine.high %v2119_v59, %v2215_v63  ;;  %v1926_v10 = vld [vmem:[%s14433_s20 + $0x8a0] sm:$0xff] }
 0x834   : > { %11854 = vmatprep.subr.bf16.mxu0 %v13074_v58  ;;  %11894 = vmatprep.subr.bf16.mxu1 %v13076_v38  ;;  %v2022_v58 = vld [vmem:[%s14433_s20 + $0xba0] sm:$0xff]  ;;  %v1927_v38 = vld [vmem:[%s14433_s20 + $0x8a8] sm:$0xff] }
 0x835   : > { %v13078_v5 = vcombine.high %v1926_v10, %v2022_v58  ;;  %v13077_v48 = vcombine.low %v1926_v10, %v2022_v58  ;;  %v13079_v36 = vcombine.low %v1927_v38, %v2023_v26  ;;  %v2217_v10 = vld [vmem:[%s14433_s20 + $0x11b8] sm:$0xff] }
 0x83b   : > { %11855 = vmatpush1.bf16.xpose.msra.mxu0 %v13073_v43  ;;  %11895 = vmatpush1.bf16.xpose.msra.mxu1 %v13075_v31  ;;  %v13080_v43 = vcombine.high %v1927_v38, %v2023_v26  ;;  %v1734_v31 = vld [vmem:[%s14433_s20 + $0x2a0] sm:$0xff] }
 0x83c   : > { %11856 = vmatprep.subr.bf16.mxu0 %v12882_v17  ;;  %11896 = vmatprep.subr.bf16.mxu1 %v12884_v18  ;;  %v1830_v17 = vld [vmem:[%s14433_s20 + $0x5a0] sm:$0xff]  ;;  %v1735_v18 = vld [vmem:[%s14433_s20 + $0x2a8] sm:$0xff] }
 0x83d   : > { %v12886_v20 = vcombine.high %v1734_v31, %v1830_v17  ;;  %v12888_v21 = vcombine.high %v1735_v18, %v1831_v57  ;;  %v12885_v4 = vcombine.low %v1734_v31, %v1830_v17  ;;  %v12887_v46 = vcombine.low %v1735_v18, %v1831_v57  ;;  %v2025_v31 = vld [vmem:[%s14433_s20 + $0xbb8] sm:$0xff] }
 0x843   : > { %11857 = vmatpush1.bf16.xpose.msra.mxu0 %v12881_v55  ;;  %11897 = vmatpush1.bf16.xpose.msra.mxu1 %v12883_v41  ;;  %v2696_v55 = vld [vmem:[%s14433_s20 + $0x20b0] sm:$0xff] }
 0x844   : > { %11926 = vmatprep.subr.bf16.mxu0 %v13846_v25  ;;  %11966 = vmatprep.subr.bf16.mxu1 %v13848_v27  ;;  %v2792_v41 = vld [vmem:[%s14433_s20 + $0x23b0] sm:$0xff]  ;;  %v2697_v25 = vld [vmem:[%s14433_s20 + $0x20b8] sm:$0xff] }
 0x845   : > { %v2793_v27 = vld [vmem:[%s14433_s20 + $0x23b8] sm:$0xff] }
 0x846   : > { %v13852_v32 = vcombine.high %v2697_v25, %v2793_v27 }
 0x84a   : > { %v11556_v15 = vpop.f32.mrf.mxu0  ;;  %11875 = vmatmul.mubr.bf16.vlgmr.msra.gmra.mxu0 %v1621_v30  ;;  %v11596_v0 = vpop.f32.mrf.mxu1  ;;  %11915 = vmatmul.mubr.bf16.vlgmr.msra.gmra.mxu1 %v1623_v52  ;;  %v13850_v30 = vcombine.high %v2696_v55, %v2792_v41  ;;  %v2504_v52 = vld [vmem:[%s14433_s20 + $0x1ab0] sm:$0xff] }
 0x84b   : > { %v11557_v16 = vadd.f32 %v11556_v15, %v16183_v47  ;;  %11927 = vmatpush1.bf16.xpose.msra.mxu0 %v13845_v13  ;;  %11967 = vmatpush1.bf16.xpose.msra.mxu1 %v13847_v53  ;;  %v2600_v13 = vld [vmem:[%s14433_s20 + $0x1db0] sm:$0xff]  ;;  %v1195_v53 = vcombine.high %v16249_v23, %v16249_v23  ;;  %v1196_v15 = vcombine.high %v16252_v11, %v16252_v11 }
 0x84c   : > { %v11558_v40 = vpop.f32.mrf.mxu0  ;;  %11928 = vmatprep.subr.bf16.mxu0 %v13654_v35  ;;  %v11598_v42 = vpop.f32.mrf.mxu1  ;;  %11968 = vmatprep.subr.bf16.mxu1 %v13656_v37  ;;  %v1625_v35 = vpack.c.bf16 %v16207_v7, %v16207_v7  ;;  %v2505_v37 = vld [vmem:[%s14433_s20 + $0x1ab8] sm:$0xff] }
 0x84d   : > { %v16225_v54 = vadd.f32 %v11596_v0, %v11557_v16  ;;  %11954 = vmatprep.mubr.bf16.mxu0 %v1626_v29  ;;  %11994 = vmatprep.mubr.bf16.mxu1 %v1628_v60  ;;  %v2601_v29 = vld [vmem:[%s14433_s20 + $0x1db8] sm:$0xff]  ;;  %v1627_v60 = vpack.c.bf16 %v16210_v1, %v16210_v1  ;;  %v13849_v16 = vcombine.low %v2696_v55, %v2792_v41 }
 0x84e   : > { %v11559_v9 = vpop.f32.mrf.mxu0  ;;  %v11599_v47 = vpop.f32.mrf.mxu1  ;;  %v13851_v0 = vcombine.low %v2697_v25, %v2793_v27  ;;  %v13658_v40 = vcombine.high %v2504_v52, %v2600_v13  ;;  %v13660_v42 = vcombine.high %v2505_v37, %v2601_v29  ;;  %v1630_v34 = vpack.c.bf16 %v1195_v53, %v1195_v53 }
 0x84f   : > { %v1632_v9 = vpack.c.bf16 %v1196_v15, %v1196_v15  ;;  %v13659_v3 = vcombine.low %v2505_v37, %v2601_v29  ;;  %v16291_v29 = vrot.slane %v397_v12, %v14467_v24 }
 0x850   : > { %v11560_v22 = vpop.f32.mrf.mxu0  ;;  %v11600_v50 = vpop.f32.mrf.mxu1 }
 0x851   : > { %v2408_v22 = vld [vmem:[%s14433_s20 + $0x17b0] sm:$0xff]  ;;  %v2409_v50 = vld [vmem:[%s14433_s20 + $0x17b8] sm:$0xff] }
 0x853   : > { %11929 = vmatpush1.bf16.xpose.msra.mxu0 %v13653_v39  ;;  %11969 = vmatpush1.bf16.xpose.msra.mxu1 %v13655_v14  ;;  %v2312_v39 = vld [vmem:[%s14433_s20 + $0x14b0] sm:$0xff] }
 0x854   : > { %11930 = vmatprep.subr.bf16.mxu0 %v13462_v51  ;;  %11970 = vmatprep.subr.bf16.mxu1 %v13464_v44  ;;  %v2313_v51 = vld [vmem:[%s14433_s20 + $0x14b8] sm:$0xff]  ;;  %v13657_v44 = vcombine.low %v2504_v52, %v2600_v13  ;;  %v13466_v59 = vcombine.high %v2312_v39, %v2408_v22  ;;  %v13465_v58 = vcombine.low %v2312_v39, %v2408_v22 }
 0x855   : > { %v13467_v38 = vcombine.low %v2313_v51, %v2409_v50  ;;  %v1197_v52 = vcombine.high %v397_v12, %v397_v12  ;;  %v1835_v12 = vld [vmem:[%s14433_s20 + $0x5c8] sm:$0xff] }
 0x857   : > { %v16294_v15 = vrot.slane %v1197_v52, %v14467_v24  ;;  %v398_v52 = vld [vmem:[%s14451_s13 + $0x168] sm:$0xff] }
 0x85b   : > { %11931 = vmatpush1.bf16.xpose.msra.mxu0 %v13461_v49  ;;  %11971 = vmatpush1.bf16.xpose.msra.mxu1 %v13463_v33  ;;  %v13468_v49 = vcombine.high %v2313_v51, %v2409_v50  ;;  %v2120_v33 = vld [vmem:[%s14433_s20 + $0xeb0] sm:$0xff] }
 0x85c   : > { %11932 = vmatprep.subr.bf16.mxu0 %v13270_v8  ;;  %11972 = vmatprep.subr.bf16.mxu1 %v13272_v6  ;;  %v2216_v8 = vld [vmem:[%s14433_s20 + $0x11b0] sm:$0xff]  ;;  %v2121_v6 = vld [vmem:[%s14433_s20 + $0xeb8] sm:$0xff] }
 0x85d   : > { %v13274_v26 = vcombine.high %v2120_v33, %v2216_v8  ;;  %v13273_v17 = vcombine.low %v2120_v33, %v2216_v8  ;;  %v13275_v18 = vcombine.low %v2121_v6, %v2217_v10 }
 0x863   : > { %11933 = vmatpush1.bf16.xpose.msra.mxu0 %v13269_v61  ;;  %11973 = vmatpush1.bf16.xpose.msra.mxu1 %v13271_v62  ;;  %v13276_v61 = vcombine.high %v2121_v6, %v2217_v10  ;;  %v1928_v62 = vld [vmem:[%s14433_s20 + $0x8b0] sm:$0xff] }
 0x864   : > { %11934 = vmatprep.subr.bf16.mxu0 %v13078_v5  ;;  %11974 = vmatprep.subr.bf16.mxu1 %v13080_v43  ;;  %v2024_v5 = vld [vmem:[%s14433_s20 + $0xbb0] sm:$0xff]  ;;  %v1929_v43 = vld [vmem:[%s14433_s20 + $0x8b8] sm:$0xff] }
 0x865   : > { %v13082_v57 = vcombine.high %v1928_v62, %v2024_v5  ;;  %v13081_v55 = vcombine.low %v1928_v62, %v2024_v5  ;;  %v13083_v41 = vcombine.low %v1929_v43, %v2025_v31  ;;  %v2219_v62 = vld [vmem:[%s14433_s20 + $0x11c8] sm:$0xff] }
 0x86b   : > { %11935 = vmatpush1.bf16.xpose.msra.mxu0 %v13077_v48  ;;  %11975 = vmatpush1.bf16.xpose.msra.mxu1 %v13079_v36  ;;  %v13084_v48 = vcombine.high %v1929_v43, %v2025_v31  ;;  %v1736_v36 = vld [vmem:[%s14433_s20 + $0x2b0] sm:$0xff] }
 0x86c   : > { %11936 = vmatprep.subr.bf16.mxu0 %v12886_v20  ;;  %11976 = vmatprep.subr.bf16.mxu1 %v12888_v21  ;;  %v1832_v20 = vld [vmem:[%s14433_s20 + $0x5b0] sm:$0xff]  ;;  %v1737_v21 = vld [vmem:[%s14433_s20 + $0x2b8] sm:$0xff] }
 0x86d   : > { %v12890_v25 = vcombine.high %v1736_v36, %v1832_v20  ;;  %v12892_v27 = vcombine.high %v1737_v21, %v1833_v2  ;;  %v12889_v13 = vcombine.low %v1736_v36, %v1832_v20  ;;  %v12891_v53 = vcombine.low %v1737_v21, %v1833_v2  ;;  %v2027_v36 = vld [vmem:[%s14433_s20 + $0xbc8] sm:$0xff] }
 0x873   : > { %11937 = vmatpush1.bf16.xpose.msra.mxu0 %v12885_v4  ;;  %11977 = vmatpush1.bf16.xpose.msra.mxu1 %v12887_v46  ;;  %v2698_v4 = vld [vmem:[%s14433_s20 + $0x20c0] sm:$0xff] }
 0x874   : > { %12006 = vmatprep.subr.bf16.mxu0 %v13850_v30  ;;  %12046 = vmatprep.subr.bf16.mxu1 %v13852_v32  ;;  %v2794_v46 = vld [vmem:[%s14433_s20 + $0x23c0] sm:$0xff]  ;;  %v2699_v30 = vld [vmem:[%s14433_s20 + $0x20c8] sm:$0xff] }
 0x875   : > { %v2795_v32 = vld [vmem:[%s14433_s20 + $0x23c8] sm:$0xff] }
 0x876   : > { %v13856_v37 = vcombine.high %v2699_v30, %v2795_v32 }
 0x87a   : > { %v11636_v19 = vpop.f32.mrf.mxu0  ;;  %11955 = vmatmul.mubr.bf16.vlgmr.msra.gmra.mxu0 %v1625_v35  ;;  %v11676_v56 = vpop.f32.mrf.mxu1  ;;  %11995 = vmatmul.mubr.bf16.vlgmr.msra.gmra.mxu1 %v1627_v60  ;;  %v13854_v35 = vcombine.high %v2698_v4, %v2794_v46  ;;  %v2506_v60 = vld [vmem:[%s14433_s20 + $0x1ac0] sm:$0xff] }
 0x87b   : > { %v11637_v7 = vadd.f32 %v11636_v19, %v16225_v54  ;;  %12007 = vmatpush1.bf16.xpose.msra.mxu0 %v13849_v16  ;;  %12047 = vmatpush1.bf16.xpose.msra.mxu1 %v13851_v0  ;;  %v2602_v16 = vld [vmem:[%s14433_s20 + $0x1dc0] sm:$0xff]  ;;  %v1212_v0 = vcombine.high %v16291_v29, %v16291_v29  ;;  %v1213_v19 = vcombine.high %v16294_v15, %v16294_v15 }
 0x87c   : > { %v11638_v45 = vpop.f32.mrf.mxu0  ;;  %12008 = vmatprep.subr.bf16.mxu0 %v13658_v40  ;;  %v11678_v47 = vpop.f32.mrf.mxu1  ;;  %12048 = vmatprep.subr.bf16.mxu1 %v13660_v42  ;;  %v1629_v40 = vpack.c.bf16 %v16249_v23, %v16249_v23  ;;  %v2507_v42 = vld [vmem:[%s14433_s20 + $0x1ac8] sm:$0xff] }
 0x87d   : > { %v16267_v1 = vadd.f32 %v11676_v56, %v11637_v7  ;;  %12034 = vmatprep.mubr.bf16.mxu0 %v1630_v34  ;;  %12074 = vmatprep.mubr.bf16.mxu1 %v1632_v9  ;;  %v2603_v34 = vld [vmem:[%s14433_s20 + $0x1dc8] sm:$0xff]  ;;  %v1631_v9 = vpack.c.bf16 %v16252_v11, %v16252_v11  ;;  %v13853_v7 = vcombine.low %v2698_v4, %v2794_v46 }
 0x87e   : > { %v11639_v14 = vpop.f32.mrf.mxu0  ;;  %v11679_v54 = vpop.f32.mrf.mxu1  ;;  %v13855_v56 = vcombine.low %v2699_v30, %v2795_v32  ;;  %v13662_v45 = vcombine.high %v2506_v60, %v2602_v16  ;;  %v13664_v47 = vcombine.high %v2507_v42, %v2603_v34  ;;  %v1634_v39 = vpack.c.bf16 %v1212_v0, %v1212_v0 }
 0x87f   : > { %v1636_v14 = vpack.c.bf16 %v1213_v19, %v1213_v19  ;;  %v13663_v8 = vcombine.low %v2507_v42, %v2603_v34  ;;  %v16333_v34 = vrot.slane %v398_v52, %v14467_v24 }
 0x880   : > { %v11640_v28 = vpop.f32.mrf.mxu0  ;;  %v11680_v63 = vpop.f32.mrf.mxu1 }
 0x881   : > { %v2410_v28 = vld [vmem:[%s14433_s20 + $0x17c0] sm:$0xff]  ;;  %v2411_v63 = vld [vmem:[%s14433_s20 + $0x17c8] sm:$0xff] }
 0x883   : > { %12009 = vmatpush1.bf16.xpose.msra.mxu0 %v13657_v44  ;;  %12049 = vmatpush1.bf16.xpose.msra.mxu1 %v13659_v3  ;;  %v2314_v44 = vld [vmem:[%s14433_s20 + $0x14c0] sm:$0xff] }
 0x884   : > { %12010 = vmatprep.subr.bf16.mxu0 %v13466_v59  ;;  %12050 = vmatprep.subr.bf16.mxu1 %v13468_v49  ;;  %v2315_v59 = vld [vmem:[%s14433_s20 + $0x14c8] sm:$0xff]  ;;  %v13661_v49 = vcombine.low %v2506_v60, %v2602_v16  ;;  %v13470_v6 = vcombine.high %v2314_v44, %v2410_v28  ;;  %v13469_v5 = vcombine.low %v2314_v44, %v2410_v28 }
 0x885   : > { %v13471_v43 = vcombine.low %v2315_v59, %v2411_v63  ;;  %v1214_v60 = vcombine.high %v398_v52, %v398_v52  ;;  %v1837_v52 = vld [vmem:[%s14433_s20 + $0x5d8] sm:$0xff] }
 0x887   : > { %v16336_v19 = vrot.slane %v1214_v60, %v14467_v24  ;;  %v399_v60 = vld [vmem:[%s14451_s13 + $0x170] sm:$0xff] }
 0x88b   : > { %12011 = vmatpush1.bf16.xpose.msra.mxu0 %v13465_v58  ;;  %12051 = vmatpush1.bf16.xpose.msra.mxu1 %v13467_v38  ;;  %v13472_v58 = vcombine.high %v2315_v59, %v2411_v63  ;;  %v2122_v38 = vld [vmem:[%s14433_s20 + $0xec0] sm:$0xff] }
 0x88c   : > { %12012 = vmatprep.subr.bf16.mxu0 %v13274_v26  ;;  %12052 = vmatprep.subr.bf16.mxu1 %v13276_v61  ;;  %v2218_v26 = vld [vmem:[%s14433_s20 + $0x11c0] sm:$0xff]  ;;  %v2123_v61 = vld [vmem:[%s14433_s20 + $0xec8] sm:$0xff] }
 0x88d   : > { %v13278_v31 = vcombine.high %v2122_v38, %v2218_v26  ;;  %v13277_v20 = vcombine.low %v2122_v38, %v2218_v26  ;;  %v13279_v21 = vcombine.low %v2123_v61, %v2219_v62 }
 0x893   : > { %12013 = vmatpush1.bf16.xpose.msra.mxu0 %v13273_v17  ;;  %12053 = vmatpush1.bf16.xpose.msra.mxu1 %v13275_v18  ;;  %v13280_v17 = vcombine.high %v2123_v61, %v2219_v62  ;;  %v1930_v18 = vld [vmem:[%s14433_s20 + $0x8c0] sm:$0xff] }
 0x894   : > { %12014 = vmatprep.subr.bf16.mxu0 %v13082_v57  ;;  %12054 = vmatprep.subr.bf16.mxu1 %v13084_v48  ;;  %v2026_v57 = vld [vmem:[%s14433_s20 + $0xbc0] sm:$0xff]  ;;  %v1931_v48 = vld [vmem:[%s14433_s20 + $0x8c8] sm:$0xff] }
 0x895   : > { %v13086_v2 = vcombine.high %v1930_v18, %v2026_v57  ;;  %v13085_v4 = vcombine.low %v1930_v18, %v2026_v57  ;;  %v13087_v46 = vcombine.low %v1931_v48, %v2027_v36  ;;  %v2221_v18 = vld [vmem:[%s14433_s20 + $0x11d8] sm:$0xff] }
 0x89b   : > { %12015 = vmatpush1.bf16.xpose.msra.mxu0 %v13081_v55  ;;  %12055 = vmatpush1.bf16.xpose.msra.mxu1 %v13083_v41  ;;  %v13088_v55 = vcombine.high %v1931_v48, %v2027_v36  ;;  %v1738_v41 = vld [vmem:[%s14433_s20 + $0x2c0] sm:$0xff] }
 0x89c   : > { %12016 = vmatprep.subr.bf16.mxu0 %v12890_v25  ;;  %12056 = vmatprep.subr.bf16.mxu1 %v12892_v27  ;;  %v1834_v25 = vld [vmem:[%s14433_s20 + $0x5c0] sm:$0xff]  ;;  %v1739_v27 = vld [vmem:[%s14433_s20 + $0x2c8] sm:$0xff] }
 0x89d   : > { %v12894_v30 = vcombine.high %v1738_v41, %v1834_v25  ;;  %v12896_v32 = vcombine.high %v1739_v27, %v1835_v12  ;;  %v12893_v16 = vcombine.low %v1738_v41, %v1834_v25  ;;  %v12895_v0 = vcombine.low %v1739_v27, %v1835_v12  ;;  %v2029_v41 = vld [vmem:[%s14433_s20 + $0xbd8] sm:$0xff] }
 0x8a3   : > { %12017 = vmatpush1.bf16.xpose.msra.mxu0 %v12889_v13  ;;  %12057 = vmatpush1.bf16.xpose.msra.mxu1 %v12891_v53  ;;  %v2700_v13 = vld [vmem:[%s14433_s20 + $0x20d0] sm:$0xff] }
 0x8a4   : > { %12086 = vmatprep.subr.bf16.mxu0 %v13854_v35  ;;  %12126 = vmatprep.subr.bf16.mxu1 %v13856_v37  ;;  %v2796_v53 = vld [vmem:[%s14433_s20 + $0x23d0] sm:$0xff]  ;;  %v2701_v35 = vld [vmem:[%s14433_s20 + $0x20d8] sm:$0xff] }
 0x8a5   : > { %v2797_v37 = vld [vmem:[%s14433_s20 + $0x23d8] sm:$0xff] }
 0x8a6   : > { %v13860_v42 = vcombine.high %v2701_v35, %v2797_v37 }
 0x8aa   : > { %v11716_v22 = vpop.f32.mrf.mxu0  ;;  %12035 = vmatmul.mubr.bf16.vlgmr.msra.gmra.mxu0 %v1629_v40  ;;  %v11756_v51 = vpop.f32.mrf.mxu1  ;;  %12075 = vmatmul.mubr.bf16.vlgmr.msra.gmra.mxu1 %v1631_v9  ;;  %v13858_v40 = vcombine.high %v2700_v13, %v2796_v53  ;;  %v2508_v9 = vld [vmem:[%s14433_s20 + $0x1ad0] sm:$0xff] }
 0x8ab   : > { %v11717_v23 = vadd.f32 %v11716_v22, %v16267_v1  ;;  %12087 = vmatpush1.bf16.xpose.msra.mxu0 %v13853_v7  ;;  %12127 = vmatpush1.bf16.xpose.msra.mxu1 %v13855_v56  ;;  %v2604_v7 = vld [vmem:[%s14433_s20 + $0x1dd0] sm:$0xff]  ;;  %v1229_v56 = vcombine.high %v16333_v34, %v16333_v34  ;;  %v1230_v22 = vcombine.high %v16336_v19, %v16336_v19 }
 0x8ac   : > { %v11718_v50 = vpop.f32.mrf.mxu0  ;;  %12088 = vmatprep.subr.bf16.mxu0 %v13662_v45  ;;  %v11758_v54 = vpop.f32.mrf.mxu1  ;;  %12128 = vmatprep.subr.bf16.mxu1 %v13664_v47  ;;  %v1633_v45 = vpack.c.bf16 %v16291_v29, %v16291_v29  ;;  %v2509_v47 = vld [vmem:[%s14433_s20 + $0x1ad8] sm:$0xff] }
 0x8ad   : > { %v16309_v11 = vadd.f32 %v11756_v51, %v11717_v23  ;;  %12114 = vmatprep.mubr.bf16.mxu0 %v1634_v39  ;;  %12154 = vmatprep.mubr.bf16.mxu1 %v1636_v14  ;;  %v2605_v39 = vld [vmem:[%s14433_s20 + $0x1dd8] sm:$0xff]  ;;  %v1635_v14 = vpack.c.bf16 %v16294_v15, %v16294_v15  ;;  %v13857_v23 = vcombine.low %v2700_v13, %v2796_v53 }
 0x8ae   : > { %v11719_v3 = vpop.f32.mrf.mxu0  ;;  %v11759_v1 = vpop.f32.mrf.mxu1  ;;  %v13859_v51 = vcombine.low %v2701_v35, %v2797_v37  ;;  %v13666_v50 = vcombine.high %v2508_v9, %v2604_v7  ;;  %v13668_v54 = vcombine.high %v2509_v47, %v2605_v39  ;;  %v1638_v44 = vpack.c.bf16 %v1229_v56, %v1229_v56 }
 0x8af   : > { %v1640_v3 = vpack.c.bf16 %v1230_v22, %v1230_v22  ;;  %v13667_v26 = vcombine.low %v2509_v47, %v2605_v39  ;;  %v16375_v39 = vrot.slane %v399_v60, %v14467_v24 }
 0x8b0   : > { %v11720_v33 = vpop.f32.mrf.mxu0  ;;  %v11760_v10 = vpop.f32.mrf.mxu1 }
 0x8b1   : > { %v2412_v33 = vld [vmem:[%s14433_s20 + $0x17d0] sm:$0xff]  ;;  %v2413_v10 = vld [vmem:[%s14433_s20 + $0x17d8] sm:$0xff] }
 0x8b3   : > { %12089 = vmatpush1.bf16.xpose.msra.mxu0 %v13661_v49  ;;  %12129 = vmatpush1.bf16.xpose.msra.mxu1 %v13663_v8  ;;  %v2316_v49 = vld [vmem:[%s14433_s20 + $0x14d0] sm:$0xff] }
 0x8b4   : > { %12090 = vmatprep.subr.bf16.mxu0 %v13470_v6  ;;  %12130 = vmatprep.subr.bf16.mxu1 %v13472_v58  ;;  %v2317_v6 = vld [vmem:[%s14433_s20 + $0x14d8] sm:$0xff]  ;;  %v13665_v58 = vcombine.low %v2508_v9, %v2604_v7  ;;  %v13474_v61 = vcombine.high %v2316_v49, %v2412_v33  ;;  %v13473_v57 = vcombine.low %v2316_v49, %v2412_v33 }
 0x8b5   : > { %v13475_v48 = vcombine.low %v2317_v6, %v2413_v10  ;;  %v1231_v9 = vcombine.high %v399_v60, %v399_v60  ;;  %v1839_v60 = vld [vmem:[%s14433_s20 + $0x5e8] sm:$0xff] }
 0x8b7   : > { %v16378_v22 = vrot.slane %v1231_v9, %v14467_v24  ;;  %v400_v9 = vld [vmem:[%s14451_s13 + $0x178] sm:$0xff] }
 0x8bb   : > { %12091 = vmatpush1.bf16.xpose.msra.mxu0 %v13469_v5  ;;  %12131 = vmatpush1.bf16.xpose.msra.mxu1 %v13471_v43  ;;  %v13476_v5 = vcombine.high %v2317_v6, %v2413_v10  ;;  %v2124_v43 = vld [vmem:[%s14433_s20 + $0xed0] sm:$0xff] }
 0x8bc   : > { %12092 = vmatprep.subr.bf16.mxu0 %v13278_v31  ;;  %12132 = vmatprep.subr.bf16.mxu1 %v13280_v17  ;;  %v2220_v31 = vld [vmem:[%s14433_s20 + $0x11d0] sm:$0xff]  ;;  %v2125_v17 = vld [vmem:[%s14433_s20 + $0xed8] sm:$0xff] }
 0x8bd   : > { %v13282_v36 = vcombine.high %v2124_v43, %v2220_v31  ;;  %v13281_v25 = vcombine.low %v2124_v43, %v2220_v31  ;;  %v13283_v27 = vcombine.low %v2125_v17, %v2221_v18 }
 0x8c3   : > { %12093 = vmatpush1.bf16.xpose.msra.mxu0 %v13277_v20  ;;  %12133 = vmatpush1.bf16.xpose.msra.mxu1 %v13279_v21  ;;  %v13284_v20 = vcombine.high %v2125_v17, %v2221_v18  ;;  %v1932_v21 = vld [vmem:[%s14433_s20 + $0x8d0] sm:$0xff] }
 0x8c4   : > { %12094 = vmatprep.subr.bf16.mxu0 %v13086_v2  ;;  %12134 = vmatprep.subr.bf16.mxu1 %v13088_v55  ;;  %v2028_v2 = vld [vmem:[%s14433_s20 + $0xbd0] sm:$0xff]  ;;  %v1933_v55 = vld [vmem:[%s14433_s20 + $0x8d8] sm:$0xff] }
 0x8c5   : > { %v13090_v12 = vcombine.high %v1932_v21, %v2028_v2  ;;  %v13089_v13 = vcombine.low %v1932_v21, %v2028_v2  ;;  %v13091_v53 = vcombine.low %v1933_v55, %v2029_v41  ;;  %v2223_v21 = vld [vmem:[%s14433_s20 + $0x11e8] sm:$0xff] }
 0x8cb   : > { %12095 = vmatpush1.bf16.xpose.msra.mxu0 %v13085_v4  ;;  %12135 = vmatpush1.bf16.xpose.msra.mxu1 %v13087_v46  ;;  %v13092_v4 = vcombine.high %v1933_v55, %v2029_v41  ;;  %v1740_v46 = vld [vmem:[%s14433_s20 + $0x2d0] sm:$0xff] }
 0x8cc   : > { %12096 = vmatprep.subr.bf16.mxu0 %v12894_v30  ;;  %12136 = vmatprep.subr.bf16.mxu1 %v12896_v32  ;;  %v1836_v30 = vld [vmem:[%s14433_s20 + $0x5d0] sm:$0xff]  ;;  %v1741_v32 = vld [vmem:[%s14433_s20 + $0x2d8] sm:$0xff] }
 0x8cd   : > { %v12898_v35 = vcombine.high %v1740_v46, %v1836_v30  ;;  %v12900_v37 = vcombine.high %v1741_v32, %v1837_v52  ;;  %v12897_v7 = vcombine.low %v1740_v46, %v1836_v30  ;;  %v12899_v56 = vcombine.low %v1741_v32, %v1837_v52  ;;  %v2031_v46 = vld [vmem:[%s14433_s20 + $0xbe8] sm:$0xff] }
 0x8d3   : > { %12097 = vmatpush1.bf16.xpose.msra.mxu0 %v12893_v16  ;;  %12137 = vmatpush1.bf16.xpose.msra.mxu1 %v12895_v0  ;;  %v2702_v16 = vld [vmem:[%s14433_s20 + $0x20e0] sm:$0xff] }
 0x8d4   : > { %12166 = vmatprep.subr.bf16.mxu0 %v13858_v40  ;;  %12206 = vmatprep.subr.bf16.mxu1 %v13860_v42  ;;  %v2798_v0 = vld [vmem:[%s14433_s20 + $0x23e0] sm:$0xff]  ;;  %v2703_v40 = vld [vmem:[%s14433_s20 + $0x20e8] sm:$0xff] }
 0x8d5   : > { %v2799_v42 = vld [vmem:[%s14433_s20 + $0x23e8] sm:$0xff] }
 0x8d6   : > { %v13864_v47 = vcombine.high %v2703_v40, %v2799_v42 }
 0x8da   : > { %v11796_v28 = vpop.f32.mrf.mxu0  ;;  %12115 = vmatmul.mubr.bf16.vlgmr.msra.gmra.mxu0 %v1633_v45  ;;  %v11836_v59 = vpop.f32.mrf.mxu1  ;;  %12155 = vmatmul.mubr.bf16.vlgmr.msra.gmra.mxu1 %v1635_v14  ;;  %v13862_v45 = vcombine.high %v2702_v16, %v2798_v0  ;;  %v2510_v14 = vld [vmem:[%s14433_s20 + $0x1ae0] sm:$0xff] }
 0x8db   : > { %v11797_v29 = vadd.f32 %v11796_v28, %v16309_v11  ;;  %12167 = vmatpush1.bf16.xpose.msra.mxu0 %v13857_v23  ;;  %12207 = vmatpush1.bf16.xpose.msra.mxu1 %v13859_v51  ;;  %v2606_v23 = vld [vmem:[%s14433_s20 + $0x1de0] sm:$0xff]  ;;  %v1246_v51 = vcombine.high %v16375_v39, %v16375_v39  ;;  %v1247_v28 = vcombine.high %v16378_v22, %v16378_v22 }
 0x8dc   : > { %v11798_v63 = vpop.f32.mrf.mxu0  ;;  %12168 = vmatprep.subr.bf16.mxu0 %v13666_v50  ;;  %v11838_v1 = vpop.f32.mrf.mxu1  ;;  %12208 = vmatprep.subr.bf16.mxu1 %v13668_v54  ;;  %v1637_v50 = vpack.c.bf16 %v16333_v34, %v16333_v34  ;;  %v2511_v54 = vld [vmem:[%s14433_s20 + $0x1ae8] sm:$0xff] }
 0x8dd   : > { %v16351_v15 = vadd.f32 %v11836_v59, %v11797_v29  ;;  %12194 = vmatprep.mubr.bf16.mxu0 %v1638_v44  ;;  %12234 = vmatprep.mubr.bf16.mxu1 %v1640_v3  ;;  %v2607_v44 = vld [vmem:[%s14433_s20 + $0x1de8] sm:$0xff]  ;;  %v1639_v3 = vpack.c.bf16 %v16336_v19, %v16336_v19  ;;  %v13861_v29 = vcombine.low %v2702_v16, %v2798_v0 }
 0x8de   : > { %v11799_v8 = vpop.f32.mrf.mxu0  ;;  %v11839_v11 = vpop.f32.mrf.mxu1  ;;  %v13863_v59 = vcombine.low %v2703_v40, %v2799_v42  ;;  %v13670_v63 = vcombine.high %v2510_v14, %v2606_v23  ;;  %v13672_v1 = vcombine.high %v2511_v54, %v2607_v44  ;;  %v1642_v49 = vpack.c.bf16 %v1246_v51, %v1246_v51 }
 0x8df   : > { %v1644_v8 = vpack.c.bf16 %v1247_v28, %v1247_v28  ;;  %v13671_v31 = vcombine.low %v2511_v54, %v2607_v44  ;;  %v16417_v44 = vrot.slane %v400_v9, %v14467_v24 }
 0x8e0   : > { %v11800_v38 = vpop.f32.mrf.mxu0  ;;  %v11840_v62 = vpop.f32.mrf.mxu1 }
 0x8e1   : > { %v2414_v38 = vld [vmem:[%s14433_s20 + $0x17e0] sm:$0xff]  ;;  %v2415_v62 = vld [vmem:[%s14433_s20 + $0x17e8] sm:$0xff] }
 0x8e3   : > { %12169 = vmatpush1.bf16.xpose.msra.mxu0 %v13665_v58  ;;  %12209 = vmatpush1.bf16.xpose.msra.mxu1 %v13667_v26  ;;  %v2318_v58 = vld [vmem:[%s14433_s20 + $0x14e0] sm:$0xff] }
 0x8e4   : > { %12170 = vmatprep.subr.bf16.mxu0 %v13474_v61  ;;  %12210 = vmatprep.subr.bf16.mxu1 %v13476_v5  ;;  %v2319_v61 = vld [vmem:[%s14433_s20 + $0x14e8] sm:$0xff]  ;;  %v13669_v5 = vcombine.low %v2510_v14, %v2606_v23  ;;  %v13478_v17 = vcombine.high %v2318_v58, %v2414_v38  ;;  %v13477_v2 = vcombine.low %v2318_v58, %v2414_v38 }
 0x8e5   : > { %v13479_v55 = vcombine.low %v2319_v61, %v2415_v62  ;;  %v1248_v14 = vcombine.high %v400_v9, %v400_v9 }
 0x8e7   : > { %v16420_v28 = vrot.slane %v1248_v14, %v14467_v24  ;;  %v1643_v24 = vpack.c.bf16 %v16378_v22, %v16378_v22 }
 0x8eb   : > { %12171 = vmatpush1.bf16.xpose.msra.mxu0 %v13473_v57  ;;  %12211 = vmatpush1.bf16.xpose.msra.mxu1 %v13475_v48  ;;  %v13480_v57 = vcombine.high %v2319_v61, %v2415_v62  ;;  %v2126_v48 = vld [vmem:[%s14433_s20 + $0xee0] sm:$0xff] }
 0x8ec   : > { %12172 = vmatprep.subr.bf16.mxu0 %v13282_v36  ;;  %12212 = vmatprep.subr.bf16.mxu1 %v13284_v20  ;;  %v2222_v36 = vld [vmem:[%s14433_s20 + $0x11e0] sm:$0xff]  ;;  %v2127_v20 = vld [vmem:[%s14433_s20 + $0xee8] sm:$0xff] }
 0x8ed   : > { %v13286_v41 = vcombine.high %v2126_v48, %v2222_v36  ;;  %v13285_v30 = vcombine.low %v2126_v48, %v2222_v36  ;;  %v13287_v32 = vcombine.low %v2127_v20, %v2223_v21 }
 0x8f3   : > { %12173 = vmatpush1.bf16.xpose.msra.mxu0 %v13281_v25  ;;  %12213 = vmatpush1.bf16.xpose.msra.mxu1 %v13283_v27  ;;  %v13288_v25 = vcombine.high %v2127_v20, %v2223_v21  ;;  %v1934_v27 = vld [vmem:[%s14433_s20 + $0x8e0] sm:$0xff] }
 0x8f4   : > { %12174 = vmatprep.subr.bf16.mxu0 %v13090_v12  ;;  %12214 = vmatprep.subr.bf16.mxu1 %v13092_v4  ;;  %v2030_v12 = vld [vmem:[%s14433_s20 + $0xbe0] sm:$0xff]  ;;  %v1935_v4 = vld [vmem:[%s14433_s20 + $0x8e8] sm:$0xff] }
 0x8f5   : > { %v13094_v52 = vcombine.high %v1934_v27, %v2030_v12  ;;  %v13093_v16 = vcombine.low %v1934_v27, %v2030_v12  ;;  %v13095_v0 = vcombine.low %v1935_v4, %v2031_v46 }
 0x8fb   : > { %12175 = vmatpush1.bf16.xpose.msra.mxu0 %v13089_v13  ;;  %12215 = vmatpush1.bf16.xpose.msra.mxu1 %v13091_v53  ;;  %v13096_v13 = vcombine.high %v1935_v4, %v2031_v46  ;;  %v1742_v53 = vld [vmem:[%s14433_s20 + $0x2e0] sm:$0xff] }
 0x8fc   : > { %12176 = vmatprep.subr.bf16.mxu0 %v12898_v35  ;;  %12216 = vmatprep.subr.bf16.mxu1 %v12900_v37  ;;  %v1838_v35 = vld [vmem:[%s14433_s20 + $0x5e0] sm:$0xff]  ;;  %v1743_v37 = vld [vmem:[%s14433_s20 + $0x2e8] sm:$0xff] }
 0x8fd   : > { %v12902_v40 = vcombine.high %v1742_v53, %v1838_v35  ;;  %v12904_v42 = vcombine.high %v1743_v37, %v1839_v60  ;;  %v12901_v23 = vcombine.low %v1742_v53, %v1838_v35  ;;  %v12903_v51 = vcombine.low %v1743_v37, %v1839_v60 }
 0x903   : > { %12177 = vmatpush1.bf16.xpose.msra.mxu0 %v12897_v7  ;;  %12217 = vmatpush1.bf16.xpose.msra.mxu1 %v12899_v56  ;;  %v2704_v7 = vld [vmem:[%s14433_s20 + $0x20f0] sm:$0xff] }
 0x904   : > { %12246 = vmatprep.subr.bf16.mxu0 %v13862_v45  ;;  %12286 = vmatprep.subr.bf16.mxu1 %v13864_v47  ;;  %v2800_v56 = vld [vmem:[%s14433_s20 + $0x23f0] sm:$0xff]  ;;  %v2705_v45 = vld [vmem:[%s14433_s20 + $0x20f8] sm:$0xff] }
 0x905   : > { %v2801_v47 = vld [vmem:[%s14433_s20 + $0x23f8] sm:$0xff] }
 0x906   : > { %v13868_v54 = vcombine.high %v2705_v45, %v2801_v47 }
 0x90a   : > { %v11876_v33 = vpop.f32.mrf.mxu0  ;;  %12195 = vmatmul.mubr.bf16.vlgmr.msra.gmra.mxu0 %v1637_v50  ;;  %v11916_v6 = vpop.f32.mrf.mxu1  ;;  %12235 = vmatmul.mubr.bf16.vlgmr.msra.gmra.mxu1 %v1639_v3  ;;  %v13866_v50 = vcombine.high %v2704_v7, %v2800_v56  ;;  %v2512_v3 = vld [vmem:[%s14433_s20 + $0x1af0] sm:$0xff] }
 0x90b   : > { %v11877_v34 = vadd.f32 %v11876_v33, %v16351_v15  ;;  %12247 = vmatpush1.bf16.xpose.msra.mxu0 %v13861_v29  ;;  %12287 = vmatpush1.bf16.xpose.msra.mxu1 %v13863_v59  ;;  %v2608_v29 = vld [vmem:[%s14433_s20 + $0x1df0] sm:$0xff]  ;;  %v1263_v59 = vcombine.high %v16417_v44, %v16417_v44  ;;  %v1264_v33 = vcombine.high %v16420_v28, %v16420_v28 }
 0x90c   : > { %v11878_v10 = vpop.f32.mrf.mxu0  ;;  %12248 = vmatprep.subr.bf16.mxu0 %v13670_v63  ;;  %v11918_v11 = vpop.f32.mrf.mxu1  ;;  %12288 = vmatprep.subr.bf16.mxu1 %v13672_v1  ;;  %v1641_v63 = vpack.c.bf16 %v16375_v39, %v16375_v39  ;;  %v2513_v1 = vld [vmem:[%s14433_s20 + $0x1af8] sm:$0xff] }
 0x90d   : > { %v16393_v19 = vadd.f32 %v11916_v6, %v11877_v34  ;;  %12274 = vmatprep.mubr.bf16.mxu0 %v1642_v49  ;;  %12314 = vmatprep.mubr.bf16.mxu1 %v1644_v8  ;;  %v2609_v49 = vld [vmem:[%s14433_s20 + $0x1df8] sm:$0xff]  ;;  %v13865_v8 = vcombine.low %v2704_v7, %v2800_v56  ;;  %v13867_v34 = vcombine.low %v2705_v45, %v2801_v47 }
 0x90e   : > { %v11879_v26 = vpop.f32.mrf.mxu0  ;;  %v11919_v15 = vpop.f32.mrf.mxu1  ;;  %v13674_v6 = vcombine.high %v2512_v3, %v2608_v29  ;;  %v13676_v10 = vcombine.high %v2513_v1, %v2609_v49  ;;  %v1646_v11 = vpack.c.bf16 %v1263_v59, %v1263_v59  ;;  %v1648_v38 = vpack.c.bf16 %v1264_v33, %v1264_v33 }
 0x90f   : > { %v2320_v15 = vld [vmem:[%s14433_s20 + $0x14f0] sm:$0xff]  ;;  %v13675_v48 = vcombine.low %v2513_v1, %v2609_v49 }
 0x910   : > { %v11880_v43 = vpop.f32.mrf.mxu0  ;;  %v11920_v18 = vpop.f32.mrf.mxu1 }
 0x911   : > { %v13673_v18 = vcombine.low %v2512_v3, %v2608_v29 }
 0x913   : > { %12249 = vmatpush1.bf16.xpose.msra.mxu0 %v13669_v5  ;;  %12289 = vmatpush1.bf16.xpose.msra.mxu1 %v13671_v31  ;;  %v2416_v5 = vld [vmem:[%s14433_s20 + $0x17f0] sm:$0xff]  ;;  %v2321_v31 = vld [vmem:[%s14433_s20 + $0x14f8] sm:$0xff] }
 0x914   : > { %12250 = vmatprep.subr.bf16.mxu0 %v13478_v17  ;;  %12290 = vmatprep.subr.bf16.mxu1 %v13480_v57  ;;  %v2417_v17 = vld [vmem:[%s14433_s20 + $0x17f8] sm:$0xff]  ;;  %v13482_v36 = vcombine.high %v2320_v15, %v2416_v5  ;;  %v13481_v27 = vcombine.low %v2320_v15, %v2416_v5 }
 0x915   : > { %v13484_v21 = vcombine.high %v2321_v31, %v2417_v17  ;;  %v13483_v12 = vcombine.low %v2321_v31, %v2417_v17 }
 0x91b   : > { %12251 = vmatpush1.bf16.xpose.msra.mxu0 %v13477_v2  ;;  %12291 = vmatpush1.bf16.xpose.msra.mxu1 %v13479_v55  ;;  %v2128_v2 = vld [vmem:[%s14433_s20 + $0xef0] sm:$0xff] }
 0x91c   : > { %12252 = vmatprep.subr.bf16.mxu0 %v13286_v41  ;;  %12292 = vmatprep.subr.bf16.mxu1 %v13288_v25  ;;  %v2224_v55 = vld [vmem:[%s14433_s20 + $0x11f0] sm:$0xff]  ;;  %v2129_v41 = vld [vmem:[%s14433_s20 + $0xef8] sm:$0xff] }
 0x91d   : > { %v2225_v25 = vld [vmem:[%s14433_s20 + $0x11f8] sm:$0xff]  ;;  %v13290_v4 = vcombine.high %v2128_v2, %v2224_v55  ;;  %v13289_v53 = vcombine.low %v2128_v2, %v2224_v55 }
 0x91e   : > { %v13292_v46 = vcombine.high %v2129_v41, %v2225_v25  ;;  %v13291_v35 = vcombine.low %v2129_v41, %v2225_v25 }
 0x923   : > { %12253 = vmatpush1.bf16.xpose.msra.mxu0 %v13285_v30  ;;  %12293 = vmatpush1.bf16.xpose.msra.mxu1 %v13287_v32  ;;  %v1936_v30 = vld [vmem:[%s14433_s20 + $0x8f0] sm:$0xff] }
 0x924   : > { %12254 = vmatprep.subr.bf16.mxu0 %v13094_v52  ;;  %12294 = vmatprep.subr.bf16.mxu1 %v13096_v13  ;;  %v2032_v32 = vld [vmem:[%s14433_s20 + $0xbf0] sm:$0xff]  ;;  %v1937_v52 = vld [vmem:[%s14433_s20 + $0x8f8] sm:$0xff] }
 0x925   : > { %v2033_v13 = vld [vmem:[%s14433_s20 + $0xbf8] sm:$0xff]  ;;  %v13098_v37 = vcombine.high %v1936_v30, %v2032_v32  ;;  %v13097_v9 = vcombine.low %v1936_v30, %v2032_v32 }
 0x926   : > { %v13100_v60 = vcombine.high %v1937_v52, %v2033_v13  ;;  %v13099_v7 = vcombine.low %v1937_v52, %v2033_v13 }
 0x92b   : > { %12255 = vmatpush1.bf16.xpose.msra.mxu0 %v13093_v16  ;;  %12295 = vmatpush1.bf16.xpose.msra.mxu1 %v13095_v0  ;;  %v1744_v16 = vld [vmem:[%s14433_s20 + $0x2f0] sm:$0xff] }
 0x92c   : > { %12256 = vmatprep.subr.bf16.mxu0 %v12902_v40  ;;  %12296 = vmatprep.subr.bf16.mxu1 %v12904_v42  ;;  %v1840_v0 = vld [vmem:[%s14433_s20 + $0x5f0] sm:$0xff]  ;;  %v1745_v40 = vld [vmem:[%s14433_s20 + $0x2f8] sm:$0xff] }
 0x92d   : > { %v1841_v42 = vld [vmem:[%s14433_s20 + $0x5f8] sm:$0xff]  ;;  %v12906_v56 = vcombine.high %v1744_v16, %v1840_v0  ;;  %v12905_v47 = vcombine.low %v1744_v16, %v1840_v0 }
 0x92e   : > { %v12908_v45 = vcombine.high %v1745_v40, %v1841_v42  ;;  %v12907_v14 = vcombine.low %v1745_v40, %v1841_v42 }
 0x933   : > { %12257 = vmatpush1.bf16.xpose.msra.mxu0 %v12901_v23  ;;  %12297 = vmatpush1.bf16.xpose.msra.mxu1 %v12903_v51  ;;  %v1645_v23 = vpack.c.bf16 %v16417_v44, %v16417_v44  ;;  %v1647_v51 = vpack.c.bf16 %v16420_v28, %v16420_v28 }
 0x934   : > { %12326 = vmatprep.subr.bf16.mxu0 %v13866_v50  ;;  %12366 = vmatprep.subr.bf16.mxu1 %v13868_v54 }
 0x93a   : > { %v11956_v58 = vpop.f32.mrf.mxu0  ;;  %12275 = vmatmul.mubr.bf16.vlgmr.msra.gmra.mxu0 %v1641_v63  ;;  %v11996_v26 = vpop.f32.mrf.mxu1  ;;  %12315 = vmatmul.mubr.bf16.vlgmr.msra.gmra.mxu1 %v1643_v24 }
 0x93b   : > { %v11957_v39 = vadd.f32 %v11956_v58, %v16393_v19  ;;  %12327 = vmatpush1.bf16.xpose.msra.mxu0 %v13865_v8  ;;  %12367 = vmatpush1.bf16.xpose.msra.mxu1 %v13867_v34 }
 0x93c   : > { %v11958_v61 = vpop.f32.mrf.mxu0  ;;  %12328 = vmatprep.subr.bf16.mxu0 %v13674_v6  ;;  %v11998_v62 = vpop.f32.mrf.mxu1  ;;  %12368 = vmatprep.subr.bf16.mxu1 %v13676_v10 }
 0x93d   : > { %v16435_v22 = vadd.f32 %v11996_v26, %v11957_v39  ;;  %12354 = vmatprep.mubr.bf16.mxu0 %v1646_v11  ;;  %12394 = vmatprep.mubr.bf16.mxu1 %v1648_v38 }
 0x93e   : > { %v11959_v43 = vpop.f32.mrf.mxu0  ;;  %v11999_v19 = vpop.f32.mrf.mxu1 }
 0x940   : > { %v11960_v57 = vpop.f32.mrf.mxu0  ;;  %v12000_v20 = vpop.f32.mrf.mxu1 }
 0x943   : > { %12329 = vmatpush1.bf16.xpose.msra.mxu0 %v13673_v18  ;;  %12369 = vmatpush1.bf16.xpose.msra.mxu1 %v13675_v48 }
 0x944   : > { %12330 = vmatprep.subr.bf16.mxu0 %v13482_v36  ;;  %12370 = vmatprep.subr.bf16.mxu1 %v13484_v21 }
 0x94b   : > { %12331 = vmatpush1.bf16.xpose.msra.mxu0 %v13481_v27  ;;  %12371 = vmatpush1.bf16.xpose.msra.mxu1 %v13483_v12 }
 0x94c   : > { %12332 = vmatprep.subr.bf16.mxu0 %v13290_v4  ;;  %12372 = vmatprep.subr.bf16.mxu1 %v13292_v46  ;;  %v1649_v46 = vld [vmem:[#allocation2] sm:$0x3] }
 0x953   : > { %12333 = vmatpush1.bf16.xpose.msra.mxu0 %v13289_v53  ;;  %12373 = vmatpush1.bf16.xpose.msra.mxu1 %v13291_v35 }
 0x954   : > { %12334 = vmatprep.subr.bf16.mxu0 %v13098_v37  ;;  %12374 = vmatprep.subr.bf16.mxu1 %v13100_v60 }
 0x95b   : > { %12335 = vmatpush1.bf16.xpose.msra.mxu0 %v13097_v9  ;;  %12375 = vmatpush1.bf16.xpose.msra.mxu1 %v13099_v7 }
 0x95c   : > { %12336 = vmatprep.subr.bf16.mxu0 %v12906_v56  ;;  %12376 = vmatprep.subr.bf16.mxu1 %v12908_v45 }
 0x963   : > { %12337 = vmatpush1.bf16.xpose.msra.mxu0 %v12905_v47  ;;  %12377 = vmatpush1.bf16.xpose.msra.mxu1 %v12907_v14 }
 0x96a   : > { %v12036_v50 = vpop.f32.mrf.mxu0  ;;  %12355 = vmatmul.mubr.bf16.vlgmr.msra.gmra.mxu0 %v1645_v23  ;;  %v12076_v3 = vpop.f32.mrf.mxu1  ;;  %12395 = vmatmul.mubr.bf16.vlgmr.msra.gmra.mxu1 %v1647_v51 }
 0x96b   : > { %v12037_v54 = vadd.f32 %v12036_v50, %v16435_v22 }
 0x96c   : > { %v12038_v29 = vpop.f32.mrf.mxu0  ;;  %v12078_v63 = vpop.f32.mrf.mxu1 }
 0x96d   : > { %v12077_v59 = vadd.f32 %v12076_v3, %v12037_v54 }
 0x96e   : > { %v12039_v1 = vpop.f32.mrf.mxu0  ;;  %v12079_v49 = vpop.f32.mrf.mxu1 }
 0x970   : > { %v12040_v33 = vpop.f32.mrf.mxu0  ;;  %v12080_v24 = vpop.f32.mrf.mxu1 }
 0x99a   : > { %v12116_v8 = vpop.f32.mrf.mxu0  ;;  %v12156_v6 = vpop.f32.mrf.mxu1 }
 0x99b   : > { %v12117_v34 = vadd.f32 %v12116_v8, %v12077_v59 }
 0x99c   : > { %v12118_v44 = vpop.f32.mrf.mxu0  ;;  %v12158_v11 = vpop.f32.mrf.mxu1 }
 0x99d   : > { %v12157_v10 = vadd.f32 %v12156_v6, %v12117_v34 }
 0x99e   : > { %v12119_v28 = vpop.f32.mrf.mxu0  ;;  %v12159_v58 = vpop.f32.mrf.mxu1 }
 0x9a0   : > { %v12120_v38 = vpop.f32.mrf.mxu0  ;;  %v12160_v39 = vpop.f32.mrf.mxu1 }
 0x9ca   : > { %v12196_v26 = vpop.f32.mrf.mxu0  ;;  %v12236_v22 = vpop.f32.mrf.mxu1 }
 0x9cb   : > { %v12197_v61 = vadd.f32 %v12196_v26, %v12157_v10 }
 0x9cc   : > { %v12198_v62 = vpop.f32.mrf.mxu0  ;;  %v12238_v5 = vpop.f32.mrf.mxu1 }
 0x9cd   : > { %v12237_v15 = vadd.f32 %v12236_v22, %v12197_v61 }
 0x9ce   : > { %v12199_v43 = vpop.f32.mrf.mxu0  ;;  %v12239_v31 = vpop.f32.mrf.mxu1 }
 0x9d0   : > { %v12200_v17 = vpop.f32.mrf.mxu0  ;;  %v12240_v19 = vpop.f32.mrf.mxu1 }
 0x9fa   : > { %v12276_v18 = vpop.f32.mrf.mxu0  ;;  %v12316_v57 = vpop.f32.mrf.mxu1 }
 0x9fb   : > { %v12277_v41 = vadd.f32 %v12276_v18, %v12237_v15 }
 0x9fc   : > { %v12278_v48 = vpop.f32.mrf.mxu0  ;;  %v12318_v36 = vpop.f32.mrf.mxu1 }
 0x9fd   : > { %v12317_v25 = vadd.f32 %v12316_v57, %v12277_v41 }
 0x9fe   : > { %v12279_v20 = vpop.f32.mrf.mxu0  ;;  %v12319_v21 = vpop.f32.mrf.mxu1 }
 0xa00   : > { %v12280_v2 = vpop.f32.mrf.mxu0  ;;  %v12320_v55 = vpop.f32.mrf.mxu1 }
 0xa2a   : > { %v12356_v27 = vpop.f32.mrf.mxu0  ;;  %v12396_v4 = vpop.f32.mrf.mxu1 }
 0xa2b   : > { %v12357_v12 = vadd.f32 %v12356_v27, %v12317_v25 }
 0xa2c   : > { %v12358_v30 = vpop.f32.mrf.mxu0  ;;  %v12398_v52 = vpop.f32.mrf.mxu1 }
 0xa2d   : > { %v12397_v32 = vadd.f32 %v12396_v4, %v12357_v12  ;;  %12408 = sbr.rel (%p13869_p12) target bundleno = 3028 (0xbd4), region = 72 }
 0xa2e   : > { %v12359_v13 = vpop.f32.mrf.mxu0  ;;  %v12399_v35 = vpop.f32.mrf.mxu1 }
 0xa2f   : > { %v12402_v53 = vadd.f32 %v12397_v32, %v1649_v46 }
 0xa30   : > { %v12360_v37 = vpop.f32.mrf.mxu0  ;;  %v12400_v60 = vpop.f32.mrf.mxu1 }
 0xa31   : > { %12404 = vst.msk [vmem:[#allocation2] sm:$0x3] %vm12403_vm1, %v12402_v53 }
 0xa32   : > { %v12430_v16 = vld [vmem:[%s16541_s3 + $0x58] sm:$0xff]  ;;  %v14264_v0 = vmov 0.0   ;;  %v12429_v40 = vld [vmem:[%s16541_s3 + $0x50] sm:$0xff]  ;;  %vm14265_vm2 = vmmov 0   ;;  %vm12530_vm3 = vcmask 1045504   ;;  %v12428_v42 = vld [vmem:[%s16541_s3 + $0x48] sm:$0xff] }
 0xa33   : > { %13901 = vmatprep.subr.mxu0 %v14264_v0  ;;  %13925 = vmatprep.mubr.msk.f32.mxu0 %vm14265_vm2, %v14264_v0  ;;  %v12518_v9 = vld [vmem:[%s16543_s5 + $0x28] sm:$0x3f]  ;;  %v12427_v7 = vld [vmem:[%s16541_s3 + $0x40] sm:$0xff]  ;;  %v12516_v45 = vld [vmem:[%s16543_s5 + $0x18] sm:$0xff]  ;;  %vm12438_vm4 = vcmask 785408   ;;  %vm12526_vm5 = vcmask 375808  }
 0xa34   : > { %13902 = vmatpush3.msra.mxu0 %v12430_v16  ;;  %13928 = vmatprep.subr.mxu1 %v14264_v0  ;;  %v12517_v56 = vld [vmem:[%s16543_s5 + $0x20] sm:$0xff]  ;;  %v12426_v47 = vld [vmem:[%s16541_s3 + $0x38] sm:$0xff]  ;;  %v12425_v14 = vld [vmem:[%s16541_s3 + $0x30] sm:$0xff]  ;;  %vm12604_vm6 = vcmask 41984  }
 0xa35   : > { %13903 = vmatprep.subr.mxu0 %v14264_v0  ;;  %13940 = vmatprep.mubr.msk.f32.mxu1 %vm14265_vm2, %v14264_v0  ;;  %v12424_v23 = vld [vmem:[%s16541_s3 + $0x28] sm:$0xff]  ;;  %v12423_v51 = vld [vmem:[%s16541_s3 + $0x20] sm:$0xff]  ;;  %v12422_v3 = vld [vmem:[%s16541_s3 + $0x18] sm:$0xff] }
 0xa36   : > { %13904 = vmatpush3.msra.mxu0 %v12429_v40  ;;  %13929 = vmatpush3.msk.msra.mxu1 %vm12530_vm3, %v12518_v9  ;;  %v13870_v54 = vld [vmem:[#allocation6] ss:$0 sm:$0xff]  ;;  %v12421_v29 = vld [vmem:[%s16541_s3 + $0x10] sm:$0xff]  ;;  %v12420_v63 = vld [vmem:[%s16541_s3 + $0x8] sm:$0xff] }
 0xa37   : > { %13905 = vmatprep.subr.mxu0 %v14264_v0  ;;  %13930 = vmatprep.subr.mxu1 %v14264_v0  ;;  %v12419_v1 = vld [vmem:[%s16541_s3] sm:$0xff]  ;;  %v12515_v33 = vld [vmem:[%s16543_s5 + $0x10] sm:$0xff]  ;;  %v12514_v24 = vld [vmem:[%s16543_s5 + $0x8] sm:$0xff] }
 0xa38   : > { %13906 = vmatpush3.msra.mxu0 %v12428_v42  ;;  %13931 = vmatpush3.msra.mxu1 %v12517_v56  ;;  %v12409_v50 = vld [vmem:[#allocation2] sm:$0x3]  ;;  %v13871_v34 = vld [vmem:[#allocation8] ss:$0 sm:$0xff]  ;;  %v13873_v28 = vld [vmem:[#allocation9] ss:$0 sm:$0xff] }
 0xa39   : > { %13907 = vmatprep.subr.mxu0 %v14264_v0  ;;  %13932 = vmatprep.subr.mxu1 %v14264_v0  ;;  %v12417_v59 = vadd.f32 %v13870_v54, %v12409_v50  ;;  %v12513_v8 = vld [vmem:[%s16543_s5] sm:$0xff] }
 0xa3a   : > { %13908 = vmatpush3.msra.mxu0 %v12427_v7  ;;  %13933 = vmatpush3.msra.mxu1 %v12516_v45 }
 0xa3b   : > { %13909 = vmatprep.subr.mxu0 %v14264_v0  ;;  %13934 = vmatprep.subr.mxu1 %v14264_v0  ;;  %v12418_v49 = vmax.f32 %v12417_v59, 0.0 }
 0xa3c   : > { %13910 = vmatpush3.msra.mxu0 %v12426_v47  ;;  %13935 = vmatpush3.msra.mxu1 %v12515_v33 }
 0xa3d   : > { %13911 = vmatprep.subr.mxu0 %v14264_v0  ;;  %13936 = vmatprep.subr.mxu1 %v14264_v0 }
 0xa3e   : > { %13912 = vmatpush3.msra.mxu0 %v12425_v14  ;;  %13937 = vmatpush3.msra.mxu1 %v12514_v24 }
 0xa3f   : > { %13913 = vmatprep.subr.mxu0 %v14264_v0  ;;  %13938 = vmatprep.subr.mxu1 %v14264_v0 }
 0xa40   : > { %13914 = vmatpush3.msra.mxu0 %v12424_v23  ;;  %13939 = vmatpush3.msra.mxu1 %v12513_v8 }
 0xa41   : > { %13915 = vmatprep.subr.mxu0 %v14264_v0 }
 0xa42   : > { %13916 = vmatpush3.msra.mxu0 %v12423_v51 }
 0xa43   : > { %13917 = vmatprep.subr.mxu0 %v14264_v0 }
 0xa44   : > { %13918 = vmatpush3.msra.mxu0 %v12422_v3 }
 0xa45   : > { %13919 = vmatprep.subr.mxu0 %v14264_v0 }
 0xa46   : > { %13920 = vmatpush3.msra.mxu0 %v12421_v29 }
 0xa47   : > { %13921 = vmatprep.subr.mxu0 %v14264_v0 }
 0xa48   : > { %13922 = vmatpush3.msra.mxu0 %v12420_v63 }
 0xa49   : > { %13923 = vmatprep.subr.mxu0 %v14264_v0 }
 0xa4a   : > { %13924 = vmatpush3.msra.mxu0 %v12419_v1 }
 0xa4b   : > { %13926 = vmatmul.mubr.msk.f32.vlgmr.msra.gmra.mxu0 %vm12438_vm4, %v12418_v49 }
 0xb0b   : > { %v12508_v6 = vpop.f32.mrf.mxu0 }
 0xb0c   : > { %v12509_v44 = vadd.f32 %v13871_v34, %v12508_v6 }
 0xb0d   : > { %v13927_v10 = vpop.f32.mrf.mxu0 }
 0xb0e   : > { %v12512_v11 = vmax.f32 %v12509_v44, 0.0 }
 0xb10   : > { %13941 = vmatmul.mubr.msk.f32.vlgmr.msra.gmra.mxu1 %vm12526_vm5, %v12512_v11 }
 0xbd0   : > { %v12600_v58 = vpop.f32.mrf.mxu1 }
 0xbd1   : > { %v12601_v38 = vadd.f32 %v13873_v28, %v12600_v58 }
 0xbd2   : > { %v13942_v39 = vpop.f32.mrf.mxu1 }
 0xbd3   : > { %12605 = vst.msk [vmem:[#allocation11] sm:$0x3] %vm12604_vm6, %v12601_v38 }
 0xbd4 PF: > { %p13984_p2 = scmp.eq.s32.totalorder %s14326_s28, 1  ;;  %s14266_s15 = smov [#allocation11]  }
 0xbd5   : > { %s12613_s21 = sshll.u32 %s14266_s15, 4  ;;  %s12614_s21 = int_to_ptr.vmem [resolvable:$true] %s12613_s21 }
 0xbd6   : > { %s14183_s14 = scalar_lea.vmem %s12614_s21, 32  ;;  %p14190_p9 = scmp.lt.s32.totalorder %s12614_s21, %s12614_s21 }
 0xbd7   : > { %p14184_p3 = scmp.ne.s32.totalorder %s12614_s21, %s14183_s14  ;;  %p14191_p13 = scmp.lt.s32.totalorder %s14183_s14, %s14183_s14 }
 0xbd9   : > { %p14185_p7 = pnand %p14184_p3, %p13984_p2  ;;  %p14192_p8 = por %p14191_p13, %p14190_p9 }
 0xbdb   : > { %p14186_p1 = pneg %p14185_p7 }
 0xbdd   : > { %p14193_p10 = pnand %p14192_p8, %p14186_p1 }
 0xbdf   : > { %14196 = shalt.err (!%p14193_p10)
}
 0xbe0   : > { %13960 = dma.vmem_to_hbm [thread:$0]  (%p13984_p2), %s12614_s21, 32, %s16545_s7, [#allocation5]  }
 0xbe1   : > { %14236 = dma.done.wait (%p13984_p2), [#allocation5], 32  }
 0xbe2   : > { %14238 = vsyncadd (%p13984_p2), [#allocation5], 4294967264 }
 0xbe3 PF: > { %p20_p0 = scmp.ge.s32.totalorder %s14329_s29, 4   ;;  %s16561_s24 = smov %s14245_s25 }
 0xbe4   : > { %s16562_s25 = smov %s14249_s26  ;;  %s16563_s26 = smov %s14339_s9 }
 0xbe5   : > { %s16564_s27 = smov %s14329_s29  ;;  %22 = sbr.rel (!%p20_p0) target bundleno = 6 (0x6), region = 108 }
 0xbea   :  { %12626 = vsyncpa [#allocation4], 1 }
 0xbeb   :  { %12628 = vsyncpa [#allocation4 + $0x1], 1 }
 0xbec   :  { %12629 = vsyncpa [#allocation7], 1 }
 0xbed   :  { %12630 = vsyncpa [#allocation10], 1 }
 0xbee   :  { %12631 = vsyncpa [#allocation5], 1 }
 0xbef   :  { %12633 = vsyncpa [#allocation5 + $0x1], 1 }

</bundles_post_ra>
